<compile_context>
chip_gen: v6e
topology: v6e:2x2x1
jax: 0.10.0
libtpu: 0.0.40
codegen_flags: <defaults>
</compile_context>

<pallas_src>
import functools

import jax
import jax.numpy as jnp
from jax import lax
from jax.experimental import pallas as pl
from jax.experimental.pallas import tpu as pltpu


# ----------------------------------------------------------------------------
# Host-side: fuse each ConvTranspose1d(k3,s1,p1) + polyphase structure into one
# block weight.  Per-layer weights are (3, Cin, Cout) with taps
# [W_prev, W_cur, W_next] (tap k applied to x[t-1+k]); biases are (1, Cout).
# ----------------------------------------------------------------------------
def _fuse_params(params):
    (w1, b1), (w2, b2), (w3, b3), (w4, b4) = params

    def taps(w):
        return w[0], w[1], w[2]                     # W_prev, W_cur, W_next

    # Layer 1: Upsample x2 (phase0 = phase1 = x) + ConvT(64->64).
    # LHS row blocks: [x | x[t-1] | x[t+1]]; output cols: [phase0 | phase1].
    Wp, Wc, Wn = taps(w1)
    Z = jnp.zeros_like(Wp)
    fw1 = jnp.concatenate([
        jnp.concatenate([Wc + Wn, Wp + Wc], axis=1),   # rows: x[t]
        jnp.concatenate([Wp,      Z      ], axis=1),   # rows: x[t-1]
        jnp.concatenate([Z,       Wn     ], axis=1),   # rows: x[t+1]
    ], axis=0)                                         # (192, 128)
    fb1 = jnp.tile(b1, (1, 2))

    # Layer 2: ConvT(64->32) on the p=2 lane-dense carry [g0 | g1].
    # LHS row blocks: [g0 | g1 | g1[t-1] | g0[t+1]]; cols: [phase0 | phase1].
    Wp, Wc, Wn = taps(w2)
    Z = jnp.zeros_like(Wp)
    fw2 = jnp.concatenate([
        jnp.concatenate([Wc, Wp], axis=1),             # rows: g0[t]
        jnp.concatenate([Wn, Wc], axis=1),             # rows: g1[t]
        jnp.concatenate([Wp, Z ], axis=1),             # rows: g1[t-1]
        jnp.concatenate([Z,  Wn], axis=1),             # rows: g0[t+1]
    ], axis=0)                                         # (256, 64)
    fb2 = jnp.tile(b2, (1, 2))

    # Layer 3: Upsample x2 (phases become h0,h0,h1,h1) + ConvT(32->32).
    # LHS row blocks: [h0 | h1 | h1[t-1] | h0[t+1]]; cols: phases 0..3.
    Wp, Wc, Wn = taps(w3)
    Z = jnp.zeros_like(Wp)
    fw3 = jnp.concatenate([
        jnp.concatenate([Wc + Wn, Wp + Wc, Wp,      Z      ], axis=1),  # h0[t]
        jnp.concatenate([Z,       Wn,      Wc + Wn, Wp + Wc], axis=1),  # h1[t]
        jnp.concatenate([Wp,      Z,       Z,       Z      ], axis=1),  # h1[t-1]
        jnp.concatenate([Z,       Z,       Z,       Wn     ], axis=1),  # h0[t+1]
    ], axis=0)                                         # (128, 128)
    fb3 = jnp.tile(b3, (1, 4))

    # Layer 4: ConvT(32->4) on the p=4 lane-dense carry [v0|v1|v2|v3].
    # LHS row blocks: [v0 | v1 | v2 | v3 | v3[t-1] | v0[t+1]]; cols: phases 0..3.
    Wp, Wc, Wn = taps(w4)
    Z = jnp.zeros_like(Wp)
    fw4 = jnp.concatenate([
        jnp.concatenate([Wc, Wp, Z,  Z ], axis=1),     # v0[t]
        jnp.concatenate([Wn, Wc, Wp, Z ], axis=1),     # v1[t]
        jnp.concatenate([Z,  Wn, Wc, Wp], axis=1),     # v2[t]
        jnp.concatenate([Z,  Z,  Wn, Wc], axis=1),     # v3[t]
        jnp.concatenate([Wp, Z,  Z,  Z ], axis=1),     # v3[t-1]
        jnp.concatenate([Z,  Z,  Z,  Wn], axis=1),     # v0[t+1]
    ], axis=0)                                         # (192, 16)
    fb4 = jnp.tile(b4, (1, 4))

    bf = jnp.bfloat16
    return (fw1.astype(bf), fb1, fw2.astype(bf), fb2,
            fw3.astype(bf), fb3, fw4.astype(bf), fb4)


# ----------------------------------------------------------------------------
# Kernel: one block of tb whole sequences flattened to (M = tb*L) rows.
# ----------------------------------------------------------------------------
def _seca_decoder_kernel(x_ref, w1, b1, w2, b2, w3, b3, w4, b4, o_ref, *, L):
    M = x_ref.shape[0]
    bf16 = jnp.bfloat16

    # In-kernel per-sequence boundary masks (one iota + compares, no (M,1) ops).
    pos = lax.broadcasted_iota(jnp.int32, (M, 64), 0) % L
    nf64, nl64 = pos != 0, pos != L - 1
    nf32, nl32 = pos[:, :32] != 0, pos[:, :32] != L - 1

    def sprev(h_f32, nf):     # row t -> value at t-1 (zero at the first row of each seq)
        return jnp.where(nf, pltpu.roll(h_f32, shift=1, axis=0), 0.0).astype(bf16)

    def snext(h_f32, nl):     # row t -> value at t+1 (zero at the last row of each seq)
        return jnp.where(nl, pltpu.roll(h_f32, shift=M - 1, axis=0), 0.0).astype(bf16)

    def block_matmul(parts, w_ref, b_ref):
        lhs = jnp.concatenate(parts, axis=1)                       # bf16, lane-dense
        return jnp.dot(lhs, w_ref[...], preferred_element_type=jnp.float32) + b_ref[...]

    x = x_ref[...]                                                 # (M, 64) f32
    # L1: Upsample(x2) folded into w1; ConvT(64->64)+ReLU  -> p=2 carry (M,128)
    y = jnp.maximum(block_matmul(
        [x.astype(bf16), sprev(x, nf64), snext(x, nl64)], w1, b1), 0.0)
    # L2: ConvT(64->32)+ReLU                                -> p=2 carry (M,64)
    y = jnp.maximum(block_matmul(
        [y.astype(bf16), sprev(y[:, 64:128], nf64), snext(y[:, 0:64], nl64)], w2, b2), 0.0)
    # L3: Upsample(x2) folded into w3; ConvT(32->32)+ReLU   -> p=4 carry (M,128)
    y = jnp.maximum(block_matmul(
        [y.astype(bf16), sprev(y[:, 32:64], nf32), snext(y[:, 0:32], nl32)], w3, b3), 0.0)
    # L4: ConvT(32->4)+Sigmoid -> lane-dense (M,16) output slab (4 phases x 4 ch)
    z = block_matmul(
        [y.astype(bf16), sprev(y[:, 96:128], nf32), snext(y[:, 0:32], nl32)], w4, b4)
    z = jnp.maximum(z, -60.0)              # guard exp overflow for extreme logits
    o_ref[...] = pl.reciprocal(1.0 + jnp.exp(-z), approx=True)     # sigmoid via EUP


# ----------------------------------------------------------------------------
# Wrapper
# ----------------------------------------------------------------------------
def seca_decoder(feat, params, tb=None, target_rows=2048,
                 vmem_limit_bytes=48 * 1024 * 1024):
    """feat: (B, L, 64) f32; params: 4 x (w:(3,Cin,Cout), b:(1,Cout)) -> (B, 4L, 4)."""
    B, L, Cin = feat.shape
    assert Cin == 64, Cin

    if tb is None:
        # Largest divisor of B whose block reaches ~target_rows flattened rows.
        want = max(1, min(B, -(-target_rows // L)))
        tb = 1
        for d in range(1, B + 1):
            if B % d == 0 and d <= want:
                tb = d
    assert B % tb == 0, "tb must divide B (whole-sequence blocks, no ragged tail)"
    M = tb * L
    grid = B // tb
    assert grid == 1 or M % 8 == 0, "per-step rows must be a multiple of 8"

    x2d = feat.reshape(B * L, Cin)
    fw1, fb1, fw2, fb2, fw3, fb3, fw4, fb4 = _fuse_params(params)

    const = lambda i: (0, 0)
    out2d = pl.pallas_call(
        functools.partial(_seca_decoder_kernel, L=L),
        out_shape=jax.ShapeDtypeStruct((B * L, 16), jnp.float32),
        grid=(grid,),
        in_specs=[
            pl.BlockSpec((M, Cin), lambda i: (i, 0)),
            pl.BlockSpec(fw1.shape, const), pl.BlockSpec(fb1.shape, const),
            pl.BlockSpec(fw2.shape, const), pl.BlockSpec(fb2.shape, const),
            pl.BlockSpec(fw3.shape, const), pl.BlockSpec(fb3.shape, const),
            pl.BlockSpec(fw4.shape, const), pl.BlockSpec(fb4.shape, const),
        ],
        out_specs=pl.BlockSpec((M, 16), lambda i: (i, 0)),
        compiler_params=pltpu.CompilerParams(
            dimension_semantics=("parallel",),      # v7x: shards grid across both TCs
            vmem_limit_bytes=vmem_limit_bytes),
    )(x2d, fw1, fb1, fw2, fb2, fw3, fb3, fw4, fb4)

    # (B*L, 16) -> (B, L, 4 phases, 4 ch) -> (B, 4L, 4): row 4t+q = phase q, time t.
    return out2d.reshape(B, L, 4, 4).reshape(B, 4 * L, 4)


# ----------------------------------------------------------------------------
# Parameters + pure-JAX reference
# ----------------------------------------------------------------------------
def init_params(key):
    """Deterministic init. Weight layout (3, Cin, Cout) is conv-oriented taps
    (tap 0 -> x[t-1], tap 1 -> x[t], tap 2 -> x[t+1]); for stride=1/padding=1
    this matches PyTorch ConvTranspose1d forward semantics with the kernel axis
    reversed / channel axes permuted (same function family)."""
    layer_channels = [(64, 64), (64, 32), (32, 32), (32, 4)]
    params = []
    for cin, cout in layer_channels:
        key, kw, kb = jax.random.split(key, 3)
        bound = 1.0 / jnp.sqrt(cin * 3.0)
        w = jax.random.uniform(kw, (3, cin, cout), jnp.float32, -bound, bound)
        b = jax.random.uniform(kb, (1, cout), jnp.float32, -bound, bound)
        params.append((w, b))
    return params


def ref_forward(feat, params):
    """Pure-JAX f32 reference of the PyTorch forward (channels-last)."""
    def conv3(h, w, b):              # zero-padded 3-tap conv
        L = h.shape[1]
        hp = jnp.pad(h, ((0, 0), (1, 1), (0, 0)))
        return hp[:, 0:L] @ w[0] + hp[:, 1:L + 1] @ w[1] + hp[:, 2:L + 2] @ w[2] + b
    (w1, b1), (w2, b2), (w3, b3), (w4, b4) = params
    h = jnp.repeat(feat, 2, axis=1)                 # Upsample(x2, nearest)
    h = jax.nn.relu(conv3(h, w1, b1))
    h = jax.nn.relu(conv3(h, w2, b2))
    h = jnp.repeat(h, 2, axis=1)                    # Upsample(x2, nearest)
    h = jax.nn.relu(conv3(h, w3, b3))
    h = jax.nn.sigmoid(conv3(h, w4, b4))
    return h                                        # (B, 4L, 4)


if __name__ == "__main__":
    key = jax.random.PRNGKey(0)
    kx, kp = jax.random.split(key)
    B, L = 16, 64                                   # feat: (16, 64, 64) -> out: (16, 256, 4)
    feat = jax.random.normal(kx, (B, L, 64), jnp.float32)
    params = init_params(kp)

    out = seca_decoder(feat, params, tb=8)          # grid=(2,) (even), M=512 rows/step
    out = jax.block_until_ready(out)

    ref = ref_forward(feat, params)
    assert out.shape == (B, 4 * L, 4), out.shape
    # bf16 activations / weights with f32 MXU accumulation -> bf16-level tolerance.
    max_err = float(jnp.max(jnp.abs(out - ref)))
    assert jnp.allclose(out, ref, rtol=2e-2, atol=2e-2), \
        f"mismatch vs reference (max abs err {max_err:.3e})"
    print("KERNEL_OK")
</pallas_src>

<mosaic_0001>
module attributes {stable_mosaic.version = 11 : i64} {
  func.func @_seca_decoder_kernel(%arg0: i32, %arg1: memref<512x64xf32, #tpu.memory_space<vmem>>, %arg2: memref<192x128xbf16, #tpu.memory_space<vmem>>, %arg3: memref<1x128xf32, #tpu.memory_space<vmem>>, %arg4: memref<256x64xbf16, #tpu.memory_space<vmem>>, %arg5: memref<1x64xf32, #tpu.memory_space<vmem>>, %arg6: memref<128x128xbf16, #tpu.memory_space<vmem>>, %arg7: memref<1x128xf32, #tpu.memory_space<vmem>>, %arg8: memref<192x16xbf16, #tpu.memory_space<vmem>>, %arg9: memref<1x16xf32, #tpu.memory_space<vmem>>, %arg10: memref<512x16xf32, #tpu.memory_space<vmem>>) attributes {dimension_semantics = [#tpu.dimension_semantics<parallel>], iteration_bounds = array<i64: 2>, scalar_prefetch = 0 : i64, scratch_operands = 0 : i64, tpu.core_type = #tpu.core_type<tc>, window_params = [{transform_indices = @transform_0, window_bounds = array<i64: 512, 64>}, {pipeline_mode = #tpu.pipeline_mode<synchronous>, transform_indices = @transform_1, window_bounds = array<i64: 192, 128>}, {pipeline_mode = #tpu.pipeline_mode<synchronous>, transform_indices = @transform_2, window_bounds = array<i64: 1, 128>}, {pipeline_mode = #tpu.pipeline_mode<synchronous>, transform_indices = @transform_3, window_bounds = array<i64: 256, 64>}, {pipeline_mode = #tpu.pipeline_mode<synchronous>, transform_indices = @transform_4, window_bounds = array<i64: 1, 64>}, {pipeline_mode = #tpu.pipeline_mode<synchronous>, transform_indices = @transform_5, window_bounds = array<i64: 128, 128>}, {pipeline_mode = #tpu.pipeline_mode<synchronous>, transform_indices = @transform_6, window_bounds = array<i64: 1, 128>}, {pipeline_mode = #tpu.pipeline_mode<synchronous>, transform_indices = @transform_7, window_bounds = array<i64: 192, 16>}, {pipeline_mode = #tpu.pipeline_mode<synchronous>, transform_indices = @transform_8, window_bounds = array<i64: 1, 16>}, {transform_indices = @transform_9, window_bounds = array<i64: 512, 16>}]} {
    %0 = tpu.iota {dimensions = array<i32: 0>} : vector<512x64xi32>
    %c64_i32 = arith.constant 64 : i32
    %c0_i32 = arith.constant 0 : i32
    %1 = arith.cmpi eq, %c64_i32, %c0_i32 : i32
    %c1_i32 = arith.constant 1 : i32
    %2 = arith.select %1, %c1_i32, %c64_i32 : i32
    %3 = vector.broadcast %2 : i32 to vector<512x64xi32>
    %4 = arith.remsi %0, %3 : vector<512x64xi32>
    %c0_i32_0 = arith.constant 0 : i32
    %5 = vector.broadcast %c0_i32_0 : i32 to vector<512x64xi32>
    %6 = arith.cmpi ne, %4, %5 : vector<512x64xi32>
    %c0_i32_1 = arith.constant 0 : i32
    %7 = vector.broadcast %c0_i32_1 : i32 to vector<512x64xi32>
    %8 = arith.cmpi slt, %4, %7 : vector<512x64xi32>
    %c0_i32_2 = arith.constant 0 : i32
    %9 = arith.cmpi slt, %2, %c0_i32_2 : i32
    %10 = vector.broadcast %9 : i1 to vector<512x64xi1>
    %11 = vector.broadcast %10 : vector<512x64xi1> to vector<512x64xi1>
    %12 = arith.xori %8, %11 : vector<512x64xi1>
    %13 = arith.andi %12, %6 : vector<512x64xi1>
    %14 = vector.broadcast %2 : i32 to vector<512x64xi32>
    %15 = arith.addi %4, %14 : vector<512x64xi32>
    %16 = arith.select %13, %15, %4 : vector<512x64xi1>, vector<512x64xi32>
    %c0_i32_3 = arith.constant 0 : i32
    %17 = vector.broadcast %c0_i32_3 : i32 to vector<512x64xi32>
    %18 = arith.cmpi ne, %16, %17 : vector<512x64xi32>
    %c63_i32 = arith.constant 63 : i32
    %19 = vector.broadcast %c63_i32 : i32 to vector<512x64xi32>
    %20 = arith.cmpi ne, %16, %19 : vector<512x64xi32>
    %21 = vector.extract_strided_slice %16 {offsets = [0, 0], sizes = [512, 32], strides = [1, 1]} : vector<512x64xi32> to vector<512x32xi32>
    %c0_i32_4 = arith.constant 0 : i32
    %22 = vector.broadcast %c0_i32_4 : i32 to vector<512x32xi32>
    %23 = arith.cmpi ne, %21, %22 : vector<512x32xi32>
    %24 = vector.extract_strided_slice %16 {offsets = [0, 0], sizes = [512, 32], strides = [1, 1]} : vector<512x64xi32> to vector<512x32xi32>
    %c63_i32_5 = arith.constant 63 : i32
    %25 = vector.broadcast %c63_i32_5 : i32 to vector<512x32xi32>
    %26 = arith.cmpi ne, %24, %25 : vector<512x32xi32>
    %c0 = arith.constant 0 : index
    %c0_6 = arith.constant 0 : index
    %27 = vector.load %arg1[%c0, %c0_6] : memref<512x64xf32, #tpu.memory_space<vmem>>, vector<512x64xf32>
    %28 = arith.truncf %27 : vector<512x64xf32> to vector<512x64xbf16>
    %c1_i32_7 = arith.constant 1 : i32
    %29 = tpu.dynamic_rotate %27 by %c1_i32_7 dim 0 : vector<512x64xf32>, i32 -> vector<512x64xf32>
    %cst = arith.constant 0.000000e+00 : f32
    %30 = vector.broadcast %cst : f32 to vector<512x64xf32>
    %31 = arith.select %18, %29, %30 : vector<512x64xi1>, vector<512x64xf32>
    %32 = arith.truncf %31 : vector<512x64xf32> to vector<512x64xbf16>
    %c511_i32 = arith.constant 511 : i32
    %33 = tpu.dynamic_rotate %27 by %c511_i32 dim 0 : vector<512x64xf32>, i32 -> vector<512x64xf32>
    %cst_8 = arith.constant 0.000000e+00 : f32
    %34 = vector.broadcast %cst_8 : f32 to vector<512x64xf32>
    %35 = arith.select %20, %33, %34 : vector<512x64xi1>, vector<512x64xf32>
    %36 = arith.truncf %35 : vector<512x64xf32> to vector<512x64xbf16>
    %37 = tpu.concatenate %28, %32, %36 in 1 : vector<512x64xbf16>, vector<512x64xbf16>, vector<512x64xbf16> -> vector<512x192xbf16>
    %c0_9 = arith.constant 0 : index
    %c0_10 = arith.constant 0 : index
    %38 = vector.load %arg2[%c0_9, %c0_10] : memref<192x128xbf16, #tpu.memory_space<vmem>>, vector<192x128xbf16>
    %cst_11 = arith.constant dense<0.000000e+00> : vector<512x128xf32>
    %39 = tpu.matmul %37, %38, %cst_11 {dimension_numbers = #tpu.dot_dimension_numbers<[1], [0], [0], [1], [0, 0, 1, 1], [], []>} : vector<512x192xbf16>, vector<192x128xbf16>, vector<512x128xf32> -> vector<512x128xf32>
    %c0_12 = arith.constant 0 : index
    %c0_13 = arith.constant 0 : index
    %40 = vector.load %arg3[%c0_12, %c0_13] : memref<1x128xf32, #tpu.memory_space<vmem>>, vector<1x128xf32>
    %41 = vector.broadcast %40 : vector<1x128xf32> to vector<512x128xf32>
    %42 = arith.addf %39, %41 : vector<512x128xf32>
    %cst_14 = arith.constant 0.000000e+00 : f32
    %43 = vector.broadcast %cst_14 : f32 to vector<512x128xf32>
    %44 = arith.maximumf %42, %43 : vector<512x128xf32>
    %45 = arith.truncf %44 : vector<512x128xf32> to vector<512x128xbf16>
    %46 = vector.extract_strided_slice %44 {offsets = [0, 64], sizes = [512, 64], strides = [1, 1]} : vector<512x128xf32> to vector<512x64xf32>
    %c1_i32_15 = arith.constant 1 : i32
    %47 = tpu.dynamic_rotate %46 by %c1_i32_15 dim 0 : vector<512x64xf32>, i32 -> vector<512x64xf32>
    %cst_16 = arith.constant 0.000000e+00 : f32
    %48 = vector.broadcast %cst_16 : f32 to vector<512x64xf32>
    %49 = arith.select %18, %47, %48 : vector<512x64xi1>, vector<512x64xf32>
    %50 = arith.truncf %49 : vector<512x64xf32> to vector<512x64xbf16>
    %51 = vector.extract_strided_slice %44 {offsets = [0, 0], sizes = [512, 64], strides = [1, 1]} : vector<512x128xf32> to vector<512x64xf32>
    %c511_i32_17 = arith.constant 511 : i32
    %52 = tpu.dynamic_rotate %51 by %c511_i32_17 dim 0 : vector<512x64xf32>, i32 -> vector<512x64xf32>
    %cst_18 = arith.constant 0.000000e+00 : f32
    %53 = vector.broadcast %cst_18 : f32 to vector<512x64xf32>
    %54 = arith.select %20, %52, %53 : vector<512x64xi1>, vector<512x64xf32>
    %55 = arith.truncf %54 : vector<512x64xf32> to vector<512x64xbf16>
    %56 = tpu.concatenate %45, %50, %55 in 1 : vector<512x128xbf16>, vector<512x64xbf16>, vector<512x64xbf16> -> vector<512x256xbf16>
    %c0_19 = arith.constant 0 : index
    %c0_20 = arith.constant 0 : index
    %57 = vector.load %arg4[%c0_19, %c0_20] : memref<256x64xbf16, #tpu.memory_space<vmem>>, vector<256x64xbf16>
    %cst_21 = arith.constant dense<0.000000e+00> : vector<512x64xf32>
    %58 = tpu.matmul %56, %57, %cst_21 {dimension_numbers = #tpu.dot_dimension_numbers<[1], [0], [0], [1], [0, 0, 1, 1], [], []>} : vector<512x256xbf16>, vector<256x64xbf16>, vector<512x64xf32> -> vector<512x64xf32>
    %c0_22 = arith.constant 0 : index
    %c0_23 = arith.constant 0 : index
    %59 = vector.load %arg5[%c0_22, %c0_23] : memref<1x64xf32, #tpu.memory_space<vmem>>, vector<1x64xf32>
    %60 = vector.broadcast %59 : vector<1x64xf32> to vector<512x64xf32>
    %61 = arith.addf %58, %60 : vector<512x64xf32>
    %cst_24 = arith.constant 0.000000e+00 : f32
    %62 = vector.broadcast %cst_24 : f32 to vector<512x64xf32>
    %63 = arith.maximumf %61, %62 : vector<512x64xf32>
    %64 = arith.truncf %63 : vector<512x64xf32> to vector<512x64xbf16>
    %65 = vector.extract_strided_slice %63 {offsets = [0, 32], sizes = [512, 32], strides = [1, 1]} : vector<512x64xf32> to vector<512x32xf32>
    %c1_i32_25 = arith.constant 1 : i32
    %66 = tpu.dynamic_rotate %65 by %c1_i32_25 dim 0 : vector<512x32xf32>, i32 -> vector<512x32xf32>
    %cst_26 = arith.constant 0.000000e+00 : f32
    %67 = vector.broadcast %cst_26 : f32 to vector<512x32xf32>
    %68 = arith.select %23, %66, %67 : vector<512x32xi1>, vector<512x32xf32>
    %69 = arith.truncf %68 : vector<512x32xf32> to vector<512x32xbf16>
    %70 = vector.extract_strided_slice %63 {offsets = [0, 0], sizes = [512, 32], strides = [1, 1]} : vector<512x64xf32> to vector<512x32xf32>
    %c511_i32_27 = arith.constant 511 : i32
    %71 = tpu.dynamic_rotate %70 by %c511_i32_27 dim 0 : vector<512x32xf32>, i32 -> vector<512x32xf32>
    %cst_28 = arith.constant 0.000000e+00 : f32
    %72 = vector.broadcast %cst_28 : f32 to vector<512x32xf32>
    %73 = arith.select %26, %71, %72 : vector<512x32xi1>, vector<512x32xf32>
    %74 = arith.truncf %73 : vector<512x32xf32> to vector<512x32xbf16>
    %75 = tpu.concatenate %64, %69, %74 in 1 : vector<512x64xbf16>, vector<512x32xbf16>, vector<512x32xbf16> -> vector<512x128xbf16>
    %c0_29 = arith.constant 0 : index
    %c0_30 = arith.constant 0 : index
    %76 = vector.load %arg6[%c0_29, %c0_30] : memref<128x128xbf16, #tpu.memory_space<vmem>>, vector<128x128xbf16>
    %cst_31 = arith.constant dense<0.000000e+00> : vector<512x128xf32>
    %77 = tpu.matmul %75, %76, %cst_31 {dimension_numbers = #tpu.dot_dimension_numbers<[1], [0], [0], [1], [0, 0, 1, 1], [], []>} : vector<512x128xbf16>, vector<128x128xbf16>, vector<512x128xf32> -> vector<512x128xf32>
    %c0_32 = arith.constant 0 : index
    %c0_33 = arith.constant 0 : index
    %78 = vector.load %arg7[%c0_32, %c0_33] : memref<1x128xf32, #tpu.memory_space<vmem>>, vector<1x128xf32>
    %79 = vector.broadcast %78 : vector<1x128xf32> to vector<512x128xf32>
    %80 = arith.addf %77, %79 : vector<512x128xf32>
    %cst_34 = arith.constant 0.000000e+00 : f32
    %81 = vector.broadcast %cst_34 : f32 to vector<512x128xf32>
    %82 = arith.maximumf %80, %81 : vector<512x128xf32>
    %83 = arith.truncf %82 : vector<512x128xf32> to vector<512x128xbf16>
    %84 = vector.extract_strided_slice %82 {offsets = [0, 96], sizes = [512, 32], strides = [1, 1]} : vector<512x128xf32> to vector<512x32xf32>
    %c1_i32_35 = arith.constant 1 : i32
    %85 = tpu.dynamic_rotate %84 by %c1_i32_35 dim 0 : vector<512x32xf32>, i32 -> vector<512x32xf32>
    %cst_36 = arith.constant 0.000000e+00 : f32
    %86 = vector.broadcast %cst_36 : f32 to vector<512x32xf32>
    %87 = arith.select %23, %85, %86 : vector<512x32xi1>, vector<512x32xf32>
    %88 = arith.truncf %87 : vector<512x32xf32> to vector<512x32xbf16>
    %89 = vector.extract_strided_slice %82 {offsets = [0, 0], sizes = [512, 32], strides = [1, 1]} : vector<512x128xf32> to vector<512x32xf32>
    %c511_i32_37 = arith.constant 511 : i32
    %90 = tpu.dynamic_rotate %89 by %c511_i32_37 dim 0 : vector<512x32xf32>, i32 -> vector<512x32xf32>
    %cst_38 = arith.constant 0.000000e+00 : f32
    %91 = vector.broadcast %cst_38 : f32 to vector<512x32xf32>
    %92 = arith.select %26, %90, %91 : vector<512x32xi1>, vector<512x32xf32>
    %93 = arith.truncf %92 : vector<512x32xf32> to vector<512x32xbf16>
    %94 = tpu.concatenate %83, %88, %93 in 1 : vector<512x128xbf16>, vector<512x32xbf16>, vector<512x32xbf16> -> vector<512x192xbf16>
    %c0_39 = arith.constant 0 : index
    %c0_40 = arith.constant 0 : index
    %95 = vector.load %arg8[%c0_39, %c0_40] : memref<192x16xbf16, #tpu.memory_space<vmem>>, vector<192x16xbf16>
    %cst_41 = arith.constant dense<0.000000e+00> : vector<512x16xf32>
    %96 = tpu.matmul %94, %95, %cst_41 {dimension_numbers = #tpu.dot_dimension_numbers<[1], [0], [0], [1], [0, 0, 1, 1], [], []>} : vector<512x192xbf16>, vector<192x16xbf16>, vector<512x16xf32> -> vector<512x16xf32>
    %c0_42 = arith.constant 0 : index
    %c0_43 = arith.constant 0 : index
    %97 = vector.load %arg9[%c0_42, %c0_43] : memref<1x16xf32, #tpu.memory_space<vmem>>, vector<1x16xf32>
    %98 = vector.broadcast %97 : vector<1x16xf32> to vector<512x16xf32>
    %99 = arith.addf %96, %98 : vector<512x16xf32>
    %cst_44 = arith.constant -6.000000e+01 : f32
    %100 = vector.broadcast %cst_44 : f32 to vector<512x16xf32>
    %101 = arith.maximumf %99, %100 : vector<512x16xf32>
    %cst_45 = arith.constant 0.000000e+00 : f32
    %102 = vector.broadcast %cst_45 : f32 to vector<512x16xf32>
    %103 = arith.subf %102, %101 : vector<512x16xf32>
    %104 = math.exp %103 : vector<512x16xf32>
    %cst_46 = arith.constant 1.000000e+00 : f32
    %105 = vector.broadcast %cst_46 : f32 to vector<512x16xf32>
    %106 = arith.addf %105, %104 : vector<512x16xf32>
    %107 = tpu.reciprocal %106 {approx = true} : vector<512x16xf32> -> vector<512x16xf32>
    %c0_47 = arith.constant 0 : index
    %c0_48 = arith.constant 0 : index
    %108 = vector.load %arg10[%c0_47, %c0_48] : memref<512x16xf32, #tpu.memory_space<vmem>>, vector<512x16xf32>
    tpu.vector_store %arg10[%c0_47, %c0_48], %107 {strides = array<i32>} : memref<512x16xf32, #tpu.memory_space<vmem>>, vector<512x16xf32>,
    return
  }
  func.func @transform_0(%arg0: i32) -> (i32, i32) {
    %c0_i32 = arith.constant 0 : i32
    %c0_i32_0 = arith.constant 0 : i32
    return %arg0, %c0_i32 : i32, i32
  }
  func.func @transform_1(%arg0: i32) -> (i32, i32) {
    %c0_i32 = arith.constant 0 : i32
    %c0_i32_0 = arith.constant 0 : i32
    %c0_i32_1 = arith.constant 0 : i32
    return %c0_i32, %c0_i32_0 : i32, i32
  }
  func.func @transform_2(%arg0: i32) -> (i32, i32) {
    %c0_i32 = arith.constant 0 : i32
    %c0_i32_0 = arith.constant 0 : i32
    %c0_i32_1 = arith.constant 0 : i32
    return %c0_i32, %c0_i32_0 : i32, i32
  }
  func.func @transform_3(%arg0: i32) -> (i32, i32) {
    %c0_i32 = arith.constant 0 : i32
    %c0_i32_0 = arith.constant 0 : i32
    %c0_i32_1 = arith.constant 0 : i32
    return %c0_i32, %c0_i32_0 : i32, i32
  }
  func.func @transform_4(%arg0: i32) -> (i32, i32) {
    %c0_i32 = arith.constant 0 : i32
    %c0_i32_0 = arith.constant 0 : i32
    %c0_i32_1 = arith.constant 0 : i32
    return %c0_i32, %c0_i32_0 : i32, i32
  }
  func.func @transform_5(%arg0: i32) -> (i32, i32) {
    %c0_i32 = arith.constant 0 : i32
    %c0_i32_0 = arith.constant 0 : i32
    %c0_i32_1 = arith.constant 0 : i32
    return %c0_i32, %c0_i32_0 : i32, i32
  }
  func.func @transform_6(%arg0: i32) -> (i32, i32) {
    %c0_i32 = arith.constant 0 : i32
    %c0_i32_0 = arith.constant 0 : i32
    %c0_i32_1 = arith.constant 0 : i32
    return %c0_i32, %c0_i32_0 : i32, i32
  }
  func.func @transform_7(%arg0: i32) -> (i32, i32) {
    %c0_i32 = arith.constant 0 : i32
    %c0_i32_0 = arith.constant 0 : i32
    %c0_i32_1 = arith.constant 0 : i32
    return %c0_i32, %c0_i32_0 : i32, i32
  }
  func.func @transform_8(%arg0: i32) -> (i32, i32) {
    %c0_i32 = arith.constant 0 : i32
    %c0_i32_0 = arith.constant 0 : i32
    %c0_i32_1 = arith.constant 0 : i32
    return %c0_i32, %c0_i32_0 : i32, i32
  }
  func.func @transform_9(%arg0: i32) -> (i32, i32) {
    %c0_i32 = arith.constant 0 : i32
    %c0_i32_0 = arith.constant 0 : i32
    return %arg0, %c0_i32 : i32, i32
  }
}

</mosaic_0001>

<bundles_post_ra>
// kernel: tpu_custom_call.1
= control target key start
LH: loop header
LB: loop body
LE: loop exit
PB: predicated region body
PF: predicated region fallthrough
CT: control target
= control target key end

     0   :  { %s8630_s30 = smov 0   ;;  %s13490_s0 = inlined_call_operand.vmem [shape: f32[1024,64], index: 0, kind: input, shape index: {}]   ;;  %s13491_s1 = inlined_call_operand.vmem [shape: bf16[192,128], index: 1, kind: input, shape index: {}]   ;;  %s13492_s2 = inlined_call_operand.vmem [shape: f32[1,128], index: 2, kind: input, shape index: {}]   ;;  %s13493_s3 = inlined_call_operand.vmem [shape: bf16[256,64], index: 3, kind: input, shape index: {}]   ;;  %s13494_s4 = inlined_call_operand.vmem [shape: f32[1,64], index: 4, kind: input, shape index: {}]   ;;  %s13495_s5 = inlined_call_operand.vmem [shape: bf16[128,128], index: 5, kind: input, shape index: {}]   ;;  %s13496_s6 = inlined_call_operand.vmem [shape: f32[1,128], index: 6, kind: input, shape index: {}]   ;;  %s13497_s7 = inlined_call_operand.vmem [shape: bf16[192,16], index: 7, kind: input, shape index: {}]   ;;  %s13498_s8 = inlined_call_operand.vmem [shape: f32[1,16], index: 8, kind: input, shape index: {}]   ;;  %s13499_s9 = inlined_call_operand.vmem [shape: f32[1024,16], index: 9, kind: output, shape index: {}]  }
   0x1 LB: > { %s7504_s10 = sadd.s32 4294967295, %s8574_s30   ;;  %p7508_p0 = scmp.ge.s32.totalorder %s8574_s30, 1  ;;  %s8574_s30 = sphi %s8630_s30, %s19_s30  }
   0x2   : > { %p288_p1 = scmp.lt.s32.totalorder %s8574_s30, 3 }
   0x4   : > { %p289_p2 = pnand %p7508_p0, %p288_p1 }
   0x6   : > { %292 = sbr.rel (%p289_p2) target bundleno = 2207 (0x89f), region = 56 }
   0xb   : > { %s7509_s11 = sshll.u32 %s7504_s10, 6  ;;  %v337_v0 = vlaneseq  ;;  %v8260_v1 = vld [vmem:[%s13491_s1 + $0x38] sm:$0xff]   ;;  %v13501_v2 = vmov 0   ;;  %v8261_v4 = vld [vmem:[%s13491_s1 + $0x30] sm:$0xff]   ;;  %v8262_v9 = vld [vmem:[%s13491_s1 + $0x28] sm:$0xff]   ;;  %v13799_v10 = vmov 0 }
   0xc   : > { %p325_p3 = scmp.lt.s32.totalorder %s7509_s11, 127  ;;  %2268 = vmatprep.subr.bf16.mxu0 %v13501_v2  ;;  %7751 = vmatprep.subr.bf16.mxu1 %v13501_v2  ;;  %v13802_v25 = vmov 0  ;;  %v8263_v26 = vld [vmem:[%s13491_s1 + $0x20] sm:$0xff]   ;;  %s8577_s24 = smov 64   ;;  %v8264_v57 = vld [vmem:[%s13491_s1 + $0x18] sm:$0xff]   ;;  %vm13596_vm5 = vcmask 523264  }
   0xd   : > { %v8643_v3 = vshrl.u32 %v337_v0, 7  ;;  %2269 = vmatpush1.bf16.msra.mxu0 %v8260_v1  ;;  %s8578_s29 = smov 96   ;;  %s8579_s15 = smov 32  }
   0xe   : > { %s14901_s11 = smov (!%p325_p3, %s7509_s11), 127  ;;  %2270 = vmatprep.subr.bf16.mxu0 %v13501_v2 }
   0xf   : > { %v406_v5 = vand.u32 63, %v8643_v3  ;;  %v346_v6 = vadd.s32 64, %v8643_v3  ;;  %s7510_s16 = sshll.u32 %s14901_s11, 3  ;;  %v8655_v7 = vadd.s32 128, %v8643_v3  ;;  %vm13590_vm1 = vcmp.lt.s32.totalorder %v8643_v3, 1 }
  0x10   : > { %s8662_s19 = scalar_lea.vmem %s13490_s0, %s7510_s16  ;;  %v8693_v20 = vadd.s32 192, %v8643_v3  ;;  %vm13593_vm4 = vcmp.lt.s32.totalorder %v8643_v3, 7  ;;  %s13279_s26 = scalar_lea.vmem %s13499_s9, %s7510_s16 }
  0x11   : > { %v462_v8 = vand.u32 63, %v346_v6  ;;  %2271 = vmatpush1.bf16.msra.mxu0 %v8261_v4  ;;  %vm8667_vm0 = vcmp.ne.s32.totalorder %v406_v5, 0  ;;  %v8672_v11 = vld [vmem:[%s8662_s19] sm:$0xff]  ;;  %v8675_v12 = vld [vmem:[%s8662_s19 + $0x8] sm:$0xff]  ;;  %v8678_v13 = vld [vmem:[%s8662_s19 + $0x1f8] sm:$0xff]  ;;  %v518_v14 = vand.u32 63, %v8655_v7 }
  0x12   : > { %v13800_v10 = vsel %vm8667_vm0, 4294967295, %v13799_v10  ;;  %2272 = vmatprep.subr.bf16.mxu0 %v13501_v2  ;;  %v1394_v15 = vrot.slane %v8672_v11, 7  ;;  %v1395_v16 = vrot.slane %v8675_v12, 7  ;;  %v13500_v17 = vrot.slane %v8678_v13, 7  ;;  %v8687_v18 = vld [vmem:[%s8662_s19 + $0x10] sm:$0xff]  ;;  %v8690_v19 = vld [vmem:[%s8662_s19 + $0x18] sm:$0xff] }
  0x13   : > { %13801 = vst [vmem:[#allocation2_spill] sm:$0xff] %v13800_v10  ;;  %v1396_v21 = vrot.slane %v8687_v18, 7  ;;  %v1397_v22 = vrot.slane %v8690_v19, 7  ;;  %v8698_v23 = vld [vmem:[%s8662_s19 + $0x20] sm:$0xff]  ;;  %v8701_v24 = vld [vmem:[%s8662_s19 + $0x28] sm:$0xff]  ;;  %vm8703_vm2 = vcmp.ne.s32.totalorder %v462_v8, 0 }
  0x14   : > { %v13803_v25 = vsel %vm8703_vm2, 4294967295, %v13802_v25  ;;  %v1521_v28 = vsel %vm13590_vm1, %v1394_v15, %v1395_v16  ;;  %v1522_v29 = vsel %vm13590_vm1, %v13500_v17, %v1394_v15  ;;  %v1398_v30 = vrot.slane %v8698_v23, 7  ;;  %v8721_v32 = vld [vmem:[%s8662_s19 + $0x30] sm:$0xff]  ;;  %v8724_v33 = vld [vmem:[%s8662_s19 + $0x38] sm:$0xff]  ;;  %v8727_v34 = vld [vmem:[%s8662_s19 + $0x40] sm:$0xff] }
  0x15   : > { %13804 = vst [vmem:[#allocation3_spill] sm:$0xff] %v13803_v25  ;;  %v1399_v31 = vrot.slane %v8701_v24, 7  ;;  %2273 = vmatpush1.bf16.msra.mxu0 %v8262_v9  ;;  %v1523_v35 = vsel %vm8667_vm0, %v1522_v29, 0.0  ;;  %v1519_v36 = vsel %vm13590_vm1, %v1396_v21, %v1397_v22  ;;  %v1520_v37 = vsel %vm13590_vm1, %v1395_v16, %v1396_v21  ;;  %v8737_v39 = vld [vmem:[%s8662_s19 + $0x48] sm:$0xff]  ;;  %v8740_v40 = vld [vmem:[%s8662_s19 + $0x50] sm:$0xff]  ;;  %v8743_v41 = vld [vmem:[%s8662_s19 + $0x58] sm:$0xff] }
  0x16   : > { %2274 = vmatprep.subr.bf16.mxu0 %v13501_v2  ;;  %v1587_v42 = vpack.c.bf16 %v1521_v28, %v1523_v35  ;;  %v1588_v43 = vpack.c.bf16 %v1519_v36, %v1520_v37  ;;  %v1518_v45 = vsel %vm13590_vm1, %v1397_v22, %v1398_v30  ;;  %v8751_v46 = vld [vmem:[%s8662_s19 + $0x60] sm:$0xff]  ;;  %v8754_v47 = vld [vmem:[%s8662_s19 + $0x68] sm:$0xff]  ;;  %v1400_v50 = vrot.slane %v8721_v32, 7  ;;  %v8765_v56 = vld [vmem:[%s8662_s19 + $0x70] sm:$0xff] }
  0x17   : > { %v1517_v44 = vsel %vm13590_vm1, %v1398_v30, %v1399_v31  ;;  %v1401_v51 = vrot.slane %v8724_v33, 7  ;;  %v1402_v52 = vrot.slane %v8727_v34, 7  ;;  %v1403_v53 = vrot.slane %v8737_v39, 7  ;;  %v8778_v62 = vld [vmem:[%s8662_s19 + $0x78] sm:$0xff]  ;;  %v8781_v63 = vld [vmem:[%s8662_s19 + $0x80] sm:$0xff]  ;;  %v8784_v0 = vld [vmem:[%s8662_s19 + $0x88] sm:$0xff] }
  0x18   : > { %v1589_v48 = vpack.c.bf16 %v1517_v44, %v1518_v45  ;;  %1876 = vrot.lane.b32.xlu0 %v1587_v42, %s8577_s24  ;;  %v1404_v54 = vrot.slane %v8740_v40, 7  ;;  %v1405_v55 = vrot.slane %v8743_v41, 7  ;;  %v1516_v59 = vsel %vm13590_vm1, %v1399_v31, %v1400_v50  ;;  %v8265_v8 = vld [vmem:[%s13491_s1 + $0x10] sm:$0xff]   ;;  %v8811_v28 = vld [vmem:[%s8662_s19 + $0xa0] sm:$0xff]  ;;  %v8816_v36 = vld [vmem:[%s8662_s19 + $0xa8] sm:$0xff] }
  0x19   : > { %2275 = vmatpush1.bf16.msra.mxu0 %v8263_v26  ;;  %v1515_v58 = vsel %vm13590_vm1, %v1400_v50, %v1401_v51  ;;  %v1406_v60 = vrot.slane %v8751_v46, 7  ;;  %v1407_v61 = vrot.slane %v8754_v47, 7  ;;  %v1513_v4 = vsel %vm13590_vm1, %v1402_v52, %v1403_v53  ;;  %v8805_v22 = vld [vmem:[%s8662_s19 + $0x90] sm:$0xff]  ;;  %v8808_v26 = vld [vmem:[%s8662_s19 + $0x98] sm:$0xff] }
  0x1a   : > { %1880 = vrot.lane.b32.xlu1 %v1589_v48, %s8577_s24  ;;  %2276 = vmatprep.subr.bf16.mxu0 %v13501_v2  ;;  %v1590_v1 = vpack.c.bf16 %v1515_v58, %v1516_v59  ;;  %v1514_v5 = vsel %vm13590_vm1, %v1401_v51, %v1402_v52  ;;  %v1511_v6 = vsel %vm13590_vm1, %v1404_v54, %v1405_v55  ;;  %v1408_v35 = vrot.slane %v8765_v56, 7  ;;  %v8830_v45 = vld [vmem:[%s8662_s19 + $0xb0] sm:$0xff]  ;;  %v8833_v48 = vld [vmem:[%s8662_s19 + $0xb8] sm:$0xff]  ;;  %v8266_v52 = vld [vmem:[%s13491_s1 + $0x8] sm:$0xff]  }
  0x1b   : > { %v1531_v9 = vsel %vm8703_vm2, %v1514_v5, 0.0  ;;  %v1512_v15 = vsel %vm13590_vm1, %v1403_v53, %v1404_v54  ;;  %v1509_v16 = vsel %vm13590_vm1, %v1406_v60, %v1407_v61  ;;  %v1510_v21 = vsel %vm13590_vm1, %v1405_v55, %v1406_v60  ;;  %v8844_v53 = vld [vmem:[%s8662_s19 + $0xc0] sm:$0xff]  ;;  %v8855_v59 = vld [vmem:[%s8662_s19 + $0xc8] sm:$0xff]  ;;  %v8858_v60 = vld [vmem:[%s8662_s19 + $0xd0] sm:$0xff] }
  0x1c   : > { %1878 = vrot.lane.b32.xlu0 %v1588_v43, %s8577_s24  ;;  %v1591_v29 = vpack.c.bf16 %v1513_v4, %v1531_v9  ;;  %v1592_v30 = vpack.c.bf16 %v1511_v6, %v1512_v15  ;;  %v1593_v31 = vpack.c.bf16 %v1509_v16, %v1510_v21  ;;  %v1409_v37 = vrot.slane %v8778_v62, 7  ;;  %v8868_v6 = vld [vmem:[%s8662_s19 + $0xd8] sm:$0xff] }
  0x1d   : > { %2277 = vmatpush1.bf16.msra.mxu0 %v8264_v57  ;;  %vm8822_vm3 = vcmp.ne.s32.totalorder %v518_v14, 0  ;;  %v13805_v42 = vmov 0  ;;  %v1410_v43 = vrot.slane %v8781_v63, 7  ;;  %v1411_v44 = vrot.slane %v8784_v0, 7  ;;  %v8982_v49 = vld [vmem:[%s8662_s19 + $0x118] sm:$0xff] }
  0x1e   : > { %1882 = vrot.lane.b32.xlu1 %v1590_v1, %s8577_s24  ;;  %v13806_v42 = vsel %vm8822_vm3, 4294967295, %v13805_v42  ;;  %2278 = vmatprep.subr.bf16.mxu0 %v13501_v2  ;;  %v1508_v50 = vsel %vm13590_vm1, %v1407_v61, %v1408_v35  ;;  %v1412_v7 = vrot.slane %v8805_v22, 7  ;;  %v1413_v14 = vrot.slane %v8808_v26, 7  ;;  %13817 = vst [vmem:[#allocation12_spill] sm:$0xff] %v8982_v49 }
  0x1f   : > { %13807 = vst [vmem:[#allocation4_spill] sm:$0xff] %v13806_v42  ;;  %v1414_v51 = vrot.slane %v8811_v28, 7  ;;  %v1507_v54 = vsel %vm13590_vm1, %v1408_v35, %v1409_v37  ;;  %v1505_v55 = vsel %vm13590_vm1, %v1410_v43, %v1411_v44  ;;  %v1506_v57 = vsel %vm13590_vm1, %v1409_v37, %v1410_v43  ;;  %v8889_v43 = vld [vmem:[%s8662_s19 + $0xe8] sm:$0xff] }
  0x20   : > { %v1415_v58 = vrot.slane %v8816_v36, 7  ;;  %1884 = vrot.lane.b32.xlu0 %v1591_v29, %s8577_s24  ;;  %v1594_v61 = vpack.c.bf16 %v1507_v54, %v1508_v50  ;;  %v1539_v1 = vsel %vm8822_vm3, %v1506_v57, 0.0  ;;  %v1503_v4 = vsel %vm13590_vm1, %v1412_v7, %v1413_v14  ;;  %v8880_v29 = vld [vmem:[%s8662_s19 + $0xe0] sm:$0xff]  ;;  %13808 = vst [vmem:[#allocation5_spill] sm:$0xff] %v8889_v43 }
  0x21   : > { %v1504_v5 = vsel %vm13590_vm1, %v1411_v44, %v1412_v7  ;;  %2279 = vmatpush1.bf16.msra.mxu0 %v8265_v8  ;;  %v1595_v9 = vpack.c.bf16 %v1505_v55, %v1539_v1  ;;  %v8877_v21 = vsel %vm13590_vm1, %v1413_v14, %v1414_v51  ;;  %v1416_v8 = vrot.slane %v8830_v45, 7  ;;  %v8267_v55 = vld [vmem:[%s13491_s1] sm:$0xff]  }
  0x22   : > { %1886 = vrot.lane.b32.xlu1 %v1592_v30, %s8577_s24  ;;  %v1596_v15 = vpack.c.bf16 %v1503_v4, %v1504_v5  ;;  %v8873_v16 = vsel %vm13590_vm1, %v1414_v51, %v1415_v58  ;;  %v1417_v37 = vrot.slane %v8833_v48, 7  ;;  %2280 = vmatprep.subr.bf16.mxu0 %v13501_v2  ;;  %v574_v30 = vand.u32 63, %v8693_v20  ;;  %v8916_v4 = vld [vmem:[%s8662_s19 + $0xf0] sm:$0xff] }
  0x23   : > { %v1597_v35 = vpack.c.bf16 %v8873_v16, %v8877_v21  ;;  %v1418_v44 = vrot.slane %v8844_v53, 7  ;;  %v1419_v50 = vrot.slane %v8855_v59, 7  ;;  %v1420_v7 = vrot.slane %v8858_v60, 7  ;;  %13812 = vst [vmem:[#allocation7_spill] sm:$0xff] %v8916_v4 }
  0x24   : > { %v1421_v14 = vrot.slane %v8868_v6, 7  ;;  %1888 = vrot.lane.b32.xlu0 %v1593_v31, %s8577_s24  ;;  %v1499_v51 = vsel %vm13590_vm1, %v1416_v8, %v1417_v37  ;;  %v1500_v20 = vsel %vm13590_vm1, %v1415_v58, %v1416_v8  ;;  %vm8900_vm6 = vcmp.ne.s32.totalorder %v574_v30, 0  ;;  %v8933_v8 = vld [vmem:[%s8662_s19 + $0xf8] sm:$0xff] }
  0x25   : > { %2281 = vmatpush1.bf16.msra.mxu0 %v8266_v52  ;;  %v13809_v54 = vmov 0  ;;  %v1422_v57 = vrot.slane %v8880_v29, 7  ;;  %v1598_v31 = vpack.c.bf16 %v1499_v51, %v1500_v20  ;;  %v1497_v58 = vsel %vm13590_vm1, %v1418_v44, %v1419_v50  ;;  %13813 = vst [vmem:[#allocation8_spill] sm:$0xff] %v8933_v8  ;;  %v8943_v20 = vld [vmem:[%s8662_s19 + $0x100] sm:$0xff] }
  0x26   : > { %v13810_v54 = vsel %vm8900_vm6, 4294967295, %v13809_v54  ;;  %1890 = vrot.lane.b32.xlu1 %v1594_v61, %s8577_s24  ;;  %2282 = vmatprep.subr.bf16.mxu0 %v13501_v2  ;;  %v1498_v52 = vsel %vm13590_vm1, %v1417_v37, %v1418_v44  ;;  %v1423_v1 = vrot.slane %v8889_v43, 7  ;;  %v8922_v61 = vsel %vm13590_vm1, %v1420_v7, %v1421_v14  ;;  %13814 = vst [vmem:[#allocation9_spill] sm:$0xff] %v8943_v20 }
  0x27   : > { %13811 = vst [vmem:[#allocation6_spill] sm:$0xff] %v13810_v54  ;;  %v1547_v5 = vsel %vm8900_vm6, %v1498_v52, 0.0  ;;  %v8926_v16 = vsel %vm13590_vm1, %v1419_v50, %v1420_v7  ;;  %v8930_v21 = vsel %vm13590_vm1, %v1421_v14, %v1422_v57  ;;  %v13507_v51 = vrot.slane %v8672_v11, 1  ;;  %v8268_v50 = vld [vmem:[%s13491_s1 + $0x58] sm:$0xff]   ;;  %v8979_v7 = vld [vmem:[%s8662_s19 + $0x110] sm:$0xff] }
  0x28   : > { %v1599_v37 = vpack.c.bf16 %v1497_v58, %v1547_v5  ;;  %v1600_v30 = vpack.c.bf16 %v8922_v61, %v8926_v16  ;;  %v8939_v44 = vsel %vm13590_vm1, %v1422_v57, %v1423_v1  ;;  %1892 = vrot.lane.b32.xlu0 %v1595_v9, %s8577_s24  ;;  %v1620_v14 = vrot.slane %v8675_v12, 1  ;;  %v8962_v61 = vld [vmem:[%s8662_s19 + $0x108] sm:$0xff]  ;;  %v8269_v16 = vld [vmem:[%s13491_s1 + $0x50] sm:$0xff]   ;;  %13816 = vst [vmem:[#allocation11_spill] sm:$0xff] %v8979_v7 }
  0x29   : > { %2283 = vmatpush1.bf16.msra.mxu0 %v8267_v55  ;;  %v1621_v57 = vrot.slane %v8687_v18, 1  ;;  %v1424_v58 = vrot.slane %v8916_v4, 7  ;;  %v1425_v9 = vrot.slane %v8933_v8, 7  ;;  %v1622_v55 = vrot.slane %v8690_v19, 1  ;;  %13815 = vst [vmem:[#allocation10_spill] sm:$0xff] %v8962_v61 }
  0x2a   : > { %1894 = vrot.lane.b32.xlu1 %v1596_v15, %s8577_s24  ;;  %2292 = vmatprep.subr.bf16.mxu0 %v13501_v2  ;;  %v370_v5 = vadd.s32 256, %v8643_v3  ;;  %v1746_v17 = vsel %vm13593_vm4, %v13507_v51, %v1620_v14  ;;  %v1426_v52 = vrot.slane %v8943_v20, 7  ;;  %v13818_v42 = vrot.slane %v8698_v23, 1 }
  0x2b   : > { %v1745_v15 = vsel %vm13593_vm4, %v1620_v14, %v1621_v57  ;;  %v8975_v27 = vsel %vm13590_vm1, %v1423_v1, %v1424_v58  ;;  %v1491_v38 = vsel %vm13590_vm1, %v1424_v58, %v1425_v9  ;;  %v8994_v1 = vsel %vm13593_vm4, %v1621_v57, %v1622_v55 }
  0x2c   : > { %v1812_v2 = vpack.c.bf16 %v1745_v15, %v1746_v17  ;;  %v8990_v25 = vsel %vm13593_vm4, %v1622_v55, %v13818_v42  ;;  %1896 = vrot.lane.b32.xlu0 %v1597_v35, %s8577_s24  ;;  %v1602_v14 = vpack.c.bf16 %v1491_v38, %v8975_v27  ;;  %v630_v58 = vand.u32 63, %v370_v5  ;;  %v9026_v17 = vld [vmem:[%s8662_s19 + $0x120] sm:$0xff]  ;;  %v9039_v55 = vld [vmem:[%s8662_s19 + $0x128] sm:$0xff] }
  0x2d   : > { %2293 = vmatpush2.bf16.msra.mxu0 %v8268_v50  ;;  %v1427_v15 = vrot.slane %v8962_v61, 7  ;;  %v13819_v42 = vmov 0   ;;  %v1490_v57 = vsel %vm13590_vm1, %v1425_v9, %v1426_v52  ;;  %v1625_v35 = vrot.slane %v8721_v32, 1  ;;  %13825 = vst [vmem:[#allocation14_spill] sm:$0xff] %v9026_v17  ;;  %13827 = vst [vmem:[#allocation15_spill] sm:$0xff] %v9039_v55 }
  0x2e   : > { %1898 = vrot.lane.b32.xlu1 %v1598_v31, %s8577_s24  ;;  %2294 = vmatprep.subr.bf16.mxu0 %v13819_v42  ;;  %v13820_v50 = vrot.slane %v8701_v24, 1  ;;  %v13821_v27 = vrot.slane %v8698_v23, 1  ;;  %vm9017_vm7 = vcmp.ne.s32.totalorder %v630_v58, 0  ;;  %v13822_v31 = vmov 0 }
  0x2f   : > { %7526 = vmatprep.mubr.msk.bf16.mxu0 %vm13596_vm5, %v1812_v2  ;;  %v13823_v31 = vsel %vm9017_vm7, 4294967295, %v13822_v31  ;;  %v1489_v9 = vsel %vm13590_vm1, %v1426_v52, %v1427_v15  ;;  %v1428_v5 = vrot.slane %v8979_v7, 7  ;;  %v1429_v51 = vrot.slane %v8982_v49, 7  ;;  %v8271_v49 = vld [vmem:[%s13491_s1 + $0x40] sm:$0xff]  }
  0x30   : > { %v9012_v38 = vsel %vm13593_vm4, %v13821_v27, %v13820_v50  ;;  %13824 = vst [vmem:[#allocation13_spill] sm:$0xff] %v13823_v31  ;;  %v1555_v50 = vsel %vm9017_vm7, %v1490_v57, 0.0  ;;  %v13826_v27 = vrot.slane %v8701_v24, 1  ;;  %v345_v58 = vadd.s32 56, %v8643_v3  ;;  %1900 = vrot.lane.b32.xlu0 %v1599_v37, %s8577_s24  ;;  %v8270_v57 = vld [vmem:[%s13491_s1 + $0x48] sm:$0xff]  }
  0x31   : > { %v1626_v52 = vrot.slane %v8724_v33, 1  ;;  %2295 = vmatpush2.bf16.msra.mxu0 %v8269_v16  ;;  %v1603_v10 = vpack.c.bf16 %v1489_v9, %v1555_v50  ;;  %v1487_v31 = vsel %vm13590_vm1, %v1428_v5, %v1429_v51  ;;  %v1627_v54 = vrot.slane %v8727_v34, 1 }
  0x32   : > { %v9034_v2 = vsel %vm13593_vm4, %v13826_v27, %v1625_v35  ;;  %1902 = vrot.lane.b32.xlu1 %v1600_v30, %s8577_s24  ;;  %2296 = vmatprep.subr.bf16.mxu0 %v13819_v42  ;;  %v1488_v37 = vsel %vm13590_vm1, %v1427_v15, %v1428_v5  ;;  %v455_v16 = vand.u32 63, %v345_v58  ;;  %v9059_v27 = vld [vmem:[%s8662_s19 + $0x130] sm:$0xff]  ;;  %v1430_v61 = vrot.slane %v9026_v17, 7  ;;  %v9069_v5 = vld [vmem:[%s8662_s19 + $0x138] sm:$0xff] }
  0x33   : > { %v1740_v9 = vsel %vm13593_vm4, %v1625_v35, %v1626_v52  ;;  %13828 = vst [vmem:[#allocation16_spill] sm:$0xff] %v9059_v27  ;;  %v1604_v30 = vpack.c.bf16 %v1487_v31, %v1488_v37  ;;  %v1739_v7 = vsel %vm13593_vm4, %v1626_v52, %v1627_v54  ;;  %v1431_v15 = vrot.slane %v9039_v55, 7  ;;  %13829 = vst [vmem:[#allocation17_spill] sm:$0xff] %v9069_v5  ;;  %v9080_v37 = vld [vmem:[%s8662_s19 + $0x140] sm:$0xff] }
  0x34   : > { %vm9071_vm8 = vcmp.ne.s32.totalorder %v455_v16, 63  ;;  %v13830_v35 = vmov 0  ;;  %v1628_v58 = vrot.slane %v8737_v39, 1  ;;  %v1629_v50 = vrot.slane %v8740_v40, 1  ;;  %13833 = vst [vmem:[#allocation19_spill] sm:$0xff] %v9080_v37 }
  0x35   : > { %v13831_v35 = vsel %vm9071_vm8, 4294967295, %v13830_v35  ;;  %2297 = vmatpush2.bf16.msra.mxu0 %v8270_v57  ;;  %v13834_v52 = vpack.c.bf16 %v8939_v44, %v8930_v21  ;;  %v1755_v16 = vsel %vm9071_vm8, %v1739_v7, 0.0  ;;  %v1485_v55 = vsel %vm13590_vm1, %v1430_v61, %v1431_v15  ;;  %v9103_v7 = vld [vmem:[%s8662_s19 + $0x148] sm:$0xff] }
  0x36   : > { %13832 = vst [vmem:[#allocation18_spill] sm:$0xff] %v13831_v35  ;;  %v1486_v17 = vsel %vm13590_vm1, %v1429_v51, %v1430_v61  ;;  %v1432_v20 = vrot.slane %v9059_v27, 7  ;;  %2298 = vmatprep.subr.bf16.mxu0 %v13819_v42  ;;  %1906 = vrot.lane.b32.xlu1 %v1602_v14, %s8577_s24  ;;  %v9095_v57 = vpack.c.bf16 %v1755_v16, %v1740_v9  ;;  %v1433_v44 = vrot.slane %v9069_v5, 7 }
  0x37   : > { %1904 = vrot.lane.b32.xlu0 %v13834_v52, %s8577_s24  ;;  %v1605_v31 = vpack.c.bf16 %v1485_v55, %v1486_v17  ;;  %v9099_v21 = vsel %vm13593_vm4, %v1628_v58, %v1629_v50  ;;  %13835 = vst [vmem:[#allocation20_spill] sm:$0xff] %v9103_v7  ;;  %v9107_v51 = vsel %vm13593_vm4, %v1627_v54, %v1628_v58  ;;  %v1630_v14 = vrot.slane %v8743_v41, 1 }
  0x38   : > { %v1484_v61 = vsel %vm13590_vm1, %v1431_v15, %v1432_v20  ;;  %v1631_v9 = vrot.slane %v8751_v46, 1  ;;  %v1483_v55 = vsel %vm13590_vm1, %v1432_v20, %v1433_v44  ;;  %v378_v16 = vadd.s32 320, %v8643_v3 }
  0x39   : > { %2299 = vmatpush2.bf16.msra.mxu0 %v8271_v49  ;;  %v1606_v54 = vpack.c.bf16 %v1483_v55, %v1484_v61  ;;  %v9127_v58 = vsel %vm13593_vm4, %v1629_v50, %v1630_v14  ;;  %v1434_v20 = vrot.slane %v9080_v37, 7  ;;  %v1435_v17 = vrot.slane %v9103_v7, 7  ;;  %v9142_v55 = vld [vmem:[%s8662_s19 + $0x150] sm:$0xff] }
  0x3a   : > { %v9123_v15 = vsel %vm13593_vm4, %v1630_v14, %v1631_v9  ;;  %1910 = vrot.lane.b32.xlu1 %v1604_v30, %s8577_s24  ;;  %v686_v49 = vand.u32 63, %v378_v16  ;;  %3716 = vmatprep.subr.bf16.mxu0 %v13819_v42  ;;  %v1633_v50 = vrot.slane %v8765_v56, 1  ;;  %13836 = vst [vmem:[#allocation21_spill] sm:$0xff] %v9142_v55  ;;  %v9145_v30 = vld [vmem:[%s8662_s19 + $0x158] sm:$0xff]  ;;  %v13838_v16 = vmov 0 }
  0x3b   : > { %1908 = vrot.lane.b32.xlu0 %v1603_v10, %s8577_s24  ;;  %v1632_v10 = vrot.slane %v8754_v47, 1  ;;  %v1482_v61 = vsel %vm13590_vm1, %v1433_v44, %v1434_v20  ;;  %13837 = vst [vmem:[#allocation22_spill] sm:$0xff] %v9145_v30  ;;  %v1481_v52 = vsel %vm13590_vm1, %v1434_v20, %v1435_v17  ;;  %v1436_v44 = vrot.slane %v9142_v55, 7 }
  0x3c   : > { %vm9147_vm9 = vcmp.ne.s32.totalorder %v686_v49, 0  ;;  %v1437_v42 = vrot.slane %v9145_v30, 7  ;;  %v353_v7 = vadd.s32 120, %v8643_v3  ;;  %v1635_v30 = vrot.slane %v8781_v63, 1 }
  0x3d   : > { %v13839_v16 = vsel %vm9147_vm9, 4294967295, %v13838_v16  ;;  %v9155_v35 = vsel %vm13593_vm4, %v1631_v9, %v1632_v10  ;;  %v1563_v14 = vsel %vm9147_vm9, %v1482_v61, 0.0  ;;  %v9163_v49 = vsel %vm13593_vm4, %v1632_v10, %v1633_v50 }
  0x3e   : > { %13840 = vst [vmem:[#allocation23_spill] sm:$0xff] %v13839_v16  ;;  %1914 = vrot.lane.b32.xlu1 %v1606_v54, %s8577_s24  ;;  %v1607_v20 = vpack.c.bf16 %v1481_v52, %v1563_v14  ;;  %v1634_v61 = vrot.slane %v8778_v62, 1  ;;  %v1479_v10 = vsel %vm13590_vm1, %v1436_v44, %v1437_v42  ;;  %v511_v16 = vand.u32 63, %v353_v7 }
  0x3f   : > { %1912 = vrot.lane.b32.xlu0 %v1605_v31, %s8577_s24  ;;  %v1480_v31 = vsel %vm13590_vm1, %v1435_v17, %v1436_v44  ;;  %v13841_v9 = vmov 0  ;;  %v386_v37 = vadd.s32 384, %v8643_v3  ;;  %v13855_v43 = vmov 0 }
  0x40   : > { %v1608_v52 = vpack.c.bf16 %v1479_v10, %v1480_v31  ;;  %v1732_v14 = vsel %vm13593_vm4, %v1633_v50, %v1634_v61  ;;  %vm9181_vm10 = vcmp.ne.s32.totalorder %v511_v16, 63  ;;  %v1731_v17 = vsel %vm13593_vm4, %v1634_v61, %v1635_v30  ;;  %v9193_v31 = vld [vmem:[%s8662_s19 + $0x160] sm:$0xff]  ;;  %v9196_v50 = vld [vmem:[%s8662_s19 + $0x168] sm:$0xff] }
  0x41   : > { %v13842_v9 = vsel %vm9181_vm10, 4294967295, %v13841_v9  ;;  %v1763_v7 = vsel %vm9181_vm10, %v1731_v17, 0.0  ;;  %13844 = vst [vmem:[#allocation25_spill] sm:$0xff] %v9193_v31  ;;  %13845 = vst [vmem:[#allocation26_spill] sm:$0xff] %v9196_v50  ;;  %v1438_v16 = vrot.slane %v9193_v31, 7  ;;  %v1636_v10 = vrot.slane %v8784_v0, 1 }
  0x42   : > { %13843 = vst [vmem:[#allocation24_spill] sm:$0xff] %v13842_v9  ;;  %1918 = vrot.lane.b32.xlu1 %v1608_v52, %s8577_s24  ;;  %v9190_v44 = vpack.c.bf16 %v1763_v7, %v1732_v14  ;;  %v1637_v61 = vrot.slane %v8805_v22, 1  ;;  %v9220_v31 = vld [vmem:[%s8662_s19 + $0x170] sm:$0xff]  ;;  %vm13939_vm2 = vcmp.lt.s32.totalorder %v8643_v3, 7 }
  0x43   : > { %1916 = vrot.lane.b32.xlu0 %v1607_v20, %s8577_s24  ;;  %v1439_v20 = vrot.slane %v9196_v50, 7  ;;  %v1478_v14 = vsel %vm13590_vm1, %v1437_v42, %v1438_v16  ;;  %v9214_v9 = vsel %vm13593_vm4, %v1635_v30, %v1636_v10  ;;  %13846 = vst [vmem:[#allocation27_spill] sm:$0xff] %v9220_v31  ;;  %v9223_v42 = vld [vmem:[%s8662_s19 + $0x178] sm:$0xff]  ;;  %v1639_v30 = vrot.slane %v8811_v28, 1 }
  0x44   : > { %v9210_v54 = vsel %vm13593_vm4, %v1636_v10, %v1637_v61  ;;  %13847 = vst [vmem:[#allocation28_spill] sm:$0xff] %v9223_v42 }
  0x45   : > { %v1477_v52 = vsel %vm13590_vm1, %v1438_v16, %v1439_v20  ;;  %v1440_v16 = vrot.slane %v9220_v31, 7  ;;  %v1641_v31 = vrot.slane %v8830_v45, 1 }
  0x46   : > { %v1609_v7 = vpack.c.bf16 %v1477_v52, %v1478_v14  ;;  %v1441_v52 = vrot.slane %v9223_v42, 7  ;;  %v1638_v14 = vrot.slane %v8808_v26, 1 }
  0x48   : > { %1920 = vrot.lane.b32.xlu0 %v1609_v7, %s8577_s24  ;;  %v1475_v10 = vsel %vm13590_vm1, %v1440_v16, %v1441_v52  ;;  %v1476_v7 = vsel %vm13590_vm1, %v1439_v20, %v1440_v16  ;;  %v9237_v55 = vsel %vm13593_vm4, %v1638_v14, %v1639_v30  ;;  %v9241_v42 = vsel %vm13593_vm4, %v1637_v61, %v1638_v14  ;;  %v9248_v20 = vld [vmem:[%s8662_s19 + $0x180] sm:$0xff] }
  0x49   : > { %v1610_v50 = vpack.c.bf16 %v1475_v10, %v1476_v7  ;;  %13848 = vst [vmem:[#allocation29_spill] sm:$0xff] %v9248_v20  ;;  %v742_v16 = vand.u32 63, %v386_v37  ;;  %v9251_v10 = vld [vmem:[%s8662_s19 + $0x188] sm:$0xff]  ;;  %v1442_v7 = vrot.slane %v9248_v20, 7  ;;  %v13850_v61 = vmov 0 }
  0x4a   : > { %13849 = vst [vmem:[#allocation30_spill] sm:$0xff] %v9251_v10  ;;  %v1443_v17 = vrot.slane %v9251_v10, 7  ;;  %v1640_v14 = vrot.slane %v8816_v36, 1 }
  0x4b   : > { %1922 = vrot.lane.b32.xlu1 %v1610_v50, %s8577_s24  ;;  %vm9255_vm11 = vcmp.ne.s32.totalorder %v742_v16, 0  ;;  %v1474_v50 = vsel %vm13590_vm1, %v1441_v52, %v1442_v7 }
  0x4c   : > { %v13851_v61 = vsel %vm9255_vm11, 4294967295, %v13850_v61  ;;  %v1473_v37 = vsel %vm13590_vm1, %v1442_v7, %v1443_v17  ;;  %v1571_v5 = vsel %vm9255_vm11, %v1474_v50, 0.0  ;;  %v9271_v20 = vsel %vm13593_vm4, %v1640_v14, %v1641_v31  ;;  %v9281_v7 = vld [vmem:[%s8662_s19 + $0x190] sm:$0xff]  ;;  %v9284_v50 = vld [vmem:[%s8662_s19 + $0x198] sm:$0xff] }
  0x4d   : > { %13852 = vst [vmem:[#allocation31_spill] sm:$0xff] %v13851_v61  ;;  %v1611_v16 = vpack.c.bf16 %v1473_v37, %v1571_v5  ;;  %v9275_v52 = vsel %vm13593_vm4, %v1639_v30, %v1640_v14  ;;  %13853 = vst [vmem:[#allocation32_spill] sm:$0xff] %v9281_v7  ;;  %v1444_v10 = vrot.slane %v9281_v7, 7  ;;  %v1445_v5 = vrot.slane %v9284_v50, 7 }
  0x4e   : > { %13854 = vst [vmem:[#allocation33_spill] sm:$0xff] %v9284_v50  ;;  %v361_v37 = vadd.s32 184, %v8643_v3  ;;  %v1642_v30 = vrot.slane %v8833_v48, 1  ;;  %v13569_v14 = vrot.slane %v8844_v53, 1 }
  0x4f   : > { %1924 = vrot.lane.b32.xlu0 %v1611_v16, %s8577_s24  ;;  %v1471_v27 = vsel %vm13590_vm1, %v1444_v10, %v1445_v5  ;;  %v1472_v16 = vsel %vm13590_vm1, %v1443_v17, %v1444_v10 }
  0x50   : > { %v567_v61 = vand.u32 63, %v361_v37  ;;  %v1612_v8 = vpack.c.bf16 %v1471_v27, %v1472_v16  ;;  %v1723_v50 = vsel %vm13593_vm4, %v1642_v30, %v13569_v14  ;;  %v1724_v4 = vsel %vm13593_vm4, %v1641_v31, %v1642_v30  ;;  %v9313_v27 = vld [vmem:[%s8662_s19 + $0x1a0] sm:$0xff]  ;;  %v9316_v37 = vld [vmem:[%s8662_s19 + $0x1a8] sm:$0xff] }
  0x51   : > { %13858 = vst [vmem:[#allocation35_spill] sm:$0xff] %v9316_v37  ;;  %v1446_v16 = vrot.slane %v9313_v27, 7  ;;  %v1447_v31 = vrot.slane %v9316_v37, 7  ;;  %v13863_v37 = vmov 0 }
  0x52   : > { %vm9303_vm12 = vcmp.ne.s32.totalorder %v567_v61, 63  ;;  %1926 = vrot.lane.b32.xlu1 %v1612_v8, %s8577_s24 }
  0x53   : > { %v13856_v43 = vsel %vm9303_vm12, 4294967295, %v13855_v43  ;;  %v1771_v17 = vsel %vm9303_vm12, %v1723_v50, 0.0  ;;  %v1469_v61 = vsel %vm13590_vm1, %v1446_v16, %v1447_v31  ;;  %v1470_v8 = vsel %vm13590_vm1, %v1445_v5, %v1446_v16  ;;  %v9329_v50 = vld [vmem:[%s8662_s19 + $0x1b8] sm:$0xff] }
  0x54   : > { %13857 = vst [vmem:[#allocation34_spill] sm:$0xff] %v13856_v43  ;;  %v9310_v10 = vpack.c.bf16 %v1771_v17, %v1724_v4  ;;  %v1613_v30 = vpack.c.bf16 %v1469_v61, %v1470_v8  ;;  %v9326_v4 = vld [vmem:[%s8662_s19 + $0x1b0] sm:$0xff]  ;;  %13860 = vst [vmem:[#allocation37_spill] sm:$0xff] %v9329_v50  ;;  %v1449_v7 = vrot.slane %v9329_v50, 7  ;;  %v394_v16 = vadd.s32 448, %v8643_v3  ;;  %v9340_v61 = vld [vmem:[%s8662_s19 + $0x1c0] sm:$0xff] }
  0x55   : > { %13859 = vst [vmem:[#allocation36_spill] sm:$0xff] %v9326_v4  ;;  %v1448_v17 = vrot.slane %v9326_v4, 7  ;;  %13861 = vst [vmem:[#allocation38_spill] sm:$0xff] %v9340_v61  ;;  %v1450_v50 = vrot.slane %v9340_v61, 7 }
  0x56   : > { %1928 = vrot.lane.b32.xlu0 %v1613_v30, %s8577_s24  ;;  %v798_v8 = vand.u32 63, %v394_v16  ;;  %v9343_v30 = vld [vmem:[%s8662_s19 + $0x1c8] sm:$0xff]  ;;  %v9362_v16 = vld [vmem:[%s8662_s19 + $0x1d8] sm:$0xff] }
  0x57   : > { %v1467_v14 = vsel %vm13590_vm1, %v1448_v17, %v1449_v7  ;;  %v1468_v43 = vsel %vm13590_vm1, %v1447_v31, %v1448_v17  ;;  %13862 = vst [vmem:[#allocation39_spill] sm:$0xff] %v9343_v30  ;;  %v1451_v4 = vrot.slane %v9343_v30, 7  ;;  %13867 = vst [vmem:[#allocation42_spill] sm:$0xff] %v9362_v16  ;;  %v1453_v30 = vrot.slane %v9362_v16, 7 }
  0x58   : > { %v1614_v5 = vpack.c.bf16 %v1467_v14, %v1468_v43  ;;  %vm9347_vm13 = vcmp.ne.s32.totalorder %v798_v8, 0  ;;  %v1466_v43 = vsel %vm13590_vm1, %v1449_v7, %v1450_v50 }
  0x59   : > { %v13864_v37 = vsel %vm9347_vm13, 4294967295, %v13863_v37  ;;  %v1465_v14 = vsel %vm13590_vm1, %v1450_v50, %v1451_v4  ;;  %v1579_v31 = vsel %vm9347_vm13, %v1466_v43, 0.0  ;;  %v9372_v43 = vld [vmem:[%s8662_s19 + $0x1e0] sm:$0xff] }
  0x5a   : > { %1930 = vrot.lane.b32.xlu1 %v1614_v5, %s8577_s24  ;;  %13865 = vst [vmem:[#allocation40_spill] sm:$0xff] %v13864_v37  ;;  %v1615_v17 = vpack.c.bf16 %v1465_v14, %v1579_v31  ;;  %v9359_v5 = vld [vmem:[%s8662_s19 + $0x1d0] sm:$0xff]  ;;  %v9375_v14 = vld [vmem:[%s8662_s19 + $0x1e8] sm:$0xff]  ;;  %v1454_v31 = vrot.slane %v9372_v43, 7 }
  0x5b   : > { %13866 = vst [vmem:[#allocation41_spill] sm:$0xff] %v9359_v5  ;;  %v1452_v8 = vrot.slane %v9359_v5, 7  ;;  %13868 = vst [vmem:[#allocation43_spill] sm:$0xff] %v9375_v14 }
  0x5c   : > { %1932 = vrot.lane.b32.xlu0 %v1615_v17, %s8577_s24  ;;  %v1455_v17 = vrot.slane %v9375_v14, 7  ;;  %v1462_v5 = vsel %vm13590_vm1, %v1453_v30, %v1454_v31  ;;  %v13870_v14 = vpack.c.bf16 %v8990_v25, %v8994_v1  ;;  %v13873_v25 = vpack.c.bf16 %v9034_v2, %v9012_v38 }
  0x5d   : > { %v1463_v7 = vsel %vm13590_vm1, %v1452_v8, %v1453_v30  ;;  %v1464_v50 = vsel %vm13590_vm1, %v1451_v4, %v1452_v8  ;;  %v9385_v8 = vld [vmem:[%s8662_s19 + $0x1f0] sm:$0xff]  ;;  %v13871_v30 = vrot.slane %v8678_v13, 7  ;;  %v13874_v1 = vpack.c.bf16 %v8701_v24, %v8698_v23 }
  0x5e   : > { %v1616_v37 = vpack.c.bf16 %v1463_v7, %v1464_v50  ;;  %v1461_v16 = vsel %vm13590_vm1, %v1454_v31, %v1455_v17  ;;  %v1456_v50 = vrot.slane %v9385_v8, 7  ;;  %v13872_v31 = vpack.c.bf16 %v8690_v19, %v8687_v18 }
  0x5f   : > { %v1617_v61 = vpack.c.bf16 %v1461_v16, %v1462_v5  ;;  %v13875_v18 = vpack.c.bf16 %v8724_v33, %v8721_v32  ;;  %v13876_v38 = vpack.c.bf16 %v9099_v21, %v9107_v51  ;;  %v13877_v23 = vpack.c.bf16 %v8737_v39, %v8727_v34 }
  0x60   : > { %1934 = vrot.lane.b32.xlu1 %v1616_v37, %s8577_s24  ;;  %v13869_v37 = vpack.c.bf16 %v8675_v12, %v8672_v11  ;;  %v1460_v5 = vsel %vm13590_vm1, %v1455_v17, %v1456_v50  ;;  %v13879_v33 = vpack.c.bf16 %v8743_v41, %v8740_v40  ;;  %v13880_v51 = vpack.c.bf16 %v9163_v49, %v9155_v35 }
  0x61   : > { %1936 = vrot.lane.b32.xlu0 %v1617_v61, %s8577_s24  ;;  %v1459_v61 = vsel %vm13590_vm1, %v1456_v50, %v13871_v30  ;;  %v13881_v39 = vpack.c.bf16 %v8754_v47, %v8751_v46  ;;  %v13882_v40 = vpack.c.bf16 %v8778_v62, %v8765_v56  ;;  %v13883_v35 = vpack.c.bf16 %v9210_v54, %v9214_v9 }
  0x62   : > { %v1618_v12 = vpack.c.bf16 %v1459_v61, %v1460_v5  ;;  %v13884_v46 = vpack.c.bf16 %v8784_v0, %v8781_v63  ;;  %v13886_v62 = vpack.c.bf16 %v8808_v26, %v8805_v22  ;;  %v13887_v54 = vpack.c.bf16 %v9271_v20, %v9275_v52 }
  0x63   : > { %v13888_v0 = vpack.c.bf16 %v8816_v36, %v8811_v28  ;;  %v13889_v20 = vrot.slane %v8844_v53, 1  ;;  %v13890_v28 = vpack.c.bf16 %v8833_v48, %v8830_v45  ;;  %v1646_v50 = vrot.slane %v8868_v6, 1 }
  0x64   : > { %1938 = vrot.lane.b32.xlu1 %v1618_v12, %s8577_s24  ;;  %v1647_v30 = vrot.slane %v8880_v29, 1  ;;  %v13891_v12 = vld [vmem:[#allocation5_spill] sm:$0xff] }
  0x66   : > { %v1719_v5 = vsel %vm13593_vm4, %v1646_v50, %v1647_v30 }
  0x8a   : > { %v1877_v4 = vpop.permute.xlu0 %1876 }
  0x8b   : > { %v1943_v7 = vsel %vm13596_vm5, %v13869_v37, %v1877_v4  ;;  %v1645_v37 = vrot.slane %v8858_v60, 1 }
  0x8c   : > { %2301 = vmatmul.mubr.bf16.vlgmr.msra.gmra.mxu0 %v1943_v7  ;;  %v1881_v13 = vpop.permute.xlu1 %1880 }
  0x8d   : > { %7527 = vmatprep.mubr.msk.bf16.mxu0 %vm13596_vm5, %v13870_v14  ;;  %v1951_v14 = vsel %vm13596_vm5, %v13874_v1, %v1881_v13  ;;  %v1720_v45 = vsel %vm13593_vm4, %v1645_v37, %v1646_v50  ;;  %v369_v13 = vadd.s32 248, %v8643_v3 }
  0x8e   : > { %v1879_v16 = vpop.permute.xlu0 %1878 }
  0x8f   : > { %v1947_v4 = vsel %vm13596_vm5, %v13872_v31, %v1879_v16  ;;  %v1825_v16 = vpack.c.bf16 %v1719_v5, %v1720_v45  ;;  %v1648_v31 = vrot.slane %v13891_v12, 1  ;;  %v13905_v45 = vld [vmem:[#allocation19_spill] sm:$0xff] }
  0x90   : > { %v1883_v17 = vpop.permute.xlu1 %1882 }
  0x91   : > { %v1955_v19 = vsel %vm13596_vm5, %v13875_v18, %v1883_v17  ;;  %v623_v17 = vand.u32 63, %v369_v13  ;;  %v13893_v18 = vld [vmem:[#allocation8_spill] sm:$0xff] }
  0x92   : > { %v1885_v2 = vpop.permute.xlu0 %1884 }
  0x93   : > { %v1959_v24 = vsel %vm13596_vm5, %v13877_v23, %v1885_v2  ;;  %vm9512_vm14 = vcmp.ne.s32.totalorder %v623_v17, 63  ;;  %v13909_v17 = vld [vmem:[#allocation20_spill] sm:$0xff] }
  0x94   : > { %2309 = vmatmul.mubr.bf16.gmra.mxu0 %v1947_v4  ;;  %v1887_v32 = vpop.permute.xlu1 %1886  ;;  %v13892_v4 = vld [vmem:[#allocation7_spill] sm:$0xff] }
  0x95   : > { %7528 = vmatprep.mubr.msk.bf16.mxu0 %vm13596_vm5, %v13873_v25  ;;  %v1963_v21 = vsel %vm13596_vm5, %v13879_v33, %v1887_v32  ;;  %v1649_v25 = vrot.slane %v13892_v4, 1 }
  0x96   : > { %v1889_v34 = vpop.permute.xlu0 %1888 }
  0x97   : > { %v1717_v1 = vsel %vm13593_vm4, %v1648_v31, %v1649_v25 }
  0x9a   : > { %v1893_v49 = vpop.permute.xlu0 %1892 }
  0x9b   : > { %v1975_v47 = vsel %vm13596_vm5, %v13884_v46, %v1893_v49 }
  0x9c   : > { %2317 = vmatmul.mubr.bf16.gmra.mxu0 %v1951_v14  ;;  %v1718_v14 = vsel %vm13593_vm4, %v1647_v30, %v1648_v31  ;;  %v13906_v31 = vmov 0 }
  0x9d   : > { %7529 = vmatprep.mubr.msk.bf16.mxu0 %vm13596_vm5, %v9095_v57  ;;  %v13878_v57 = vpack.c.bf16 %v9123_v15, %v9127_v58  ;;  %v1967_v15 = vsel %vm13596_vm5, %v13881_v39, %v1889_v34  ;;  %v1891_v58 = vpop.permute.xlu1 %1890  ;;  %v13898_v39 = vld [vmem:[#allocation10_spill] sm:$0xff] }
  0x9e   : > { %v1971_v41 = vsel %vm13596_vm5, %v13882_v40, %v1891_v58  ;;  %v1897_v63 = vpop.permute.xlu0 %1896  ;;  %v13899_v58 = vld [vmem:[#allocation11_spill] sm:$0xff] }
  0x9f   : > { %v1653_v40 = vrot.slane %v13899_v58, 1 }
  0xa1   : > { %v1895_v56 = vpop.permute.xlu1 %1894 }
  0xa2   : > { %v1979_v9 = vsel %vm13596_vm5, %v13886_v62, %v1895_v56  ;;  %v1901_v61 = vpop.permute.xlu0 %1900  ;;  %v13901_v62 = vld [vmem:[#allocation14_spill] sm:$0xff] }
  0xa4   : > { %2325 = vmatmul.mubr.bf16.gmra.mxu0 %v1955_v19  ;;  %v1650_v19 = vrot.slane %v13893_v18, 1 }
  0xa5   : > { %7530 = vmatprep.mubr.msk.bf16.mxu0 %vm13596_vm5, %v13876_v38  ;;  %v1899_v22 = vpop.permute.xlu1 %1898  ;;  %v13894_v38 = vld [vmem:[#allocation9_spill] sm:$0xff] }
  0xa6   : > { %v1987_v36 = vsel %vm13596_vm5, %v13890_v28, %v1899_v22  ;;  %v1651_v2 = vrot.slane %v13894_v38, 1  ;;  %v1716_v33 = vsel %vm13593_vm4, %v1649_v25, %v1650_v19  ;;  %v13902_v22 = vld [vmem:[#allocation15_spill] sm:$0xff]  ;;  %v377_v28 = vadd.s32 312, %v8643_v3 }
  0xa7   : > { %v1380_v25 = vpack.c.bf16 %v13902_v22, %v13901_v62 }
  0xa9   : > { %v1905_v32 = vpop.permute.xlu0 %1904 }
  0xac   : > { %2333 = vmatmul.mubr.bf16.gmra.mxu0 %v1959_v24  ;;  %v1826_v24 = vpack.c.bf16 %v1717_v1, %v1718_v14 }
  0xad   : > { %7531 = vmatprep.mubr.msk.bf16.mxu0 %vm13596_vm5, %v13878_v57  ;;  %v13895_v57 = vmov 0 }
  0xae   : > { %v13896_v57 = vsel %vm9512_vm14, 4294967295, %v13895_v57 }
  0xaf   : > { %13897 = vst [vmem:[#allocation5_spill] sm:$0xff] %v13896_v57 }
  0xb4   : > { %2341 = vmatmul.mubr.bf16.gmra.mxu0 %v1963_v21 }
  0xb5   : > { %7532 = vmatprep.mubr.msk.bf16.mxu0 %vm13596_vm5, %v13880_v51 }
  0xbc   : > { %2349 = vmatmul.mubr.bf16.gmra.mxu0 %v1967_v15  ;;  %v1652_v15 = vrot.slane %v13898_v39, 1 }
  0xbd   : > { %7533 = vmatprep.mubr.msk.bf16.mxu0 %vm13596_vm5, %v9190_v44  ;;  %v13885_v44 = vpack.c.bf16 %v9237_v55, %v9241_v42  ;;  %v1983_v55 = vsel %vm13596_vm5, %v13888_v0, %v1897_v63  ;;  %v1644_v42 = vrot.slane %v8855_v59, 1  ;;  %v1909_v63 = vpop.permute.xlu0 %1908 }
  0xbe   : > { %v1714_v49 = vsel %vm13593_vm4, %v1651_v2, %v1652_v15 }
  0xbf   : > { %v1721_v26 = vsel %vm13593_vm4, %v1644_v42, %v1645_v37  ;;  %v1722_v52 = vsel %vm13593_vm4, %v13889_v20, %v1644_v42  ;;  %v13903_v20 = vld [vmem:[#allocation16_spill] sm:$0xff] }
  0xc0   : > { %v1824_v7 = vpack.c.bf16 %v1721_v26, %v1722_v52  ;;  %v1656_v26 = vrot.slane %v13902_v22, 1  ;;  %v1657_v52 = vrot.slane %v13903_v20, 1 }
  0xc1   : > { %v1913_v13 = vpop.permute.xlu0 %1912 }
  0xc2   : > { %v1709_v50 = vsel %vm13593_vm4, %v1656_v26, %v1657_v52  ;;  %v2015_v1 = vsel %vm13596_vm5, %v1380_v25, %v1913_v13 }
  0xc4   : > { %2357 = vmatmul.mubr.bf16.gmra.mxu0 %v1971_v41 }
  0xc5   : > { %7534 = vmatprep.mubr.msk.bf16.mxu0 %vm13596_vm5, %v13883_v35  ;;  %v1713_v35 = vsel %vm13593_vm4, %v1652_v15, %v1653_v40  ;;  %v1917_v15 = vpop.permute.xlu0 %1916 }
  0xcc   : > { %2365 = vmatmul.mubr.bf16.gmra.mxu0 %v1975_v47  ;;  %v1828_v47 = vpack.c.bf16 %v1713_v35, %v1714_v49  ;;  %v13913_v35 = vld [vmem:[#allocation26_spill] sm:$0xff] }
  0xcd   : > { %7535 = vmatprep.mubr.msk.bf16.mxu0 %vm13596_vm5, %v13885_v44  ;;  %v13900_v44 = vld [vmem:[#allocation12_spill] sm:$0xff]  ;;  %v1664_v49 = vrot.slane %v13913_v35, 1 }
  0xce   : > { %v1654_v56 = vrot.slane %v13900_v44, 1 }
  0xd4   : > { %2373 = vmatmul.mubr.bf16.gmra.mxu0 %v1979_v9  ;;  %v1655_v9 = vrot.slane %v13901_v62, 1 }
  0xd5   : > { %7536 = vmatprep.mubr.msk.bf16.mxu0 %vm13596_vm5, %v13887_v54  ;;  %v1378_v54 = vpack.c.bf16 %v13898_v39, %v13894_v38  ;;  %v1382_v39 = vpack.c.bf16 %v13909_v17, %v13905_v45 }
  0xd6   : > { %v1711_v0 = vsel %vm13593_vm4, %v1654_v56, %v1655_v9  ;;  %v1710_v30 = vsel %vm13593_vm4, %v1655_v9, %v1656_v26 }
  0xd7   : > { %v2007_v42 = vsel %vm13596_vm5, %v1378_v54, %v1909_v63 }
  0xdc   : > { %2381 = vmatmul.mubr.bf16.gmra.mxu0 %v1983_v55  ;;  %v1712_v55 = vsel %vm13593_vm4, %v1653_v40, %v1654_v56 }
  0xdd   : > { %7537 = vmatprep.mubr.msk.bf16.mxu0 %vm13596_vm5, %v9310_v10  ;;  %v1374_v10 = vpack.c.bf16 %v8855_v59, %v8844_v53  ;;  %v1375_v53 = vpack.c.bf16 %v8868_v6, %v8858_v60  ;;  %v1903_v59 = vpop.permute.xlu1 %1902  ;;  %v1715_v60 = vsel %vm13593_vm4, %v1650_v19, %v1651_v2  ;;  %v1376_v6 = vpack.c.bf16 %v13891_v12, %v8880_v29  ;;  %v13910_v19 = vld [vmem:[#allocation21_spill] sm:$0xff] }
  0xde   : > { %v1779_v21 = vsel %vm9512_vm14, %v1715_v60, 0.0  ;;  %v1377_v29 = vpack.c.bf16 %v13893_v18, %v13892_v4  ;;  %v1829_v37 = vpack.c.bf16 %v1711_v0, %v1712_v55  ;;  %v1830_v12 = vpack.c.bf16 %v1709_v50, %v1710_v30  ;;  %v13915_v0 = vld [vmem:[#allocation28_spill] sm:$0xff] }
  0xdf   : > { %v1991_v48 = vsel %vm13596_vm5, %v1374_v10, %v1901_v61  ;;  %v1995_v23 = vsel %vm13596_vm5, %v1375_v53, %v1903_v59  ;;  %v1999_v51 = vsel %vm13596_vm5, %v1376_v6, %v1905_v32  ;;  %v1827_v34 = vpack.c.bf16 %v1779_v21, %v1716_v33  ;;  %v13904_v61 = vld [vmem:[#allocation17_spill] sm:$0xff]  ;;  %v13911_v33 = vld [vmem:[#allocation22_spill] sm:$0xff] }
  0xe0   : > { %v679_v10 = vand.u32 63, %v377_v28  ;;  %v1658_v5 = vrot.slane %v13904_v61, 1  ;;  %v1660_v18 = vrot.slane %v13909_v17, 1  ;;  %v1661_v38 = vrot.slane %v13910_v19, 1 }
  0xe1   : > { %v1907_v41 = vpop.permute.xlu1 %1906  ;;  %v1381_v2 = vpack.c.bf16 %v13904_v61, %v13903_v20  ;;  %v1662_v21 = vrot.slane %v13911_v33, 1  ;;  %v1383_v56 = vpack.c.bf16 %v13911_v33, %v13910_v19  ;;  %v1666_v55 = vrot.slane %v13915_v0, 1  ;;  %v13920_v61 = vld [vmem:[#allocation30_spill] sm:$0xff] }
  0xe2   : > { %v2003_v46 = vsel %vm13596_vm5, %v1377_v29, %v1907_v41  ;;  %vm9559_vm15 = vcmp.ne.s32.totalorder %v679_v10, 63  ;;  %v1708_v53 = vsel %vm13593_vm4, %v1657_v52, %v1658_v5  ;;  %v2023_v29 = vsel %vm13596_vm5, %v1382_v39, %v1917_v15 }
  0xe3   : > { %v13907_v31 = vsel %vm9559_vm15, 4294967295, %v13906_v31  ;;  %v1704_v40 = vsel %vm13593_vm4, %v1661_v38, %v1662_v21  ;;  %v13917_v20 = vmov 0  ;;  %v393_v33 = vadd.s32 440, %v8643_v3 }
  0xe4   : > { %2389 = vmatmul.mubr.bf16.gmra.mxu0 %v1987_v36  ;;  %v1379_v36 = vpack.c.bf16 %v13900_v44, %v13899_v58  ;;  %13908 = vst [vmem:[#allocation7_spill] sm:$0xff] %v13907_v31  ;;  %v385_v44 = vadd.s32 376, %v8643_v3 }
  0xe5   : > { %7538 = vmatprep.mubr.msk.bf16.mxu0 %vm13596_vm5, %v1824_v7  ;;  %v1911_v7 = vpop.permute.xlu1 %1910 }
  0xe6   : > { %v735_v63 = vand.u32 63, %v385_v44 }
  0xe8   : > { %vm9606_vm1 = vcmp.ne.s32.totalorder %v735_v63, 63 }
  0xe9   : > { %v13918_v20 = vsel %vm9606_vm1, 4294967295, %v13917_v20 }
  0xea   : > { %13919 = vst [vmem:[#allocation8_spill] sm:$0xff] %v13918_v20 }
  0xec   : > { %2397 = vmatmul.mubr.bf16.gmra.mxu0 %v1991_v48  ;;  %v1659_v48 = vrot.slane %v13905_v45, 1  ;;  %v13921_v45 = vld [vmem:[#allocation32_spill] sm:$0xff] }
  0xed   : > { %7539 = vmatprep.mubr.msk.bf16.mxu0 %vm13596_vm5, %v1825_v16  ;;  %v2011_v16 = vsel %vm13596_vm5, %v1379_v36, %v1911_v7  ;;  %v1921_v36 = vpop.permute.xlu0 %1920 }
  0xee   : > { %v1707_v4 = vsel %vm13593_vm4, %v1658_v5, %v1659_v48  ;;  %v1706_v60 = vsel %vm13593_vm4, %v1659_v48, %v1660_v18  ;;  %v1668_v5 = vrot.slane %v13920_v61, 1  ;;  %v1669_v48 = vrot.slane %v13921_v45, 1 }
  0xef   : > { %v1787_v59 = vsel %vm9559_vm15, %v1707_v4, 0.0 }
  0xf0   : > { %v1831_v14 = vpack.c.bf16 %v1787_v59, %v1708_v53  ;;  %v1697_v4 = vsel %vm13593_vm4, %v1668_v5, %v1669_v48  ;;  %v13922_v59 = vld [vmem:[#allocation33_spill] sm:$0xff] }
  0xf4   : > { %2405 = vmatmul.mubr.bf16.gmra.mxu0 %v1995_v23  ;;  %v1915_v23 = vpop.permute.xlu1 %1914 }
  0xf5   : > { %7540 = vmatprep.mubr.msk.bf16.mxu0 %vm13596_vm5, %v1826_v24  ;;  %v1705_v24 = vsel %vm13593_vm4, %v1660_v18, %v1661_v38  ;;  %v2019_v6 = vsel %vm13596_vm5, %v1381_v2, %v1915_v23  ;;  %v1925_v18 = vpop.permute.xlu0 %1924 }
  0xf6   : > { %v1832_v32 = vpack.c.bf16 %v1705_v24, %v1706_v60  ;;  %v13923_v24 = vld [vmem:[#allocation35_spill] sm:$0xff] }
  0xf7   : > { %v1672_v60 = vrot.slane %v13923_v24, 1  ;;  %v1388_v63 = vpack.c.bf16 %v13923_v24, %v9313_v27 }
  0xf8   : > { %v1919_v62 = vpop.permute.xlu1 %1918 }
  0xf9   : > { %v2027_v22 = vsel %vm13596_vm5, %v1383_v56, %v1919_v62  ;;  %v13927_v62 = vmov 0 }
  0xfc   : > { %2413 = vmatmul.mubr.bf16.gmra.mxu0 %v1999_v51  ;;  %v13912_v51 = vld [vmem:[#allocation25_spill] sm:$0xff] }
  0xfd   : > { %7541 = vmatprep.mubr.msk.bf16.mxu0 %vm13596_vm5, %v1827_v34  ;;  %v1663_v34 = vrot.slane %v13912_v51, 1  ;;  %v1384_v28 = vpack.c.bf16 %v13913_v35, %v13912_v51  ;;  %v1387_v51 = vpack.c.bf16 %v13922_v59, %v13921_v45  ;;  %v13926_v35 = vld [vmem:[#allocation38_spill] sm:$0xff] }
  0xff   : > { %v1703_v58 = vsel %vm13593_vm4, %v1662_v21, %v1663_v34  ;;  %v1702_v54 = vsel %vm13593_vm4, %v1663_v34, %v1664_v49  ;;  %v2031_v30 = vsel %vm13596_vm5, %v1384_v28, %v1921_v36  ;;  %v13930_v36 = vld [vmem:[#allocation39_spill] sm:$0xff] }
 0x100   : > { %v1833_v41 = vpack.c.bf16 %v1703_v58, %v1704_v40  ;;  %v791_v40 = vand.u32 63, %v393_v33 }
 0x102   : > { %vm9657_vm3 = vcmp.ne.s32.totalorder %v791_v40, 63  ;;  %v8276_v40 = vld [vmem:[%s13493_s3 + $0x18] sm:$0xff]  }
 0x103   : > { %v13928_v62 = vsel %vm9657_vm3, 4294967295, %v13927_v62 }
 0x104   : > { %2421 = vmatmul.mubr.bf16.gmra.mxu0 %v2003_v46  ;;  %v13914_v46 = vld [vmem:[#allocation27_spill] sm:$0xff]  ;;  %13929 = vst [vmem:[#allocation9_spill] sm:$0xff] %v13928_v62 }
 0x105   : > { %7542 = vmatprep.mubr.msk.bf16.mxu0 %vm13596_vm5, %v1828_v47  ;;  %v1665_v47 = vrot.slane %v13914_v46, 1 }
 0x107   : > { %v1701_v9 = vsel %vm13593_vm4, %v1664_v49, %v1665_v47  ;;  %v1700_v7 = vsel %vm13593_vm4, %v1665_v47, %v1666_v55  ;;  %v1675_v49 = vrot.slane %v13926_v35, 1 }
 0x108   : > { %v1834_v26 = vpack.c.bf16 %v1701_v9, %v1702_v54 }
 0x10c   : > { %2429 = vmatmul.mubr.bf16.gmra.mxu0 %v2007_v42  ;;  %v13916_v42 = vld [vmem:[#allocation29_spill] sm:$0xff] }
 0x10d   : > { %7543 = vmatprep.mubr.msk.bf16.mxu0 %vm13596_vm5, %v1829_v37  ;;  %v1667_v37 = vrot.slane %v13916_v42, 1  ;;  %v1386_v17 = vpack.c.bf16 %v13920_v61, %v13916_v42 }
 0x10f   : > { %v1699_v52 = vsel %vm13593_vm4, %v1666_v55, %v1667_v37  ;;  %v1698_v25 = vsel %vm13593_vm4, %v1667_v37, %v1668_v5  ;;  %v2039_v2 = vsel %vm13596_vm5, %v1386_v17, %v1925_v18  ;;  %v1929_v55 = vpop.permute.xlu0 %1928  ;;  %v1679_v17 = vrot.slane %v9372_v43, 1  ;;  %v8274_v18 = vld [vmem:[%s13493_s3 + $0x28] sm:$0xff]  }
 0x110   : > { %v1795_v50 = vsel %vm9606_vm1, %v1699_v52, 0.0  ;;  %v1836_v53 = vpack.c.bf16 %v1697_v4, %v1698_v25  ;;  %v8273_v4 = vld [vmem:[%s13493_s3 + $0x30] sm:$0xff]  }
 0x111   : > { %v1835_v10 = vpack.c.bf16 %v1795_v50, %v1700_v7  ;;  %v1676_v7 = vrot.slane %v13930_v36, 1  ;;  %v13931_v50 = vld [vmem:[#allocation41_spill] sm:$0xff] }
 0x114   : > { %2437 = vmatmul.mubr.bf16.gmra.mxu0 %v2011_v16  ;;  %v1385_v16 = vpack.c.bf16 %v13915_v0, %v13914_v46 }
 0x115   : > { %7544 = vmatprep.mubr.msk.bf16.mxu0 %vm13596_vm5, %v1830_v12  ;;  %v1923_v12 = vpop.permute.xlu1 %1922 }
 0x116   : > { %v2035_v13 = vsel %vm13596_vm5, %v1385_v16, %v1923_v12  ;;  %v1690_v16 = vsel %vm13593_vm4, %v1675_v49, %v1676_v7  ;;  %v13932_v12 = vmov 0  }
 0x119   : > { %v1927_v39 = vpop.permute.xlu1 %1926 }
 0x11a   : > { %v2043_v47 = vsel %vm13596_vm5, %v1387_v51, %v1927_v39  ;;  %v13934_v39 = vld [vmem:[#allocation43_spill] sm:$0xff] }
 0x11c   : > { %2445 = vmatmul.mubr.bf16.gmra.mxu0 %v2015_v1  ;;  %v1670_v1 = vrot.slane %v13922_v59, 1 }
 0x11d   : > { %7545 = vmatprep.mubr.msk.bf16.mxu0 %vm13596_vm5, %v1831_v14  ;;  %v1671_v14 = vrot.slane %v9313_v27, 1  ;;  %v8272_v27 = vld [vmem:[%s13493_s3 + $0x38] sm:$0xff]   ;;  %v1931_v45 = vpop.permute.xlu1 %1930 }
 0x11e   : > { %v1696_v38 = vsel %vm13593_vm4, %v1669_v48, %v1670_v1  ;;  %7767 = vmatpush1.bf16.msra.mxu1 %v8272_v27  ;;  %3717 = vmatpush1.bf16.msra.mxu0 %v8272_v27 }
 0x11f   : > { %v1695_v19 = vsel %vm13593_vm4, %v1670_v1, %v1671_v14  ;;  %v1694_v58 = vsel %vm13593_vm4, %v1671_v14, %v1672_v60  ;;  %7752 = vmatprep.subr.bf16.mxu1 %v13932_v12  ;;  %3718 = vmatprep.subr.bf16.mxu0 %v13932_v12  ;;  %v13933_v1 = vld [vmem:[#allocation42_spill] sm:$0xff] }
 0x120   : > { %v1837_v23 = vpack.c.bf16 %v1695_v19, %v1696_v38  ;;  %v1678_v14 = vrot.slane %v13933_v1, 1  ;;  %v1390_v38 = vpack.c.bf16 %v13930_v36, %v13926_v35  ;;  %v1391_v35 = vpack.c.bf16 %v13933_v1, %v13931_v50 }
 0x121   : > { %v13935_v36 = vmov 0 }
 0x122   : > { %7768 = vmatpush1.bf16.msra.mxu1 %v8273_v4  ;;  %3719 = vmatpush1.bf16.msra.mxu0 %v8273_v4  ;;  %v1687_v24 = vsel %vm13593_vm4, %v1678_v14, %v1679_v17  ;;  %v8279_v4 = vld [vmem:[%s13493_s3] sm:$0xff]  }
 0x123   : > { %7753 = vmatprep.subr.bf16.mxu1 %v13932_v12  ;;  %3720 = vmatprep.subr.bf16.mxu0 %v13932_v12 }
 0x124   : > { %2453 = vmatmul.mubr.bf16.gmra.mxu0 %v2019_v6  ;;  %v13924_v6 = vld [vmem:[#allocation36_spill] sm:$0xff] }
 0x125   : > { %7546 = vmatprep.mubr.msk.bf16.mxu0 %vm13596_vm5, %v1832_v32  ;;  %v1673_v32 = vrot.slane %v13924_v6, 1 }
 0x126   : > { %7769 = vmatpush1.bf16.msra.mxu1 %v8274_v18  ;;  %3721 = vmatpush1.bf16.msra.mxu0 %v8274_v18 }
 0x127   : > { %v1693_v15 = vsel %vm13593_vm4, %v1672_v60, %v1673_v32  ;;  %7754 = vmatprep.subr.bf16.mxu1 %v13932_v12  ;;  %3722 = vmatprep.subr.bf16.mxu0 %v13932_v12 }
 0x128   : > { %v1838_v44 = vpack.c.bf16 %v1693_v15, %v1694_v58  ;;  %v1680_v15 = vrot.slane %v13934_v39, 1  ;;  %v1681_v58 = vrot.slane %v9385_v8, 1 }
 0x12c   : > { %2461 = vmatmul.mubr.bf16.gmra.mxu0 %v2023_v29  ;;  %v13925_v29 = vld [vmem:[#allocation37_spill] sm:$0xff] }
 0x12d   : > { %7547 = vmatprep.mubr.msk.bf16.mxu0 %vm13596_vm5, %v1833_v41  ;;  %v1674_v41 = vrot.slane %v13925_v29, 1  ;;  %v1389_v61 = vpack.c.bf16 %v13925_v29, %v13924_v6  ;;  %v8275_v6 = vld [vmem:[%s13493_s3 + $0x20] sm:$0xff]   ;;  %v401_v29 = vadd.s32 504, %v8643_v3 }
 0x12e   : > { %7770 = vmatpush1.bf16.msra.mxu1 %v8275_v6  ;;  %3723 = vmatpush1.bf16.msra.mxu0 %v8275_v6 }
 0x12f   : > { %v1691_v9 = vsel %vm13593_vm4, %v1674_v41, %v1675_v49  ;;  %v1692_v42 = vsel %vm13593_vm4, %v1673_v32, %v1674_v41  ;;  %7755 = vmatprep.subr.bf16.mxu1 %v13932_v12  ;;  %3724 = vmatprep.subr.bf16.mxu0 %v13932_v12 }
 0x130   : > { %v1803_v37 = vsel %vm9657_vm3, %v1691_v9, 0.0  ;;  %v8277_v9 = vld [vmem:[%s13493_s3 + $0x10] sm:$0xff]  }
 0x131   : > { %v1839_v52 = vpack.c.bf16 %v1803_v37, %v1692_v42 }
 0x132   : > { %7771 = vmatpush1.bf16.msra.mxu1 %v8276_v40  ;;  %3725 = vmatpush1.bf16.msra.mxu0 %v8276_v40 }
 0x133   : > { %7756 = vmatprep.subr.bf16.mxu1 %v13932_v12  ;;  %3726 = vmatprep.subr.bf16.mxu0 %v13932_v12 }
 0x134   : > { %2469 = vmatmul.mubr.bf16.gmra.mxu0 %v2027_v22 }
 0x135   : > { %7548 = vmatprep.mubr.msk.bf16.mxu0 %vm13596_vm5, %v1834_v26  ;;  %v2047_v26 = vsel %vm13596_vm5, %v1388_v63, %v1929_v55  ;;  %v9743_v63 = vld [vmem:[%s8662_s19 + $0x1f8] sm:$0xff]  ;;  %v847_v55 = vand.u32 63, %v401_v29 }
 0x136   : > { %7772 = vmatpush1.bf16.msra.mxu1 %v8277_v9  ;;  %3727 = vmatpush1.bf16.msra.mxu0 %v8277_v9 }
 0x137   : > { %7757 = vmatprep.subr.bf16.mxu1 %v13932_v12  ;;  %3728 = vmatprep.subr.bf16.mxu0 %v13932_v12 }
 0x13c   : > { %2477 = vmatmul.mubr.bf16.gmra.mxu0 %v2031_v30  ;;  %v1677_v30 = vrot.slane %v13931_v50, 1 }
 0x13d   : > { %7549 = vmatprep.mubr.msk.bf16.mxu0 %vm13596_vm5, %v1835_v10 }
 0x13e   : > { %v1689_v48 = vsel %vm13593_vm4, %v1676_v7, %v1677_v30  ;;  %v1688_v60 = vsel %vm13593_vm4, %v1677_v30, %v1678_v14  ;;  %v13938_v7 = vrot.slane %v8672_v11, 1  ;;  %v9766_v30 = vld [vmem:[%s13492_s2] ss:$0 sm:$0xff] }
 0x13f   : > { %v1841_v51 = vpack.c.bf16 %v1687_v24, %v1688_v60 }
 0x144   : > { %2485 = vmatmul.mubr.bf16.gmra.mxu0 %v2035_v13  ;;  %v2051_v13 = vsel %vm13596_vm5, %v1389_v61, %v1931_v45 }
 0x145   : > { %7550 = vmatprep.mubr.msk.bf16.mxu0 %vm13596_vm5, %v1836_v53  ;;  %v1840_v53 = vpack.c.bf16 %v1689_v48, %v1690_v16 }
 0x14c   : > { %v9643_v21 = vpop.f32.mrf.mxu0  ;;  %2493 = vmatmul.mubr.bf16.gmra.mxu0 %v2039_v2 }
 0x14d   : > { %7551 = vmatprep.mubr.msk.bf16.mxu0 %vm13596_vm5, %v1837_v23  ;;  %v1933_v23 = vpop.permute.xlu0 %1932 }
 0x14e   : > { %v2304_v34 = vpop.f32.mrf.mxu0  ;;  %v2055_v33 = vsel %vm13596_vm5, %v1390_v38, %v1933_v23  ;;  %v1393_v23 = vpack.c.bf16 %v9743_v63, %v9385_v8  ;;  %v8281_v8 = vld [vmem:[%s13493_s3 + $0x70] sm:$0xff]  }
 0x150   : > { %v9654_v46 = vpop.f32.mrf.mxu0 }
 0x151   : > { %v1937_v45 = vpop.permute.xlu0 %1936 }
 0x152   : > { %v2307_v56 = vpop.f32.mrf.mxu0 }
 0x153   : > { %v1686_v56 = vsel %vm13593_vm4, %v1679_v17, %v1680_v15  ;;  %v8280_v17 = vld [vmem:[%s13493_s3 + $0x78] sm:$0xff]  }
 0x154   : > { %v9663_v54 = vpop.f32.mrf.mxu0  ;;  %2501 = vmatmul.mubr.bf16.gmra.mxu0 %v2043_v47  ;;  %v1935_v47 = vpop.permute.xlu1 %1934 }
 0x155   : > { %7552 = vmatprep.mubr.msk.bf16.mxu0 %vm13596_vm5, %v1838_v44  ;;  %v1685_v44 = vsel %vm13593_vm4, %v1680_v15, %v1681_v58  ;;  %v2059_v37 = vsel %vm13596_vm5, %v1391_v35, %v1935_v47  ;;  %vm9754_vm4 = vcmp.ne.s32.totalorder %v847_v55, 63  ;;  %v8282_v47 = vld [vmem:[%s13493_s3 + $0x68] sm:$0xff]  }
 0x156   : > { %v2312_v0 = vpop.f32.mrf.mxu0  ;;  %v13936_v36 = vsel %vm9754_vm4, 4294967295, %v13935_v36 }
 0x157   : > { %v1682_v0 = vrot.slane %v9743_v63, 1  ;;  %13937 = vst [vmem:[#allocation10_spill] sm:$0xff] %v13936_v36 }
 0x158   : > { %v9672_v22 = vpop.f32.mrf.mxu0 }
 0x159   : > { %v1747_v50 = vsel %vm13939_vm2, %v1682_v0, %v13938_v7  ;;  %v1684_v48 = vsel %vm13939_vm2, %v1681_v58, %v1682_v0 }
 0x15a   : > { %v2315_v28 = vpop.f32.mrf.mxu0  ;;  %v1811_v16 = vsel %vm9754_vm4, %v1747_v50, 0.0 }
 0x15b   : > { %v8278_v28 = vld [vmem:[%s13493_s3 + $0x8] sm:$0xff]   ;;  %v1843_v1 = vpack.c.bf16 %v1811_v16, %v1684_v48 }
 0x15c   : > { %v9680_v10 = vpop.f32.mrf.mxu0  ;;  %2509 = vmatmul.mubr.bf16.gmra.mxu0 %v2047_v26  ;;  %v1842_v26 = vpack.c.bf16 %v1685_v44, %v1686_v56  ;;  %7773 = vmatpush1.bf16.msra.mxu1 %v8278_v28 }
 0x15d   : > { %7553 = vmatprep.mubr.msk.bf16.mxu0 %vm13596_vm5, %v1839_v52  ;;  %7758 = vmatprep.subr.bf16.mxu1 %v13932_v12 }
 0x15e   : > { %v2320_v5 = vpop.f32.mrf.mxu0  ;;  %3729 = vmatpush1.bf16.msra.mxu0 %v8278_v28  ;;  %v8283_v28 = vld [vmem:[%s13493_s3 + $0x60] sm:$0xff]  }
 0x15f   : > { %v1392_v5 = vpack.c.bf16 %v13934_v39, %v9372_v43  ;;  %3730 = vmatprep.subr.bf16.mxu0 %v13932_v12 }
 0x160   : > { %v9694_v25 = vpop.f32.mrf.mxu0  ;;  %7774 = vmatpush1.bf16.msra.mxu1 %v8279_v4 }
 0x161   : > { %7759 = vmatprep.subr.bf16.mxu1 %v13932_v12 }
 0x162   : > { %v2323_v59 = vpop.f32.mrf.mxu0  ;;  %3731 = vmatpush1.bf16.msra.mxu0 %v8279_v4 }
 0x163   : > { %v2063_v59 = vsel %vm13596_vm5, %v1392_v5, %v1937_v45  ;;  %3732 = vmatprep.subr.bf16.mxu0 %v13932_v12  ;;  %v8284_v45 = vld [vmem:[%s13493_s3 + $0x58] sm:$0xff]  }
 0x164   : > { %v9704_v19 = vpop.f32.mrf.mxu0  ;;  %2517 = vmatmul.mubr.bf16.gmra.mxu0 %v2051_v13  ;;  %7775 = vmatpush2.bf16.msra.mxu1 %v8280_v17 }
 0x165   : > { %7554 = vmatprep.mubr.msk.bf16.mxu0 %vm13596_vm5, %v1840_v53  ;;  %7760 = vmatprep.subr.bf16.mxu1 %v13932_v12 }
 0x166   : > { %v2328_v2 = vpop.f32.mrf.mxu0  ;;  %3733 = vmatpush2.bf16.msra.mxu0 %v8280_v17 }
 0x167   : > { %3734 = vmatprep.subr.bf16.mxu0 %v13932_v12 }
 0x168   : > { %v9718_v32 = vpop.f32.mrf.mxu0  ;;  %7776 = vmatpush2.bf16.msra.mxu1 %v8281_v8 }
 0x169   : > { %7761 = vmatprep.subr.bf16.mxu1 %v13932_v12 }
 0x16a   : > { %v2331_v34 = vpop.f32.mrf.mxu0  ;;  %3735 = vmatpush2.bf16.msra.mxu0 %v8281_v8 }
 0x16b   : > { %v1939_v34 = vpop.permute.xlu1 %1938  ;;  %3736 = vmatprep.subr.bf16.mxu0 %v13932_v12 }
 0x16c   : > { %v9729_v41 = vpop.f32.mrf.mxu0  ;;  %2525 = vmatmul.mubr.bf16.gmra.mxu0 %v2055_v33  ;;  %v2067_v35 = vsel %vm13596_vm5, %v1393_v23, %v1939_v34  ;;  %7777 = vmatpush2.bf16.msra.mxu1 %v8282_v47 }
 0x16d   : > { %7555 = vmatprep.mubr.msk.bf16.mxu0 %vm13596_vm5, %v1841_v51  ;;  %7762 = vmatprep.subr.bf16.mxu1 %v13932_v12 }
 0x16e   : > { %v2336_v49 = vpop.f32.mrf.mxu0  ;;  %3737 = vmatpush2.bf16.msra.mxu0 %v8282_v47 }
 0x16f   : > { %3738 = vmatprep.subr.bf16.mxu0 %v13932_v12 }
 0x170   : > { %v9747_v42 = vpop.f32.mrf.mxu0  ;;  %7778 = vmatpush2.bf16.msra.mxu1 %v8283_v28 }
 0x171   : > { %7763 = vmatprep.subr.bf16.mxu1 %v13932_v12 }
 0x172   : > { %v2339_v52 = vpop.f32.mrf.mxu0  ;;  %3739 = vmatpush2.bf16.msra.mxu0 %v8283_v28 }
 0x173   : > { %3740 = vmatprep.subr.bf16.mxu0 %v13932_v12 }
 0x174   : > { %v2342_v27 = vpop.f32.mrf.mxu0  ;;  %2533 = vmatmul.mubr.bf16.gmra.mxu0 %v2059_v37  ;;  %7779 = vmatpush2.bf16.msra.mxu1 %v8284_v45 }
 0x175   : > { %v2343_v61 = vadd.f32 %v9766_v30, %v2342_v27  ;;  %7556 = vmatprep.mubr.msk.bf16.mxu0 %vm13596_vm5, %v1842_v26  ;;  %7764 = vmatprep.subr.bf16.mxu1 %v13932_v12 }
 0x176   : > { %v2344_v11 = vpop.f32.mrf.mxu0  ;;  %3741 = vmatpush2.bf16.msra.mxu0 %v8284_v45 }
 0x177   : > { %v9781_v43 = vmax.f32 %v2343_v61, 0.0  ;;  %3742 = vmatprep.subr.bf16.mxu0 %v13932_v12 }
 0x178   : > { %v2345_v13 = vpop.f32.mrf.mxu0 }
 0x179   : > { %v2346_v53 = vadd.f32 %v9766_v30, %v2345_v13  ;;  %v13597_v38 = vrot.slane %v9781_v43, 1 }
 0x17a   : > { %v2347_v14 = vpop.f32.mrf.mxu0 }
 0x17b   : > { %v9789_v18 = vmax.f32 %v2346_v53, 0.0 }
 0x17c   : > { %v2350_v2 = vpop.f32.mrf.mxu0  ;;  %2541 = vmatmul.mubr.bf16.gmra.mxu0 %v2063_v59 }
 0x17d   : > { %13940 = vst [vmem:[#allocation11_spill] sm:$0xff] %v9789_v18  ;;  %v3144_v60 = vrot.slane %v9789_v18, 1  ;;  %v2351_v6 = vadd.f32 %v9766_v30, %v2350_v2  ;;  %7557 = vmatprep.mubr.msk.bf16.mxu0 %vm13596_vm5, %v1843_v1  ;;  %v8285_v2 = vld [vmem:[%s13493_s3 + $0x50] sm:$0xff]   ;;  %vm13948_vm5 = vmmov %vm13939_vm2 }
 0x17e   : > { %v2352_v51 = vpop.f32.mrf.mxu0  ;;  %7780 = vmatpush2.bf16.msra.mxu1 %v8285_v2  ;;  %3743 = vmatpush2.bf16.msra.mxu0 %v8285_v2 }
 0x17f   : > { %v9806_v39 = vmax.f32 %v2351_v6, 0.0  ;;  %v9812_v15 = vsel %vm13939_vm2, %v13597_v38, %v3144_v60  ;;  %7765 = vmatprep.subr.bf16.mxu1 %v13932_v12  ;;  %3744 = vmatprep.subr.bf16.mxu0 %v13932_v12 }
 0x180   : > { %v2353_v58 = vpop.f32.mrf.mxu0 }
 0x181   : > { %13941 = vst [vmem:[#allocation12_spill] sm:$0xff] %v9806_v39  ;;  %v3145_v40 = vrot.slane %v9806_v39, 1  ;;  %v2354_v29 = vadd.f32 %v9766_v30, %v2353_v58  ;;  %v8286_v58 = vld [vmem:[%s13493_s3 + $0x48] sm:$0xff]  }
 0x182   : > { %v2355_v49 = vpop.f32.mrf.mxu0  ;;  %7781 = vmatpush2.bf16.msra.mxu1 %v8286_v58  ;;  %3745 = vmatpush2.bf16.msra.mxu0 %v8286_v58 }
 0x183   : > { %v9822_v44 = vmax.f32 %v2354_v29, 0.0  ;;  %v9826_v56 = vsel %vm13939_vm2, %v3144_v60, %v3145_v40  ;;  %7766 = vmatprep.subr.bf16.mxu1 %v13932_v12  ;;  %3746 = vmatprep.subr.bf16.mxu0 %v13932_v12 }
 0x184   : > { %v2358_v9 = vpop.f32.mrf.mxu0  ;;  %2549 = vmatmul.mubr.bf16.gmra.mxu0 %v2067_v35 }
 0x185   : > { %13942 = vst [vmem:[#allocation14_spill] sm:$0xff] %v9822_v44  ;;  %v3146_v55 = vrot.slane %v9822_v44, 1  ;;  %v2359_v37 = vadd.f32 %v9766_v30, %v2358_v9 }
 0x186   : > { %v2360_v52 = vpop.f32.mrf.mxu0 }
 0x187   : > { %v9841_v7 = vmax.f32 %v2359_v37, 0.0  ;;  %v9845_v50 = vsel %vm13939_vm2, %v3145_v40, %v3146_v55  ;;  %v8287_v52 = vld [vmem:[%s13493_s3 + $0x40] sm:$0xff]  }
 0x188   : > { %v2361_v27 = vpop.f32.mrf.mxu0  ;;  %7782 = vmatpush2.bf16.msra.mxu1 %v8287_v52  ;;  %3747 = vmatpush2.bf16.msra.mxu0 %v8287_v52 }
 0x189   : > { %13943 = vst [vmem:[#allocation15_spill] sm:$0xff] %v9841_v7  ;;  %v3147_v61 = vrot.slane %v9841_v7, 1  ;;  %v2362_v5 = vadd.f32 %v9766_v30, %v2361_v27  ;;  %6710 = vmatprep.subr.bf16.mxu1 %v13932_v12 }
 0x18a   : > { %v2363_v11 = vpop.f32.mrf.mxu0 }
 0x18b   : > { %v9854_v48 = vmax.f32 %v2362_v5, 0.0  ;;  %v9858_v16 = vsel %vm13939_vm2, %v3146_v55, %v3147_v61 }
 0x18c   : > { %v2366_v4 = vpop.f32.mrf.mxu0 }
 0x18d   : > { %13944 = vst [vmem:[#allocation16_spill] sm:$0xff] %v9854_v48  ;;  %v3148_v59 = vrot.slane %v9854_v48, 1  ;;  %v2367_v1 = vadd.f32 %v9766_v30, %v2366_v4 }
 0x18e   : > { %v2368_v17 = vpop.f32.mrf.mxu0 }
 0x18f   : > { %v9873_v23 = vmax.f32 %v2367_v1, 0.0  ;;  %v3245_v60 = vsel %vm13939_vm2, %v3147_v61, %v3148_v59 }
 0x190   : > { %v2369_v6 = vpop.f32.mrf.mxu0 }
 0x191   : > { %13945 = vst [vmem:[#allocation17_spill] sm:$0xff] %v9873_v23  ;;  %v3149_v51 = vrot.slane %v9873_v23, 1  ;;  %v2370_v34 = vadd.f32 %v9766_v30, %v2369_v6 }
 0x192   : > { %v2371_v8 = vpop.f32.mrf.mxu0 }
 0x193   : > { %v9884_v40 = vmax.f32 %v2370_v34, 0.0  ;;  %v3244_v29 = vsel %vm13939_vm2, %v3148_v59, %v3149_v51 }
 0x194   : > { %v2374_v35 = vpop.f32.mrf.mxu0  ;;  %v3276_v47 = vsel %vm9181_vm10, %v3244_v29, 0.0  ;;  %vm13976_vm10 = vcmp.lt.s32.totalorder %v8643_v3, 1 }
 0x195   : > { %13946 = vst [vmem:[#allocation19_spill] sm:$0xff] %v9884_v40  ;;  %v2375_v9 = vadd.f32 %v9766_v30, %v2374_v35  ;;  %v9893_v55 = vpack.c.bf16 %v3276_v47, %v3245_v60  ;;  %v3150_v28 = vrot.slane %v9884_v40, 1 }
 0x196   : > { %v2376_v37 = vpop.f32.mrf.mxu0 }
 0x197   : > { %v9899_v27 = vmax.f32 %v2375_v9, 0.0  ;;  %v9916_v17 = vsel %vm13948_vm5, %v3149_v51, %v3150_v28  ;;  %vm13949_vm5 = vmmov %vm13939_vm2 }
 0x198   : > { %v2377_v61 = vpop.f32.mrf.mxu0 }
 0x199   : > { %v3151_v5 = vrot.slane %v9899_v27, 1  ;;  %v2378_v11 = vadd.f32 %v9766_v30, %v2377_v61  ;;  %v7795_v45 = vpack.i.bf16 %v9899_v27, %v9884_v40 }
 0x19a   : > { %v2379_v4 = vpop.f32.mrf.mxu0 }
 0x19b   : > { %v9907_v59 = vmax.f32 %v2378_v11, 0.0  ;;  %7796 = vrot.lane.b32.xlu0 %v7795_v45, %s8577_s24  ;;  %v9912_v1 = vsel %vm13939_vm2, %v3150_v28, %v3151_v5 }
 0x19c   : > { %v2382_v2 = vpop.f32.mrf.mxu0 }
 0x19d   : > { %v2383_v6 = vadd.f32 %v9766_v30, %v2382_v2  ;;  %2755 = vrot.lane.b32.xlu1 %v9907_v59, %s8577_s24  ;;  %v3152_v58 = vrot.slane %v9907_v59, 1 }
 0x19e   : > { %v2384_v8 = vpop.f32.mrf.mxu0 }
 0x19f   : > { %v9926_v29 = vmax.f32 %v2383_v6, 0.0  ;;  %v3241_v28 = vsel %vm13939_vm2, %v3151_v5, %v3152_v58 }
 0x1a0   : > { %v2385_v35 = vpop.f32.mrf.mxu0 }
 0x1a1   : > { %v3153_v51 = vrot.slane %v9926_v29, 1  ;;  %v2386_v47 = vadd.f32 %v9766_v30, %v2385_v35 }
 0x1a2   : > { %v2387_v9 = vpop.f32.mrf.mxu0 }
 0x1a3   : > { %v9930_v37 = vmax.f32 %v2386_v47, 0.0  ;;  %v3240_v52 = vsel %vm13949_vm5, %v3152_v58, %v3153_v51  ;;  %vm13950_vm5 = vmmov %vm13939_vm2 }
 0x1a4   : > { %v2390_v61 = vpop.f32.mrf.mxu0  ;;  %v3334_v11 = vpack.c.bf16 %v3240_v52, %v3241_v28 }
 0x1a5   : > { %v2391_v45 = vadd.f32 %v9766_v30, %v2390_v61  ;;  %v7800_v4 = vpack.i.bf16 %v9930_v37, %v9926_v29  ;;  %v3154_v8 = vrot.slane %v9930_v37, 1 }
 0x1a6   : > { %v2392_v6 = vpop.f32.mrf.mxu0  ;;  %3407 = vrot.lane.b32.xlu0 %v3334_v11, %s8577_s24 }
 0x1a7   : > { %v9943_v35 = vmax.f32 %v2391_v45, 0.0  ;;  %7801 = vrot.lane.b32.xlu1 %v7800_v4, %s8577_s24  ;;  %v3239_v61 = vsel %vm13939_vm2, %v3153_v51, %v3154_v8 }
 0x1a8   : > { %v2393_v5 = vpop.f32.mrf.mxu0 }
 0x1a9   : > { %v3155_v58 = vrot.slane %v9943_v35, 1  ;;  %v2394_v47 = vadd.f32 %v9766_v30, %v2393_v5 }
 0x1aa   : > { %v2395_v9 = vpop.f32.mrf.mxu0 }
 0x1ab   : > { %v9948_v52 = vmax.f32 %v2394_v47, 0.0  ;;  %v3238_v28 = vsel %vm13950_vm5, %v3154_v8, %v3155_v58  ;;  %vm13951_vm5 = vmmov %vm13939_vm2 }
 0x1ac   : > { %v2398_v11 = vpop.f32.mrf.mxu0  ;;  %v3335_v6 = vpack.c.bf16 %v3238_v28, %v3239_v61 }
 0x1ad   : > { %v2399_v45 = vadd.f32 %v9766_v30, %v2398_v11  ;;  %v7805_v4 = vpack.i.bf16 %v9948_v52, %v9943_v35  ;;  %v3156_v9 = vrot.slane %v9948_v52, 1 }
 0x1ae   : > { %v2400_v5 = vpop.f32.mrf.mxu0  ;;  %3409 = vrot.lane.b32.xlu0 %v3335_v6, %s8577_s24 }
 0x1af   : > { %v9960_v47 = vmax.f32 %v2399_v45, 0.0  ;;  %7806 = vrot.lane.b32.xlu1 %v7805_v4, %s8577_s24  ;;  %v3237_v6 = vsel %vm13939_vm2, %v3155_v58, %v3156_v9 }
 0x1b0   : > { %v2401_v51 = vpop.f32.mrf.mxu0 }
 0x1b1   : > { %v3157_v8 = vrot.slane %v9960_v47, 1  ;;  %v2402_v28 = vadd.f32 %v9766_v30, %v2401_v51 }
 0x1b2   : > { %v2403_v61 = vpop.f32.mrf.mxu0 }
 0x1b3   : > { %v9966_v11 = vmax.f32 %v2402_v28, 0.0  ;;  %v3236_v0 = vsel %vm13951_vm5, %v3156_v9, %v3157_v8  ;;  %vm13953_vm5 = vmmov %vm13939_vm2 }
 0x1b4   : > { %v2406_v5 = vpop.f32.mrf.mxu0  ;;  %v3284_v4 = vsel %vm9303_vm12, %v3236_v0, 0.0 }
 0x1b5   : > { %v2407_v24 = vadd.f32 %v9766_v30, %v2406_v5  ;;  %v7810_v14 = vpack.i.bf16 %v9966_v11, %v9960_v47  ;;  %v3336_v26 = vpack.c.bf16 %v3284_v4, %v3237_v6  ;;  %v3158_v61 = vrot.slane %v9966_v11, 1 }
 0x1b6   : > { %v2408_v51 = vpop.f32.mrf.mxu0 }
 0x1b7   : > { %v9980_v33 = vmax.f32 %v2407_v24, 0.0  ;;  %7811 = vrot.lane.b32.xlu1 %v7810_v14, %s8577_s24  ;;  %3411 = vrot.lane.b32.xlu0 %v3336_v26, %s8577_s24  ;;  %v3235_v4 = vsel %vm13939_vm2, %v3157_v8, %v3158_v61 }
 0x1b8   : > { %v2409_v58 = vpop.f32.mrf.mxu0 }
 0x1b9   : > { %v3159_v0 = vrot.slane %v9980_v33, 1  ;;  %v2410_v9 = vadd.f32 %v9766_v30, %v2409_v58 }
 0x1ba   : > { %v2411_v5 = vpop.f32.mrf.mxu0 }
 0x1bb   : > { %v9986_v60 = vmax.f32 %v2410_v9, 0.0  ;;  %v3234_v6 = vsel %vm13953_vm5, %v3158_v61, %v3159_v0  ;;  %vm13954_vm5 = vmmov %vm13939_vm2 }
 0x1bc   : > { %v2414_v24 = vpop.f32.mrf.mxu0  ;;  %v3337_v51 = vpack.c.bf16 %v3234_v6, %v3235_v4 }
 0x1bd   : > { %v2415_v14 = vadd.f32 %v9766_v30, %v2414_v24  ;;  %v7815_v26 = vpack.i.bf16 %v9986_v60, %v9980_v33  ;;  %v3160_v9 = vrot.slane %v9986_v60, 1 }
 0x1be   : > { %v2416_v58 = vpop.f32.mrf.mxu0  ;;  %3413 = vrot.lane.b32.xlu0 %v3337_v51, %s8577_s24 }
 0x1bf   : > { %v9999_v5 = vmax.f32 %v2415_v14, 0.0  ;;  %7816 = vrot.lane.b32.xlu1 %v7815_v26, %s8577_s24  ;;  %v3233_v51 = vsel %vm13939_vm2, %v3159_v0, %v3160_v9 }
 0x1c0   : > { %v2417_v8 = vpop.f32.mrf.mxu0 }
 0x1c1   : > { %v3161_v61 = vrot.slane %v9999_v5, 1  ;;  %v2418_v6 = vadd.f32 %v9766_v30, %v2417_v8 }
 0x1c2   : > { %v2419_v4 = vpop.f32.mrf.mxu0 }
 0x1c3   : > { %v10004_v24 = vmax.f32 %v2418_v6, 0.0  ;;  %v3232_v63 = vsel %vm13954_vm5, %v3160_v9, %v3161_v61  ;;  %vm13955_vm5 = vmmov %vm13939_vm2 }
 0x1c4   : > { %v2422_v58 = vpop.f32.mrf.mxu0  ;;  %v3338_v38 = vpack.c.bf16 %v3232_v63, %v3233_v51 }
 0x1c5   : > { %v2423_v14 = vadd.f32 %v9766_v30, %v2422_v58  ;;  %v7820_v26 = vpack.i.bf16 %v10004_v24, %v9999_v5  ;;  %v3162_v6 = vrot.slane %v10004_v24, 1 }
 0x1c6   : > { %v2424_v8 = vpop.f32.mrf.mxu0  ;;  %3415 = vrot.lane.b32.xlu0 %v3338_v38, %s8577_s24 }
 0x1c7   : > { %v10017_v4 = vmax.f32 %v2423_v14, 0.0  ;;  %7821 = vrot.lane.b32.xlu1 %v7820_v26, %s8577_s24  ;;  %v3231_v38 = vsel %vm13939_vm2, %v3161_v61, %v3162_v6 }
 0x1c8   : > { %v2425_v0 = vpop.f32.mrf.mxu0 }
 0x1c9   : > { %v3163_v63 = vrot.slane %v10017_v4, 1  ;;  %v2426_v9 = vadd.f32 %v9766_v30, %v2425_v0 }
 0x1ca   : > { %v2427_v51 = vpop.f32.mrf.mxu0 }
 0x1cb   : > { %v10022_v58 = vmax.f32 %v2426_v9, 0.0  ;;  %v3230_v13 = vsel %vm13955_vm5, %v3162_v6, %v3163_v63  ;;  %vm13956_vm5 = vmmov %vm13939_vm2 }
 0x1cc   : > { %v2430_v8 = vpop.f32.mrf.mxu0  ;;  %v3339_v28 = vpack.c.bf16 %v3230_v13, %v3231_v38 }
 0x1cd   : > { %v2431_v14 = vadd.f32 %v9766_v30, %v2430_v8  ;;  %v7825_v26 = vpack.i.bf16 %v10022_v58, %v10017_v4  ;;  %v3164_v51 = vrot.slane %v10022_v58, 1 }
 0x1ce   : > { %v2432_v0 = vpop.f32.mrf.mxu0  ;;  %3417 = vrot.lane.b32.xlu0 %v3339_v28, %s8577_s24 }
 0x1cf   : > { %v10034_v9 = vmax.f32 %v2431_v14, 0.0  ;;  %7826 = vrot.lane.b32.xlu1 %v7825_v26, %s8577_s24  ;;  %v3229_v28 = vsel %vm13939_vm2, %v3163_v63, %v3164_v51 }
 0x1d0   : > { %v2433_v61 = vpop.f32.mrf.mxu0 }
 0x1d1   : > { %v3165_v13 = vrot.slane %v10034_v9, 1  ;;  %v2434_v6 = vadd.f32 %v9766_v30, %v2433_v61 }
 0x1d2   : > { %v2435_v38 = vpop.f32.mrf.mxu0 }
 0x1d3   : > { %v10040_v8 = vmax.f32 %v2434_v6, 0.0  ;;  %v3228_v53 = vsel %vm13956_vm5, %v3164_v51, %v3165_v13  ;;  %vm13957_vm5 = vmmov %vm13939_vm2 }
 0x1d4   : > { %v2438_v0 = vpop.f32.mrf.mxu0  ;;  %v3292_v14 = vsel %vm9512_vm14, %v3228_v53, 0.0 }
 0x1d5   : > { %v2439_v26 = vadd.f32 %v9766_v30, %v2438_v0  ;;  %v7830_v2 = vpack.i.bf16 %v10040_v8, %v10034_v9  ;;  %v3340_v34 = vpack.c.bf16 %v3292_v14, %v3229_v28  ;;  %v3166_v38 = vrot.slane %v10040_v8, 1 }
 0x1d6   : > { %v2440_v61 = vpop.f32.mrf.mxu0 }
 0x1d7   : > { %v10054_v12 = vmax.f32 %v2439_v26, 0.0  ;;  %7831 = vrot.lane.b32.xlu1 %v7830_v2, %s8577_s24  ;;  %3419 = vrot.lane.b32.xlu0 %v3340_v34, %s8577_s24  ;;  %v3227_v14 = vsel %vm13939_vm2, %v3165_v13, %v3166_v38 }
 0x1d8   : > { %v2441_v63 = vpop.f32.mrf.mxu0 }
 0x1d9   : > { %v3167_v53 = vrot.slane %v10054_v12, 1  ;;  %v2442_v51 = vadd.f32 %v9766_v30, %v2441_v63 }
 0x1da   : > { %v2443_v0 = vpop.f32.mrf.mxu0 }
 0x1db   : > { %v10060_v49 = vmax.f32 %v2442_v51, 0.0  ;;  %v3226_v28 = vsel %vm13957_vm5, %v3166_v38, %v3167_v53  ;;  %vm13958_vm5 = vmmov %vm13939_vm2 }
 0x1dc   : > { %v2446_v26 = vpop.f32.mrf.mxu0  ;;  %v3341_v61 = vpack.c.bf16 %v3226_v28, %v3227_v14 }
 0x1dd   : > { %v2447_v2 = vadd.f32 %v9766_v30, %v2446_v26  ;;  %v7835_v34 = vpack.i.bf16 %v10060_v49, %v10054_v12  ;;  %v3168_v51 = vrot.slane %v10060_v49, 1 }
 0x1de   : > { %v2448_v63 = vpop.f32.mrf.mxu0  ;;  %3421 = vrot.lane.b32.xlu0 %v3341_v61, %s8577_s24 }
 0x1df   : > { %v10073_v0 = vmax.f32 %v2447_v2, 0.0  ;;  %7836 = vrot.lane.b32.xlu1 %v7835_v34, %s8577_s24  ;;  %v3225_v61 = vsel %vm13939_vm2, %v3167_v53, %v3168_v51 }
 0x1e0   : > { %v2449_v13 = vpop.f32.mrf.mxu0 }
 0x1e1   : > { %v3169_v38 = vrot.slane %v10073_v0, 1  ;;  %v2450_v28 = vadd.f32 %v9766_v30, %v2449_v13 }
 0x1e2   : > { %v2451_v14 = vpop.f32.mrf.mxu0 }
 0x1e3   : > { %v10078_v26 = vmax.f32 %v2450_v28, 0.0  ;;  %v3224_v6 = vsel %vm13958_vm5, %v3168_v51, %v3169_v38  ;;  %vm13959_vm5 = vmmov %vm13939_vm2 }
 0x1e4   : > { %v2454_v63 = vpop.f32.mrf.mxu0  ;;  %v3342_v57 = vpack.c.bf16 %v3224_v6, %v3225_v61 }
 0x1e5   : > { %v2455_v2 = vadd.f32 %v9766_v30, %v2454_v63  ;;  %v7840_v34 = vpack.i.bf16 %v10078_v26, %v10073_v0  ;;  %v3170_v28 = vrot.slane %v10078_v26, 1 }
 0x1e6   : > { %v2456_v13 = vpop.f32.mrf.mxu0  ;;  %3423 = vrot.lane.b32.xlu0 %v3342_v57, %s8577_s24 }
 0x1e7   : > { %v10091_v14 = vmax.f32 %v2455_v2, 0.0  ;;  %7841 = vrot.lane.b32.xlu1 %v7840_v34, %s8577_s24  ;;  %v3223_v57 = vsel %vm13939_vm2, %v3169_v38, %v3170_v28 }
 0x1e8   : > { %v2457_v53 = vpop.f32.mrf.mxu0 }
 0x1e9   : > { %v3171_v6 = vrot.slane %v10091_v14, 1  ;;  %v2458_v51 = vadd.f32 %v9766_v30, %v2457_v53 }
 0x1ea   : > { %v2459_v61 = vpop.f32.mrf.mxu0 }
 0x1eb   : > { %v10096_v63 = vmax.f32 %v2458_v51, 0.0  ;;  %v3222_v40 = vsel %vm13959_vm5, %v3170_v28, %v3171_v6  ;;  %vm13962_vm5 = vmmov %vm13939_vm2 }
 0x1ec   : > { %v2462_v13 = vpop.f32.mrf.mxu0  ;;  %v3343_v45 = vpack.c.bf16 %v3222_v40, %v3223_v57 }
 0x1ed   : > { %v2463_v2 = vadd.f32 %v9766_v30, %v2462_v13  ;;  %v7845_v34 = vpack.i.bf16 %v10096_v63, %v10091_v14  ;;  %v3172_v61 = vrot.slane %v10096_v63, 1 }
 0x1ee   : > { %v2464_v53 = vpop.f32.mrf.mxu0  ;;  %3425 = vrot.lane.b32.xlu0 %v3343_v45, %s8577_s24 }
 0x1ef   : > { %v10108_v51 = vmax.f32 %v2463_v2, 0.0  ;;  %7846 = vrot.lane.b32.xlu1 %v7845_v34, %s8577_s24  ;;  %v3221_v45 = vsel %vm13939_vm2, %v3171_v6, %v3172_v61 }
 0x1f0   : > { %v2465_v38 = vpop.f32.mrf.mxu0 }
 0x1f1   : > { %13960 = vst [vmem:[#allocation20_spill] sm:$0xff] %v10108_v51  ;;  %v3173_v40 = vrot.slane %v10108_v51, 1  ;;  %v2466_v28 = vadd.f32 %v9766_v30, %v2465_v38 }
 0x1f2   : > { %v2467_v57 = vpop.f32.mrf.mxu0 }
 0x1f3   : > { %v10114_v13 = vmax.f32 %v2466_v28, 0.0  ;;  %v3220_v23 = vsel %vm13962_vm5, %v3172_v61, %v3173_v40  ;;  %vm13965_vm5 = vmmov %vm13939_vm2 }
 0x1f4   : > { %v2470_v53 = vpop.f32.mrf.mxu0  ;;  %v3300_v2 = vsel %vm9559_vm15, %v3220_v23, 0.0  ;;  %vm13977_vm15 = vmmov %vm13976_vm10 }
 0x1f5   : > { %13961 = vst [vmem:[#allocation21_spill] sm:$0xff] %v10114_v13  ;;  %v2471_v34 = vadd.f32 %v9766_v30, %v2470_v53  ;;  %v7850_v7 = vpack.i.bf16 %v10114_v13, %v10108_v51  ;;  %v3344_v48 = vpack.c.bf16 %v3300_v2, %v3221_v45  ;;  %v3174_v57 = vrot.slane %v10114_v13, 1 }
 0x1f6   : > { %v2472_v38 = vpop.f32.mrf.mxu0 }
 0x1f7   : > { %v10128_v39 = vmax.f32 %v2471_v34, 0.0  ;;  %7851 = vrot.lane.b32.xlu1 %v7850_v7, %s8577_s24  ;;  %3427 = vrot.lane.b32.xlu0 %v3344_v48, %s8577_s24  ;;  %v3219_v2 = vsel %vm13939_vm2, %v3173_v40, %v3174_v57 }
 0x1f8   : > { %v2473_v6 = vpop.f32.mrf.mxu0 }
 0x1f9   : > { %13963 = vst [vmem:[#allocation22_spill] sm:$0xff] %v10128_v39  ;;  %v3175_v23 = vrot.slane %v10128_v39, 1  ;;  %v2474_v61 = vadd.f32 %v9766_v30, %v2473_v6 }
 0x1fa   : > { %v2475_v53 = vpop.f32.mrf.mxu0 }
 0x1fb   : > { %v10134_v31 = vmax.f32 %v2474_v61, 0.0  ;;  %v3218_v45 = vsel %vm13965_vm5, %v3174_v57, %v3175_v23  ;;  %vm13968_vm5 = vmmov %vm13939_vm2 }
 0x1fc   : > { %v2478_v34 = vpop.f32.mrf.mxu0  ;;  %v3345_v38 = vpack.c.bf16 %v3218_v45, %v3219_v2 }
 0x1fd   : > { %13964 = vst [vmem:[#allocation25_spill] sm:$0xff] %v10134_v31  ;;  %v2479_v7 = vadd.f32 %v9766_v30, %v2478_v34  ;;  %v7855_v48 = vpack.i.bf16 %v10134_v31, %v10128_v39  ;;  %v3176_v61 = vrot.slane %v10134_v31, 1 }
 0x1fe   : > { %v2480_v6 = vpop.f32.mrf.mxu0  ;;  %3429 = vrot.lane.b32.xlu0 %v3345_v38, %s8577_s24 }
 0x1ff   : > { %v10147_v53 = vmax.f32 %v2479_v7, 0.0  ;;  %7856 = vrot.lane.b32.xlu1 %v7855_v48, %s8577_s24  ;;  %v3217_v38 = vsel %vm13939_vm2, %v3175_v23, %v3176_v61 }
 0x200   : > { %v2481_v40 = vpop.f32.mrf.mxu0 }
 0x201   : > { %13966 = vst [vmem:[#allocation26_spill] sm:$0xff] %v10147_v53  ;;  %v3177_v57 = vrot.slane %v10147_v53, 1  ;;  %v2482_v45 = vadd.f32 %v9766_v30, %v2481_v40 }
 0x202   : > { %v2483_v2 = vpop.f32.mrf.mxu0 }
 0x203   : > { %v10152_v34 = vmax.f32 %v2482_v45, 0.0  ;;  %v3216_v28 = vsel %vm13968_vm5, %v3176_v61, %v3177_v57  ;;  %vm13971_vm5 = vmmov %vm13939_vm2 }
 0x204   : > { %v2486_v6 = vpop.f32.mrf.mxu0  ;;  %v3346_v39 = vpack.c.bf16 %v3216_v28, %v3217_v38 }
 0x205   : > { %13967 = vst [vmem:[#allocation27_spill] sm:$0xff] %v10152_v34  ;;  %v2487_v7 = vadd.f32 %v9766_v30, %v2486_v6  ;;  %v7860_v48 = vpack.i.bf16 %v10152_v34, %v10147_v53  ;;  %v3178_v45 = vrot.slane %v10152_v34, 1 }
 0x206   : > { %v2488_v40 = vpop.f32.mrf.mxu0  ;;  %3431 = vrot.lane.b32.xlu0 %v3346_v39, %s8577_s24 }
 0x207   : > { %v10165_v2 = vmax.f32 %v2487_v7, 0.0  ;;  %7861 = vrot.lane.b32.xlu1 %v7860_v48, %s8577_s24  ;;  %v3215_v39 = vsel %vm13939_vm2, %v3177_v57, %v3178_v45 }
 0x208   : > { %v2489_v23 = vpop.f32.mrf.mxu0 }
 0x209   : > { %13969 = vst [vmem:[#allocation28_spill] sm:$0xff] %v10165_v2  ;;  %v3179_v28 = vrot.slane %v10165_v2, 1  ;;  %v2490_v61 = vadd.f32 %v9766_v30, %v2489_v23 }
 0x20a   : > { %v2491_v38 = vpop.f32.mrf.mxu0 }
 0x20b   : > { %v10170_v6 = vmax.f32 %v2490_v61, 0.0  ;;  %v3214_v31 = vsel %vm13971_vm5, %v3178_v45, %v3179_v28  ;;  %vm13975_vm5 = vmmov %vm13939_vm2 }
 0x20c   : > { %v2494_v40 = vpop.f32.mrf.mxu0  ;;  %v3347_v53 = vpack.c.bf16 %v3214_v31, %v3215_v39 }
 0x20d   : > { %13970 = vst [vmem:[#allocation29_spill] sm:$0xff] %v10170_v6  ;;  %v2495_v7 = vadd.f32 %v9766_v30, %v2494_v40  ;;  %v7797_v34 = vpop.permute.xlu0 %7796  ;;  %v7865_v48 = vpack.i.bf16 %v10170_v6, %v10165_v2  ;;  %v3180_v31 = vrot.slane %v10170_v6, 1 }
 0x20e   : > { %v7799_v38 = vunpack.i.h.bf16 %v7797_v34  ;;  %v7798_v61 = vunpack.i.l.bf16 %v7797_v34  ;;  %v2496_v44 = vpop.f32.mrf.mxu0  ;;  %3433 = vrot.lane.b32.xlu0 %v3347_v53, %s8577_s24 }
 0x20f   : > { %v10182_v18 = vmax.f32 %v2495_v7, 0.0  ;;  %7866 = vrot.lane.b32.xlu1 %v7865_v48, %s8577_s24  ;;  %v2756_v57 = vpop.permute.xlu1 %2755  ;;  %v3213_v48 = vsel %vm13939_vm2, %v3179_v28, %v3180_v31 }
 0x210   : > { %v2927_v45 = vrot.slane %v7799_v38, 7  ;;  %v10186_v39 = vrot.slane %v7798_v61, 7  ;;  %v2928_v40 = vrot.slane %v2756_v57, 7  ;;  %v2497_v51 = vpop.f32.mrf.mxu0 }
 0x211   : > { %13972 = vst [vmem:[#allocation30_spill] sm:$0xff] %v10182_v18  ;;  %v3181_v13 = vrot.slane %v10182_v18, 1  ;;  %v2498_v23 = vadd.f32 %v9766_v30, %v2497_v51 }
 0x212   : > { %13973 = vst [vmem:[#allocation32_spill] sm:$0xff] %v10186_v39  ;;  %v2499_v34 = vpop.f32.mrf.mxu0  ;;  %v3017_v61 = vsel %vm13976_vm10, %v2927_v45, %v2928_v40  ;;  %v3018_v51 = vsel %vm13977_vm15, %v10186_v39, %v2927_v45  ;;  %vm13978_vm10 = vcmask 523264   ;;  %vm13980_vm15 = vmmov %vm13939_vm2 }
 0x213   : > { %v10190_v44 = vmax.f32 %v2498_v23, 0.0  ;;  %v3212_v53 = vsel %vm13975_vm5, %v3180_v31, %v3181_v13  ;;  %v3110_v20 = vpack.c.bf16 %v3017_v61, %v3018_v51  ;;  %vm13981_vm5 = vmmov %vm13939_vm2  ;;  %vm13982_vm2 = vcmp.lt.s32.totalorder %v8643_v3, 1 }
 0x214   : > { %v2502_v7 = vpop.f32.mrf.mxu0  ;;  %v3308_v38 = vsel %vm9606_vm1, %v3212_v53, 0.0 }
 0x215   : > { %13974 = vst [vmem:[#allocation33_spill] sm:$0xff] %v10190_v44  ;;  %v2503_v23 = vadd.f32 %v9766_v30, %v2502_v7  ;;  %v7870_v57 = vpack.i.bf16 %v10190_v44, %v10182_v18  ;;  %v3348_v34 = vpack.c.bf16 %v3308_v38, %v3213_v48  ;;  %v3182_v31 = vrot.slane %v10190_v44, 1 }
 0x216   : > { %v2504_v2 = vpop.f32.mrf.mxu0 }
 0x217   : > { %v10209_v53 = vmax.f32 %v2503_v23, 0.0  ;;  %7871 = vrot.lane.b32.xlu1 %v7870_v57, %s8577_s24  ;;  %3435 = vrot.lane.b32.xlu0 %v3348_v34, %s8577_s24  ;;  %v13979_v57 = vpack.c.bf16 %v9907_v59, %v9899_v27  ;;  %v3211_v51 = vsel %vm13981_vm5, %v3181_v13, %v3182_v31 }
 0x218   : > { %v2505_v45 = vpop.f32.mrf.mxu0  ;;  %v3408_v39 = vpop.permute.xlu0 %3407 }
 0x219   : > { %v3183_v7 = vrot.slane %v10209_v53, 1  ;;  %v2506_v6 = vadd.f32 %v9766_v30, %v2505_v45  ;;  %v7802_v48 = vpop.permute.xlu1 %7801  ;;  %v3491_v2 = vsel %vm13978_vm10, %v3110_v20, %v3408_v39  ;;  %vm13983_vm10 = vmmov %vm13982_vm2 }
 0x21a   : > { %v7804_v38 = vunpack.i.h.bf16 %v7802_v48  ;;  %v7803_v28 = vunpack.i.l.bf16 %v7802_v48  ;;  %v2507_v18 = vpop.f32.mrf.mxu0  ;;  %3820 = vmatprep.mubr.bf16.mxu1 %v3491_v2 }
 0x21b   : > { %v10216_v23 = vmax.f32 %v2506_v6, 0.0  ;;  %3821 = vmatmul.mubr.bf16.vlgmr.msra.gmra.mxu1 %v13979_v57  ;;  %v3210_v61 = vsel %vm13980_vm15, %v3182_v31, %v3183_v7  ;;  %vm13984_vm15 = vcmask 523264  }
 0x21c   : > { %v2930_v34 = vrot.slane %v7804_v38, 7  ;;  %v2929_v45 = vrot.slane %v7803_v28, 7  ;;  %v2510_v44 = vpop.f32.mrf.mxu0  ;;  %v3349_v20 = vpack.c.bf16 %v3210_v61, %v3211_v51 }
 0x21d   : > { %v2511_v39 = vadd.f32 %v9766_v30, %v2510_v44  ;;  %v7875_v18 = vpack.i.bf16 %v10216_v23, %v10209_v53  ;;  %v3184_v28 = vrot.slane %v10216_v23, 1 }
 0x21e   : > { %v2512_v27 = vpop.f32.mrf.mxu0  ;;  %3437 = vrot.lane.b32.xlu0 %v3349_v20, %s8577_s24  ;;  %v3015_v59 = vsel %vm13982_vm2, %v2929_v45, %v2930_v34  ;;  %v3016_v13 = vsel %vm13983_vm10, %v2928_v40, %v2929_v45  ;;  %v2303_v40 = vadd.f32 %v9766_v30, %v9643_v21  ;;  %vm13986_vm2 = vmmov %vm13981_vm5 }
 0x21f   : > { %v10236_v31 = vmax.f32 %v2511_v39, 0.0  ;;  %7876 = vrot.lane.b32.xlu1 %v7875_v18, %s8577_s24  ;;  %v3111_v44 = vpack.c.bf16 %v3015_v59, %v3016_v13  ;;  %v13985_v39 = vpack.c.bf16 %v9930_v37, %v9926_v29  ;;  %v3209_v59 = vsel %vm13986_vm2, %v3183_v7, %v3184_v28 }
 0x220   : > { %v2513_v48 = vpop.f32.mrf.mxu0  ;;  %v3410_v2 = vpop.permute.xlu0 %3409  ;;  %v2311_v29 = vadd.f32 %v9766_v30, %v9663_v54  ;;  %v2306_v54 = vadd.f32 %v9766_v30, %v9654_v46 }
 0x221   : > { %v3185_v38 = vrot.slane %v10236_v31, 1  ;;  %v2514_v57 = vadd.f32 %v9766_v30, %v2513_v48  ;;  %v7807_v61 = vpop.permute.xlu1 %7806  ;;  %v3495_v51 = vsel %vm13984_vm15, %v3111_v44, %v3410_v2  ;;  %vm13987_vm15 = vmmov %vm13983_vm10 }
 0x222   : > { %v7809_v20 = vunpack.i.h.bf16 %v7807_v61  ;;  %v7808_v27 = vunpack.i.l.bf16 %v7807_v61  ;;  %v2515_v6 = vpop.f32.mrf.mxu0  ;;  %3828 = vmatprep.mubr.bf16.mxu1 %v3495_v51  ;;  %v10265_v61 = vmax.f32 %v2303_v40, 0.0  ;;  %v10277_v40 = vmax.f32 %v2311_v29, 0.0 }
 0x223   : > { %v10244_v45 = vmax.f32 %v2514_v57, 0.0  ;;  %3829 = vmatmul.mubr.bf16.gmra.mxu1 %v13985_v39  ;;  %v3208_v18 = vsel %vm13981_vm5, %v3184_v28, %v3185_v38  ;;  %vm13988_vm5 = vcmask 523264   ;;  %v10289_v29 = vmax.f32 %v2306_v54, 0.0 }
 0x224   : > { %v2932_v13 = vrot.slane %v7809_v20, 7  ;;  %v2931_v44 = vrot.slane %v7808_v27, 7  ;;  %v2518_v48 = vpop.f32.mrf.mxu0  ;;  %v3350_v6 = vpack.c.bf16 %v3208_v18, %v3209_v59 }
 0x225   : > { %v2519_v2 = vadd.f32 %v9766_v30, %v2518_v48  ;;  %v7880_v21 = vpack.i.bf16 %v10244_v45, %v10236_v31  ;;  %v3186_v51 = vrot.slane %v10244_v45, 1 }
 0x226   : > { %v2520_v37 = vpop.f32.mrf.mxu0  ;;  %3439 = vrot.lane.b32.xlu0 %v3350_v6, %s8577_s24  ;;  %v3013_v7 = vsel %vm13983_vm10, %v2931_v44, %v2932_v13  ;;  %v3014_v28 = vsel %vm13987_vm15, %v2930_v34, %v2931_v44  ;;  %vm13989_vm10 = vmmov %vm13986_vm2 }
 0x227   : > { %v10268_v20 = vmax.f32 %v2519_v2, 0.0  ;;  %7881 = vrot.lane.b32.xlu1 %v7880_v21, %s8577_s24  ;;  %v3112_v27 = vpack.c.bf16 %v3013_v7, %v3014_v28  ;;  %v3207_v28 = vsel %vm13989_vm10, %v3185_v38, %v3186_v51  ;;  %v3135_v38 = vrot.slane %v10277_v40, 1 }
 0x228   : > { %v2521_v39 = vpop.f32.mrf.mxu0 }
 0x229   : > { %v13633_v18 = vrot.slane %v10268_v20, 1  ;;  %v2522_v59 = vadd.f32 %v9766_v30, %v2521_v39  ;;  %v7812_v48 = vpop.permute.xlu1 %7811  ;;  %v3412_v6 = vpop.permute.xlu0 %3411  ;;  %v7885_v34 = vpack.i.bf16 %v10268_v20, %v10265_v61 }
 0x22a   : > { %v7814_v44 = vunpack.i.h.bf16 %v7812_v48  ;;  %v7813_v2 = vunpack.i.l.bf16 %v7812_v48  ;;  %v2523_v37 = vpop.f32.mrf.mxu0  ;;  %v3499_v21 = vsel %vm13988_vm5, %v3112_v27, %v3412_v6  ;;  %v13990_v27 = vpack.c.bf16 %v9948_v52, %v9943_v35  ;;  %vm13991_vm5 = vmmov %vm13987_vm15 }
 0x22b   : > { %v10280_v7 = vmax.f32 %v2522_v59, 0.0  ;;  %3836 = vmatprep.mubr.bf16.mxu1 %v3499_v21  ;;  %7886 = vrot.lane.b32.xlu1 %v7885_v34, %s8577_s24  ;;  %v3206_v46 = vsel %vm13986_vm2, %v3186_v51, %v13633_v18  ;;  %v2319_v6 = vadd.f32 %v9766_v30, %v9680_v10  ;;  %vm13993_vm2 = vcmask 523264  }
 0x22c   : > { %v2934_v39 = vrot.slane %v7814_v44, 7  ;;  %v2933_v48 = vrot.slane %v7813_v2, 7  ;;  %v2526_v37 = vpop.f32.mrf.mxu0  ;;  %3837 = vmatmul.mubr.bf16.gmra.mxu1 %v13990_v27  ;;  %v3351_v59 = vpack.c.bf16 %v3206_v46, %v3207_v28  ;;  %v3134_v2 = vrot.slane %v10289_v29, 1 }
 0x22d   : > { %v2527_v34 = vadd.f32 %v9766_v30, %v2526_v37  ;;  %v2314_v46 = vadd.f32 %v9766_v30, %v9672_v22 }
 0x22e   : > { %v2528_v51 = vpop.f32.mrf.mxu0  ;;  %3441 = vrot.lane.b32.xlu0 %v3351_v59, %s8577_s24  ;;  %v3011_v54 = vsel %vm13987_vm15, %v2933_v48, %v2934_v39  ;;  %v3012_v35 = vsel %vm13991_vm5, %v2932_v13, %v2933_v48  ;;  %v13634_v59 = vrot.slane %v10265_v61, 1  ;;  %v3258_v22 = vsel %vm13989_vm10, %v3134_v2, %v3135_v38  ;;  %vm13995_vm15 = vmmov %vm13989_vm10 }
 0x22f   : > { %v10305_v52 = vmax.f32 %v2527_v34, 0.0  ;;  %v3061_v10 = vsel %vm8900_vm6, %v3012_v35, 0.0  ;;  %v10313_v51 = vmax.f32 %v2319_v6, 0.0  ;;  %vm13997_vm10 = vcmask 523264  }
 0x230   : > { %v2529_v28 = vpop.f32.mrf.mxu0  ;;  %v3414_v37 = vpop.permute.xlu0 %3413  ;;  %v3113_v27 = vpack.c.bf16 %v3011_v54, %v3061_v10  ;;  %vm14028_vm6 = vcmask 523264  }
 0x231   : > { %v2530_v21 = vadd.f32 %v9766_v30, %v2529_v28  ;;  %v7817_v13 = vpop.permute.xlu1 %7816  ;;  %v7890_v48 = vpack.i.bf16 %v10305_v52, %v10289_v29  ;;  %v10326_v30 = vmax.f32 %v2314_v46, 0.0 }
 0x232   : > { %v7819_v34 = vunpack.i.h.bf16 %v7817_v13  ;;  %v7818_v35 = vunpack.i.l.bf16 %v7817_v13  ;;  %v2531_v57 = vpop.f32.mrf.mxu0  ;;  %v3503_v18 = vsel %vm13993_vm2, %v3113_v27, %v3414_v37  ;;  %v3259_v37 = vsel %vm13995_vm15, %v13634_v59, %v3134_v2  ;;  %vm13996_vm2 = vmmov %vm13991_vm5 }
 0x233   : > { %v10323_v54 = vmax.f32 %v2530_v21, 0.0  ;;  %3844 = vmatprep.mubr.bf16.mxu1 %v3503_v18  ;;  %7891 = vrot.lane.b32.xlu1 %v7890_v48, %s8577_s24  ;;  %v13994_v57 = vpack.c.bf16 %v9966_v11, %v9960_v47  ;;  %v13635_v21 = vrot.slane %v10313_v51, 1  ;;  %v10339_v18 = vld [vmem:[%s13492_s2] ss:$0 sm:$0xff]  ;;  %v3325_v27 = vpack.c.bf16 %v3258_v22, %v3259_v37 }
 0x234   : > { %v2936_v6 = vrot.slane %v7819_v34, 7  ;;  %v2935_v10 = vrot.slane %v7818_v35, 7  ;;  %v2534_v28 = vpop.f32.mrf.mxu0  ;;  %v2327_v13 = vadd.f32 %v10339_v18, %v9704_v19  ;;  %v3136_v22 = vrot.slane %v10326_v30, 1 }
 0x235   : > { %3845 = vmatmul.mubr.bf16.gmra.mxu1 %v13994_v57  ;;  %v2535_v46 = vadd.f32 %v10339_v18, %v2534_v28  ;;  %v2322_v19 = vadd.f32 %v10339_v18, %v9694_v25 }
 0x236   : > { %v2536_v47 = vpop.f32.mrf.mxu0  ;;  %v3009_v11 = vsel %vm13991_vm5, %v2935_v10, %v2936_v6  ;;  %v3010_v2 = vsel %vm13996_vm2, %v2934_v39, %v2935_v10  ;;  %v3256_v25 = vsel %vm13995_vm15, %v3136_v22, %v13635_v21  ;;  %vm13999_vm5 = vmmov %vm13995_vm15  ;;  %vm14001_vm15 = vcmask 523264  }
 0x237   : > { %v10350_v34 = vmax.f32 %v2535_v46, 0.0  ;;  %3389 = vrot.lane.b32.xlu1 %v3325_v27, %s8577_s24  ;;  %v3114_v35 = vpack.c.bf16 %v3009_v11, %v3010_v2  ;;  %v10360_v46 = vmax.f32 %v2327_v13, 0.0  ;;  %v2335_v2 = vadd.f32 %v10339_v18, %v9729_v41 }
 0x238   : > { %v2537_v28 = vpop.f32.mrf.mxu0  ;;  %v3416_v57 = vpop.permute.xlu0 %3415  ;;  %v2330_v41 = vadd.f32 %v10339_v18, %v9718_v32 }
 0x239   : > { %v2538_v37 = vadd.f32 %v10339_v18, %v2537_v28  ;;  %v7822_v47 = vpop.permute.xlu1 %7821  ;;  %v3507_v39 = vsel %vm13997_vm10, %v3114_v35, %v3416_v57  ;;  %v7905_v10 = vpack.i.bf16 %v10350_v34, %v10326_v30  ;;  %v10371_v35 = vmax.f32 %v2322_v19, 0.0  ;;  %vm14000_vm10 = vmmov %vm13996_vm2 }
 0x23a   : > { %v7824_v48 = vunpack.i.h.bf16 %v7822_v47  ;;  %v7823_v27 = vunpack.i.l.bf16 %v7822_v47  ;;  %v2539_v11 = vpop.f32.mrf.mxu0  ;;  %3852 = vmatprep.mubr.bf16.mxu1 %v3507_v39  ;;  %v13998_v47 = vpack.c.bf16 %v9986_v60, %v9980_v33  ;;  %v3257_v39 = vsel %vm13999_vm5, %v3135_v38, %v3136_v22 }
 0x23b   : > { %v10368_v28 = vmax.f32 %v2538_v37, 0.0  ;;  %7906 = vrot.lane.b32.xlu1 %v7905_v10, %s8577_s24  ;;  %v3326_v10 = vpack.c.bf16 %v3256_v25, %v3257_v39  ;;  %v3139_v19 = vrot.slane %v10360_v46, 1  ;;  %v10390_v11 = vmax.f32 %v2335_v2, 0.0 }
 0x23c   : > { %v2938_v13 = vrot.slane %v7824_v48, 7  ;;  %v2937_v57 = vrot.slane %v7823_v27, 7  ;;  %v2542_v59 = vpop.f32.mrf.mxu0 }
 0x23d   : > { %3853 = vmatmul.mubr.bf16.gmra.mxu1 %v13998_v47  ;;  %v2543_v37 = vadd.f32 %v10339_v18, %v2542_v59  ;;  %v3138_v59 = vrot.slane %v10371_v35, 1  ;;  %v10396_v47 = vmax.f32 %v2330_v41, 0.0 }
 0x23e   : > { %v2544_v27 = vpop.f32.mrf.mxu0  ;;  %v3007_v33 = vsel %vm13996_vm2, %v2937_v57, %v2938_v13  ;;  %v3008_v60 = vsel %vm14000_vm10, %v2936_v6, %v2937_v57  ;;  %vm14004_vm2 = vmmov %vm13999_vm5 }
 0x23f   : > { %v10392_v38 = vmax.f32 %v2543_v37, 0.0  ;;  %3391 = vrot.lane.b32.xlu1 %v3326_v10, %s8577_s24  ;;  %v3115_v32 = vpack.c.bf16 %v3007_v33, %v3008_v60  ;;  %v3254_v10 = vsel %vm13999_vm5, %v3138_v59, %v3139_v19  ;;  %vm14007_vm5 = vmmov %vm14004_vm2 }
 0x240   : > { %v2545_v22 = vpop.f32.mrf.mxu0  ;;  %v3418_v25 = vpop.permute.xlu0 %3417 }
 0x241   : > { %v2546_v39 = vadd.f32 %v10339_v18, %v2545_v22  ;;  %v7827_v27 = vpop.permute.xlu1 %7826  ;;  %v3511_v48 = vsel %vm14001_vm15, %v3115_v32, %v3418_v25  ;;  %v7915_v6 = vpack.i.bf16 %v10392_v38, %v10371_v35  ;;  %v14002_v32 = vpack.c.bf16 %v10004_v24, %v9999_v5  ;;  %vm14005_vm15 = vmmov %vm14000_vm10 }
 0x242   : > { %v7829_v2 = vunpack.i.h.bf16 %v7827_v27  ;;  %v7828_v57 = vunpack.i.l.bf16 %v7827_v27  ;;  %v2547_v37 = vpop.f32.mrf.mxu0  ;;  %3860 = vmatprep.mubr.bf16.mxu1 %v3511_v48  ;;  %v14003_v25 = vrot.slane %v10313_v51, 1  ;;  %v3140_v27 = vrot.slane %v10396_v47, 1 }
 0x243   : > { %v10405_v60 = vmax.f32 %v2546_v39, 0.0  ;;  %7916 = vrot.lane.b32.xlu1 %v7915_v6, %s8577_s24 }
 0x244   : > { %v2940_v41 = vrot.slane %v7829_v2, 7  ;;  %v2939_v22 = vrot.slane %v7828_v57, 7  ;;  %v2550_v21 = vpop.f32.mrf.mxu0  ;;  %v3255_v48 = vsel %vm14004_vm2, %v14003_v25, %v3138_v59  ;;  %v14006_v57 = vrot.slane %v10390_v11, 1 }
 0x245   : > { %3861 = vmatmul.mubr.bf16.gmra.mxu1 %v14002_v32  ;;  %v3327_v37 = vpack.c.bf16 %v3254_v10, %v3255_v48  ;;  %v2551_v24 = vadd.f32 %v10339_v18, %v2550_v21  ;;  %v3188_v25 = vrot.slane %v10280_v7, 1  ;;  %vm14008_vm2 = vcmask 523264  }
 0x246   : > { %v2552_v33 = vpop.f32.mrf.mxu0  ;;  %v3005_v6 = vsel %vm14000_vm10, %v2939_v22, %v2940_v41  ;;  %v3006_v2 = vsel %vm14005_vm15, %v2938_v13, %v2939_v22  ;;  %v3252_v10 = vsel %vm14007_vm5, %v3140_v27, %v14006_v57  ;;  %vm14011_vm10 = vmmov %vm14007_vm5 }
 0x247   : > { %3393 = vrot.lane.b32.xlu1 %v3327_v37, %s8577_s24  ;;  %v3116_v59 = vpack.c.bf16 %v3005_v6, %v3006_v2  ;;  %v2338_v33 = vadd.f32 %v10339_v18, %v9747_v42  ;;  %v3268_v2 = vsel %vm9071_vm8, %v3252_v10, 0.0  ;;  %v10436_v44 = vmax.f32 %v2551_v24, 0.0  ;;  %vm14013_vm15 = vmmov %vm14007_vm5 }
 0x248   : > { %v2553_v32 = vpop.f32.mrf.mxu0  ;;  %v14010_v42 = vrot.slane %v10305_v52, 1  ;;  %v3253_v24 = vsel %vm14013_vm15, %v3139_v19, %v3140_v27  ;;  %vm14014_vm5 = vcmp.lt.s32.totalorder %v8643_v3, 1  ;;  %vm14018_vm15 = vcmask 523264  }
 0x249   : > { %v2554_v13 = vadd.f32 %v10339_v18, %v2553_v32  ;;  %v7832_v22 = vpop.permute.xlu1 %7831  ;;  %v3420_v48 = vpop.permute.xlu0 %3419  ;;  %v10451_v10 = vmax.f32 %v2338_v33, 0.0  ;;  %v14017_v33 = vrot.slane %v10268_v20, 1 }
 0x24a   : > { %v7834_v39 = vunpack.i.h.bf16 %v7832_v22  ;;  %v7833_v21 = vunpack.i.l.bf16 %v7832_v22  ;;  %v2555_v5 = vpop.f32.mrf.mxu0  ;;  %v3515_v37 = vsel %vm14008_vm2, %v3116_v59, %v3420_v48  ;;  %v3204_v18 = vsel %vm14011_vm10, %v3188_v25, %v14010_v42  ;;  %vm14015_vm2 = vmmov %vm14014_vm5 }
 0x24b   : > { %v10438_v57 = vmax.f32 %v2554_v13, 0.0  ;;  %3868 = vmatprep.mubr.bf16.mxu1 %v3515_v37  ;;  %2731 = vrot.lane.b32.xlu1 %v10396_v47, %s8577_s24  ;;  %v14012_v59 = vpack.c.bf16 %v10022_v58, %v10017_v4  ;;  %v3328_v22 = vpack.c.bf16 %v3268_v2, %v3253_v24  ;;  %v3205_v37 = vsel %vm14011_vm10, %v14017_v33, %v3188_v25 }
 0x24c   : > { %v2942_v32 = vrot.slane %v7834_v39, 7  ;;  %v2941_v5 = vrot.slane %v7833_v21, 7  ;;  %v3316_v39 = vsel %vm9657_vm3, %v3204_v18, 0.0  ;;  %v3142_v42 = vrot.slane %v10451_v10, 1 }
 0x24d   : > { %3869 = vmatmul.mubr.bf16.gmra.mxu1 %v14012_v59  ;;  %v7895_v13 = vpack.i.bf16 %v10438_v57, %v10280_v7  ;;  %v2652_v48 = vpack.c.bf16 %v10438_v57, %v10436_v44  ;;  %v3352_v59 = vpack.c.bf16 %v3316_v39, %v3205_v37  ;;  %v3190_v25 = vrot.slane %v10323_v54, 1 }
 0x24e   : > { %v3003_v21 = vsel %vm14014_vm5, %v2941_v5, %v2942_v32  ;;  %v3004_v4 = vsel %vm14015_vm2, %v2940_v41, %v2941_v5  ;;  %v3191_v41 = vrot.slane %v10350_v34, 1  ;;  %vm14020_vm5 = vmmov %vm14011_vm10  ;;  %v14021_v39 = vpack.c.bf16 %v10040_v8, %v10034_v9 }
 0x24f   : > { %7896 = vrot.lane.b32.xlu0 %v7895_v13, %s8577_s24  ;;  %3395 = vrot.lane.b32.xlu1 %v3328_v22, %s8577_s24  ;;  %v3069_v19 = vsel %vm9017_vm7, %v3004_v4, 0.0  ;;  %v14019_v22 = vrot.slane %v9781_v43, 1  ;;  %v14022_v33 = vrot.slane %v10390_v11, 1  ;;  %vm14023_vm2 = vmmov %vm14020_vm5  ;;  %vm14024_vm10 = vcmp.lt.s32.totalorder %v8643_v3, 1 }
 0x250   : > { %v3422_v27 = vpop.permute.xlu0 %3421  ;;  %v3117_v2 = vpack.c.bf16 %v3003_v21, %v3069_v19 }
 0x251   : > { %v7837_v18 = vpop.permute.xlu1 %7836  ;;  %v3250_v4 = vsel %vm14020_vm5, %v3142_v42, %v14019_v22  ;;  %v3251_v37 = vsel %vm14023_vm2, %v14022_v33, %v3142_v42  ;;  %vm14026_vm5 = vmmov %vm14023_vm2 }
 0x252   : > { %v7839_v5 = vunpack.i.h.bf16 %v7837_v18  ;;  %v7838_v24 = vunpack.i.l.bf16 %v7837_v18  ;;  %v3519_v13 = vsel %vm14018_vm15, %v3117_v2, %v3422_v27  ;;  %v7900_v27 = vpack.i.bf16 %v10277_v40, %v10323_v54  ;;  %vm14025_vm15 = vmmov %vm14024_vm10 }
 0x253   : > { %3443 = vrot.lane.b32.xlu0 %v3352_v59, %s8577_s24  ;;  %3876 = vmatprep.mubr.bf16.mxu1 %v3519_v13  ;;  %v3329_v2 = vpack.c.bf16 %v3250_v4, %v3251_v37 }
 0x254   : > { %v2944_v21 = vrot.slane %v7839_v5, 7  ;;  %v2943_v19 = vrot.slane %v7838_v24, 7  ;;  %2735 = vrot.lane.b32.xlu1 %v10451_v10, %s8577_s24  ;;  %v3202_v5 = vsel %vm14026_vm5, %v3190_v25, %v3191_v41  ;;  %v14027_v24 = vrot.slane %v10305_v52, 1  ;;  %vm14035_vm5 = vmmov %vm14023_vm2 }
 0x255   : > { %3877 = vmatmul.mubr.bf16.gmra.mxu1 %v14021_v39 }
 0x256   : > { %v3001_v18 = vsel %vm14024_vm10, %v2943_v19, %v2944_v21  ;;  %v3002_v59 = vsel %vm14025_vm15, %v2942_v32, %v2943_v19  ;;  %v3203_v42 = vsel %vm14023_vm2, %v14027_v24, %v3190_v25  ;;  %v3193_v32 = vrot.slane %v10392_v38, 1  ;;  %vm14033_vm15 = vmmov %vm14023_vm2 }
 0x257   : > { %7901 = vrot.lane.b32.xlu0 %v7900_v27, %s8577_s24  ;;  %v3118_v9 = vpack.c.bf16 %v3001_v18, %v3002_v59  ;;  %v3353_v4 = vpack.c.bf16 %v3202_v5, %v3203_v42  ;;  %v3192_v27 = vrot.slane %v10368_v28, 1  ;;  %v14030_v25 = vpack.c.bf16 %v10060_v49, %v10054_v12 }
 0x258   : > { %3397 = vrot.lane.b32.xlu1 %v3329_v2, %s8577_s24  ;;  %v3424_v8 = vpop.permute.xlu0 %3423  ;;  %v14029_v2 = vpack.c.bf16 %v9826_v56, %v9812_v15  ;;  %v7910_v18 = vpack.i.bf16 %v10313_v51, %v10368_v28  ;;  %v14034_v12 = vpack.c.bf16 %v9858_v16, %v9845_v50  ;;  %vm14036_vm2 = vcmask 523264  }
 0x259   : > { %v7842_v13 = vpop.permute.xlu1 %7841  ;;  %v3523_v22 = vsel %vm14028_vm6, %v3118_v9, %v3424_v8  ;;  %vm14031_vm6 = vmmov %vm14024_vm10  ;;  %v3200_v9 = vsel %vm14033_vm15, %v3192_v27, %v3193_v32  ;;  %v3201_v49 = vsel %vm14035_vm5, %v3191_v41, %v3192_v27  ;;  %v14037_v16 = vpack.c.bf16 %v10078_v26, %v10073_v0 }
 0x25a   : > { %v7844_v19 = vunpack.i.h.bf16 %v7842_v13  ;;  %v7843_v39 = vunpack.i.l.bf16 %v7842_v13  ;;  %3884 = vmatprep.mubr.bf16.mxu1 %v3523_v22  ;;  %vm14032_vm10 = vmmov %vm14031_vm6  ;;  %v3354_v42 = vpack.c.bf16 %v3200_v9, %v3201_v49  ;;  %v7920_v41 = vpack.i.bf16 %v10360_v46, %v10405_v60 }
 0x25b   : > { %3445 = vrot.lane.b32.xlu0 %v3353_v4, %s8577_s24  ;;  %v3194_v4 = vrot.slane %v10405_v60, 1  ;;  %vm14039_vm15 = vmmov %vm14035_vm5  ;;  %v14040_v0 = vpack.c.bf16 %v9912_v1, %v9916_v17 }
 0x25c   : > { %v2946_v33 = vrot.slane %v7844_v19, 7  ;;  %v2945_v37 = vrot.slane %v7843_v39, 7  ;;  %3399 = vrot.lane.b32.xlu1 %v14029_v2, %s8577_s24  ;;  %v3196_v2 = vrot.slane %v10438_v57, 1 }
 0x25d   : > { %3885 = vmatmul.mubr.bf16.gmra.mxu1 %v14030_v25  ;;  %v3199_v26 = vsel %vm14035_vm5, %v3193_v32, %v3194_v4  ;;  %v14043_v32 = vpack.c.bf16 %v10096_v63, %v10091_v14 }
 0x25e   : > { %v2999_v59 = vsel %vm14031_vm6, %v2945_v37, %v2946_v33  ;;  %v3000_v5 = vsel %vm14032_vm10, %v2944_v21, %v2945_v37  ;;  %v3195_v21 = vrot.slane %v10436_v44, 1  ;;  %vm14038_vm10 = vmmov %vm14031_vm6 }
 0x25f   : > { %7911 = vrot.lane.b32.xlu0 %v7910_v18, %s8577_s24  ;;  %v3119_v15 = vpack.c.bf16 %v2999_v59, %v3000_v5 }
 0x260   : > { %3401 = vrot.lane.b32.xlu1 %v14034_v12, %s8577_s24  ;;  %v3426_v56 = vpop.permute.xlu0 %3425  ;;  %v3198_v37 = vsel %vm14039_vm15, %v3194_v4, %v3195_v21  ;;  %vm14044_vm15 = vmmov %vm14038_vm10 }
 0x261   : > { %v7847_v8 = vpop.permute.xlu1 %7846  ;;  %v3527_v24 = vsel %vm14036_vm2, %v3119_v15, %v3426_v56  ;;  %v3355_v59 = vpack.c.bf16 %v3198_v37, %v3199_v26  ;;  %v14041_v15 = vrot.slane %v10265_v61, 1  ;;  %v7925_v56 = vpack.i.bf16 %v10436_v44, %v10390_v11  ;;  %v14047_v37 = vld [vmem:[#allocation20_spill] sm:$0xff]  ;;  %v14051_v26 = vld [vmem:[#allocation11_spill] sm:$0xff] }
 0x262   : > { %v7849_v13 = vunpack.i.h.bf16 %v7847_v8  ;;  %v7848_v22 = vunpack.i.l.bf16 %v7847_v8  ;;  %3892 = vmatprep.mubr.bf16.mxu1 %v3527_v24  ;;  %v3197_v24 = vsel %vm14035_vm5, %v3195_v21, %v3196_v2 }
 0x263   : > { %3447 = vrot.lane.b32.xlu0 %v3354_v42, %s8577_s24 }
 0x264   : > { %v2948_v19 = vrot.slane %v7849_v13, 7  ;;  %v2947_v50 = vrot.slane %v7848_v22, 7  ;;  %3403 = vrot.lane.b32.xlu1 %v9893_v55, %s8577_s24 }
 0x265   : > { %3893 = vmatmul.mubr.bf16.gmra.mxu1 %v14037_v16 }
 0x266   : > { %v2997_v39 = vsel %vm14031_vm6, %v2947_v50, %v2948_v19  ;;  %v2998_v27 = vsel %vm14038_vm10, %v2946_v33, %v2947_v50  ;;  %vm14042_vm6 = vmmov %vm14035_vm5 }
 0x267   : > { %7921 = vrot.lane.b32.xlu0 %v7920_v41, %s8577_s24  ;;  %v3120_v55 = vpack.c.bf16 %v2997_v39, %v2998_v27  ;;  %v3260_v12 = vsel %vm14042_vm6, %v3196_v2, %v14041_v15  ;;  %v14046_v27 = vld [vmem:[#allocation21_spill] sm:$0xff]  ;;  %vm14049_vm6 = vmmov %vm14038_vm10 }
 0x268   : > { %3405 = vrot.lane.b32.xlu1 %v14040_v0, %s8577_s24  ;;  %v3324_v42 = vsel %vm9754_vm4, %v3260_v12, 0.0  ;;  %v14048_v2 = vpack.c.bf16 %v14046_v27, %v14047_v37  ;;  %v14054_v12 = vld [vmem:[#allocation14_spill] sm:$0xff]  ;;  %vm14060_vm5 = vmmov %vm14049_vm6  ;;  %v14066_v37 = vld [vmem:[#allocation17_spill] sm:$0xff] }
 0x269   : > { %v7852_v25 = vpop.permute.xlu1 %7851  ;;  %v3428_v18 = vpop.permute.xlu0 %3427  ;;  %v3356_v50 = vpack.c.bf16 %v3324_v42, %v3197_v24 }
 0x26a   : > { %v7854_v33 = vunpack.i.h.bf16 %v7852_v25  ;;  %v7853_v5 = vunpack.i.l.bf16 %v7852_v25  ;;  %v3531_v9 = vsel %vm14036_vm2, %v3120_v55, %v3428_v18  ;;  %v14052_v25 = vpack.i.bf16 %v14051_v26, %v9781_v43 }
 0x26b   : > { %3900 = vmatprep.mubr.bf16.mxu1 %v3531_v9  ;;  %3449 = vrot.lane.b32.xlu0 %v3355_v59, %s8577_s24 }
 0x26c   : > { %v2950_v1 = vrot.slane %v7854_v33, 7  ;;  %v2949_v17 = vrot.slane %v7853_v5, 7 }
 0x26d   : > { %3901 = vmatmul.mubr.bf16.gmra.mxu1 %v14043_v32 }
 0x26e   : > { %v2995_v49 = vsel %vm14038_vm10, %v2949_v17, %v2950_v1  ;;  %v2996_v8 = vsel %vm14044_vm15, %v2948_v19, %v2949_v17  ;;  %vm14050_vm10 = vmmov %vm14049_vm6  ;;  %v14055_v17 = vld [vmem:[#allocation12_spill] sm:$0xff] }
 0x26f   : > { %7926 = vrot.lane.b32.xlu0 %v7925_v56, %s8577_s24  ;;  %v3077_v14 = vsel %vm9147_vm9, %v2996_v8, 0.0  ;;  %vm14053_vm15 = vmmov %vm14036_vm2  ;;  %v14056_v32 = vpack.i.bf16 %v14054_v12, %v14055_v17  ;;  %v14058_v8 = vld [vmem:[#allocation22_spill] sm:$0xff] }
 0x270   : > { %v3430_v63 = vpop.permute.xlu0 %3429  ;;  %v3121_v22 = vpack.c.bf16 %v2995_v49, %v3077_v14  ;;  %v14057_v49 = vld [vmem:[#allocation25_spill] sm:$0xff] }
 0x271   : > { %v7857_v4 = vpop.permute.xlu1 %7856  ;;  %v14059_v24 = vpack.c.bf16 %v14057_v49, %v14058_v8 }
 0x272   : > { %v7859_v16 = vunpack.i.h.bf16 %v7857_v4  ;;  %v7858_v41 = vunpack.i.l.bf16 %v7857_v4  ;;  %v3535_v39 = vsel %vm14036_vm2, %v3121_v22, %v3430_v63  ;;  %vm14061_vm2 = vmmov %vm14060_vm5  ;;  %v14062_v63 = vld [vmem:[#allocation16_spill] sm:$0xff]  ;;  %v14063_v22 = vld [vmem:[#allocation15_spill] sm:$0xff] }
 0x273   : > { %3908 = vmatprep.mubr.bf16.mxu1 %v3535_v39  ;;  %3451 = vrot.lane.b32.xlu0 %v3356_v50, %s8577_s24  ;;  %v14064_v4 = vpack.i.bf16 %v14062_v63, %v14063_v22 }
 0x274   : > { %v2952_v21 = vrot.slane %v7859_v16, 7  ;;  %v2951_v19 = vrot.slane %v7858_v41, 7 }
 0x275   : > { %3909 = vmatmul.mubr.bf16.gmra.mxu1 %v14048_v2 }
 0x276   : > { %v2993_v55 = vsel %vm14049_vm6, %v2951_v19, %v2952_v21  ;;  %v2994_v0 = vsel %vm14050_vm10, %v2950_v1, %v2951_v19  ;;  %vm14065_vm6 = vmmov %vm14053_vm15 }
 0x277   : > { %7931 = vrot.lane.b32.xlu0 %v14052_v25, %s8577_s24  ;;  %v3122_v18 = vpack.c.bf16 %v2993_v55, %v2994_v0  ;;  %v14067_v0 = vld [vmem:[#allocation27_spill] sm:$0xff]  ;;  %vm14070_vm10 = vmmov %vm14061_vm2 }
 0x278   : > { %v3432_v59 = vpop.permute.xlu0 %3431 }
 0x279   : > { %v7862_v33 = vpop.permute.xlu1 %7861  ;;  %v3539_v5 = vsel %vm14053_vm15, %v3122_v18, %v3432_v59  ;;  %vm14071_vm15 = vmmov %vm14061_vm2 }
 0x27a   : > { %v7864_v9 = vunpack.i.h.bf16 %v7862_v33  ;;  %v7863_v15 = vunpack.i.l.bf16 %v7862_v33  ;;  %3916 = vmatprep.mubr.bf16.mxu1 %v3539_v5 }
 0x27b   : > { %7936 = vrot.lane.b32.xlu0 %v14056_v32, %s8577_s24 }
 0x27c   : > { %v2954_v56 = vrot.slane %v7864_v9, 7  ;;  %v2953_v1 = vrot.slane %v7863_v15, 7 }
 0x27d   : > { %3917 = vmatmul.mubr.bf16.gmra.mxu1 %v14059_v24  ;;  %v14073_v24 = vld [vmem:[#allocation29_spill] sm:$0xff] }
 0x27e   : > { %v2991_v42 = vsel %vm14060_vm5, %v2953_v1, %v2954_v56  ;;  %v2992_v14 = vsel %vm14061_vm2, %v2952_v21, %v2953_v1  ;;  %v14068_v21 = vld [vmem:[#allocation26_spill] sm:$0xff]  ;;  %vm14072_vm5 = vmmov %vm14065_vm6 }
 0x27f   : > { %7941 = vrot.lane.b32.xlu0 %v14064_v4, %s8577_s24  ;;  %v3123_v50 = vpack.c.bf16 %v2991_v42, %v2992_v14  ;;  %v14069_v25 = vpack.c.bf16 %v14067_v0, %v14068_v21  ;;  %v14074_v42 = vld [vmem:[#allocation28_spill] sm:$0xff] }
 0x280   : > { %v3434_v16 = vpop.permute.xlu0 %3433  ;;  %v14075_v14 = vpack.c.bf16 %v14073_v24, %v14074_v42 }
 0x281   : > { %v7867_v41 = vpop.permute.xlu1 %7866  ;;  %v3543_v39 = vsel %vm14065_vm6, %v3123_v50, %v3434_v16  ;;  %vm14076_vm6 = vmmov %vm14061_vm2 }
 0x282   : > { %v7869_v19 = vunpack.i.h.bf16 %v7867_v41  ;;  %v7868_v27 = vunpack.i.l.bf16 %v7867_v41  ;;  %3924 = vmatprep.mubr.bf16.mxu1 %v3543_v39 }
 0x283   : > { %2749 = vrot.lane.b32.xlu0 %v14066_v37, %s8577_s24 }
 0x284   : > { %v2956_v2 = vrot.slane %v7869_v19, 7  ;;  %v2955_v55 = vrot.slane %v7868_v27, 7 }
 0x285   : > { %3925 = vmatmul.mubr.bf16.gmra.mxu1 %v14069_v25 }
 0x286   : > { %v2989_v18 = vsel %vm14070_vm10, %v2955_v55, %v2956_v2  ;;  %v2990_v59 = vsel %vm14071_vm15, %v2954_v56, %v2955_v55  ;;  %vm14078_vm10 = vmmov %vm14072_vm5 }
 0x287   : > { %v3124_v33 = vpack.c.bf16 %v2989_v18, %v2990_v59  ;;  %v14079_v18 = vld [vmem:[#allocation33_spill] sm:$0xff]  ;;  %v14080_v59 = vld [vmem:[#allocation30_spill] sm:$0xff]  ;;  %vm14082_vm15 = vmmov %vm14061_vm2 }
 0x289   : > { %v7872_v5 = vpop.permute.xlu1 %7871  ;;  %v3436_v9 = vpop.permute.xlu0 %3435 }
 0x28a   : > { %v7874_v15 = vunpack.i.h.bf16 %v7872_v5  ;;  %v7873_v32 = vunpack.i.l.bf16 %v7872_v5  ;;  %v3547_v1 = vsel %vm14072_vm5, %v3124_v33, %v3436_v9  ;;  %v14081_v33 = vpack.c.bf16 %v14079_v18, %v14080_v59  ;;  %vm14083_vm5 = vmmov %vm14061_vm2 }
 0x28b   : > { %3932 = vmatprep.mubr.bf16.mxu1 %v3547_v1 }
 0x28c   : > { %v2958_v49 = vrot.slane %v7874_v15, 7  ;;  %v2957_v8 = vrot.slane %v7873_v32, 7 }
 0x28d   : > { %3933 = vmatmul.mubr.bf16.gmra.mxu1 %v14075_v14 }
 0x28e   : > { %v2987_v4 = vsel %vm14061_vm2, %v2957_v8, %v2958_v49  ;;  %v2988_v56 = vsel %vm14076_vm6, %v2956_v2, %v2957_v8  ;;  %vm14084_vm2 = vmmov %vm14078_vm10 }
 0x28f   : > { %v3085_v16 = vsel %vm9255_vm11, %v2988_v56, 0.0  ;;  %vm14086_vm6 = vmmov %vm14083_vm5 }
 0x290   : > { %v3438_v41 = vpop.permute.xlu0 %3437  ;;  %v3125_v39 = vpack.c.bf16 %v2987_v4, %v3085_v16  ;;  %v14085_v4 = vpack.c.bf16 %v10216_v23, %v10209_v53 }
 0x291   : > { %v7877_v19 = vpop.permute.xlu1 %7876 }
 0x292   : > { %v7879_v27 = vunpack.i.h.bf16 %v7877_v19  ;;  %v7878_v55 = vunpack.i.l.bf16 %v7877_v19  ;;  %v3551_v0 = vsel %vm14078_vm10, %v3125_v39, %v3438_v41  ;;  %vm14087_vm10 = vmmov %vm14083_vm5  ;;  %v14089_v19 = vpack.c.bf16 %v10244_v45, %v10236_v31 }
 0x293   : > { %3940 = vmatprep.mubr.bf16.mxu1 %v3551_v0 }
 0x294   : > { %v2960_v21 = vrot.slane %v7879_v27, 7  ;;  %v2959_v25 = vrot.slane %v7878_v55, 7 }
 0x295   : > { %3941 = vmatmul.mubr.bf16.gmra.mxu1 %v14081_v33 }
 0x296   : > { %v2985_v2 = vsel %vm14082_vm15, %v2959_v25, %v2960_v21  ;;  %v2986_v5 = vsel %vm14083_vm5, %v2958_v49, %v2959_v25  ;;  %vm14088_vm15 = vmmov %vm14084_vm2 }
 0x297   : > { %v3126_v9 = vpack.c.bf16 %v2985_v2, %v2986_v5 }
 0x298   : > { %v3440_v15 = vpop.permute.xlu0 %3439 }
 0x299   : > { %v7882_v32 = vpop.permute.xlu1 %7881  ;;  %v3555_v1 = vsel %vm14084_vm2, %v3126_v9, %v3440_v15  ;;  %vm14090_vm2 = vmmov %vm14083_vm5 }
 0x29a   : > { %v7884_v8 = vunpack.i.h.bf16 %v7882_v32  ;;  %v7883_v24 = vunpack.i.l.bf16 %v7882_v32  ;;  %3948 = vmatprep.mubr.bf16.mxu1 %v3555_v1 }
 0x29c   : > { %v2962_v42 = vrot.slane %v7884_v8, 7  ;;  %v2961_v14 = vrot.slane %v7883_v24, 7 }
 0x29d   : > { %3949 = vmatmul.mubr.bf16.gmra.mxu1 %v14085_v4  ;;  %v7887_v27 = vpop.permute.xlu1 %7886 }
 0x29e   : > { %v2983_v56 = vsel %vm14086_vm6, %v2961_v14, %v2962_v42  ;;  %v2984_v49 = vsel %vm14087_vm10, %v2960_v21, %v2961_v14  ;;  %v7889_v23 = vunpack.i.h.bf16 %v7887_v27  ;;  %v7888_v18 = vunpack.i.l.bf16 %v7887_v27  ;;  %vm14091_vm6 = vmmov %vm14090_vm2 }
 0x29f   : > { %v3127_v16 = vpack.c.bf16 %v2983_v56, %v2984_v49  ;;  %vm14092_vm10 = vmmov %vm14090_vm2 }
 0x2a0   : > { %v3442_v41 = vpop.permute.xlu0 %3441  ;;  %v2963_v33 = vrot.slane %v7889_v23, 7  ;;  %v2909_v15 = vrot.slane %v7888_v18, 7 }
 0x2a1   : > { %v3559_v39 = vsel %vm14088_vm15, %v3127_v16, %v3442_v41 }
 0x2a2   : > { %3956 = vmatprep.mubr.bf16.mxu1 %v3559_v39  ;;  %v2982_v24 = vsel %vm14090_vm2, %v2962_v42, %v2963_v33  ;;  %v2621_v42 = vpack.c.bf16 %v10289_v29, %v10265_v61 }
 0x2a5   : > { %3957 = vmatmul.mubr.bf16.gmra.mxu1 %v14089_v19  ;;  %v7892_v55 = vpop.permute.xlu1 %7891 }
 0x2a6   : > { %v7893_v25 = vunpack.i.l.bf16 %v7892_v55  ;;  %v7894_v8 = vunpack.i.h.bf16 %v7892_v55 }
 0x2a8   : > { %v2910_v9 = vrot.slane %v7893_v25, 7  ;;  %v2965_v27 = vrot.slane %v7894_v8, 7 }
 0x2a9   : > { %v3390_v0 = vpop.permute.xlu1 %3389 }
 0x2aa   : > { %v3035_v56 = vsel %vm14092_vm10, %v2909_v15, %v2910_v9  ;;  %vm14097_vm10 = vmmov %vm14090_vm2 }
 0x2ad   : > { %v7907_v53 = vpop.permute.xlu1 %7906 }
 0x2ae   : > { %v7908_v41 = vunpack.i.l.bf16 %v7907_v53 }
 0x2b1   : > { %v3392_v2 = vpop.permute.xlu1 %3391 }
 0x2b5   : > { %v7917_v39 = vpop.permute.xlu1 %7916 }
 0x2c1   : > { %v7897_v59 = vpop.permute.xlu0 %7896 }
 0x2c2   : > { %v7899_v21 = vunpack.i.h.bf16 %v7897_v59  ;;  %v7898_v5 = vunpack.i.l.bf16 %v7897_v59 }
 0x2c4   : > { %v10645_v32 = vrot.slane %v7899_v21, 7  ;;  %v2964_v1 = vrot.slane %v7898_v5, 7  ;;  %v2912_v5 = vrot.slane %v7908_v41, 7 }
 0x2c5   : > { %v3444_v31 = vpop.permute.xlu0 %3443 }
 0x2c6   : > { %v2981_v45 = vsel %vm14083_vm5, %v2963_v33, %v2964_v1  ;;  %v3036_v14 = vsel %vm14091_vm6, %v10645_v32, %v2909_v15  ;;  %vm14094_vm5 = vmmov %vm14088_vm15  ;;  %v14095_v33 = vpack.c.bf16 %v10280_v7, %v10268_v20  ;;  %v2980_v21 = vsel %vm14090_vm2, %v2964_v1, %v2965_v27 }
 0x2c7   : > { %v3128_v4 = vpack.c.bf16 %v2981_v45, %v2982_v24  ;;  %v3037_v16 = vsel %vm8667_vm0, %v3036_v14, 0.0  ;;  %v3394_v45 = vpop.permute.xlu1 %3393  ;;  %vm14096_vm6 = vmmov %vm14090_vm2  ;;  %v3093_v7 = vsel %vm9347_vm13, %v2980_v21, 0.0  ;;  %v7909_v14 = vunpack.i.h.bf16 %v7907_v53 }
 0x2c8   : > { %v3101_v19 = vpack.c.bf16 %v3035_v56, %v3037_v16  ;;  %v7919_v21 = vunpack.i.h.bf16 %v7917_v39 }
 0x2c9   : > { %v7902_v55 = vpop.permute.xlu0 %7901  ;;  %v3563_v23 = vsel %vm14088_vm15, %v3128_v4, %v3444_v31  ;;  %vm14098_vm15 = vmmov %vm14090_vm2  ;;  %v7918_v4 = vunpack.i.l.bf16 %v7917_v39 }
 0x2ca   : > { %v7904_v25 = vunpack.i.h.bf16 %v7902_v55  ;;  %v7903_v18 = vunpack.i.l.bf16 %v7902_v55  ;;  %3964 = vmatprep.mubr.bf16.mxu1 %v3563_v23  ;;  %v3455_v59 = vsel %vm14094_vm5, %v3101_v19, %v3390_v0  ;;  %vm14100_vm2 = vmmov %vm14094_vm5  ;;  %v2622_v19 = vpack.c.bf16 %v10326_v30, %v10277_v40 }
 0x2cb   : > { %3748 = vmatprep.mubr.bf16.mxu0 %v3455_v59  ;;  %3965 = vmatmul.mubr.bf16.gmra.mxu1 %v14095_v33  ;;  %v2967_v23 = vrot.slane %v7909_v14, 7  ;;  %v10682_v53 = vpop.permute.xlu1 %2731  ;;  %vm14105_vm13 = vmmov %vm14100_vm2 }
 0x2cc   : > { %v2911_v15 = vrot.slane %v7904_v25, 7  ;;  %v2966_v8 = vrot.slane %v7903_v18, 7  ;;  %3749 = vmatmul.mubr.bf16.vlgmr.msra.gmra.mxu0 %v2621_v42  ;;  %v2914_v42 = vrot.slane %v7918_v4, 7  ;;  %v2916_v39 = vrot.slane %v10682_v53, 7 }
 0x2cd   : > { %v3446_v31 = vpop.permute.xlu0 %3445 }
 0x2ce   : > { %v3033_v61 = vsel %vm14096_vm6, %v2911_v15, %v2912_v5  ;;  %v3034_v29 = vsel %vm14097_vm10, %v2910_v9, %v2911_v15  ;;  %v2979_v0 = vsel %vm14098_vm15, %v2965_v27, %v2966_v8  ;;  %v14101_v27 = vpack.c.bf16 %v10323_v54, %v10305_v52  ;;  %vm14102_vm10 = vmmov %vm14096_vm6 }
 0x2cf   : > { %v3102_v24 = vpack.c.bf16 %v3033_v61, %v3034_v29  ;;  %v3129_v1 = vpack.c.bf16 %v2979_v0, %v3093_v7  ;;  %vm14103_vm15 = vmmov %vm14096_vm6  ;;  %v2623_v29 = vpack.c.bf16 %v10371_v35, %v10313_v51  ;;  %v3396_v0 = vpop.permute.xlu1 %3395  ;;  %v10703_v51 = vld [vmem:[%s13494_s4] ss:$0 sm:$0xff] }
 0x2d1   : > { %v7912_v56 = vpop.permute.xlu0 %7911  ;;  %v3459_v16 = vsel %vm14094_vm5, %v3102_v24, %v3392_v2  ;;  %v3567_v41 = vsel %vm14100_vm2, %v3129_v1, %v3446_v31  ;;  %vm14104_vm5 = vmmov %vm14096_vm6  ;;  %v2969_v1 = vrot.slane %v7919_v21, 7 }
 0x2d2   : > { %v7914_v55 = vunpack.i.h.bf16 %v7912_v56  ;;  %v7913_v9 = vunpack.i.l.bf16 %v7912_v56  ;;  %3756 = vmatprep.mubr.bf16.mxu0 %v3459_v16  ;;  %3972 = vmatprep.mubr.bf16.mxu1 %v3567_v41  ;;  %v2978_v52 = vsel %vm14104_vm5, %v2966_v8, %v2967_v23  ;;  %v14106_v8 = vpack.c.bf16 %v10368_v28, %v10350_v34 }
 0x2d3   : > { %3973 = vmatmul.mubr.bf16.gmra.mxu1 %v14101_v27 }
 0x2d4   : > { %v2913_v25 = vrot.slane %v7914_v55, 7  ;;  %v2968_v18 = vrot.slane %v7913_v9, 7  ;;  %3757 = vmatmul.mubr.bf16.gmra.mxu0 %v2622_v19  ;;  %v10713_v9 = vpop.permute.xlu1 %2735 }
 0x2d5   : > { %v3448_v2 = vpop.permute.xlu0 %3447 }
 0x2d6   : > { %v3031_v59 = vsel %vm14096_vm6, %v2913_v25, %v2914_v42  ;;  %v3032_v40 = vsel %vm14102_vm10, %v2912_v5, %v2913_v25  ;;  %v2977_v30 = vsel %vm14103_vm15, %v2967_v23, %v2968_v18  ;;  %vm14108_vm6 = vmmov %vm14104_vm5 }
 0x2d7   : > { %v3103_v54 = vpack.c.bf16 %v3031_v59, %v3032_v40  ;;  %v3130_v33 = vpack.c.bf16 %v2977_v30, %v2978_v52  ;;  %vm14109_vm10 = vmmov %vm14104_vm5  ;;  %v2624_v59 = vpack.c.bf16 %v10396_v47, %v10360_v46 }
 0x2d8   : > { %vm14110_vm15 = vmmov %vm14104_vm5 }
 0x2d9   : > { %v7922_v15 = vpop.permute.xlu0 %7921  ;;  %v3463_v31 = vsel %vm14100_vm2, %v3103_v54, %v3394_v45  ;;  %v3571_v61 = vsel %vm14105_vm13, %v3130_v33, %v3448_v2  ;;  %vm14107_vm13 = vmmov %vm14104_vm5  ;;  %v2976_v16 = vsel %vm14110_vm15, %v2968_v18, %v2969_v1  ;;  %v14112_v54 = vpack.c.bf16 %v10405_v60, %v10392_v38 }
 0x2da   : > { %v7924_v7 = vunpack.i.h.bf16 %v7922_v15  ;;  %v7923_v5 = vunpack.i.l.bf16 %v7922_v15  ;;  %3764 = vmatprep.mubr.bf16.mxu0 %v3463_v31  ;;  %3980 = vmatprep.mubr.bf16.mxu1 %v3571_v61  ;;  %vm14111_vm5 = vmmov %vm14100_vm2  ;;  %v2918_v33 = vrot.slane %v10713_v9, 7 }
 0x2db   : > { %v3822_v24 = vpop.f32.mrf.mxu1  ;;  %3981 = vmatmul.mubr.bf16.gmra.mxu1 %v14106_v8  ;;  %vm14115_vm15 = vmmov %vm14108_vm6 }
 0x2dc   : > { %v2915_v14 = vrot.slane %v7924_v7, 7  ;;  %v2970_v45 = vrot.slane %v7923_v5, 7  ;;  %3765 = vmatmul.mubr.bf16.gmra.mxu0 %v2623_v29  ;;  %v3823_v23 = vadd.f32 %v10703_v51, %v3822_v24 }
 0x2dd   : > { %v3824_v4 = vpop.f32.mrf.mxu1  ;;  %v3450_v56 = vpop.permute.xlu0 %3449 }
 0x2de   : > { %v3029_v35 = vsel %vm14107_vm13, %v2915_v14, %v2916_v39  ;;  %v3030_v34 = vsel %vm14108_vm6, %v2914_v42, %v2915_v14  ;;  %v2975_v28 = vsel %vm14109_vm10, %v2969_v1, %v2970_v45  ;;  %v10727_v31 = vmax.f32 %v3823_v23, 0.0  ;;  %vm14113_vm13 = vmmov %vm14108_vm6  ;;  %v14116_v1 = vld [vmem:[#allocation3_spill] sm:$0xff]  ;;  %v3398_v4 = vpop.permute.xlu1 %3397 }
 0x2df   : > { %v3825_v41 = vpop.f32.mrf.mxu1  ;;  %v3104_v19 = vpack.c.bf16 %v3029_v35, %v3030_v34  ;;  %v3131_v55 = vpack.c.bf16 %v2975_v28, %v2976_v16  ;;  %vm14114_vm10 = vmmov %vm14108_vm6 }
 0x2e0   : > { %v3826_v27 = vadd.f32 %v10703_v51, %v3825_v41  ;;  %v13640_v35 = vrot.slane %v10727_v31, 1 }
 0x2e1   : > { %v3827_v53 = vpop.f32.mrf.mxu1  ;;  %v7927_v25 = vpop.permute.xlu0 %7926  ;;  %v3467_v2 = vsel %vm14111_vm5, %v3104_v19, %v3396_v0  ;;  %v3575_v42 = vsel %vm14100_vm2, %v3131_v55, %v3450_v56  ;;  %vm14117_vm5 = vnez %v14116_v1 }
 0x2e2   : > { %v7929_v40 = vunpack.i.h.bf16 %v7927_v25  ;;  %v7928_v18 = vunpack.i.l.bf16 %v7927_v25  ;;  %3772 = vmatprep.mubr.bf16.mxu0 %v3467_v2  ;;  %3988 = vmatprep.mubr.bf16.mxu1 %v3575_v42  ;;  %v10721_v30 = vmax.f32 %v3826_v27, 0.0 }
 0x2e3   : > { %v3830_v52 = vpop.f32.mrf.mxu1  ;;  %3989 = vmatmul.mubr.bf16.gmra.mxu1 %v14112_v54 }
 0x2e4   : > { %v2971_v21 = vrot.slane %v7929_v40, 7  ;;  %v2917_v15 = vrot.slane %v7928_v18, 7  ;;  %3773 = vmatmul.mubr.bf16.gmra.mxu0 %v2624_v59  ;;  %v3831_v46 = vadd.f32 %v10703_v51, %v3830_v52  ;;  %v4600_v7 = vrot.slane %v10721_v30, 1  ;;  %v3400_v59 = vpop.permute.xlu1 %3399 }
 0x2e5   : > { %v3832_v47 = vpop.f32.mrf.mxu1  ;;  %v3452_v61 = vpop.permute.xlu0 %3451 }
 0x2e6   : > { %v2973_v29 = vsel %vm14113_vm13, %v2971_v21, %v10645_v32  ;;  %v2974_v0 = vsel %vm14108_vm6, %v2970_v45, %v2971_v21  ;;  %v3027_v38 = vsel %vm14114_vm10, %v2917_v15, %v2918_v33  ;;  %v3028_v60 = vsel %vm14115_vm15, %v2916_v39, %v2917_v15  ;;  %vm14119_vm13 = vmmov %vm14100_vm2 }
 0x2e7   : > { %v10740_v5 = vmax.f32 %v3831_v46, 0.0  ;;  %v3833_v24 = vpop.f32.mrf.mxu1  ;;  %v3132_v8 = vpack.c.bf16 %v2973_v29, %v2974_v0  ;;  %v3045_v14 = vsel %vm14117_vm5, %v3028_v60, 0.0  ;;  %v2625_v32 = vpack.c.bf16 %v10451_v10, %v10390_v11 }
 0x2e8   : > { %v3834_v45 = vadd.f32 %v10703_v51, %v3833_v24  ;;  %v3105_v56 = vpack.c.bf16 %v3027_v38, %v3045_v14  ;;  %vm14120_vm6 = vcmp.lt.s32.totalorder %v8643_v3, 7 }
 0x2e9   : > { %v4601_v39 = vrot.slane %v10740_v5, 1  ;;  %v3835_v28 = vpop.f32.mrf.mxu1  ;;  %v7932_v16 = vpop.permute.xlu0 %7931  ;;  %v3579_v41 = vsel %vm14100_vm2, %v3132_v8, %v3452_v61  ;;  %vm14121_vm10 = vmmov %vm14120_vm6 }
 0x2ea   : > { %v10752_v19 = vmax.f32 %v3834_v45, 0.0  ;;  %v7934_v55 = vunpack.i.h.bf16 %v7932_v16  ;;  %v7933_v9 = vunpack.i.l.bf16 %v7932_v16  ;;  %3996 = vmatprep.mubr.bf16.mxu1 %v3579_v41  ;;  %v3471_v11 = vsel %vm14119_vm13, %v3105_v56, %v3398_v4  ;;  %vm14122_vm2 = vmmov %vm14115_vm15  ;;  %v3402_v16 = vpop.permute.xlu1 %3401 }
 0x2eb   : > { %3780 = vmatprep.mubr.bf16.mxu0 %v3471_v11  ;;  %3997 = vmatmul.mubr.bf16.gmra.mxu1 %v2652_v48  ;;  %v10760_v10 = vsel %vm14120_vm6, %v4600_v7, %v4601_v39  ;;  %v10766_v27 = vsel %vm14121_vm10, %v13640_v35, %v4600_v7  ;;  %vm14124_vm13 = vmmov %vm14120_vm6  ;;  %vm14126_vm6 = vcmask 523264  }
 0x2ec   : > { %14118 = vst [vmem:[#allocation35_spill] sm:$0xff] %v10752_v19  ;;  %v4602_v53 = vrot.slane %v10752_v19, 1  ;;  %v2920_v25 = vrot.slane %v7934_v55, 7  ;;  %v2919_v2 = vrot.slane %v7933_v9, 7  ;;  %3781 = vmatmul.mubr.bf16.gmra.mxu0 %v2625_v32  ;;  %v3838_v44 = vpop.f32.mrf.mxu1  ;;  %vm14127_vm10 = vmmov %vm14122_vm2  ;;  %v14131_v9 = vpack.c.bf16 %v14051_v26, %v9781_v43 }
 0x2ed   : > { %v3839_v57 = vadd.f32 %v10703_v51, %v3838_v44  ;;  %v7937_v48 = vpop.permute.xlu0 %7936 }
 0x2ee   : > { %v7939_v40 = vunpack.i.h.bf16 %v7937_v48  ;;  %v7938_v18 = vunpack.i.l.bf16 %v7937_v48  ;;  %v3840_v52 = vpop.f32.mrf.mxu1  ;;  %v3025_v54 = vsel %vm14115_vm15, %v2919_v2, %v2920_v25  ;;  %v3026_v21 = vsel %vm14122_vm2, %v2918_v33, %v2919_v2  ;;  %vm14128_vm15 = vmmov %vm14122_vm2 }
 0x2ef   : > { %v10778_v15 = vmax.f32 %v3839_v57, 0.0  ;;  %v3106_v46 = vpack.c.bf16 %v3025_v54, %v3026_v21  ;;  %v10782_v47 = vsel %vm14124_vm13, %v4601_v39, %v4602_v53  ;;  %vm14129_vm2 = vmmov %vm14124_vm13 }
 0x2f0   : > { %14125 = vst [vmem:[#allocation37_spill] sm:$0xff] %v10782_v47  ;;  %v2922_v61 = vrot.slane %v7939_v40, 7  ;;  %v2921_v29 = vrot.slane %v7938_v18, 7  ;;  %v3841_v0 = vpop.f32.mrf.mxu1  ;;  %vm14132_vm13 = vmmov %vm14126_vm6 }
 0x2f1   : > { %14123 = vst [vmem:[#allocation36_spill] sm:$0xff] %v10778_v15  ;;  %v4603_v38 = vrot.slane %v10778_v15, 1  ;;  %v3842_v7 = vadd.f32 %v10703_v51, %v3841_v0  ;;  %v7942_v24 = vpop.permute.xlu0 %7941  ;;  %v3475_v33 = vsel %vm14126_vm6, %v3106_v46, %v3400_v59  ;;  %vm14133_vm6 = vmmov %vm14127_vm10 }
 0x2f2   : > { %v7944_v8 = vunpack.i.h.bf16 %v7942_v24  ;;  %v7943_v14 = vunpack.i.l.bf16 %v7942_v24  ;;  %3788 = vmatprep.mubr.bf16.mxu0 %v3475_v33  ;;  %v3843_v32 = vpop.f32.mrf.mxu1  ;;  %v3023_v4 = vsel %vm14127_vm10, %v2921_v29, %v2922_v61  ;;  %v3024_v45 = vsel %vm14128_vm15, %v2920_v25, %v2921_v29  ;;  %vm14134_vm10 = vmmov %vm14133_vm6  ;;  %v3404_v33 = vpop.permute.xlu1 %3403 }
 0x2f3   : > { %v10793_v56 = vmax.f32 %v3842_v7, 0.0  ;;  %v3107_v39 = vpack.c.bf16 %v3023_v4, %v3024_v45  ;;  %v10797_v28 = vsel %vm14129_vm2, %v4602_v53, %v4603_v38  ;;  %vm14136_vm15 = vmmov %vm14129_vm2  ;;  %v14141_v32 = vpack.c.bf16 %v14054_v12, %v14055_v17 }
 0x2f4   : > { %14130 = vst [vmem:[#allocation38_spill] sm:$0xff] %v10797_v28  ;;  %v2924_v41 = vrot.slane %v7944_v8, 7  ;;  %v2923_v55 = vrot.slane %v7943_v14, 7  ;;  %3789 = vmatmul.mubr.bf16.gmra.mxu0 %v14131_v9  ;;  %vm14137_vm2 = vmmov %vm14133_vm6 }
 0x2f5   : > { %v3846_v11 = vpop.f32.mrf.mxu1  ;;  %v4604_v44 = vrot.slane %v10793_v56, 1  ;;  %v2750_v53 = vpop.permute.xlu0 %2749  ;;  %v3479_v48 = vsel %vm14132_vm13, %v3107_v39, %v3402_v16  ;;  %vm14138_vm13 = vmmov %vm14136_vm15 }
 0x2f6   : > { %v3847_v57 = vadd.f32 %v10703_v51, %v3846_v11  ;;  %v2925_v59 = vrot.slane %v2750_v53, 7  ;;  %3796 = vmatprep.mubr.bf16.mxu0 %v3479_v48  ;;  %v3021_v43 = vsel %vm14133_vm6, %v2923_v55, %v2924_v41  ;;  %v3022_v26 = vsel %vm14134_vm10, %v2922_v61, %v2923_v55  ;;  %vm14140_vm6 = vmmov %vm14137_vm2  ;;  %v14144_v11 = vld [vmem:[#allocation4_spill] sm:$0xff] }
 0x2f7   : > { %v3848_v40 = vpop.f32.mrf.mxu1  ;;  %v4685_v52 = vsel %vm14136_vm15, %v4603_v38, %v4604_v44  ;;  %v3108_v21 = vpack.c.bf16 %v3021_v43, %v3022_v26  ;;  %v14139_v38 = vld [vmem:[#allocation32_spill] sm:$0xff]  ;;  %vm14142_vm10 = vcmask 523264   ;;  %vm14145_vm15 = vnez %v14144_v11 }
 0x2f8   : > { %v10813_v18 = vmax.f32 %v3847_v57, 0.0  ;;  %v3020_v7 = vsel %vm14137_vm2, %v2924_v41, %v2925_v59  ;;  %v3019_v14 = vsel %vm14140_vm6, %v2925_v59, %v14139_v38  ;;  %vm14148_vm2 = vmmov %vm14138_vm13 }
 0x2f9   : > { %v3849_v54 = vpop.f32.mrf.mxu1  ;;  %v3483_v45 = vsel %vm14142_vm10, %v3108_v21, %v3404_v33  ;;  %v3406_v21 = vpop.permute.xlu1 %3405  ;;  %vm14153_vm6 = vmmov %vm14142_vm10 }
 0x2fa   : > { %14135 = vst [vmem:[#allocation39_spill] sm:$0xff] %v10813_v18  ;;  %v4605_v46 = vrot.slane %v10813_v18, 1  ;;  %v3850_v0 = vadd.f32 %v10703_v51, %v3849_v54  ;;  %vm14155_vm10 = vmmov %vm14148_vm2 }
 0x2fb   : > { %v3851_v24 = vpop.f32.mrf.mxu1 }
 0x2fc   : > { %v10823_v61 = vmax.f32 %v3850_v0, 0.0  ;;  %v4684_v8 = vsel %vm14138_vm13, %v4604_v44, %v4605_v46  ;;  %3797 = vmatmul.mubr.bf16.gmra.mxu0 %v14141_v32  ;;  %v3053_v44 = vsel %vm14145_vm15, %v3020_v7, 0.0  ;;  %vm14150_vm13 = vmmov %vm14148_vm2 }
 0x2fd   : > { %v3854_v4 = vpop.f32.mrf.mxu1  ;;  %v4732_v16 = vsel %vm9303_vm12, %v4684_v8, 0.0  ;;  %3804 = vmatprep.mubr.bf16.mxu0 %v3483_v45  ;;  %v3109_v59 = vpack.c.bf16 %v3019_v14, %v3053_v44 }
 0x2fe   : > { %v4606_v55 = vrot.slane %v10823_v61, 1  ;;  %v3855_v9 = vadd.f32 %v10703_v51, %v3854_v4  ;;  %v10842_v12 = vpack.c.bf16 %v4732_v16, %v4685_v52 }
 0x2ff   : > { %v3856_v57 = vpop.f32.mrf.mxu1  ;;  %v3487_v24 = vsel %vm14153_vm6, %v3109_v59, %v3406_v21  ;;  %vm14164_vm6 = vmmov %vm14148_vm2 }
 0x300   : > { %14146 = vst [vmem:[#allocation41_spill] sm:$0xff] %v10842_v12  ;;  %v10844_v17 = vmax.f32 %v3855_v9, 0.0  ;;  %v10848_v53 = vsel %vm14148_vm2, %v4605_v46, %v4606_v55  ;;  %v14152_v46 = vpack.c.bf16 %v14062_v63, %v14063_v22  ;;  %v14157_v9 = vld [vmem:[#allocation19_spill] sm:$0xff] }
 0x301   : > { %14149 = vst [vmem:[#allocation43_spill] sm:$0xff] %v10848_v53  ;;  %v3857_v48 = vpop.f32.mrf.mxu1  ;;  %v2629_v44 = vpack.c.bf16 %v14157_v9, %v14066_v37 }
 0x302   : > { %14147 = vst [vmem:[#allocation42_spill] sm:$0xff] %v10844_v17  ;;  %v4607_v40 = vrot.slane %v10844_v17, 1  ;;  %v3858_v26 = vadd.f32 %v10703_v51, %v3857_v48 }
 0x303   : > { %v3859_v54 = vpop.f32.mrf.mxu1 }
 0x304   : > { %v10854_v0 = vmax.f32 %v3858_v26, 0.0  ;;  %v10858_v52 = vsel %vm14150_vm13, %v4606_v55, %v4607_v40  ;;  %3805 = vmatmul.mubr.bf16.gmra.mxu0 %v14152_v46  ;;  %vm14161_vm13 = vmmov %vm14148_vm2 }
 0x305   : > { %14151 = vst [vmem:[#allocation21_spill] sm:$0xff] %v10858_v52  ;;  %v3862_v7 = vpop.f32.mrf.mxu1  ;;  %3812 = vmatprep.mubr.bf16.mxu0 %v3487_v24 }
 0x306   : > { %v4608_v38 = vrot.slane %v10854_v0, 1  ;;  %v3863_v14 = vadd.f32 %v10703_v51, %v3862_v7 }
 0x307   : > { %v3864_v32 = vpop.f32.mrf.mxu1 }
 0x308   : > { %v10870_v4 = vmax.f32 %v3863_v14, 0.0  ;;  %v10874_v63 = vsel %vm14155_vm10, %v4607_v40, %v4608_v38  ;;  %vm14167_vm10 = vmmov %vm14148_vm2 }
 0x309   : > { %14156 = vst [vmem:[#allocation11_spill] sm:$0xff] %v10874_v63  ;;  %v3865_v22 = vpop.f32.mrf.mxu1 }
 0x30a   : > { %14154 = vst [vmem:[#allocation20_spill] sm:$0xff] %v10870_v4  ;;  %v4609_v45 = vrot.slane %v10870_v4, 1  ;;  %v3866_v55 = vadd.f32 %v10703_v51, %v3865_v22 }
 0x30b   : > { %v3867_v57 = vpop.f32.mrf.mxu1 }
 0x30c   : > { %v10882_v48 = vmax.f32 %v3866_v55, 0.0  ;;  %v10886_v59 = vsel %vm14148_vm2, %v4608_v38, %v4609_v45  ;;  %3813 = vmatmul.mubr.bf16.gmra.mxu0 %v2629_v44 }
 0x30d   : > { %14159 = vst [vmem:[#allocation12_spill] sm:$0xff] %v10886_v59  ;;  %v3870_v40 = vpop.f32.mrf.mxu1 }
 0x30e   : > { %14158 = vst [vmem:[#allocation14_spill] sm:$0xff] %v10882_v48  ;;  %v4610_v21 = vrot.slane %v10882_v48, 1  ;;  %v3871_v46 = vadd.f32 %v10703_v51, %v3870_v40 }
 0x30f   : > { %v3872_v37 = vpop.f32.mrf.mxu1 }
 0x310   : > { %v10894_v7 = vmax.f32 %v3871_v46, 0.0  ;;  %v10898_v24 = vsel %vm14161_vm13, %v4609_v45, %v4610_v21  ;;  %vm14172_vm13 = vmmov %vm14148_vm2 }
 0x311   : > { %14162 = vst [vmem:[#allocation22_spill] sm:$0xff] %v10898_v24  ;;  %v3873_v38 = vpop.f32.mrf.mxu1 }
 0x312   : > { %14160 = vst [vmem:[#allocation25_spill] sm:$0xff] %v10894_v7  ;;  %v4611_v14 = vrot.slane %v10894_v7, 1  ;;  %v3874_v22 = vadd.f32 %v10703_v51, %v3873_v38 }
 0x313   : > { %v3875_v55 = vpop.f32.mrf.mxu1 }
 0x314   : > { %v10904_v9 = vmax.f32 %v3874_v22, 0.0  ;;  %v10908_v44 = vsel %vm14164_vm6, %v4610_v21, %v4611_v14  ;;  %vm14175_vm6 = vmmov %vm14148_vm2 }
 0x315   : > { %14165 = vst [vmem:[#allocation15_spill] sm:$0xff] %v10908_v44  ;;  %v3878_v57 = vpop.f32.mrf.mxu1 }
 0x316   : > { %14163 = vst [vmem:[#allocation16_spill] sm:$0xff] %v10904_v9  ;;  %v4612_v46 = vrot.slane %v10904_v9, 1  ;;  %v3879_v37 = vadd.f32 %v10703_v51, %v3878_v57 }
 0x317   : > { %v3880_v54 = vpop.f32.mrf.mxu1 }
 0x318   : > { %v10916_v38 = vmax.f32 %v3879_v37, 0.0  ;;  %v4677_v22 = vsel %vm14167_vm10, %v4611_v14, %v4612_v46  ;;  %vm14178_vm10 = vmmov %vm14148_vm2 }
 0x319   : > { %v3881_v55 = vpop.f32.mrf.mxu1 }
 0x31a   : > { %14166 = vst [vmem:[#allocation17_spill] sm:$0xff] %v10916_v38  ;;  %v4613_v21 = vrot.slane %v10916_v38, 1  ;;  %v3882_v41 = vadd.f32 %v10703_v51, %v3881_v55 }
 0x31b   : > { %v3883_v25 = vpop.f32.mrf.mxu1 }
 0x31c   : > { %v10924_v40 = vmax.f32 %v3882_v41, 0.0  ;;  %v4676_v57 = vsel %vm14148_vm2, %v4612_v46, %v4613_v21 }
 0x31d   : > { %v3886_v54 = vpop.f32.mrf.mxu1  ;;  %v4740_v23 = vsel %vm9512_vm14, %v4676_v57, 0.0 }
 0x31e   : > { %14168 = vst [vmem:[#allocation27_spill] sm:$0xff] %v10924_v40  ;;  %v4614_v45 = vrot.slane %v10924_v40, 1  ;;  %v3887_v26 = vadd.f32 %v10703_v51, %v3886_v54  ;;  %v10934_v33 = vpack.c.bf16 %v4740_v23, %v4677_v22 }
 0x31f   : > { %v3888_v55 = vpop.f32.mrf.mxu1 }
 0x320   : > { %14170 = vst [vmem:[#allocation26_spill] sm:$0xff] %v10934_v33  ;;  %v10936_v25 = vmax.f32 %v3887_v26, 0.0  ;;  %v10940_v41 = vsel %vm14172_vm13, %v4613_v21, %v4614_v45  ;;  %vm14183_vm13 = vmmov %vm14148_vm2 }
 0x321   : > { %14173 = vst [vmem:[#allocation28_spill] sm:$0xff] %v10940_v41  ;;  %v3889_v46 = vpop.f32.mrf.mxu1 }
 0x322   : > { %14171 = vst [vmem:[#allocation29_spill] sm:$0xff] %v10936_v25  ;;  %v4615_v2 = vrot.slane %v10936_v25, 1  ;;  %v3890_v14 = vadd.f32 %v10703_v51, %v3889_v46 }
 0x323   : > { %v3891_v35 = vpop.f32.mrf.mxu1 }
 0x324   : > { %v10946_v42 = vmax.f32 %v3890_v14, 0.0  ;;  %v10950_v23 = vsel %vm14175_vm6, %v4614_v45, %v4615_v2  ;;  %vm14186_vm6 = vmmov %vm14148_vm2 }
 0x325   : > { %14176 = vst [vmem:[#allocation30_spill] sm:$0xff] %v10950_v23  ;;  %v3894_v26 = vpop.f32.mrf.mxu1 }
 0x326   : > { %14174 = vst [vmem:[#allocation33_spill] sm:$0xff] %v10946_v42  ;;  %v4616_v54 = vrot.slane %v10946_v42, 1  ;;  %v3895_v55 = vadd.f32 %v10703_v51, %v3894_v26 }
 0x327   : > { %v3896_v57 = vpop.f32.mrf.mxu1 }
 0x328   : > { %v10958_v46 = vmax.f32 %v3895_v55, 0.0  ;;  %v10962_v35 = vsel %vm14178_vm10, %v4615_v2, %v4616_v54  ;;  %vm14189_vm10 = vmmov %vm14148_vm2 }
 0x329   : > { %14179 = vst [vmem:[#allocation19_spill] sm:$0xff] %v10962_v35  ;;  %v3897_v45 = vpop.f32.mrf.mxu1 }
 0x32a   : > { %14177 = vst [vmem:[#allocation32_spill] sm:$0xff] %v10958_v46  ;;  %v4617_v14 = vrot.slane %v10958_v46, 1  ;;  %v3898_v8 = vadd.f32 %v10703_v51, %v3897_v45 }
 0x32b   : > { %v3899_v21 = vpop.f32.mrf.mxu1 }
 0x32c   : > { %v10968_v16 = vmax.f32 %v3898_v8, 0.0  ;;  %v10972_v57 = vsel %vm14148_vm2, %v4616_v54, %v4617_v14 }
 0x32d   : > { %14181 = vst [vmem:[#allocation45_spill] sm:$0xff] %v10972_v57  ;;  %v3902_v26 = vpop.f32.mrf.mxu1 }
 0x32e   : > { %14180 = vst [vmem:[#allocation44_spill] sm:$0xff] %v10968_v16  ;;  %v4618_v29 = vrot.slane %v10968_v16, 1  ;;  %v3903_v22 = vadd.f32 %v10703_v51, %v3902_v26 }
 0x32f   : > { %v3904_v32 = vpop.f32.mrf.mxu1 }
 0x330   : > { %v10980_v45 = vmax.f32 %v3903_v22, 0.0  ;;  %v10984_v8 = vsel %vm14183_vm13, %v4617_v14, %v4618_v29 }
 0x331   : > { %14184 = vst [vmem:[#allocation47_spill] sm:$0xff] %v10984_v8  ;;  %v3905_v21 = vpop.f32.mrf.mxu1 }
 0x332   : > { %14182 = vst [vmem:[#allocation46_spill] sm:$0xff] %v10980_v45  ;;  %v4619_v54 = vrot.slane %v10980_v45, 1  ;;  %v3906_v34 = vadd.f32 %v10703_v51, %v3905_v21 }
 0x333   : > { %v3907_v55 = vpop.f32.mrf.mxu1 }
 0x334   : > { %v10990_v43 = vmax.f32 %v3906_v34, 0.0  ;;  %v10994_v32 = vsel %vm14186_vm6, %v4618_v29, %v4619_v54  ;;  %vm14195_vm6 = vmmov %vm14148_vm2 }
 0x335   : > { %14187 = vst [vmem:[#allocation49_spill] sm:$0xff] %v10994_v32  ;;  %v3910_v22 = vpop.f32.mrf.mxu1 }
 0x336   : > { %14185 = vst [vmem:[#allocation48_spill] sm:$0xff] %v10990_v43  ;;  %v4620_v60 = vrot.slane %v10990_v43, 1  ;;  %v3911_v2 = vadd.f32 %v10703_v51, %v3910_v22 }
 0x337   : > { %v3912_v37 = vpop.f32.mrf.mxu1 }
 0x338   : > { %v11002_v21 = vmax.f32 %v3911_v2, 0.0  ;;  %v4669_v34 = vsel %vm14189_vm10, %v4619_v54, %v4620_v60  ;;  %v14191_v2 = vld [vmem:[#allocation7_spill] sm:$0xff]  ;;  %vm14198_vm10 = vmmov %vm14148_vm2 }
 0x339   : > { %v3913_v55 = vpop.f32.mrf.mxu1  ;;  %vm14192_vm13 = vnez %v14191_v2 }
 0x33a   : > { %14188 = vst [vmem:[#allocation50_spill] sm:$0xff] %v11002_v21  ;;  %v4621_v29 = vrot.slane %v11002_v21, 1  ;;  %v3914_v14 = vadd.f32 %v10703_v51, %v3913_v55 }
 0x33b   : > { %v3915_v20 = vpop.f32.mrf.mxu1 }
 0x33c   : > { %v11010_v26 = vmax.f32 %v3914_v14, 0.0  ;;  %v4668_v22 = vsel %vm14148_vm2, %v4620_v60, %v4621_v29 }
 0x33d   : > { %v3918_v37 = vpop.f32.mrf.mxu1  ;;  %v4748_v35 = vsel %vm14192_vm13, %v4668_v22, 0.0 }
 0x33e   : > { %14190 = vst [vmem:[#allocation51_spill] sm:$0xff] %v11010_v26  ;;  %v4622_v57 = vrot.slane %v11010_v26, 1  ;;  %v3919_v33 = vadd.f32 %v10703_v51, %v3918_v37  ;;  %v11020_v39 = vpack.c.bf16 %v4748_v35, %v4669_v34 }
 0x33f   : > { %v3920_v55 = vpop.f32.mrf.mxu1 }
 0x340   : > { %14193 = vst [vmem:[#allocation52_spill] sm:$0xff] %v11020_v39  ;;  %v11022_v20 = vmax.f32 %v3919_v33, 0.0  ;;  %v11026_v14 = vsel %vm14195_vm6, %v4621_v29, %v4622_v57  ;;  %vm14203_vm6 = vmmov %vm14148_vm2 }
 0x341   : > { %14196 = vst [vmem:[#allocation54_spill] sm:$0xff] %v11026_v14  ;;  %v3921_v60 = vpop.f32.mrf.mxu1 }
 0x342   : > { %14194 = vst [vmem:[#allocation53_spill] sm:$0xff] %v11022_v20  ;;  %v4623_v2 = vrot.slane %v11022_v20, 1  ;;  %v3922_v54 = vadd.f32 %v10703_v51, %v3921_v60 }
 0x343   : > { %v3923_v50 = vpop.f32.mrf.mxu1 }
 0x344   : > { %v11032_v13 = vmax.f32 %v3922_v54, 0.0  ;;  %v11036_v35 = vsel %vm14198_vm10, %v4622_v57, %v4623_v2  ;;  %vm14206_vm10 = vmmov %vm14148_vm2 }
 0x345   : > { %14199 = vst [vmem:[#allocation56_spill] sm:$0xff] %v11036_v35  ;;  %v3926_v33 = vpop.f32.mrf.mxu1 }
 0x346   : > { %14197 = vst [vmem:[#allocation55_spill] sm:$0xff] %v11032_v13  ;;  %v4624_v37 = vrot.slane %v11032_v13, 1  ;;  %v3927_v55 = vadd.f32 %v10703_v51, %v3926_v33 }
 0x347   : > { %v3928_v22 = vpop.f32.mrf.mxu1 }
 0x348   : > { %v11044_v60 = vmax.f32 %v3927_v55, 0.0  ;;  %v11048_v50 = vsel %vm14148_vm2, %v4623_v2, %v4624_v37 }
 0x349   : > { %14201 = vst [vmem:[#allocation58_spill] sm:$0xff] %v11048_v50  ;;  %v3929_v57 = vpop.f32.mrf.mxu1 }
 0x34a   : > { %14200 = vst [vmem:[#allocation57_spill] sm:$0xff] %v11044_v60  ;;  %v4625_v54 = vrot.slane %v11044_v60, 1  ;;  %v3930_v39 = vadd.f32 %v10703_v51, %v3929_v57 }
 0x34b   : > { %v3931_v29 = vpop.f32.mrf.mxu1 }
 0x34c   : > { %v11054_v14 = vmax.f32 %v3930_v39, 0.0  ;;  %v11058_v22 = vsel %vm14203_vm6, %v4624_v37, %v4625_v54  ;;  %vm14211_vm6 = vmmov %vm14148_vm2 }
 0x34d   : > { %14204 = vst [vmem:[#allocation60_spill] sm:$0xff] %v11058_v22  ;;  %v3934_v33 = vpop.f32.mrf.mxu1 }
 0x34e   : > { %14202 = vst [vmem:[#allocation59_spill] sm:$0xff] %v11054_v14  ;;  %v4626_v35 = vrot.slane %v11054_v14, 1  ;;  %v3935_v34 = vadd.f32 %v10703_v51, %v3934_v33 }
 0x34f   : > { %v3936_v8 = vpop.f32.mrf.mxu1 }
 0x350   : > { %v11066_v57 = vmax.f32 %v3935_v34, 0.0  ;;  %v11070_v39 = vsel %vm14206_vm10, %v4625_v54, %v4626_v35  ;;  %vm14213_vm10 = vmmov %vm14148_vm2 }
 0x351   : > { %14207 = vst [vmem:[#allocation62_spill] sm:$0xff] %v11070_v39  ;;  %v3937_v29 = vpop.f32.mrf.mxu1 }
 0x352   : > { %14205 = vst [vmem:[#allocation61_spill] sm:$0xff] %v11066_v57  ;;  %v4627_v37 = vrot.slane %v11066_v57, 1  ;;  %v3938_v50 = vadd.f32 %v10703_v51, %v3937_v29 }
 0x353   : > { %v3939_v55 = vpop.f32.mrf.mxu1 }
 0x354   : > { %v11076_v22 = vmax.f32 %v3938_v50, 0.0  ;;  %v11080_v8 = vsel %vm14148_vm2, %v4626_v35, %v4627_v37 }
 0x355   : > { %14209 = vst [vmem:[#allocation64_spill] sm:$0xff] %v11080_v8  ;;  %v3942_v34 = vpop.f32.mrf.mxu1 }
 0x356   : > { %14208 = vst [vmem:[#allocation63_spill] sm:$0xff] %v11076_v22  ;;  %v4628_v32 = vrot.slane %v11076_v22, 1  ;;  %v3943_v2 = vadd.f32 %v10703_v51, %v3942_v34 }
 0x357   : > { %v3944_v11 = vpop.f32.mrf.mxu1 }
 0x358   : > { %v11088_v29 = vmax.f32 %v3943_v2, 0.0  ;;  %v4661_v50 = vsel %vm14211_vm6, %v4627_v37, %v4628_v32  ;;  %vm14219_vm6 = vmmov %vm14148_vm2 }
 0x359   : > { %v3945_v55 = vpop.f32.mrf.mxu1 }
 0x35a   : > { %14210 = vst [vmem:[#allocation65_spill] sm:$0xff] %v11088_v29  ;;  %v4629_v35 = vrot.slane %v11088_v29, 1  ;;  %v3946_v54 = vadd.f32 %v10703_v51, %v3945_v55 }
 0x35b   : > { %v3947_v39 = vpop.f32.mrf.mxu1 }
 0x35c   : > { %v11096_v33 = vmax.f32 %v3946_v54, 0.0  ;;  %v4660_v34 = vsel %vm14213_vm10, %v4628_v32, %v4629_v35  ;;  %vm14222_vm10 = vmmov %vm14148_vm2 }
 0x35d   : > { %v3950_v11 = vpop.f32.mrf.mxu1  ;;  %v4756_v8 = vsel %vm9606_vm1, %v4660_v34, 0.0 }
 0x35e   : > { %14212 = vst [vmem:[#allocation66_spill] sm:$0xff] %v11096_v33  ;;  %v4630_v23 = vrot.slane %v11096_v33, 1  ;;  %v3951_v58 = vadd.f32 %v10703_v51, %v3950_v11  ;;  %v11106_v41 = vpack.c.bf16 %v4756_v8, %v4661_v50 }
 0x35f   : > { %v3952_v55 = vpop.f32.mrf.mxu1 }
 0x360   : > { %14215 = vst [vmem:[#allocation67_spill] sm:$0xff] %v11106_v41  ;;  %v11108_v39 = vmax.f32 %v3951_v58, 0.0  ;;  %v11112_v54 = vsel %vm14148_vm2, %v4629_v35, %v4630_v23 }
 0x361   : > { %14217 = vst [vmem:[#allocation69_spill] sm:$0xff] %v11112_v54  ;;  %v3953_v32 = vpop.f32.mrf.mxu1 }
 0x362   : > { %14216 = vst [vmem:[#allocation68_spill] sm:$0xff] %v11108_v39  ;;  %v4631_v2 = vrot.slane %v11108_v39, 1  ;;  %v3954_v37 = vadd.f32 %v10703_v51, %v3953_v32 }
 0x363   : > { %v3955_v1 = vpop.f32.mrf.mxu1 }
 0x364   : > { %v11118_v49 = vmax.f32 %v3954_v37, 0.0  ;;  %v11122_v8 = vsel %vm14219_vm6, %v4630_v23, %v4631_v2  ;;  %vm14226_vm6 = vmmov %vm14148_vm2 }
 0x365   : > { %14220 = vst [vmem:[#allocation71_spill] sm:$0xff] %v11122_v8  ;;  %v3958_v58 = vpop.f32.mrf.mxu1 }
 0x366   : > { %14218 = vst [vmem:[#allocation70_spill] sm:$0xff] %v11118_v49  ;;  %v4632_v11 = vrot.slane %v11118_v49, 1  ;;  %v3959_v55 = vadd.f32 %v10703_v51, %v3958_v58 }
 0x367   : > { %v3960_v34 = vpop.f32.mrf.mxu1 }
 0x368   : > { %v11130_v32 = vmax.f32 %v3959_v55, 0.0  ;;  %v11134_v1 = vsel %vm14222_vm10, %v4631_v2, %v4632_v11  ;;  %vm14230_vm10 = vmmov %vm14148_vm2 }
 0x369   : > { %14223 = vst [vmem:[#allocation73_spill] sm:$0xff] %v11134_v1  ;;  %v3961_v23 = vpop.f32.mrf.mxu1 }
 0x36a   : > { %14221 = vst [vmem:[#allocation72_spill] sm:$0xff] %v11130_v32  ;;  %v4633_v37 = vrot.slane %v11130_v32, 1  ;;  %v3962_v41 = vadd.f32 %v10703_v51, %v3961_v23 }
 0x36b   : > { %v3963_v35 = vpop.f32.mrf.mxu1 }
 0x36c   : > { %v11140_v54 = vmax.f32 %v3962_v41, 0.0  ;;  %v11144_v34 = vsel %vm14148_vm2, %v4632_v11, %v4633_v37 }
 0x36d   : > { %14225 = vst [vmem:[#allocation75_spill] sm:$0xff] %v11144_v34 }
 0x36e   : > { %14224 = vst [vmem:[#allocation74_spill] sm:$0xff] %v11140_v54  ;;  %v4634_v55 = vrot.slane %v11140_v54, 1 }
 0x370   : > { %v11153_v50 = vsel %vm14226_vm6, %v4633_v37, %v4634_v55  ;;  %vm14235_vm6 = vmmov %vm14148_vm2 }
 0x371   : > { %14227 = vst [vmem:[#allocation76_spill] sm:$0xff] %v11153_v50 }
 0x38b   : > { %v3966_v23 = vpop.f32.mrf.mxu1 }
 0x38c   : > { %v3967_v41 = vadd.f32 %v10703_v51, %v3966_v23  ;;  %v3750_v35 = vpop.f32.mrf.mxu0 }
 0x38d   : > { %v3968_v8 = vpop.f32.mrf.mxu1  ;;  %v3751_v44 = vadd.f32 %v10703_v51, %v3750_v35 }
 0x38e   : > { %v11156_v24 = vmax.f32 %v3967_v41, 0.0  ;;  %v3752_v11 = vpop.f32.mrf.mxu0 }
 0x38f   : > { %v3969_v58 = vpop.f32.mrf.mxu1  ;;  %v11170_v35 = vmax.f32 %v3751_v44, 0.0 }
 0x390   : > { %14228 = vst [vmem:[#allocation77_spill] sm:$0xff] %v11156_v24  ;;  %v4635_v1 = vrot.slane %v11156_v24, 1  ;;  %v3970_v34 = vadd.f32 %v10703_v51, %v3969_v58  ;;  %v3753_v37 = vpop.f32.mrf.mxu0 }
 0x391   : > { %v3754_v63 = vadd.f32 %v10703_v51, %v3753_v37  ;;  %v3971_v59 = vpop.f32.mrf.mxu1 }
 0x392   : > { %v11164_v23 = vmax.f32 %v3970_v34, 0.0  ;;  %v3755_v8 = vpop.f32.mrf.mxu0  ;;  %v11168_v41 = vsel %vm14230_vm10, %v4634_v55, %v4635_v1  ;;  %vm14236_vm10 = vmmov %vm14148_vm2 }
 0x393   : > { %14231 = vst [vmem:[#allocation79_spill] sm:$0xff] %v11168_v41  ;;  %v11172_v11 = vmax.f32 %v3754_v63, 0.0  ;;  %v3974_v2 = vpop.f32.mrf.mxu1 }
 0x394   : > { %14229 = vst [vmem:[#allocation78_spill] sm:$0xff] %v11164_v23  ;;  %v4636_v59 = vrot.slane %v11164_v23, 1  ;;  %v3975_v34 = vadd.f32 %v10703_v51, %v3974_v2  ;;  %v3758_v37 = vpop.f32.mrf.mxu0 }
 0x395   : > { %14232 = vst [vmem:[#allocation80_spill] sm:$0xff] %v11172_v11  ;;  %v3759_v44 = vadd.f32 %v10703_v51, %v3758_v37  ;;  %v3976_v8 = vpop.f32.mrf.mxu1  ;;  %v4582_v50 = vrot.slane %v11172_v11, 1 }
 0x396   : > { %v11183_v63 = vmax.f32 %v3975_v34, 0.0  ;;  %v3760_v52 = vpop.f32.mrf.mxu0  ;;  %v4653_v53 = vsel %vm14148_vm2, %v4635_v1, %v4636_v59 }
 0x397   : > { %v11188_v58 = vmax.f32 %v3759_v44, 0.0  ;;  %v3977_v41 = vpop.f32.mrf.mxu1 }
 0x398   : > { %14233 = vst [vmem:[#allocation81_spill] sm:$0xff] %v11183_v63  ;;  %v4637_v2 = vrot.slane %v11183_v63, 1  ;;  %v3978_v55 = vadd.f32 %v10703_v51, %v3977_v41  ;;  %v3761_v37 = vpop.f32.mrf.mxu0 }
 0x399   : > { %v13669_v52 = vrot.slane %v11188_v58, 1  ;;  %v7950_v1 = vpack.i.bf16 %v11188_v58, %v11172_v11  ;;  %v3762_v8 = vadd.f32 %v10703_v51, %v3761_v37  ;;  %v3979_v44 = vpop.f32.mrf.mxu1  ;;  %v14237_v37 = vrot.slane %v11170_v35, 1 }
 0x39a   : > { %v11199_v47 = vmax.f32 %v3978_v55, 0.0  ;;  %v3763_v28 = vpop.f32.mrf.mxu0  ;;  %v4652_v54 = vsel %vm14235_vm6, %v4636_v59, %v4637_v2  ;;  %vm14240_vm6 = vmmov %vm14148_vm2 }
 0x39b   : > { %v11203_v12 = vmax.f32 %v3762_v8, 0.0  ;;  %v3982_v41 = vpop.f32.mrf.mxu1  ;;  %7951 = vrot.lane.b32.xlu1 %v7950_v1, %s8578_s29  ;;  %v11210_v34 = vsel %vm14236_vm10, %v4582_v50, %v13669_v52  ;;  %v11216_v28 = vsel %vm14148_vm2, %v14237_v37, %v4582_v50  ;;  %v4764_v59 = vsel %vm9657_vm3, %v4652_v54, 0.0  ;;  %vm14244_vm10 = vmmov %vm14148_vm2 }
 0x39c   : > { %14234 = vst [vmem:[#allocation82_spill] sm:$0xff] %v11199_v47  ;;  %v4638_v1 = vrot.slane %v11199_v47, 1  ;;  %v3983_v8 = vadd.f32 %v10703_v51, %v3982_v41  ;;  %v3766_v44 = vpop.f32.mrf.mxu0  ;;  %v11228_v50 = vpack.c.bf16 %v4764_v59, %v4653_v53  ;;  %v14242_v52 = vpack.i.bf16 %v10778_v15, %v10752_v19 }
 0x39d   : > { %v3984_v23 = vpop.f32.mrf.mxu1  ;;  %v3767_v62 = vadd.f32 %v10703_v51, %v3766_v44 }
 0x39e   : > { %14238 = vst [vmem:[#allocation83_spill] sm:$0xff] %v11228_v50  ;;  %v11230_v37 = vmax.f32 %v3983_v8, 0.0  ;;  %v3768_v54 = vpop.f32.mrf.mxu0  ;;  %v11234_v55 = vsel %vm14240_vm6, %v4637_v2, %v4638_v1  ;;  %vm14249_vm6 = vmmov %vm14148_vm2 }
 0x39f   : > { %14241 = vst [vmem:[#allocation85_spill] sm:$0xff] %v11234_v55  ;;  %v3985_v41 = vpop.f32.mrf.mxu1  ;;  %7966 = vrot.lane.b32.xlu1 %v14242_v52, %s8578_s29  ;;  %v11252_v15 = vmax.f32 %v3767_v62, 0.0 }
 0x3a0   : > { %14239 = vst [vmem:[#allocation84_spill] sm:$0xff] %v11230_v37  ;;  %v4639_v53 = vrot.slane %v11230_v37, 1  ;;  %v3986_v59 = vadd.f32 %v10703_v51, %v3985_v41  ;;  %v3769_v8 = vpop.f32.mrf.mxu0 }
 0x3a1   : > { %v3770_v54 = vadd.f32 %v10703_v51, %v3769_v8  ;;  %v3987_v2 = vpop.f32.mrf.mxu1 }
 0x3a2   : > { %v11246_v11 = vmax.f32 %v3986_v59, 0.0  ;;  %v3771_v44 = vpop.f32.mrf.mxu0  ;;  %v11250_v50 = vsel %vm14244_vm10, %v4638_v1, %v4639_v53  ;;  %vm14252_vm10 = vmmov %vm14148_vm2 }
 0x3a3   : > { %14245 = vst [vmem:[#allocation87_spill] sm:$0xff] %v11250_v50  ;;  %v11254_v52 = vmax.f32 %v3770_v54, 0.0  ;;  %v3990_v23 = vpop.f32.mrf.mxu1 }
 0x3a4   : > { %14243 = vst [vmem:[#allocation86_spill] sm:$0xff] %v11246_v11  ;;  %v4640_v8 = vrot.slane %v11246_v11, 1  ;;  %v3991_v59 = vadd.f32 %v10703_v51, %v3990_v23  ;;  %v3774_v2 = vpop.f32.mrf.mxu0  ;;  %v14254_v23 = vpack.i.bf16 %v10844_v17, %v10823_v61 }
 0x3a5   : > { %v3775_v62 = vadd.f32 %v10703_v51, %v3774_v2  ;;  %v3992_v44 = vpop.f32.mrf.mxu1 }
 0x3a6   : > { %v11265_v54 = vmax.f32 %v3991_v59, 0.0  ;;  %v3776_v63 = vpop.f32.mrf.mxu0  ;;  %v11269_v19 = vsel %vm14148_vm2, %v4639_v53, %v4640_v8 }
 0x3a7   : > { %14247 = vst [vmem:[#allocation89_spill] sm:$0xff] %v11269_v19  ;;  %v11271_v55 = vmax.f32 %v3775_v62, 0.0  ;;  %v3993_v41 = vpop.f32.mrf.mxu1 }
 0x3a8   : > { %14246 = vst [vmem:[#allocation88_spill] sm:$0xff] %v11265_v54  ;;  %v4641_v50 = vrot.slane %v11265_v54, 1  ;;  %v3994_v1 = vadd.f32 %v10703_v51, %v3993_v41  ;;  %v3777_v47 = vpop.f32.mrf.mxu0 }
 0x3a9   : > { %v7970_v59 = vpack.i.bf16 %v11271_v55, %v11254_v52  ;;  %v3778_v63 = vadd.f32 %v10703_v51, %v3777_v47  ;;  %v3995_v2 = vpop.f32.mrf.mxu1 }
 0x3aa   : > { %v11280_v44 = vmax.f32 %v3994_v1, 0.0  ;;  %v3779_v53 = vpop.f32.mrf.mxu0  ;;  %v11284_v62 = vsel %vm14249_vm6, %v4640_v8, %v4641_v50  ;;  %vm14257_vm6 = vmmov %vm14148_vm2 }
 0x3ab   : > { %14250 = vst [vmem:[#allocation91_spill] sm:$0xff] %v11284_v62  ;;  %v11286_v37 = vmax.f32 %v3778_v63, 0.0  ;;  %v3998_v24 = vpop.f32.mrf.mxu1  ;;  %7971 = vrot.lane.b32.xlu1 %v7970_v59, %s8578_s29 }
 0x3ac   : > { %14248 = vst [vmem:[#allocation90_spill] sm:$0xff] %v11280_v44  ;;  %v4642_v47 = vrot.slane %v11280_v44, 1  ;;  %v3999_v1 = vadd.f32 %v10703_v51, %v3998_v24  ;;  %v3782_v2 = vpop.f32.mrf.mxu0 }
 0x3ad   : > { %v4000_v53 = vpop.f32.mrf.mxu1  ;;  %v3783_v41 = vadd.f32 %v10703_v51, %v3782_v2 }
 0x3ae   : > { %v11297_v63 = vmax.f32 %v3999_v1, 0.0  ;;  %v3784_v11 = vpop.f32.mrf.mxu0  ;;  %v11301_v59 = vsel %vm14252_vm10, %v4641_v50, %v4642_v47  ;;  %v14258_v53 = vrot.slane %v11170_v35, 1  ;;  %vm14259_vm10 = vmmov %vm14148_vm2 }
 0x3af   : > { %14253 = vst [vmem:[#allocation93_spill] sm:$0xff] %v11301_v59  ;;  %v4001_v19 = vpop.f32.mrf.mxu1  ;;  %7986 = vrot.lane.b32.xlu1 %v14254_v23, %s8578_s29  ;;  %v11319_v17 = vmax.f32 %v3783_v41, 0.0 }
 0x3b0   : > { %14251 = vst [vmem:[#allocation92_spill] sm:$0xff] %v11297_v63  ;;  %v4643_v24 = vrot.slane %v11297_v63, 1  ;;  %v4002_v1 = vadd.f32 %v10703_v51, %v4001_v19  ;;  %v3785_v11 = vpop.f32.mrf.mxu0 }
 0x3b1   : > { %v3786_v8 = vadd.f32 %v10703_v51, %v3785_v11  ;;  %v4003_v50 = vpop.f32.mrf.mxu1 }
 0x3b2   : > { %v11313_v62 = vmax.f32 %v4002_v1, 0.0  ;;  %v3787_v2 = vpop.f32.mrf.mxu0  ;;  %v11317_v54 = vsel %vm14148_vm2, %v4642_v47, %v4643_v24  ;;  %v7955_v47 = vpack.i.bf16 %v11252_v15, %v11203_v12 }
 0x3b3   : > { %14256 = vst [vmem:[#allocation95_spill] sm:$0xff] %v11317_v54  ;;  %v11321_v23 = vmax.f32 %v3786_v8, 0.0 }
 0x3b4   : > { %14255 = vst [vmem:[#allocation94_spill] sm:$0xff] %v11313_v62  ;;  %v4644_v11 = vrot.slane %v11313_v62, 1  ;;  %v7945_v1 = vpack.i.bf16 %v11313_v62, %v11170_v35  ;;  %v3790_v50 = vpop.f32.mrf.mxu0 }
 0x3b5   : > { %v3791_v41 = vadd.f32 %v10703_v51, %v3790_v50 }
 0x3b6   : > { %v3792_v2 = vpop.f32.mrf.mxu0  ;;  %7946 = vrot.lane.b32.xlu0 %v7945_v1, %s8578_s29  ;;  %v4645_v8 = vsel %vm14257_vm6, %v4643_v24, %v4644_v11  ;;  %v4708_v19 = vsel %vm14259_vm10, %v4644_v11, %v14258_v53  ;;  %vm14272_vm6 = vmmov %vm14148_vm2 }
 0x3b7   : > { %v11340_v59 = vmax.f32 %v3791_v41, 0.0  ;;  %v4772_v62 = vsel %vm9754_vm4, %v4708_v19, 0.0  ;;  %vm14274_vm10 = vmmov %vm14148_vm2 }
 0x3b8   : > { %v3793_v50 = vpop.f32.mrf.mxu0  ;;  %v11346_v2 = vpack.c.bf16 %v4772_v62, %v4645_v8  ;;  %v14261_v62 = vpack.i.bf16 %v10740_v5, %v10721_v30  ;;  %vm14282_vm4 = vmmov %vm14148_vm2 }
 0x3b9   : > { %v7990_v1 = vpack.i.bf16 %v11340_v59, %v11321_v23  ;;  %v3794_v24 = vadd.f32 %v10703_v51, %v3793_v50 }
 0x3ba   : > { %14260 = vst [vmem:[#allocation96_spill] sm:$0xff] %v11346_v2  ;;  %v3795_v54 = vpop.f32.mrf.mxu0  ;;  %7956 = vrot.lane.b32.xlu0 %v7955_v47, %s8578_s29  ;;  %v7975_v47 = vpack.i.bf16 %v11319_v17, %v11286_v37 }
 0x3bb   : > { %v11352_v53 = vmax.f32 %v3794_v24, 0.0  ;;  %7991 = vrot.lane.b32.xlu1 %v7990_v1, %s8578_s29  ;;  %v14262_v54 = vpack.i.bf16 %v10894_v7, %v10882_v48  ;;  %v14264_v48 = vpack.i.bf16 %v10870_v4, %v10854_v0 }
 0x3bc   : > { %v3798_v11 = vpop.f32.mrf.mxu0 }
 0x3bd   : > { %v3799_v8 = vadd.f32 %v10703_v51, %v3798_v11 }
 0x3be   : > { %v3800_v41 = vpop.f32.mrf.mxu0  ;;  %7961 = vrot.lane.b32.xlu0 %v14261_v62, %s8578_s29 }
 0x3bf   : > { %8006 = vrot.lane.b32.xlu1 %v14262_v54, %s8578_s29  ;;  %v11370_v41 = vmax.f32 %v3799_v8, 0.0  ;;  %v8566_v54 = vld [vmem:[%s13494_s4] ss:$0 sm:$0xff] }
 0x3c0   : > { %v3801_v50 = vpop.f32.mrf.mxu0 }
 0x3c1   : > { %v3802_v1 = vadd.f32 %v10703_v51, %v3801_v50  ;;  %v14263_v51 = vpack.i.bf16 %v10813_v18, %v10793_v56  ;;  %v7995_v8 = vpack.i.bf16 %v11370_v41, %v11352_v53 }
 0x3c2   : > { %v3803_v24 = vpop.f32.mrf.mxu0  ;;  %7976 = vrot.lane.b32.xlu0 %v7975_v47, %s8578_s29 }
 0x3c3   : > { %v11372_v19 = vmax.f32 %v3802_v1, 0.0 }
 0x3c4   : > { %v3806_v62 = vpop.f32.mrf.mxu0 }
 0x3c5   : > { %v3807_v36 = vadd.f32 %v8566_v54, %v3806_v62 }
 0x3c6   : > { %v3808_v2 = vpop.f32.mrf.mxu0  ;;  %7981 = vrot.lane.b32.xlu0 %v14263_v51, %s8578_s29 }
 0x3c7   : > { %v11383_v47 = vmax.f32 %v3807_v36, 0.0  ;;  %v4589_v36 = vrot.slane %v11319_v17, 1 }
 0x3c8   : > { %v3809_v50 = vpop.f32.mrf.mxu0 }
 0x3c9   : > { %v8010_v1 = vpack.i.bf16 %v11383_v47, %v11372_v19  ;;  %v3810_v24 = vadd.f32 %v8566_v54, %v3809_v50 }
 0x3ca   : > { %v3811_v11 = vpop.f32.mrf.mxu0  ;;  %7996 = vrot.lane.b32.xlu0 %v7995_v8, %s8578_s29 }
 0x3cb   : > { %v11390_v62 = vmax.f32 %v3810_v24, 0.0  ;;  %8011 = vrot.lane.b32.xlu1 %v8010_v1, %s8578_s29  ;;  %v14265_v11 = vpack.i.bf16 %v10958_v46, %v10946_v42 }
 0x3cc   : > { %v3814_v2 = vpop.f32.mrf.mxu0 }
 0x3cd   : > { %v3815_v51 = vadd.f32 %v8566_v54, %v3814_v2 }
 0x3ce   : > { %v3816_v7 = vpop.f32.mrf.mxu0  ;;  %8001 = vrot.lane.b32.xlu0 %v14264_v48, %s8578_s29 }
 0x3cf   : > { %v11399_v18 = vmax.f32 %v3815_v51, 0.0  ;;  %8031 = vrot.lane.b32.xlu1 %v14265_v11, %s8578_s29  ;;  %v14266_v51 = vpack.i.bf16 %v10916_v38, %v10904_v9  ;;  %v14267_v11 = vpack.i.bf16 %v11002_v21, %v10990_v43  ;;  %v4587_v7 = vrot.slane %v11271_v55, 1 }
 0x3d0   : > { %v3817_v8 = vpop.f32.mrf.mxu0 }
 0x3d1   : > { %v8015_v50 = vpack.i.bf16 %v11399_v18, %v11390_v62  ;;  %v3818_v1 = vadd.f32 %v8566_v54, %v3817_v8  ;;  %v4585_v54 = vrot.slane %v11252_v15, 1  ;;  %v14268_v8 = vpack.i.bf16 %v10936_v25, %v10924_v40  ;;  %v14334_v25 = vld [vmem:[#allocation28_spill] sm:$0xff] }
 0x3d2   : > { %v3819_v24 = vpop.f32.mrf.mxu0 }
 0x3d3   : > { %v11407_v2 = vmax.f32 %v3818_v1, 0.0  ;;  %8016 = vrot.lane.b32.xlu0 %v8015_v50, %s8578_s29  ;;  %v4584_v50 = vrot.slane %v11203_v12, 1  ;;  %v14269_v24 = vpack.i.bf16 %v11044_v60, %v11032_v13  ;;  %v14273_v60 = vpack.i.bf16 %v11088_v29, %v11076_v22 }
 0x3d5   : > { %v8040_v48 = vpack.i.bf16 %v10727_v31, %v11407_v2  ;;  %v4704_v1 = vsel %vm14148_vm2, %v4584_v50, %v4585_v54 }
 0x3d7   : > { %8041 = vrot.lane.b32.xlu1 %v8040_v48, %s8578_s29  ;;  %8021 = vrot.lane.b32.xlu0 %v14266_v51, %s8578_s29  ;;  %v14270_v48 = vpack.c.bf16 %v11210_v34, %v11216_v28  ;;  %v14271_v51 = vrot.slane %v11188_v58, 1  ;;  %v4586_v34 = vrot.slane %v11254_v52, 1  ;;  %v4588_v28 = vrot.slane %v11286_v37, 1 }
 0x3db   : > { %8046 = vrot.lane.b32.xlu1 %v14267_v11, %s8578_s29  ;;  %8026 = vrot.lane.b32.xlu0 %v14268_v8, %s8578_s29  ;;  %v4705_v11 = vsel %vm14272_vm6, %v14271_v51, %v4584_v50  ;;  %v14275_v50 = vpack.i.bf16 %v11130_v32, %v11118_v49  ;;  %vm14277_vm6 = vmmov %vm14148_vm2  ;;  %v4591_v32 = vrot.slane %v11340_v59, 1  ;;  %v4593_v49 = vrot.slane %v11370_v41, 1 }
 0x3dc   : > { %v4774_v8 = vpack.c.bf16 %v4704_v1, %v4705_v11  ;;  %v14276_v1 = vpack.i.bf16 %v10980_v45, %v10968_v16  ;;  %v14333_v16 = vld [vmem:[#allocation30_spill] sm:$0xff] }
 0x3dd   : > { %v14335_v42 = vpack.c.bf16 %v14333_v16, %v14334_v25 }
 0x3df   : > { %8056 = vrot.lane.b32.xlu1 %v14269_v24, %s8578_s29  ;;  %4933 = vrot.lane.b32.xlu0 %v14270_v48, %s8578_s29  ;;  %v4702_v24 = vsel %vm14274_vm10, %v4586_v34, %v4587_v7  ;;  %v4703_v48 = vsel %vm14277_vm6, %v4585_v54, %v4586_v34  ;;  %vm14278_vm10 = vmmov %vm14148_vm2  ;;  %v14279_v34 = vpack.i.bf16 %v11022_v20, %v11010_v26 }
 0x3e0   : > { %v4775_v51 = vpack.c.bf16 %v4702_v24, %v4703_v48  ;;  %v4592_v24 = vrot.slane %v11352_v53, 1  ;;  %vm14280_vm6 = vmmov %vm14148_vm2 }
 0x3e2   : > { %v4697_v48 = vsel %vm14282_vm4, %v4591_v32, %v4592_v24  ;;  %vm14287_vm4 = vmmov %vm14148_vm2 }
 0x3e3   : > { %8066 = vrot.lane.b32.xlu1 %v14273_v60, %s8578_s29  ;;  %4935 = vrot.lane.b32.xlu0 %v4774_v8, %s8578_s29  ;;  %v4700_v60 = vsel %vm14148_vm2, %v4588_v28, %v4589_v36  ;;  %v4701_v8 = vsel %vm14278_vm10, %v4587_v7, %v4588_v28  ;;  %vm14281_vm10 = vmmov %vm14148_vm2 }
 0x3e4   : > { %v4716_v11 = vsel %vm9071_vm8, %v4700_v60, 0.0  ;;  %v4696_v60 = vsel %vm14281_vm10, %v4592_v24, %v4593_v49  ;;  %v4596_v24 = vrot.slane %v11390_v62, 1 }
 0x3e7   : > { %8076 = vrot.lane.b32.xlu1 %v14275_v50, %s8578_s29  ;;  %8036 = vrot.lane.b32.xlu0 %v14276_v1, %s8578_s29  ;;  %v4776_v50 = vpack.c.bf16 %v4716_v11, %v4701_v8  ;;  %v4590_v1 = vrot.slane %v11321_v23, 1  ;;  %v4595_v11 = vrot.slane %v11383_v47, 1  ;;  %v4594_v8 = vrot.slane %v11372_v19, 1 }
 0x3e9   : > { %v4698_v54 = vsel %vm14148_vm2, %v4590_v1, %v4591_v32  ;;  %v4699_v7 = vsel %vm14280_vm6, %v4589_v36, %v4590_v1  ;;  %v14283_v36 = vpack.i.bf16 %v11066_v57, %v11054_v14  ;;  %vm14284_vm6 = vmmov %vm14148_vm2  ;;  %v4597_v32 = vrot.slane %v11399_v18, 1 }
 0x3ea   : > { %v4777_v28 = vpack.c.bf16 %v4698_v54, %v4699_v7  ;;  %v4695_v1 = vsel %vm14284_vm6, %v4593_v49, %v4594_v8  ;;  %v14286_v7 = vpack.c.bf16 %v10760_v10, %v10766_v27  ;;  %v14293_v10 = vrot.slane %v10727_v31, 1  ;;  %vm14294_vm6 = vmmov %vm14148_vm2 }
 0x3eb   : > { %4937 = vrot.lane.b32.xlu0 %v4775_v51, %s8578_s29  ;;  %v4778_v51 = vpack.c.bf16 %v4696_v60, %v4697_v48  ;;  %v4692_v49 = vsel %vm14287_vm4, %v4596_v24, %v4597_v32  ;;  %v14290_v48 = vld [vmem:[#allocation77_spill] sm:$0xff]  ;;  %vm14295_vm4 = vmmov %vm14148_vm2 }
 0x3ef   : > { %4939 = vrot.lane.b32.xlu0 %v4776_v50, %s8578_s29  ;;  %v4694_v50 = vsel %vm14148_vm2, %v4594_v8, %v4595_v11 }
 0x3f0   : > { %v4779_v54 = vpack.c.bf16 %v4694_v50, %v4695_v1  ;;  %v4693_v50 = vsel %vm14148_vm2, %v4595_v11, %v4596_v24  ;;  %v4598_v1 = vrot.slane %v11407_v2, 1  ;;  %v8288_v11 = vld [vmem:[%s13495_s5 + $0x38] sm:$0xff]   ;;  %vm14313_vm2 = vcmp.lt.s32.totalorder %v8643_v3, 1 }
 0x3f1   : > { %7671 = vmatprep.subr.bf16.mxu0 %v8288_v11  ;;  %v14299_v24 = vld [vmem:[#allocation41_spill] sm:$0xff]  ;;  %vm14318_vm3 = vmmov %vm14313_vm2 }
 0x3f2   : > { %v4690_v27 = vsel %vm14294_vm6, %v4598_v1, %v14293_v10  ;;  %7672 = vmatpush3.bf16.msra.mxu0 %v8288_v11  ;;  %v14307_v11 = vld [vmem:[#allocation11_spill] sm:$0xff]  ;;  %vm14314_vm6 = vmmov %vm14313_vm2 }
 0x3f3   : > { %8051 = vrot.lane.b32.xlu0 %v14279_v34, %s8578_s29  ;;  %v14285_v34 = vpack.i.bf16 %v11108_v39, %v11096_v33 }
 0x3f7   : > { %4941 = vrot.lane.b32.xlu0 %v4777_v28, %s8578_s29  ;;  %v14288_v28 = vld [vmem:[#allocation24_spill] sm:$0xff] }
 0x3f8   : > { %vm14289_vm10 = vnez %v14288_v28 }
 0x3f9   : > { %v4724_v60 = vsel %vm14289_vm10, %v4692_v49, 0.0 }
 0x3fb   : > { %4943 = vrot.lane.b32.xlu0 %v4778_v51, %s8578_s29  ;;  %v14291_v51 = vld [vmem:[#allocation74_spill] sm:$0xff] }
 0x3fc   : > { %v14292_v8 = vpack.i.bf16 %v14290_v48, %v14291_v51 }
 0x3ff   : > { %8061 = vrot.lane.b32.xlu0 %v14283_v36, %s8578_s29  ;;  %v4780_v36 = vpack.c.bf16 %v4724_v60, %v4693_v50  ;;  %v14300_v60 = vld [vmem:[#allocation84_spill] sm:$0xff]  ;;  %v14301_v50 = vld [vmem:[#allocation82_spill] sm:$0xff] }
 0x403   : > { %4945 = vrot.lane.b32.xlu0 %v4779_v54, %s8578_s29  ;;  %v4691_v54 = vsel %vm14295_vm4, %v4597_v32, %v4598_v1  ;;  %v8289_v32 = vld [vmem:[%s13495_s5 + $0x30] sm:$0xff]   ;;  %v8290_v1 = vld [vmem:[%s13495_s5 + $0x28] sm:$0xff]   ;;  %vm14316_vm4 = vmmov %vm14313_vm2 }
 0x404   : > { %7673 = vmatprep.subr.bf16.mxu0 %v8289_v32 }
 0x405   : > { %7674 = vmatpush3.bf16.msra.mxu0 %v8289_v32 }
 0x406   : > { %7675 = vmatprep.subr.bf16.mxu0 %v8290_v1 }
 0x407   : > { %8071 = vrot.lane.b32.xlu0 %v14285_v34, %s8578_s29  ;;  %v14296_v34 = vld [vmem:[#allocation38_spill] sm:$0xff] }
 0x409   : > { %7676 = vmatpush3.bf16.msra.mxu0 %v8290_v1  ;;  %v8293_v1 = vld [vmem:[%s13495_s5 + $0x10] sm:$0xff]  }
 0x40b   : > { %4951 = vrot.lane.b32.xlu0 %v14286_v7, %s8578_s29  ;;  %v14297_v7 = vld [vmem:[#allocation37_spill] sm:$0xff] }
 0x40c   : > { %v14298_v49 = vpack.c.bf16 %v14296_v34, %v14297_v7 }
 0x40d   : > { %v11549_v10 = vpop.permute.xlu1 %7951 }
 0x40f   : > { %8081 = vrot.lane.b32.xlu0 %v14292_v8, %s8578_s29  ;;  %v4781_v8 = vpack.c.bf16 %v4690_v27, %v4691_v54  ;;  %v14303_v27 = vld [vmem:[#allocation21_spill] sm:$0xff]  ;;  %v14304_v54 = vld [vmem:[#allocation43_spill] sm:$0xff] }
 0x410   : > { %v14305_v34 = vpack.c.bf16 %v14303_v27, %v14304_v54  ;;  %v8292_v27 = vld [vmem:[%s13495_s5 + $0x18] sm:$0xff]  }
 0x411   : > { %v7967_v32 = vpop.permute.xlu1 %7966 }
 0x412   : > { %v7968_v54 = vunpack.i.l.bf16 %v7967_v32  ;;  %v7969_v51 = vunpack.i.h.bf16 %v7967_v32  ;;  %v7953_v32 = vunpack.i.l.bf16 %v11549_v10 }
 0x413   : > { %4947 = vrot.lane.b32.xlu0 %v4780_v36, %s8578_s29  ;;  %v14302_v36 = vpack.i.bf16 %v14300_v60, %v14301_v50  ;;  %v14310_v60 = vld [vmem:[#allocation15_spill] sm:$0xff]  ;;  %v14311_v50 = vld [vmem:[#allocation22_spill] sm:$0xff] }
 0x414   : > { %v14312_v48 = vpack.c.bf16 %v14310_v60, %v14311_v50 }
 0x417   : > { %4953 = vrot.lane.b32.xlu0 %v14298_v49, %s8578_s29  ;;  %v8291_v49 = vld [vmem:[%s13495_s5 + $0x20] sm:$0xff]  }
 0x418   : > { %7677 = vmatprep.subr.bf16.mxu0 %v8291_v49 }
 0x419   : > { %7678 = vmatpush3.bf16.msra.mxu0 %v8291_v49 }
 0x41a   : > { %7679 = vmatprep.subr.bf16.mxu0 %v8292_v27 }
 0x41b   : > { %4949 = vrot.lane.b32.xlu0 %v4781_v8, %s8578_s29  ;;  %v14306_v8 = vld [vmem:[#allocation12_spill] sm:$0xff] }
 0x41d   : > { %7680 = vmatpush3.bf16.msra.mxu0 %v8292_v27 }
 0x41e   : > { %7681 = vmatprep.subr.bf16.mxu0 %v8293_v1 }
 0x41f   : > { %4955 = vrot.lane.b32.xlu0 %v14299_v24, %s8578_s29  ;;  %v14308_v24 = vpack.c.bf16 %v14306_v8, %v14307_v11 }
 0x421   : > { %7682 = vmatpush3.bf16.msra.mxu0 %v8293_v1 }
 0x423   : > { %8091 = vrot.lane.b32.xlu0 %v14302_v36, %s8578_s29 }
 0x427   : > { %4957 = vrot.lane.b32.xlu0 %v14305_v34, %s8578_s29  ;;  %v14309_v34 = vpack.i.bf16 %v11297_v63, %v11280_v44  ;;  %v8294_v63 = vld [vmem:[%s13495_s5 + $0x8] sm:$0xff]  }
 0x428   : > { %v7947_v7 = vpop.permute.xlu0 %7946  ;;  %7683 = vmatprep.subr.bf16.mxu0 %v8294_v63 }
 0x429   : > { %v7948_v27 = vunpack.i.l.bf16 %v7947_v7  ;;  %7684 = vmatpush3.bf16.msra.mxu0 %v8294_v63 }
 0x42b   : > { %4959 = vrot.lane.b32.xlu0 %v14308_v24, %s8578_s29  ;;  %v4378_v24 = vrot.slane %v7968_v54, 7 }
 0x42c   : > { %v7957_v36 = vpop.permute.xlu0 %7956 }
 0x42d   : > { %v7958_v39 = vunpack.i.l.bf16 %v7957_v36  ;;  %v7959_v33 = vunpack.i.h.bf16 %v7957_v36 }
 0x42f   : > { %8101 = vrot.lane.b32.xlu0 %v14309_v34, %s8578_s29  ;;  %v7949_v34 = vunpack.i.h.bf16 %v7947_v7  ;;  %v4357_v7 = vrot.slane %v7948_v27, 7  ;;  %v4361_v26 = vrot.slane %v7959_v33, 7 }
 0x430   : > { %v7962_v8 = vpop.permute.xlu0 %7961 }
 0x431   : > { %v7964_v49 = vunpack.i.h.bf16 %v7962_v8  ;;  %v7963_v11 = vunpack.i.l.bf16 %v7962_v8  ;;  %v11589_v50 = vrot.slane %v7949_v34, 7 }
 0x433   : > { %v4377_v28 = vrot.slane %v7964_v49, 7  ;;  %v11572_v6 = vrot.slane %v7963_v11, 7  ;;  %4961 = vrot.lane.b32.xlu0 %v14312_v48, %s8578_s29  ;;  %v7972_v49 = vpop.permute.xlu1 %7971  ;;  %v8295_v48 = vld [vmem:[%s13495_s5] sm:$0xff]   ;;  %14315 = vst [vmem:[#allocation38_spill] sm:$0xff] %v11589_v50  ;;  %v4379_v11 = vrot.slane %v7969_v51, 7  ;;  %v4484_v34 = vsel %vm14316_vm4, %v11589_v50, %v4357_v7  ;;  %vm14320_vm4 = vmmov %vm14313_vm2 }
 0x434   : > { %v7977_v44 = vpop.permute.xlu0 %7976  ;;  %7685 = vmatprep.subr.bf16.mxu0 %v8295_v48  ;;  %v4485_v14 = vsel %vm8667_vm0, %v4484_v34, 0.0 }
 0x435   : > { %v4463_v54 = vsel %vm14313_vm2, %v4377_v28, %v4378_v24  ;;  %v4464_v8 = vsel %vm14314_vm6, %v11572_v6, %v4377_v28  ;;  %7686 = vmatpush3.bf16.msra.mxu0 %v8295_v48  ;;  %vm14317_vm6 = vmmov %vm14313_vm2  ;;  %v4360_v48 = vrot.slane %v7958_v39, 7  ;;  %v7978_v45 = vunpack.i.l.bf16 %v7977_v44 }
 0x436   : > { %v4559_v60 = vpack.c.bf16 %v4463_v54, %v4464_v8  ;;  %v7954_v8 = vunpack.i.h.bf16 %v11549_v10  ;;  %v4462_v29 = vsel %vm14317_vm6, %v4378_v24, %v4379_v11  ;;  %v7974_v39 = vunpack.i.h.bf16 %v7972_v49  ;;  %vm14322_vm6 = vmmov %vm14313_vm2 }
 0x437   : > { %v11598_v63 = vpop.permute.xlu1 %7986  ;;  %v7979_v36 = vunpack.i.h.bf16 %v7977_v44 }
 0x438   : > { %v11591_v1 = vpop.permute.xlu0 %7981  ;;  %4857 = vrot.lane.b32.xlu1 %v4559_v60, %s8577_s24  ;;  %v4358_v60 = vrot.slane %v7953_v32, 7  ;;  %v4359_v10 = vrot.slane %v7954_v8, 7  ;;  %v7973_v32 = vunpack.i.l.bf16 %v7972_v49  ;;  %v4363_v33 = vrot.slane %v7974_v39, 7 }
 0x439   : > { %v7983_v28 = vunpack.i.l.bf16 %v11591_v1  ;;  %v4365_v44 = vrot.slane %v7979_v36, 7 }
 0x43a   : > { %v4483_v57 = vsel %vm14318_vm3, %v4357_v7, %v4358_v60  ;;  %v4362_v24 = vrot.slane %v7973_v32, 7  ;;  %vm14321_vm3 = vmmov %vm14313_vm2 }
 0x43b   : > { %v11596_v54 = vrot.slane %v7983_v28, 7  ;;  %v7992_v20 = vpop.permute.xlu1 %7991  ;;  %v4549_v21 = vpack.c.bf16 %v4483_v57, %v4485_v14  ;;  %v4480_v57 = vsel %vm14322_vm6, %v4360_v48, %v4361_v26  ;;  %vm14325_vm6 = vmmov %vm14313_vm2 }
 0x43c   : > { %v7997_v27 = vpop.permute.xlu0 %7996  ;;  %v4479_v14 = vsel %vm14313_vm2, %v4361_v26, %v4362_v24  ;;  %v4478_v26 = vsel %vm14313_vm2, %v4362_v24, %v4363_v33 }
 0x43d   : > { %v4461_v51 = vsel %vm14313_vm2, %v4379_v11, %v11596_v54  ;;  %v4482_v11 = vsel %vm14321_vm3, %v4358_v60, %v4359_v10  ;;  %v4551_v22 = vpack.c.bf16 %v4479_v14, %v4480_v57  ;;  %v7998_v60 = vunpack.i.l.bf16 %v7997_v27  ;;  %vm14324_vm3 = vmmov %vm14313_vm2 }
 0x43e   : > { %v4560_v28 = vpack.c.bf16 %v4461_v51, %v4462_v29  ;;  %v4481_v29 = vsel %vm14320_vm4, %v4359_v10, %v4360_v48  ;;  %v4364_v51 = vrot.slane %v7978_v45, 7  ;;  %vm14323_vm4 = vmmov %vm14313_vm2  ;;  %v7994_v48 = vunpack.i.h.bf16 %v7992_v20 }
 0x43f   : > { %v11623_v34 = vpop.permute.xlu1 %8006  ;;  %v4550_v8 = vpack.c.bf16 %v4481_v29, %v4482_v11  ;;  %v7999_v36 = vunpack.i.h.bf16 %v7997_v27  ;;  %v4368_v46 = vrot.slane %v7998_v60, 7 }
 0x440   : > { %v11613_v13 = vpop.permute.xlu0 %8001  ;;  %4859 = vrot.lane.b32.xlu1 %v4560_v28, %s8577_s24  ;;  %v4477_v45 = vsel %vm14323_vm4, %v4363_v33, %v4364_v51  ;;  %v4476_v29 = vsel %vm14324_vm3, %v4364_v51, %v4365_v44  ;;  %vm14326_vm4 = vmmov %vm14313_vm2 }
 0x441   : > { %v4552_v43 = vpack.c.bf16 %v4477_v45, %v4478_v26  ;;  %vm14328_vm3 = vmmov %vm14313_vm2  ;;  %v8004_v40 = vunpack.i.h.bf16 %v11613_v13 }
 0x443   : > { %v8012_v28 = vpop.permute.xlu1 %8011 }
 0x444   : > { %4837 = vrot.lane.b32.xlu1 %v4549_v21, %s8577_s24  ;;  %v7993_v21 = vunpack.i.l.bf16 %v7992_v20  ;;  %v8013_v57 = vunpack.i.l.bf16 %v8012_v28  ;;  %v4493_v20 = vsel %vm14117_vm5, %v4476_v29, 0.0 }
 0x445   : > { %v11619_v7 = vpop.permute.xlu0 %8016 }
 0x446   : > { %v4366_v39 = vrot.slane %v7993_v21, 7  ;;  %v4367_v21 = vrot.slane %v7994_v48, 7  ;;  %v4370_v60 = vrot.slane %v8013_v57, 7  ;;  %v8018_v29 = vunpack.i.l.bf16 %v11619_v7 }
 0x447   : > { %v8032_v27 = vpop.permute.xlu1 %8031  ;;  %v8014_v48 = vunpack.i.h.bf16 %v8012_v28 }
 0x448   : > { %4839 = vrot.lane.b32.xlu1 %v4550_v8, %s8577_s24 }
 0x449   : > { %v8022_v49 = vpop.permute.xlu0 %8021 }
 0x44a   : > { %v8024_v32 = vunpack.i.h.bf16 %v8022_v49  ;;  %v8023_v10 = vunpack.i.l.bf16 %v8022_v49 }
 0x44c   : > { %v4389_v11 = vrot.slane %v8024_v32, 7  ;;  %4841 = vrot.lane.b32.xlu1 %v4551_v22, %s8577_s24  ;;  %v11637_v8 = vrot.slane %v8023_v10, 7  ;;  %v4475_v22 = vsel %vm14326_vm4, %v4365_v44, %v4366_v39  ;;  %v4369_v32 = vrot.slane %v7999_v36, 7  ;;  %vm14331_vm4 = vmmov %vm14313_vm2 }
 0x44d   : > { %v11639_v14 = vpop.permute.xlu0 %8026  ;;  %v4553_v45 = vpack.c.bf16 %v4475_v22, %v4493_v20  ;;  %v8034_v36 = vunpack.i.h.bf16 %v8032_v27  ;;  %v8033_v22 = vunpack.i.l.bf16 %v8032_v27  ;;  %v8019_v20 = vunpack.i.h.bf16 %v11619_v7 }
 0x44e   : > { %v8028_v49 = vunpack.i.l.bf16 %v11639_v14  ;;  %v4452_v51 = vsel %vm14325_vm6, %v11637_v8, %v4389_v11  ;;  %vm14330_vm6 = vmmov %vm14313_vm2 }
 0x44f   : > { %v4517_v44 = vsel %vm9017_vm7, %v4452_v51, 0.0  ;;  %v4472_v51 = vsel %vm14331_vm4, %v4368_v46, %v4369_v32  ;;  %v4393_v27 = vrot.slane %v8034_v36, 7  ;;  %v4373_v7 = vrot.slane %v8019_v20, 7  ;;  %vm14337_vm4 = vmmov %vm14313_vm2 }
 0x450   : > { %v11649_v33 = vrot.slane %v8028_v49, 7  ;;  %4843 = vrot.lane.b32.xlu1 %v4552_v43, %s8577_s24  ;;  %v4473_v49 = vsel %vm14313_vm2, %v4367_v21, %v4368_v46  ;;  %v8042_v43 = vpop.permute.xlu1 %8041  ;;  %vm14339_vm7 = vmmov %vm14313_vm2 }
 0x451   : > { %v11652_v10 = vpop.permute.xlu0 %4933  ;;  %v8043_v28 = vunpack.i.l.bf16 %v8042_v43 }
 0x452   : > { %v4451_v26 = vsel %vm14328_vm3, %v4389_v11, %v11649_v33  ;;  %v4474_v11 = vsel %vm14330_vm6, %v4366_v39, %v4367_v21  ;;  %vm14332_vm3 = vmmov %vm14313_vm2  ;;  %v11680_v21 = vrot.slane %v8033_v22, 7 }
 0x453   : > { %v4565_v24 = vpack.c.bf16 %v4451_v26, %v4517_v44  ;;  %v4554_v26 = vpack.c.bf16 %v4473_v49, %v4474_v11  ;;  %v4471_v44 = vsel %vm14332_vm3, %v4369_v32, %v4370_v60  ;;  %v8044_v49 = vunpack.i.h.bf16 %v8042_v43  ;;  %vm14336_vm6 = vmmov %vm14313_vm2 }
 0x454   : > { %4845 = vrot.lane.b32.xlu1 %v4553_v45, %s8577_s24  ;;  %v4372_v45 = vrot.slane %v8018_v29, 7  ;;  %v4555_v46 = vpack.c.bf16 %v4471_v44, %v4472_v51  ;;  %v4374_v11 = vrot.slane %v8043_v28, 7  ;;  %vm14338_vm3 = vmmov %vm14313_vm2 }
 0x455   : > { %4869 = vrot.lane.b32.xlu0 %v4565_v24, %s8577_s24  ;;  %v11664_v57 = vpop.permute.xlu0 %4935  ;;  %v4371_v24 = vrot.slane %v8014_v48, 7  ;;  %v8047_v48 = vpop.permute.xlu1 %8046  ;;  %v4375_v43 = vrot.slane %v8044_v49, 7  ;;  %v4448_v51 = vsel %vm14338_vm3, %v11680_v21, %v4393_v27  ;;  %vm14347_vm3 = vmmov %vm14313_vm2 }
 0x456   : > { %v4468_v25 = vsel %vm14337_vm4, %v4372_v45, %v4373_v7  ;;  %v8049_v22 = vunpack.i.h.bf16 %v8047_v48  ;;  %v8048_v20 = vunpack.i.l.bf16 %v8047_v48  ;;  %v4467_v28 = vsel %vm14339_vm7, %v4373_v7, %v4374_v11  ;;  %vm14342_vm7 = vmmov %vm14313_vm2 }
 0x457   : > { %v4469_v29 = vsel %vm14313_vm2, %v4371_v24, %v4372_v45  ;;  %v4470_v16 = vsel %vm14336_vm6, %v4370_v60, %v4371_v24  ;;  %v7984_v60 = vunpack.i.h.bf16 %v11591_v1  ;;  %v4501_v49 = vsel %vm14145_vm15, %v4468_v25, 0.0  ;;  %vm14341_vm6 = vmmov %vm14313_vm2 }
 0x458   : > { %4847 = vrot.lane.b32.xlu1 %v4554_v26, %s8577_s24  ;;  %v4556_v36 = vpack.c.bf16 %v4469_v29, %v4470_v16  ;;  %v4397_v29 = vrot.slane %v8049_v22, 7  ;;  %v11709_v48 = vrot.slane %v8048_v20, 7  ;;  %v4466_v1 = vsel %vm14342_vm7, %v4374_v11, %v4375_v43  ;;  %v14344_v22 = vld [vmem:[#allocation47_spill] sm:$0xff]  ;;  %vm14346_vm4 = vmmov %vm14313_vm2 }
 0x459   : > { %4965 = vrot.lane.b32.xlu0 %v14335_v42, %s8578_s29  ;;  %v11678_v39 = vpop.permute.xlu0 %8036  ;;  %v4381_v7 = vrot.slane %v7984_v60, 7  ;;  %v7988_v16 = vunpack.i.l.bf16 %v11598_v63  ;;  %v7989_v60 = vunpack.i.h.bf16 %v11598_v63  ;;  %v14352_v63 = vld [vmem:[#allocation81_spill] sm:$0xff] }
 0x45a   : > { %v8038_v32 = vunpack.i.l.bf16 %v11678_v39  ;;  %v4444_v11 = vsel %vm14346_vm4, %v11709_v48, %v4397_v29  ;;  %vm14355_vm4 = vmmov %vm14313_vm2 }
 0x45b   : > { %v4383_v38 = vrot.slane %v7989_v60, 7  ;;  %v14357_v60 = vld [vmem:[#allocation54_spill] sm:$0xff] }
 0x45c   : > { %4849 = vrot.lane.b32.xlu1 %v4555_v46, %s8577_s24  ;;  %v11686_v26 = vrot.slane %v8038_v32, 7  ;;  %v4557_v32 = vpack.c.bf16 %v4467_v28, %v4501_v49 }
 0x45d   : > { %v11688_v42 = vpop.permute.xlu0 %4937 }
 0x45e   : > { %v4447_v44 = vsel %vm14313_vm2, %v4393_v27, %v11686_v26  ;;  %v4465_v27 = vsel %vm14341_vm6, %v4375_v43, %v11572_v6  ;;  %v8003_v6 = vunpack.i.l.bf16 %v11613_v13  ;;  %v4460_v43 = vsel %vm14347_vm3, %v11596_v54, %v4381_v7  ;;  %vm14349_vm6 = vmmov %vm14313_vm2  ;;  %v14356_v13 = vld [vmem:[#allocation56_spill] sm:$0xff] }
 0x45f   : > { %v4567_v45 = vpack.c.bf16 %v4447_v44, %v4448_v51  ;;  %v14343_v51 = vld [vmem:[#allocation49_spill] sm:$0xff]  ;;  %v4558_v44 = vpack.c.bf16 %v4465_v27, %v4466_v1  ;;  %v4385_v1 = vrot.slane %v8004_v40, 7  ;;  %vm14359_vm3 = vmmov %vm14313_vm2  ;;  %v8009_v40 = vunpack.i.h.bf16 %v11623_v34 }
 0x460   : > { %4851 = vrot.lane.b32.xlu1 %v4556_v36, %s8577_s24  ;;  %v14345_v20 = vpack.c.bf16 %v14343_v51, %v14344_v22  ;;  %v4525_v51 = vsel %vm9147_vm9, %v4444_v11, 0.0  ;;  %v4384_v22 = vrot.slane %v8003_v6, 7  ;;  %vm14430_vm9 = vcmask 785408  }
 0x461   : > { %v11704_v24 = vpop.permute.xlu0 %4939  ;;  %4873 = vrot.lane.b32.xlu0 %v4567_v45, %s8577_s24  ;;  %v4382_v45 = vrot.slane %v7988_v16, 7  ;;  %v14353_v16 = vld [vmem:[#allocation78_spill] sm:$0xff] }
 0x462   : > { %v14354_v46 = vpack.i.bf16 %v14352_v63, %v14353_v16 }
 0x463   : > { %v4459_v54 = vsel %vm14349_vm6, %v4381_v7, %v4382_v45  ;;  %v4457_v7 = vsel %vm14355_vm4, %v4383_v38, %v4384_v22  ;;  %vm14360_vm6 = vmmov %vm14313_vm2 }
 0x464   : > { %4853 = vrot.lane.b32.xlu1 %v4557_v32, %s8577_s24  ;;  %v8057_v32 = vpop.permute.xlu1 %8056  ;;  %vm14361_vm4 = vmmov %vm14313_vm2 }
 0x465   : > { %v11718_v36 = vpop.permute.xlu0 %8051  ;;  %4969 = vrot.lane.b32.xlu0 %v14345_v20, %s8578_s29  ;;  %v8059_v6 = vunpack.i.h.bf16 %v8057_v32  ;;  %v8058_v11 = vunpack.i.l.bf16 %v8057_v32  ;;  %v4458_v32 = vsel %vm14359_vm3, %v4382_v45, %v4383_v38  ;;  %vm14362_vm3 = vmmov %vm14313_vm2 }
 0x466   : > { %v8053_v25 = vunpack.i.l.bf16 %v11718_v36  ;;  %v4562_v63 = vpack.c.bf16 %v4457_v7, %v4458_v32  ;;  %v4456_v7 = vsel %vm14362_vm3, %v4384_v22, %v4385_v1  ;;  %vm14371_vm3 = vmmov %vm14313_vm2 }
 0x468   : > { %v11732_v28 = vrot.slane %v8053_v25, 7  ;;  %4855 = vrot.lane.b32.xlu1 %v4558_v44, %s8577_s24  ;;  %v14350_v25 = vld [vmem:[#allocation6_spill] sm:$0xff] }
 0x469   : > { %v11736_v49 = vpop.permute.xlu0 %4941  ;;  %vm14351_vm7 = vnez %v14350_v25  ;;  %v14358_v25 = vpack.c.bf16 %v14356_v13, %v14357_v60 }
 0x46a   : > { %v4443_v27 = vsel %vm14313_vm2, %v4397_v29, %v11732_v28  ;;  %v4509_v44 = vsel %vm14351_vm7, %v4460_v43, 0.0  ;;  %v8008_v43 = vunpack.i.l.bf16 %v11623_v34  ;;  %vm14431_vm7 = vmmov %vm14430_vm9 }
 0x46b   : > { %v4569_v20 = vpack.c.bf16 %v4443_v27, %v4525_v51  ;;  %v4561_v27 = vpack.c.bf16 %v4459_v54, %v4509_v44  ;;  %v8067_v51 = vpop.permute.xlu1 %8066  ;;  %v11767_v54 = vrot.slane %v8058_v11, 7 }
 0x46c   : > { %8086 = vrot.lane.b32.xlu1 %v14354_v46, %s8578_s29  ;;  %v8069_v16 = vunpack.i.h.bf16 %v8067_v51  ;;  %v8068_v9 = vunpack.i.l.bf16 %v8067_v51  ;;  %v14364_v51 = vld [vmem:[#allocation86_spill] sm:$0xff] }
 0x46d   : > { %v11752_v29 = vpop.permute.xlu0 %4943  ;;  %4877 = vrot.lane.b32.xlu0 %v4569_v20, %s8577_s24  ;;  %v4401_v20 = vrot.slane %v8059_v6, 7 }
 0x46e   : > { %v4405_v6 = vrot.slane %v8069_v16, 7  ;;  %v4404_v34 = vrot.slane %v8068_v9, 7  ;;  %v8029_v9 = vunpack.i.h.bf16 %v11639_v14 }
 0x46f   : > { %v4440_v45 = vsel %vm14360_vm6, %v11767_v54, %v4401_v20  ;;  %vm14366_vm6 = vmmov %vm14313_vm2  ;;  %v8077_v22 = vpop.permute.xlu1 %8076 }
 0x470   : > { %4861 = vrot.lane.b32.xlu1 %v4561_v27, %s8577_s24  ;;  %v4386_v27 = vrot.slane %v8008_v43, 7  ;;  %v14363_v43 = vld [vmem:[#allocation88_spill] sm:$0xff]  ;;  %v8078_v14 = vunpack.i.l.bf16 %v8077_v22 }
 0x471   : > { %v11759_v46 = vpop.permute.xlu0 %8061  ;;  %4973 = vrot.lane.b32.xlu0 %v14358_v25, %s8578_s29  ;;  %v14365_v60 = vpack.i.bf16 %v14363_v43, %v14364_v51 }
 0x472   : > { %v8063_v44 = vunpack.i.l.bf16 %v11759_v46  ;;  %v4455_v25 = vsel %vm14361_vm4, %v4385_v1, %v4386_v27  ;;  %v4436_v1 = vsel %vm14366_vm6, %v4404_v34, %v4405_v6  ;;  %vm14367_vm4 = vmmov %vm14313_vm2 }
 0x473   : > { %vm14373_vm6 = vmmov %vm14313_vm2 }
 0x474   : > { %v11771_v50 = vrot.slane %v8063_v44, 7  ;;  %4863 = vrot.lane.b32.xlu1 %v4562_v63, %s8577_s24  ;;  %v4387_v63 = vrot.slane %v8009_v40, 7 }
 0x475   : > { %v11774_v13 = vpop.permute.xlu0 %4945 }
 0x476   : > { %v4439_v38 = vsel %vm14313_vm2, %v4401_v20, %v11771_v50  ;;  %v4563_v20 = vpack.c.bf16 %v4455_v25, %v4456_v7  ;;  %v4453_v16 = vsel %vm14313_vm2, %v4387_v63, %v11637_v8  ;;  %v14368_v25 = vld [vmem:[#allocation64_spill] sm:$0xff] }
 0x477   : > { %v4571_v11 = vpack.c.bf16 %v4439_v38, %v4440_v45  ;;  %v4454_v38 = vsel %vm14367_vm4, %v4386_v27, %v4387_v63  ;;  %vm14378_vm4 = vmmov %vm14313_vm2 }
 0x478   : > { %8096 = vrot.lane.b32.xlu1 %v14365_v60, %s8578_s29  ;;  %v4564_v8 = vpack.c.bf16 %v4453_v16, %v4454_v38  ;;  %v8079_v60 = vunpack.i.h.bf16 %v8077_v22  ;;  %v8039_v22 = vunpack.i.h.bf16 %v11678_v39  ;;  %v14376_v38 = vld [vmem:[#allocation69_spill] sm:$0xff] }
 0x479   : > { %v8072_v32 = vpop.permute.xlu0 %8071  ;;  %4881 = vrot.lane.b32.xlu0 %v4571_v11, %s8577_s24  ;;  %v14369_v11 = vld [vmem:[#allocation62_spill] sm:$0xff] }
 0x47a   : > { %v8073_v44 = vunpack.i.l.bf16 %v8072_v32  ;;  %v14370_v7 = vpack.c.bf16 %v14368_v25, %v14369_v11  ;;  %v4409_v63 = vrot.slane %v8079_v60, 7  ;;  %v4408_v25 = vrot.slane %v8078_v14, 7 }
 0x47b   : > { %v8054_v60 = vunpack.i.h.bf16 %v11718_v36 }
 0x47c   : > { %v4406_v40 = vrot.slane %v8073_v44, 7  ;;  %4865 = vrot.lane.b32.xlu1 %v4563_v20, %s8577_s24  ;;  %v4533_v44 = vsel %vm9255_vm11, %v4436_v1, 0.0  ;;  %v4391_v20 = vrot.slane %v8029_v9, 7  ;;  %v14374_v1 = vld [vmem:[#allocation26_spill] sm:$0xff] }
 0x47d   : > { %v11800_v45 = vpop.permute.xlu0 %4951  ;;  %4977 = vrot.lane.b32.xlu0 %v14370_v7, %s8578_s29  ;;  %v4399_v36 = vrot.slane %v8054_v60, 7 }
 0x47e   : > { %v4435_v51 = vsel %vm14371_vm3, %v4405_v6, %v4406_v40  ;;  %v4449_v6 = vsel %vm14313_vm2, %v4391_v20, %v11680_v21  ;;  %vm14379_vm3 = vmmov %vm14313_vm2 }
 0x47f   : > { %v4573_v4 = vpack.c.bf16 %v4435_v51, %v4533_v44  ;;  %v4450_v51 = vsel %vm14373_vm6, %v11649_v33, %v4391_v20  ;;  %v4432_v21 = vsel %vm14379_vm3, %v4408_v25, %v4409_v63  ;;  %vm14380_vm6 = vmmov %vm14313_vm2  ;;  %v14381_v20 = vld [vmem:[#allocation45_spill] sm:$0xff] }
 0x480   : > { %4867 = vrot.lane.b32.xlu1 %v4564_v8, %s8577_s24  ;;  %v4566_v7 = vpack.c.bf16 %v4449_v6, %v4450_v51  ;;  %v4395_v8 = vrot.slane %v8039_v22, 7  ;;  %v14384_v22 = vld [vmem:[#allocation79_spill] sm:$0xff]  ;;  %v14385_v6 = vld [vmem:[#allocation76_spill] sm:$0xff]  ;;  %vm14388_vm3 = vmmov %vm14313_vm2 }
 0x481   : > { %v11811_v27 = vpop.permute.xlu0 %8081  ;;  %4885 = vrot.lane.b32.xlu0 %v4573_v4, %s8577_s24  ;;  %v14375_v4 = vld [vmem:[#allocation71_spill] sm:$0xff]  ;;  %v14386_v51 = vpack.c.bf16 %v14384_v22, %v14385_v6 }
 0x482   : > { %v8083_v16 = vunpack.i.l.bf16 %v11811_v27  ;;  %v14377_v11 = vpack.c.bf16 %v14375_v4, %v14376_v38  ;;  %v4445_v14 = vsel %vm14313_vm2, %v4395_v8, %v11709_v48  ;;  %v4446_v44 = vsel %vm14380_vm6, %v11686_v26, %v4395_v8  ;;  %v14389_v38 = vld [vmem:[#allocation52_spill] sm:$0xff]  ;;  %vm14390_vm6 = vmmov %vm14313_vm2  ;;  %v14392_v8 = vld [vmem:[#allocation58_spill] sm:$0xff] }
 0x483   : > { %v8064_v48 = vunpack.i.h.bf16 %v11759_v46  ;;  %v4442_v4 = vsel %vm14388_vm3, %v11732_v28, %v4399_v36  ;;  %vm14395_vm3 = vmmov %vm14313_vm2 }
 0x484   : > { %v11822_v9 = vrot.slane %v8083_v16, 7  ;;  %4963 = vrot.lane.b32.xlu1 %v14374_v1, %s8578_s29  ;;  %v14382_v16 = vld [vmem:[#allocation19_spill] sm:$0xff]  ;;  %v4568_v1 = vpack.c.bf16 %v4445_v14, %v4446_v44 }
 0x485   : > { %4981 = vrot.lane.b32.xlu0 %v14377_v11, %s8578_s29 }
 0x486   : > { %v4431_v39 = vsel %vm14378_vm4, %v4409_v63, %v11822_v9  ;;  %v14383_v63 = vpack.c.bf16 %v14381_v20, %v14382_v16  ;;  %vm14387_vm4 = vmmov %vm14313_vm2  ;;  %v14398_v20 = vld [vmem:[#allocation73_spill] sm:$0xff] }
 0x487   : > { %v4575_v33 = vpack.c.bf16 %v4431_v39, %v4432_v21  ;;  %v4441_v26 = vsel %vm14387_vm4, %v4399_v36, %v11767_v54  ;;  %v8074_v39 = vunpack.i.h.bf16 %v8072_v32  ;;  %v14391_v54 = vld [vmem:[#allocation60_spill] sm:$0xff]  ;;  %vm14394_vm4 = vmmov %vm14313_vm2 }
 0x488   : > { %4871 = vrot.lane.b32.xlu1 %v4566_v7, %s8577_s24  ;;  %v4570_v11 = vpack.c.bf16 %v4441_v26, %v4442_v4  ;;  %v4403_v7 = vrot.slane %v8064_v48, 7 }
 0x489   : > { %4889 = vrot.lane.b32.xlu0 %v4575_v33, %s8577_s24  ;;  %v14393_v33 = vpack.c.bf16 %v14391_v54, %v14392_v8  ;;  %v4407_v60 = vrot.slane %v8074_v39, 7 }
 0x48a   : > { %v4437_v21 = vsel %vm14313_vm2, %v4403_v7, %v4404_v34  ;;  %v4438_v46 = vsel %vm14390_vm6, %v11771_v50, %v4403_v7  ;;  %v14396_v34 = vld [vmem:[#allocation67_spill] sm:$0xff]  ;;  %vm14402_vm2 = vcmask 523264   ;;  %vm13730_vm6 = vcmask 785408  }
 0x48b   : > { %v4572_v28 = vpack.c.bf16 %v4437_v21, %v4438_v46  ;;  %v4433_v14 = vsel %vm14394_vm4, %v4407_v60, %v4408_v25  ;;  %v4434_v32 = vsel %vm14395_vm3, %v4406_v40, %v4407_v60  ;;  %v14397_v50 = vld [vmem:[#allocation75_spill] sm:$0xff]  ;;  %v14400_v25 = vld [vmem:[#allocation80_spill] sm:$0xff]  ;;  %vm14404_vm4 = vmmov %vm14402_vm2  ;;  %v14405_v21 = vpack.c.bf16 %v11254_v52, %v11252_v15 }
 0x48c   : > { %4967 = vrot.lane.b32.xlu1 %v14383_v63, %s8578_s29  ;;  %v4574_v44 = vpack.c.bf16 %v4433_v14, %v4434_v32  ;;  %v14399_v16 = vpack.c.bf16 %v14397_v50, %v14398_v20  ;;  %v4948_v63 = vpop.permute.xlu0 %4947  ;;  %v14401_v36 = vpack.c.bf16 %v14400_v25, %v11170_v35  ;;  %vm14406_vm3 = vmmov %vm14402_vm2  ;;  %v14408_v15 = vpack.c.bf16 %v11321_v23, %v11319_v17 }
 0x48d   : > { %4985 = vrot.lane.b32.xlu0 %v14386_v51, %s8578_s29  ;;  %v14412_v17 = vpack.c.bf16 %v11372_v19, %v11370_v41  ;;  %v14415_v19 = vpack.c.bf16 %v11407_v2, %v11399_v18  ;;  %v4078_v20 = vpack.c.bf16 %v10721_v30, %v10727_v31 }
 0x490   : > { %4875 = vrot.lane.b32.xlu1 %v4568_v1, %s8577_s24  ;;  %v4954_v51 = vpop.permute.xlu0 %4953 }
 0x494   : > { %4971 = vrot.lane.b32.xlu1 %v14389_v38, %s8578_s29  ;;  %v4950_v26 = vpop.permute.xlu0 %4949  ;;  %v14403_v38 = vpack.c.bf16 %v11203_v12, %v11188_v58  ;;  %v14407_v12 = vpack.c.bf16 %v11286_v37, %v11271_v55  ;;  %v14410_v37 = vpack.c.bf16 %v11352_v53, %v11340_v59  ;;  %v14413_v59 = vpack.c.bf16 %v11390_v62, %v11383_v47  ;;  %v14417_v62 = vld [vmem:[#allocation35_spill] sm:$0xff] }
 0x495   : > { %v8084_v47 = vunpack.i.h.bf16 %v11811_v27 }
 0x497   : > { %v4411_v31 = vrot.slane %v8084_v47, 7 }
 0x498   : > { %4879 = vrot.lane.b32.xlu1 %v4570_v11, %s8577_s24  ;;  %v4956_v35 = vpop.permute.xlu0 %4955 }
 0x49c   : > { %4975 = vrot.lane.b32.xlu1 %v14393_v33, %s8578_s29  ;;  %v11908_v8 = vpop.permute.xlu0 %8091 }
 0x49d   : > { %v8093_v2 = vunpack.i.l.bf16 %v11908_v8 }
 0x4a0   : > { %4883 = vrot.lane.b32.xlu1 %v4572_v28, %s8577_s24  ;;  %v4958_v55 = vpop.permute.xlu0 %4957 }
 0x4a4   : > { %4979 = vrot.lane.b32.xlu1 %v14396_v34, %s8578_s29  ;;  %v4960_v32 = vpop.permute.xlu0 %4959 }
 0x4a8   : > { %4887 = vrot.lane.b32.xlu1 %v4574_v44, %s8577_s24  ;;  %v11933_v50 = vpop.permute.xlu0 %8101 }
 0x4aa   : > { %v4858_v22 = vpop.permute.xlu1 %4857 }
 0x4ac   : > { %4983 = vrot.lane.b32.xlu1 %v14399_v16, %s8578_s29  ;;  %v14418_v16 = vpack.c.bf16 %v14417_v62, %v10740_v5  ;;  %v4414_v5 = vrot.slane %v8093_v2, 7 }
 0x4b2   : > { %v4860_v6 = vpop.permute.xlu1 %4859 }
 0x4b6   : > { %v4838_v1 = vpop.permute.xlu1 %4837 }
 0x4b7   : > { %v4999_v40 = vsel %vm14402_vm2, %v14401_v36, %v4838_v1  ;;  %v4962_v36 = vpop.permute.xlu0 %4961 }
 0x4b8   : > { %v5095_v48 = vsel %vm13730_vm6, %v4999_v40, %v11652_v10 }
 0x4b9   : > { %7687 = vmatprep.mubr.bf16.mxu0 %v5095_v48 }
 0x4ba   : > { %v4840_v4 = vpop.permute.xlu1 %4839 }
 0x4bb   : > { %v5002_v11 = vsel %vm14404_vm4, %v14403_v38, %v4840_v4  ;;  %vm14409_vm4 = vmmov %vm14402_vm2 }
 0x4bc   : > { %v5098_v7 = vsel %vm13730_vm6, %v5002_v11, %v11664_v57 }
 0x4bd   : > { %7688 = vmatmul.mubr.bf16.vlgmr.msra.gmra.mxu0 %v5098_v7 }
 0x4be   : > { %v4842_v39 = vpop.permute.xlu1 %4841 }
 0x4bf   : > { %v5005_v46 = vsel %vm14406_vm3, %v14405_v21, %v4842_v39  ;;  %vm14411_vm3 = vmmov %vm14402_vm2  ;;  %v14425_v21 = vld [vmem:[#allocation39_spill] sm:$0xff] }
 0x4c0   : > { %v5101_v10 = vsel %vm13730_vm6, %v5005_v46, %v11688_v42  ;;  %v14426_v46 = vpack.c.bf16 %v10823_v61, %v14425_v21  ;;  %v8094_v61 = vunpack.i.h.bf16 %v11908_v8 }
 0x4c1   : > { %7691 = vmatprep.mubr.bf16.mxu0 %v5101_v10 }
 0x4c2   : > { %v4844_v54 = vpop.permute.xlu1 %4843 }
 0x4c3   : > { %v5008_v58 = vsel %vm14402_vm2, %v14407_v12, %v4844_v54 }
 0x4c4   : > { %v5104_v57 = vsel %vm13730_vm6, %v5008_v58, %v11704_v24 }
 0x4c5   : > { %7692 = vmatmul.mubr.bf16.gmra.mxu0 %v5104_v57 }
 0x4c6   : > { %v4846_v33 = vpop.permute.xlu1 %4845 }
 0x4c7   : > { %v5011_v52 = vsel %vm14409_vm4, %v14408_v15, %v4846_v33  ;;  %vm14414_vm4 = vmmov %vm14402_vm2  ;;  %v4870_v38 = vpop.permute.xlu0 %4869 }
 0x4c8   : > { %v5107_v42 = vsel %vm13730_vm6, %v5011_v52, %v11736_v49 }
 0x4c9   : > { %7695 = vmatprep.mubr.bf16.mxu0 %v5107_v42  ;;  %v8103_v42 = vunpack.i.l.bf16 %v11933_v50 }
 0x4ca   : > { %v4848_v28 = vpop.permute.xlu1 %4847 }
 0x4cb   : > { %v5014_v24 = vsel %vm14411_vm3, %v14410_v37, %v4848_v28  ;;  %vm14416_vm3 = vmmov %vm14402_vm2  ;;  %v4966_v52 = vpop.permute.xlu0 %4965  ;;  %v4415_v37 = vrot.slane %v8094_v61, 7  ;;  %v14467_v61 = vld [vmem:[#allocation33_spill] sm:$0xff] }
 0x4cc   : > { %v5110_v60 = vsel %vm13730_vm6, %v5014_v24, %v11752_v29 }
 0x4cd   : > { %7696 = vmatmul.mubr.bf16.gmra.mxu0 %v5110_v60  ;;  %v14437_v60 = vld [vmem:[#allocation83_spill] sm:$0xff] }
 0x4ce   : > { %v4850_v14 = vpop.permute.xlu1 %4849 }
 0x4cf   : > { %v5017_v23 = vsel %vm14402_vm2, %v14412_v17, %v4850_v14 }
 0x4d0   : > { %v5113_v49 = vsel %vm13730_vm6, %v5017_v23, %v11774_v13  ;;  %v14438_v23 = vld [vmem:[#allocation87_spill] sm:$0xff] }
 0x4d1   : > { %7699 = vmatprep.mubr.bf16.mxu0 %v5113_v49  ;;  %v14439_v49 = vld [vmem:[#allocation85_spill] sm:$0xff] }
 0x4d2   : > { %v4852_v34 = vpop.permute.xlu1 %4851 }
 0x4d3   : > { %v5020_v53 = vsel %vm14414_vm4, %v14413_v59, %v4852_v34  ;;  %vm14419_vm4 = vmmov %vm14402_vm2  ;;  %v4874_v8 = vpop.permute.xlu0 %4873  ;;  %v14440_v34 = vpack.c.bf16 %v14438_v23, %v14439_v49 }
 0x4d4   : > { %v5116_v29 = vsel %vm13730_vm6, %v5020_v53, %v4948_v63  ;;  %v5029_v63 = vsel %vm14402_vm2, %v14418_v16, %v4858_v22  ;;  %v14420_v22 = vld [vmem:[#allocation36_spill] sm:$0xff]  ;;  %v8104_v53 = vunpack.i.h.bf16 %v11933_v50 }
 0x4d5   : > { %7700 = vmatmul.mubr.bf16.gmra.mxu0 %v5116_v29  ;;  %v5125_v30 = vsel %vm13730_vm6, %v5029_v63, %v4954_v51 }
 0x4d6   : > { %v4854_v44 = vpop.permute.xlu1 %4853 }
 0x4d7   : > { %v5023_v41 = vsel %vm14416_vm3, %v14415_v19, %v4854_v44  ;;  %vm14422_vm3 = vmmov %vm14402_vm2  ;;  %vm14423_vm2 = vcmp.lt.s32.totalorder %v8643_v3, 1  ;;  %v4970_v2 = vpop.permute.xlu0 %4969 }
 0x4d8   : > { %v5119_v13 = vsel %vm13730_vm6, %v5023_v41, %v4950_v26  ;;  %v14421_v26 = vpack.c.bf16 %v10793_v56, %v14420_v22  ;;  %v4430_v39 = vsel %vm14423_vm2, %v11822_v9, %v4411_v31  ;;  %vm14428_vm11 = vmmov %vm14423_vm2  ;;  %v14432_v9 = vld [vmem:[#allocation40_spill] sm:$0xff] }
 0x4d9   : > { %7703 = vmatprep.mubr.bf16.mxu0 %v5119_v13  ;;  %v14443_v13 = vld [vmem:[#allocation14_spill] sm:$0xff] }
 0x4da   : > { %v4856_v1 = vpop.permute.xlu1 %4855  ;;  %v5032_v4 = vsel %vm14422_vm3, %v14421_v26, %v4860_v6 }
 0x4db   : > { %v5026_v25 = vsel %vm14419_vm4, %v4078_v20, %v4856_v1  ;;  %vm14424_vm4 = vmmov %vm14423_vm2  ;;  %v5128_v54 = vsel %vm14430_vm9, %v5032_v4, %v4956_v35  ;;  %v14434_v35 = vld [vmem:[#allocation42_spill] sm:$0xff]  ;;  %v14444_v20 = vld [vmem:[#allocation20_spill] sm:$0xff] }
 0x4dc   : > { %v5122_v18 = vsel %vm13730_vm6, %v5026_v25, %v11800_v45  ;;  %vm14427_vm6 = vmmov %vm14422_vm3  ;;  %v14435_v28 = vpack.c.bf16 %v10854_v0, %v14434_v35  ;;  %v4418_v0 = vrot.slane %v8103_v42, 7  ;;  %v14445_v47 = vpack.c.bf16 %v14443_v13, %v14444_v20 }
 0x4dd   : > { %7704 = vmatmul.mubr.bf16.gmra.mxu0 %v5122_v18  ;;  %vm14429_vm3 = vmmov %vm14423_vm2  ;;  %vm14433_vm2 = vnez %v14432_v9  ;;  %v4419_v18 = vrot.slane %v8104_v53, 7 }
 0x4de   : > { %v8087_v40 = vpop.permute.xlu1 %8086  ;;  %7707 = vmatprep.mubr.bf16.mxu0 %v5125_v30  ;;  %vm14436_vm9 = vmmov %vm14427_vm6 }
 0x4df   : > { %v8089_v27 = vunpack.i.h.bf16 %v8087_v40  ;;  %v8088_v48 = vunpack.i.l.bf16 %v8087_v40  ;;  %v14448_v40 = vld [vmem:[#allocation38_spill] sm:$0xff] }
 0x4e1   : > { %v4413_v11 = vrot.slane %v8089_v27, 7  ;;  %v4412_v45 = vrot.slane %v8088_v48, 7 }
 0x4e2   : > { %v4862_v7 = vpop.permute.xlu1 %4861 }
 0x4e3   : > { %v4428_v51 = vsel %vm14424_vm4, %v4412_v45, %v4413_v11  ;;  %v5035_v10 = vsel %vm14427_vm6, %v14426_v46, %v4862_v7  ;;  %v4429_v56 = vsel %vm14428_vm11, %v4411_v31, %v4412_v45  ;;  %v4427_v6 = vsel %vm14429_vm3, %v4413_v11, %v4414_v5  ;;  %vm14441_vm11 = vmmov %vm14431_vm7  ;;  %v4878_v31 = vpop.permute.xlu0 %4877  ;;  %v14455_v11 = vld [vmem:[#allocation95_spill] sm:$0xff]  ;;  %v14456_v45 = vld [vmem:[#allocation93_spill] sm:$0xff] }
 0x4e4   : > { %v4576_v12 = vpack.c.bf16 %v4429_v56, %v4430_v39  ;;  %v5131_v58 = vsel %vm14431_vm7, %v5035_v10, %v4958_v55  ;;  %v4541_v57 = vsel %vm14433_vm2, %v4428_v51, 0.0  ;;  %vm14442_vm7 = vmmov %vm14429_vm3  ;;  %v14457_v7 = vpack.c.bf16 %v14455_v11, %v14456_v45  ;;  %v14458_v39 = vld [vmem:[#allocation91_spill] sm:$0xff]  ;;  %v14459_v51 = vld [vmem:[#allocation89_spill] sm:$0xff] }
 0x4e5   : > { %7708 = vmatmul.mubr.bf16.gmra.mxu0 %v5128_v54  ;;  %v4577_v33 = vpack.c.bf16 %v4427_v6, %v4541_v57  ;;  %v4426_v41 = vsel %vm14442_vm7, %v4414_v5, %v4415_v37  ;;  %vm14446_vm4 = vmmov %vm14429_vm3  ;;  %v14451_v5 = vld [vmem:[#allocation16_spill] sm:$0xff]  ;;  %v14460_v21 = vpack.c.bf16 %v14458_v39, %v14459_v51  ;;  %v14461_v46 = vld [vmem:[#allocation27_spill] sm:$0xff] }
 0x4e6   : > { %v4864_v15 = vpop.permute.xlu1 %4863  ;;  %4891 = vrot.lane.b32.xlu1 %v4576_v12, %s8577_s24  ;;  %7711 = vmatprep.mubr.bf16.mxu0 %v5131_v58  ;;  %vm14449_vm7 = vmmov %vm14429_vm3  ;;  %v14462_v10 = vld [vmem:[#allocation17_spill] sm:$0xff]  ;;  %v14502_v11 = vld [vmem:[#allocation66_spill] sm:$0xff] }
 0x4e7   : > { %4893 = vrot.lane.b32.xlu0 %v4577_v33, %s8577_s24  ;;  %v5038_v55 = vsel %vm14436_vm9, %v14435_v28, %v4864_v15  ;;  %vm14447_vm9 = vmmov %vm14429_vm3  ;;  %v4421_v27 = vsel %vm14449_vm7, %v4419_v18, %v14448_v40  ;;  %v14463_v56 = vpack.c.bf16 %v14461_v46, %v14462_v10  ;;  %v4974_v33 = vpop.permute.xlu0 %4973  ;;  %v14468_v15 = vld [vmem:[#allocation29_spill] sm:$0xff] }
 0x4e8   : > { %v5134_v59 = vsel %vm14441_vm11, %v5038_v55, %v4960_v32  ;;  %v14469_v42 = vpack.c.bf16 %v14467_v61, %v14468_v15  ;;  %v14471_v55 = vld [vmem:[#allocation96_spill] sm:$0xff]  ;;  %v14503_v45 = vld [vmem:[#allocation65_spill] sm:$0xff] }
 0x4e9   : > { %v14513_v61 = vld [vmem:[#allocation72_spill] sm:$0xff] }
 0x4ea   : > { %v8097_v24 = vpop.permute.xlu1 %8096  ;;  %4987 = vrot.lane.b32.xlu1 %v14437_v60, %s8578_s29 }
 0x4eb   : > { %v8099_v14 = vunpack.i.h.bf16 %v8097_v24  ;;  %v8098_v17 = vunpack.i.l.bf16 %v8097_v24  ;;  %4989 = vrot.lane.b32.xlu0 %v14440_v34, %s8578_s29  ;;  %v4882_v60 = vpop.permute.xlu0 %4881  ;;  %v14478_v34 = vld [vmem:[#allocation48_spill] sm:$0xff] }
 0x4ed   : > { %v4417_v29 = vrot.slane %v8099_v14, 7  ;;  %v4416_v44 = vrot.slane %v8098_v17, 7  ;;  %7712 = vmatmul.mubr.bf16.gmra.mxu0 %v5134_v59  ;;  %v14479_v59 = vld [vmem:[#allocation46_spill] sm:$0xff] }
 0x4ee   : > { %v4866_v19 = vpop.permute.xlu1 %4865  ;;  %v14480_v53 = vpack.c.bf16 %v14478_v34, %v14479_v59 }
 0x4ef   : > { %v5041_v62 = vsel %vm14427_vm6, %v14445_v47, %v4866_v19  ;;  %v4423_v16 = vsel %vm14446_vm4, %v4417_v29, %v4418_v0  ;;  %v4424_v32 = vsel %vm14429_vm3, %v4416_v44, %v4417_v29  ;;  %v4425_v50 = vsel %vm14447_vm9, %v4415_v37, %v4416_v44  ;;  %vm14450_vm6 = vmmov %vm14429_vm3  ;;  %v14473_v37 = vld [vmem:[#allocation32_spill] sm:$0xff]  ;;  %v4978_v49 = vpop.permute.xlu0 %4977  ;;  %v14482_v44 = vld [vmem:[#allocation51_spill] sm:$0xff] }
 0x4f0   : > { %v5137_v63 = vsel %vm14441_vm11, %v5041_v62, %v4962_v36  ;;  %v4579_v1 = vpack.c.bf16 %v4423_v16, %v4424_v32  ;;  %v4578_v25 = vpack.c.bf16 %v4425_v50, %v4426_v41  ;;  %v4422_v48 = vsel %vm14450_vm6, %v4418_v0, %v4419_v18  ;;  %v14452_v36 = vld [vmem:[#allocation25_spill] sm:$0xff]  ;;  %vm14465_vm9 = vmmov %vm14441_vm11  ;;  %v14483_v19 = vld [vmem:[#allocation50_spill] sm:$0xff] }
 0x4f1   : > { %7715 = vmatprep.mubr.bf16.mxu0 %v5137_v63  ;;  %v14453_v22 = vpack.c.bf16 %v14451_v5, %v14452_v36  ;;  %vm14454_vm4 = vcmask 523264   ;;  %vm14466_vm11 = vmmov %vm14465_vm9  ;;  %v4580_v58 = vpack.c.bf16 %v4421_v27, %v4422_v48  ;;  %v14484_v41 = vpack.c.bf16 %v14482_v44, %v14483_v19  ;;  %v14488_v16 = vld [vmem:[#allocation55_spill] sm:$0xff]  ;;  %v14489_v32 = vld [vmem:[#allocation53_spill] sm:$0xff] }
 0x4f2   : > { %v4868_v30 = vpop.permute.xlu1 %4867  ;;  %4897 = vrot.lane.b32.xlu0 %v4579_v1, %s8577_s24  ;;  %4895 = vrot.lane.b32.xlu1 %v4578_v25, %s8577_s24  ;;  %vm14464_vm3 = vmmov %vm14454_vm4  ;;  %v14490_v50 = vpack.c.bf16 %v14488_v16, %v14489_v32  ;;  %v14492_v25 = vld [vmem:[#allocation59_spill] sm:$0xff]  ;;  %v14493_v18 = vld [vmem:[#allocation57_spill] sm:$0xff] }
 0x4f3   : > { %v5044_v26 = vsel %vm14454_vm4, %v14453_v22, %v4868_v30  ;;  %v5047_v6 = vsel %vm14464_vm3, %v14463_v56, %v4870_v38  ;;  %vm14470_vm7 = vmmov %vm14464_vm3  ;;  %v14472_v38 = vld [vmem:[#allocation44_spill] sm:$0xff]  ;;  %v4886_v62 = vpop.permute.xlu0 %4885  ;;  %v14498_v5 = vld [vmem:[#allocation63_spill] sm:$0xff] }
 0x4f4   : > { %v5143_v12 = vsel %vm14466_vm11, %v5047_v6, %v4966_v52  ;;  %v14474_v24 = vpack.c.bf16 %v14472_v38, %v14473_v37  ;;  %vm14475_vm6 = vmmov %vm14464_vm3  ;;  %v14499_v36 = vld [vmem:[#allocation61_spill] sm:$0xff]  ;;  %v14508_v6 = vld [vmem:[#allocation70_spill] sm:$0xff] }
 0x4f5   : > { %vm14476_vm4 = vmmov %vm14465_vm9  ;;  %v14500_v22 = vpack.c.bf16 %v14498_v5, %v14499_v36  ;;  %v14518_v37 = vld [vmem:[#allocation78_spill] sm:$0xff] }
 0x4f6   : > { %v4964_v4 = vpop.permute.xlu1 %4963  ;;  %4993 = vrot.lane.b32.xlu0 %v14457_v7, %s8578_s29  ;;  %4991 = vrot.lane.b32.xlu1 %v14460_v21, %s8578_s29  ;;  %v5053_v52 = vsel %vm14475_vm6, %v14474_v24, %v4874_v8  ;;  %vm14477_vm3 = vmmov %vm14476_vm4  ;;  %v14504_v7 = vpack.c.bf16 %v14502_v11, %v14503_v45  ;;  %v14519_v24 = vld [vmem:[#allocation77_spill] sm:$0xff]  ;;  %v14528_v19 = vld [vmem:[#allocation90_spill] sm:$0xff] }
 0x4f7   : > { %v5140_v54 = vsel %vm14465_vm9, %v5044_v26, %v4964_v4  ;;  %v5149_v17 = vsel %vm14477_vm3, %v5053_v52, %v4970_v2  ;;  %vm14481_vm9 = vmmov %vm14475_vm6  ;;  %v14494_v2 = vpack.c.bf16 %v14492_v25, %v14493_v18  ;;  %v4982_v27 = vpop.permute.xlu0 %4981  ;;  %v14520_v52 = vpack.c.bf16 %v14518_v37, %v14519_v24  ;;  %v14538_v18 = vld [vmem:[#allocation94_spill] sm:$0xff] }
 0x4f8   : > { %7716 = vmatmul.mubr.bf16.gmra.mxu0 %v5140_v54  ;;  %vm14485_vm11 = vmmov %vm14475_vm6  ;;  %v14509_v54 = vld [vmem:[#allocation68_spill] sm:$0xff] }
 0x4f9   : > { %7719 = vmatprep.mubr.bf16.mxu0 %v5143_v12  ;;  %v5059_v8 = vsel %vm14485_vm11, %v14484_v41, %v4878_v31  ;;  %vm14487_vm6 = vmmov %vm14477_vm3  ;;  %v14510_v12 = vpack.c.bf16 %v14508_v6, %v14509_v54  ;;  %v14529_v41 = vld [vmem:[#allocation88_spill] sm:$0xff]  ;;  %v14546_v54 = vmov 0  }
 0x4fa   : > { %v4872_v57 = vpop.permute.xlu1 %4871  ;;  %4899 = vrot.lane.b32.xlu1 %v4580_v58, %s8577_s24  ;;  %v5155_v20 = vsel %vm14487_vm6, %v5059_v8, %v4974_v33  ;;  %vm14497_vm11 = vmmov %vm14487_vm6  ;;  %v14512_v33 = vld [vmem:[#allocation74_spill] sm:$0xff]  ;;  %v14530_v8 = vpack.c.bf16 %v14528_v19, %v14529_v41 }
 0x4fb   : > { %v5050_v35 = vsel %vm14470_vm7, %v14469_v42, %v4872_v57  ;;  %vm14486_vm7 = vmmov %vm14477_vm3  ;;  %v4890_v51 = vpop.permute.xlu0 %4889  ;;  %v14514_v15 = vpack.c.bf16 %v14512_v33, %v14513_v61 }
 0x4fe   : > { %v4968_v28 = vpop.permute.xlu1 %4967  ;;  %4995 = vrot.lane.b32.xlu1 %v14471_v55, %s8578_s29 }
 0x4ff   : > { %v5146_v14 = vsel %vm14476_vm4, %v5050_v35, %v4968_v28  ;;  %vm14491_vm4 = vmmov %vm14481_vm9  ;;  %v4986_v56 = vpop.permute.xlu0 %4985 }
 0x500   : > { %7720 = vmatmul.mubr.bf16.gmra.mxu0 %v5146_v14  ;;  %vm14495_vm3 = vmmov %vm14491_vm4 }
 0x501   : > { %7723 = vmatprep.mubr.bf16.mxu0 %v5149_v17  ;;  %v5065_v30 = vsel %vm14495_vm3, %v14494_v2, %v4882_v60  ;;  %v14522_v17 = vld [vmem:[#allocation82_spill] sm:$0xff]  ;;  %v14539_v2 = vld [vmem:[#allocation92_spill] sm:$0xff] }
 0x502   : > { %v4876_v23 = vpop.permute.xlu1 %4875  ;;  %v5161_v40 = vsel %vm14497_vm11, %v5065_v30, %v4978_v49  ;;  %v14540_v30 = vpack.c.bf16 %v14538_v18, %v14539_v2 }
 0x503   : > { %v5056_v0 = vsel %vm14481_vm9, %v14480_v53, %v4876_v23  ;;  %vm14496_vm9 = vmmov %vm14487_vm6  ;;  %v14523_v23 = vld [vmem:[#allocation81_spill] sm:$0xff] }
 0x504   : > { %vm14505_vm6 = vmmov %vm14495_vm3  ;;  %v14524_v49 = vpack.c.bf16 %v14522_v17, %v14523_v23 }
 0x505   : > { %v5071_v39 = vsel %vm14505_vm6, %v14504_v7, %v4886_v62  ;;  %vm14515_vm11 = vmmov %vm14505_vm6 }
 0x506   : > { %v4972_v29 = vpop.permute.xlu1 %4971  ;;  %v5077_v42 = vsel %vm14515_vm11, %v14514_v15, %v4890_v51 }
 0x507   : > { %v5152_v13 = vsel %vm14486_vm7, %v5056_v0, %v4972_v29  ;;  %vm14501_vm7 = vmmov %vm14495_vm3 }
 0x508   : > { %7724 = vmatmul.mubr.bf16.gmra.mxu0 %v5152_v13 }
 0x509   : > { %7727 = vmatprep.mubr.bf16.mxu0 %v5155_v20  ;;  %v14532_v20 = vld [vmem:[#allocation86_spill] sm:$0xff] }
 0x50a   : > { %v4880_v47 = vpop.permute.xlu1 %4879 }
 0x50b   : > { %v5062_v63 = vsel %vm14491_vm4, %v14490_v50, %v4880_v47  ;;  %vm14506_vm4 = vmmov %vm14496_vm9  ;;  %v14533_v47 = vld [vmem:[#allocation84_spill] sm:$0xff] }
 0x50c   : > { %vm14507_vm3 = vmmov %vm14506_vm4  ;;  %v14534_v62 = vpack.c.bf16 %v14532_v20, %v14533_v47 }
 0x50d   : > { %v5167_v46 = vsel %vm14507_vm3, %v5071_v39, %v4982_v27  ;;  %v8296_v39 = vld [vmem:[%s13497_s7 + $0x38] sm:$0xff]  }
 0x50e   : > { %v4976_v1 = vpop.permute.xlu1 %4975  ;;  %6711 = vmatpush1.bf16.msra.mxu1 %v8296_v39 }
 0x50f   : > { %v5158_v31 = vsel %vm14496_vm9, %v5062_v63, %v4976_v1  ;;  %vm14511_vm9 = vmmov %vm14505_vm6  ;;  %6712 = vmatprep.subr.bf16.mxu1 %v14546_v54 }
 0x510   : > { %7728 = vmatmul.mubr.bf16.gmra.mxu0 %v5158_v31  ;;  %vm14517_vm6 = vmmov %vm14507_vm3 }
 0x511   : > { %7731 = vmatprep.mubr.bf16.mxu0 %v5161_v40  ;;  %v5173_v28 = vsel %vm14517_vm6, %v5077_v42, %v4986_v56  ;;  %vm14527_vm11 = vmmov %vm14517_vm6 }
 0x512   : > { %v4884_v48 = vpop.permute.xlu1 %4883 }
 0x513   : > { %v5068_v26 = vsel %vm14501_vm7, %v14500_v22, %v4884_v48  ;;  %vm14516_vm7 = vmmov %vm14507_vm3  ;;  %v12108_v48 = vld [vmem:[%s13496_s6] ss:$0 sm:$0xff] }
 0x516   : > { %v4980_v4 = vpop.permute.xlu1 %4979 }
 0x517   : > { %v5164_v21 = vsel %vm14506_vm4, %v5068_v26, %v4980_v4  ;;  %vm14521_vm4 = vmmov %vm14511_vm9 }
 0x518   : > { %7732 = vmatmul.mubr.bf16.gmra.mxu0 %v5164_v21  ;;  %vm14525_vm3 = vmmov %vm14521_vm4 }
 0x519   : > { %7735 = vmatprep.mubr.bf16.mxu0 %v5167_v46 }
 0x51a   : > { %v4888_v10 = vpop.permute.xlu1 %4887 }
 0x51b   : > { %v5074_v58 = vsel %vm14511_vm9, %v14510_v12, %v4888_v10  ;;  %vm14526_vm9 = vmmov %vm14517_vm6 }
 0x51c   : > { %vm14535_vm6 = vmmov %vm14525_vm3 }
 0x51e   : > { %v4984_v57 = vpop.permute.xlu1 %4983 }
 0x51f   : > { %v5170_v35 = vsel %vm14516_vm7, %v5074_v58, %v4984_v57  ;;  %vm14531_vm7 = vmmov %vm14525_vm3 }
 0x520   : > { %7736 = vmatmul.mubr.bf16.gmra.mxu0 %v5170_v35 }
 0x521   : > { %7739 = vmatprep.mubr.bf16.mxu0 %v5173_v28 }
 0x558   : > { %v4892_v55 = vpop.permute.xlu1 %4891 }
 0x559   : > { %v4894_v38 = vpop.permute.xlu0 %4893  ;;  %v5080_v60 = vsel %vm14521_vm4, %v14520_v52, %v4892_v55  ;;  %vm14536_vm4 = vmmov %vm14526_vm9 }
 0x55a   : > { %v5083_v34 = vsel %vm14525_vm3, %v14524_v49, %v4894_v38  ;;  %vm14537_vm3 = vmmov %vm14536_vm4 }
 0x55c   : > { %v4988_v14 = vpop.permute.xlu1 %4987 }
 0x55d   : > { %v5176_v59 = vsel %vm14526_vm9, %v5080_v60, %v4988_v14  ;;  %v4990_v53 = vpop.permute.xlu0 %4989  ;;  %vm14541_vm9 = vmmov %vm14535_vm6 }
 0x55e   : > { %7740 = vmatmul.mubr.bf16.gmra.mxu0 %v5176_v59  ;;  %v5179_v0 = vsel %vm14527_vm11, %v5083_v34, %v4990_v53  ;;  %vm14542_vm11 = vmmov %vm14537_vm3 }
 0x55f   : > { %7743 = vmatprep.mubr.bf16.mxu0 %v5179_v0 }
 0x564   : > { %v4898_v29 = vpop.permute.xlu0 %4897  ;;  %v4896_v44 = vpop.permute.xlu1 %4895 }
 0x565   : > { %v5089_v13 = vsel %vm14531_vm7, %v14530_v8, %v4898_v29  ;;  %v5086_v16 = vsel %vm14535_vm6, %v14534_v62, %v4896_v44  ;;  %vm14547_vm7 = vcmp.lt.s32.totalorder %v8643_v3, 7 }
 0x566   : > { %vm14549_vm6 = vmmov %vm14547_vm7 }
 0x568   : > { %v4994_v32 = vpop.permute.xlu0 %4993  ;;  %v4992_v50 = vpop.permute.xlu1 %4991 }
 0x569   : > { %v5182_v63 = vsel %vm14536_vm4, %v5086_v16, %v4992_v50  ;;  %v5185_v1 = vsel %vm14537_vm3, %v5089_v13, %v4994_v32  ;;  %vm14551_vm4 = vmmov %vm14549_vm6 }
 0x56a   : > { %7744 = vmatmul.mubr.bf16.gmra.mxu0 %v5182_v63  ;;  %vm14554_vm3 = vmmov %vm14551_vm4 }
 0x56b   : > { %7747 = vmatprep.mubr.bf16.mxu0 %v5185_v1 }
 0x56c   : > { %v4900_v25 = vpop.permute.xlu1 %4899 }
 0x56d   : > { %v5092_v31 = vsel %vm14541_vm9, %v14540_v30, %v4900_v25  ;;  %vm14555_vm9 = vmmov %vm14554_vm3 }
 0x570   : > { %v4996_v40 = vpop.permute.xlu1 %4995 }
 0x571   : > { %v5188_v27 = vsel %vm14542_vm11, %v5092_v31, %v4996_v40  ;;  %vm14557_vm11 = vmmov %vm14554_vm3 }
 0x572   : > { %7748 = vmatmul.mubr.bf16.gmra.mxu0 %v5188_v27 }
 0x57d   : > { %v7689_v5 = vpop.f32.mrf.mxu0 }
 0x57e   : > { %v5304_v36 = vadd.f32 %v7689_v5, %v12108_v48 }
 0x57f   : > { %v5295_v22 = vpop.f32.mrf.mxu0 }
 0x580   : > { %v5296_v26 = vadd.f32 %v12108_v48, %v5295_v22  ;;  %v12113_v45 = vmax.f32 %v5304_v36, 0.0 }
 0x581   : > { %v7690_v4 = vpop.f32.mrf.mxu0 }
 0x582   : > { %v5307_v11 = vadd.f32 %v7690_v4, %v12108_v48  ;;  %14543 = vst [vmem:[#allocation37_spill] sm:$0xff] %v12113_v45  ;;  %v12121_v46 = vmax.f32 %v5296_v26, 0.0  ;;  %v6128_v12 = vrot.slane %v12113_v45, 1  ;;  %v8297_v26 = vld [vmem:[%s13497_s7 + $0x30] sm:$0xff]  }
 0x583   : > { %v5298_v7 = vpop.f32.mrf.mxu0  ;;  %6713 = vmatpush1.bf16.msra.mxu1 %v8297_v26 }
 0x584   : > { %v12118_v51 = vmax.f32 %v5307_v11, 0.0  ;;  %v5299_v21 = vadd.f32 %v12108_v48, %v5298_v7  ;;  %v13733_v42 = vrot.slane %v12121_v46, 1  ;;  %6714 = vmatprep.subr.bf16.mxu1 %v14546_v54 }
 0x585   : > { %v7693_v10 = vpop.f32.mrf.mxu0 }
 0x586   : > { %14544 = vst [vmem:[#allocation41_spill] sm:$0xff] %v12118_v51  ;;  %v6129_v56 = vrot.slane %v12118_v51, 1  ;;  %v12124_v6 = vmax.f32 %v5299_v21, 0.0  ;;  %v5320_v58 = vadd.f32 %v7693_v10, %v12108_v48  ;;  %v8110_v55 = vpack.i.bf16 %v12118_v51, %v12113_v45 }
 0x587   : > { %v5311_v57 = vpop.f32.mrf.mxu0 }
 0x588   : > { %14545 = vst [vmem:[#allocation21_spill] sm:$0xff] %v12124_v6  ;;  %v6127_v61 = vrot.slane %v12124_v6, 1  ;;  %v5312_v15 = vadd.f32 %v12108_v48, %v5311_v57  ;;  %5712 = vrot.lane.b32.xlu1 %v12124_v6, %s8579_s15  ;;  %v12138_v28 = vsel %vm14547_vm7, %v6128_v12, %v6129_v56  ;;  %v12149_v52 = vmax.f32 %v5320_v58, 0.0  ;;  %vm14559_vm7 = vmmov %vm14554_vm3 }
 0x589   : > { %v7694_v35 = vpop.f32.mrf.mxu0 }
 0x58a   : > { %v12142_v38 = vmax.f32 %v5312_v15, 0.0  ;;  %v5323_v37 = vadd.f32 %v7694_v35, %v12108_v48  ;;  %v12147_v24 = vsel %vm14549_vm6, %v6127_v61, %v6128_v12  ;;  %14550 = vst [vmem:[#allocation12_spill] sm:$0xff] %v12149_v52  ;;  %v12155_v14 = vsel %vm14551_vm4, %v13733_v42, %v6127_v61  ;;  %vm14562_vm6 = vmmov %vm14554_vm3 }
 0x58b   : > { %v5314_v60 = vpop.f32.mrf.mxu0  ;;  %v6132_v29 = vrot.slane %v12149_v52, 1  ;;  %vm14564_vm4 = vmmov %vm14554_vm3 }
 0x58c   : > { %14548 = vst [vmem:[#allocation43_spill] sm:$0xff] %v12142_v38  ;;  %v6130_v17 = vrot.slane %v12142_v38, 1  ;;  %v12158_v23 = vmax.f32 %v5323_v37, 0.0  ;;  %v5315_v49 = vadd.f32 %v12108_v48, %v5314_v60  ;;  %8111 = vrot.lane.b32.xlu1 %v8110_v55, %s8579_s15 }
 0x58d   : > { %v7697_v59 = vpop.f32.mrf.mxu0 }
 0x58e   : > { %14552 = vst [vmem:[#allocation11_spill] sm:$0xff] %v12158_v23  ;;  %v6133_v53 = vrot.slane %v12158_v23, 1  ;;  %v12165_v0 = vmax.f32 %v5315_v49, 0.0  ;;  %v5336_v44 = vadd.f32 %v7697_v59, %v12108_v48  ;;  %v12171_v41 = vsel %vm14554_vm3, %v6129_v56, %v6130_v17 }
 0x58f   : > { %v5327_v19 = vpop.f32.mrf.mxu0  ;;  %v8120_v18 = vpack.i.bf16 %v12158_v23, %v12149_v52 }
 0x590   : > { %14553 = vst [vmem:[#allocation15_spill] sm:$0xff] %v12165_v0  ;;  %v6131_v13 = vrot.slane %v12165_v0, 1  ;;  %v8115_v20 = vpack.i.bf16 %v12165_v0, %v12142_v38  ;;  %v5328_v47 = vadd.f32 %v12108_v48, %v5327_v19  ;;  %v6246_v32 = vsel %vm14555_vm9, %v6132_v29, %v6133_v53  ;;  %vm14570_vm9 = vmmov %vm14554_vm3 }
 0x591   : > { %v7698_v62 = vpop.f32.mrf.mxu0  ;;  %v12195_v2 = vmax.f32 %v5336_v44, 0.0 }
 0x592   : > { %v12185_v63 = vmax.f32 %v5328_v47, 0.0  ;;  %v5339_v1 = vadd.f32 %v7698_v62, %v12108_v48  ;;  %8116 = vrot.lane.b32.xlu1 %v8115_v20, %s8579_s15  ;;  %v12191_v25 = vsel %vm14557_vm11, %v6131_v13, %v6132_v29  ;;  %v12199_v31 = vsel %vm14559_vm7, %v6130_v17, %v6131_v13  ;;  %vm14571_vm11 = vmmov %vm14554_vm3 }
 0x593   : > { %14558 = vst [vmem:[#allocation30_spill] sm:$0xff] %v12195_v2  ;;  %v5330_v30 = vpop.f32.mrf.mxu0  ;;  %v6136_v39 = vrot.slane %v12195_v2, 1  ;;  %vm14573_vm7 = vmmov %vm14554_vm3 }
 0x594   : > { %14556 = vst [vmem:[#allocation22_spill] sm:$0xff] %v12185_v63  ;;  %v6134_v40 = vrot.slane %v12185_v63, 1  ;;  %v12202_v27 = vmax.f32 %v5339_v1, 0.0  ;;  %v5331_v5 = vadd.f32 %v12108_v48, %v5330_v30 }
 0x595   : > { %v7701_v22 = vpop.f32.mrf.mxu0 }
 0x596   : > { %14560 = vst [vmem:[#allocation28_spill] sm:$0xff] %v12202_v27  ;;  %v6137_v11 = vrot.slane %v12202_v27, 1  ;;  %v12213_v7 = vmax.f32 %v5331_v5, 0.0  ;;  %8121 = vrot.lane.b32.xlu1 %v8120_v18, %s8579_s15  ;;  %v5352_v21 = vadd.f32 %v7701_v22, %v12108_v48  ;;  %v6245_v56 = vsel %vm14562_vm6, %v6133_v53, %v6134_v40  ;;  %vm14574_vm6 = vmmov %vm14554_vm3 }
 0x597   : > { %v5343_v10 = vpop.f32.mrf.mxu0  ;;  %v6261_v15 = vsel %vm9071_vm8, %v6245_v56, 0.0  ;;  %vm14566_vm8 = vmmov %vm14554_vm3  ;;  %v8130_v13 = vpack.i.bf16 %v12202_v27, %v12195_v2 }
 0x598   : > { %14561 = vst [vmem:[#allocation49_spill] sm:$0xff] %v12213_v7  ;;  %v6135_v12 = vrot.slane %v12213_v7, 1  ;;  %v8125_v58 = vpack.i.bf16 %v12213_v7, %v12185_v63  ;;  %v5344_v57 = vadd.f32 %v12108_v48, %v5343_v10  ;;  %v12227_v55 = vpack.c.bf16 %v6261_v15, %v6246_v32 }
 0x599   : > { %v7702_v35 = vpop.f32.mrf.mxu0  ;;  %v12231_v37 = vsel %vm14564_vm4, %v6136_v39, %v6137_v11  ;;  %v12247_v29 = vmax.f32 %v5352_v21, 0.0  ;;  %vm14578_vm4 = vmmov %vm14554_vm3 }
 0x59a   : > { %v12235_v17 = vmax.f32 %v5344_v57, 0.0  ;;  %v5355_v49 = vadd.f32 %v7702_v35, %v12108_v48  ;;  %8126 = vrot.lane.b32.xlu1 %v8125_v58, %s8579_s15  ;;  %v12241_v59 = vsel %vm14554_vm3, %v6135_v12, %v6136_v39  ;;  %v12245_v53 = vsel %vm14566_vm8, %v6134_v40, %v6135_v12  ;;  %vm14581_vm8 = vmmov %vm14554_vm3 }
 0x59b   : > { %14567 = vst [vmem:[#allocation56_spill] sm:$0xff] %v12247_v29  ;;  %v5346_v44 = vpop.f32.mrf.mxu0  ;;  %v6140_v40 = vrot.slane %v12247_v29, 1 }
 0x59c   : > { %14565 = vst [vmem:[#allocation47_spill] sm:$0xff] %v12235_v17  ;;  %v6138_v20 = vrot.slane %v12235_v17, 1  ;;  %v12254_v47 = vmax.f32 %v5355_v49, 0.0  ;;  %v5347_v62 = vadd.f32 %v12108_v48, %v5346_v44 }
 0x59d   : > { %v7705_v32 = vpop.f32.mrf.mxu0 }
 0x59e   : > { %14568 = vst [vmem:[#allocation54_spill] sm:$0xff] %v12254_v47  ;;  %v6141_v18 = vrot.slane %v12254_v47, 1  ;;  %v12260_v30 = vmax.f32 %v5347_v62, 0.0  ;;  %8131 = vrot.lane.b32.xlu1 %v8130_v13, %s8579_s15  ;;  %v5368_v5 = vadd.f32 %v7705_v32, %v12108_v48  ;;  %v12267_v26 = vsel %vm14570_vm9, %v6137_v11, %v6138_v20  ;;  %vm14586_vm9 = vmmov %vm14554_vm3 }
 0x59f   : > { %v5359_v22 = vpop.f32.mrf.mxu0  ;;  %v8140_v62 = vpack.i.bf16 %v12254_v47, %v12247_v29 }
 0x5a0   : > { %14569 = vst [vmem:[#allocation64_spill] sm:$0xff] %v12260_v30  ;;  %v6139_v39 = vrot.slane %v12260_v30, 1  ;;  %v8135_v21 = vpack.i.bf16 %v12260_v30, %v12235_v17  ;;  %v5360_v56 = vadd.f32 %v12108_v48, %v5359_v22  ;;  %v6238_v57 = vsel %vm14571_vm11, %v6140_v40, %v6141_v18  ;;  %vm14587_vm11 = vmmov %vm14554_vm3 }
 0x5a1   : > { %v7706_v12 = vpop.f32.mrf.mxu0  ;;  %v12291_v49 = vmax.f32 %v5368_v5, 0.0 }
 0x5a2   : > { %v12279_v61 = vmax.f32 %v5360_v56, 0.0  ;;  %v5371_v11 = vadd.f32 %v7706_v12, %v12108_v48  ;;  %8136 = vrot.lane.b32.xlu1 %v8135_v21, %s8579_s15  ;;  %v12285_v15 = vsel %vm14573_vm7, %v6139_v39, %v6140_v40  ;;  %v12289_v35 = vsel %vm14574_vm6, %v6138_v20, %v6139_v39  ;;  %v8298_v56 = vld [vmem:[%s13497_s7 + $0x28] sm:$0xff]   ;;  %vm14589_vm7 = vmmov %vm14554_vm3 }
 0x5a3   : > { %14575 = vst [vmem:[#allocation26_spill] sm:$0xff] %v12291_v49  ;;  %v5362_v44 = vpop.f32.mrf.mxu0  ;;  %v6144_v12 = vrot.slane %v12291_v49, 1  ;;  %6715 = vmatpush1.bf16.msra.mxu1 %v8298_v56  ;;  %vm14590_vm6 = vmmov %vm14554_vm3 }
 0x5a4   : > { %14572 = vst [vmem:[#allocation62_spill] sm:$0xff] %v12279_v61  ;;  %v6142_v32 = vrot.slane %v12279_v61, 1  ;;  %v12298_v22 = vmax.f32 %v5371_v11, 0.0  ;;  %v5363_v40 = vadd.f32 %v12108_v48, %v5362_v44  ;;  %6716 = vmatprep.subr.bf16.mxu1 %v14546_v54 }
 0x5a5   : > { %v7709_v21 = vpop.f32.mrf.mxu0 }
 0x5a6   : > { %14576 = vst [vmem:[#allocation71_spill] sm:$0xff] %v12298_v22  ;;  %v6145_v5 = vrot.slane %v12298_v22, 1  ;;  %v12304_v39 = vmax.f32 %v5363_v40, 0.0  ;;  %8141 = vrot.lane.b32.xlu1 %v8140_v62, %s8579_s15  ;;  %v5384_v11 = vadd.f32 %v7709_v21, %v12108_v48  ;;  %v6237_v44 = vsel %vm14578_vm4, %v6141_v18, %v6142_v32  ;;  %vm14594_vm4 = vmmov %vm14554_vm3 }
 0x5a7   : > { %v5375_v1 = vpop.f32.mrf.mxu0  ;;  %v6269_v21 = vsel %vm14289_vm10, %v6237_v44, 0.0  ;;  %v8150_v60 = vpack.i.bf16 %v12298_v22, %v12291_v49  ;;  %vm14583_vm10 = vmmov %vm14554_vm3 }
 0x5a8   : > { %14577 = vst [vmem:[#allocation69_spill] sm:$0xff] %v12304_v39  ;;  %v6143_v20 = vrot.slane %v12304_v39, 1  ;;  %v8145_v40 = vpack.i.bf16 %v12304_v39, %v12279_v61  ;;  %v5376_v10 = vadd.f32 %v12108_v48, %v5375_v1  ;;  %v12325_v18 = vsel %vm14554_vm3, %v6144_v12, %v6145_v5 }
 0x5a9   : > { %v7710_v4 = vpop.f32.mrf.mxu0  ;;  %v12331_v62 = vpack.c.bf16 %v6269_v21, %v6238_v57  ;;  %v12339_v56 = vmax.f32 %v5384_v11, 0.0 }
 0x5aa   : > { %v12327_v8 = vmax.f32 %v5376_v10, 0.0  ;;  %v5387_v50 = vadd.f32 %v7710_v4, %v12108_v48  ;;  %8146 = vrot.lane.b32.xlu1 %v8145_v40, %s8579_s15  ;;  %v12335_v1 = vsel %vm14581_vm8, %v6143_v20, %v6144_v12  ;;  %v12343_v10 = vsel %vm14583_vm10, %v6142_v32, %v6143_v20  ;;  %vm14596_vm8 = vmmov %vm14554_vm3 }
 0x5ab   : > { %14582 = vst [vmem:[#allocation19_spill] sm:$0xff] %v12339_v56  ;;  %v5378_v44 = vpop.f32.mrf.mxu0  ;;  %v6148_v32 = vrot.slane %v12339_v56, 1  ;;  %vm14597_vm10 = vmmov %vm14554_vm3 }
 0x5ac   : > { %14580 = vst [vmem:[#allocation45_spill] sm:$0xff] %v12327_v8  ;;  %v6146_v4 = vrot.slane %v12327_v8, 1  ;;  %v12346_v33 = vmax.f32 %v5387_v50, 0.0  ;;  %v5379_v57 = vadd.f32 %v12108_v48, %v5378_v44 }
 0x5ad   : > { %v7713_v40 = vpop.f32.mrf.mxu0 }
 0x5ae   : > { %14584 = vst [vmem:[#allocation79_spill] sm:$0xff] %v12346_v33  ;;  %v6149_v11 = vrot.slane %v12346_v33, 1  ;;  %v12354_v13 = vmax.f32 %v5379_v57, 0.0  ;;  %8151 = vrot.lane.b32.xlu1 %v8150_v60, %s8579_s15  ;;  %v5400_v50 = vadd.f32 %v7713_v40, %v12108_v48  ;;  %v12361_v44 = vsel %vm14586_vm9, %v6145_v5, %v6146_v4  ;;  %vm14603_vm9 = vmmov %vm14554_vm3 }
 0x5af   : > { %v5391_v20 = vpop.f32.mrf.mxu0 }
 0x5b0   : > { %14585 = vst [vmem:[#allocation76_spill] sm:$0xff] %v12354_v13  ;;  %v6147_v12 = vrot.slane %v12354_v13, 1  ;;  %v8155_v21 = vpack.i.bf16 %v12354_v13, %v12327_v8  ;;  %v5392_v58 = vadd.f32 %v12108_v48, %v5391_v20  ;;  %v6230_v40 = vsel %vm14587_vm11, %v6148_v32, %v6149_v11  ;;  %vm14605_vm11 = vmmov %vm14554_vm3 }
 0x5b1   : > { %v7714_v60 = vpop.f32.mrf.mxu0  ;;  %v12385_v57 = vmax.f32 %v5400_v50, 0.0 }
 0x5b2   : > { %v12373_v36 = vmax.f32 %v5392_v58, 0.0  ;;  %v5403_v5 = vadd.f32 %v7714_v60, %v12108_v48  ;;  %8156 = vrot.lane.b32.xlu1 %v8155_v21, %s8579_s15  ;;  %v12379_v16 = vsel %vm14589_vm7, %v6147_v12, %v6148_v32  ;;  %v12383_v20 = vsel %vm14590_vm6, %v6146_v4, %v6147_v12  ;;  %v8299_v4 = vld [vmem:[%s13497_s7 + $0x20] sm:$0xff]   ;;  %vm14606_vm7 = vmmov %vm14554_vm3 }
 0x5b3   : > { %14591 = vst [vmem:[#allocation60_spill] sm:$0xff] %v12385_v57  ;;  %v5394_v19 = vpop.f32.mrf.mxu0  ;;  %v8160_v58 = vpack.i.bf16 %v12346_v33, %v12339_v56  ;;  %v6152_v34 = vrot.slane %v12385_v57, 1  ;;  %6717 = vmatpush1.bf16.msra.mxu1 %v8299_v4  ;;  %vm14610_vm6 = vmmov %vm14554_vm3 }
 0x5b4   : > { %14588 = vst [vmem:[#allocation52_spill] sm:$0xff] %v12373_v36  ;;  %v6150_v60 = vrot.slane %v12373_v36, 1  ;;  %v12392_v21 = vmax.f32 %v5403_v5, 0.0  ;;  %v5395_v32 = vadd.f32 %v12108_v48, %v5394_v19  ;;  %6718 = vmatprep.subr.bf16.mxu1 %v14546_v54 }
 0x5b6   : > { %14592 = vst [vmem:[#allocation58_spill] sm:$0xff] %v12392_v21  ;;  %v6153_v50 = vrot.slane %v12392_v21, 1  ;;  %v12401_v42 = vmax.f32 %v5395_v32, 0.0  ;;  %8161 = vrot.lane.b32.xlu1 %v8160_v58, %s8579_s15  ;;  %v6229_v5 = vsel %vm14594_vm4, %v6149_v11, %v6150_v60  ;;  %v8170_v32 = vpack.i.bf16 %v12392_v21, %v12385_v57  ;;  %vm14612_vm4 = vmmov %vm14554_vm3 }
 0x5b7   : > { %v6277_v58 = vsel %vm9303_vm12, %v6229_v5, 0.0  ;;  %vm14602_vm12 = vmmov %vm14554_vm3 }
 0x5b8   : > { %14593 = vst [vmem:[#allocation67_spill] sm:$0xff] %v12401_v42  ;;  %v6151_v19 = vrot.slane %v12401_v42, 1  ;;  %v8165_v9 = vpack.i.bf16 %v12401_v42, %v12373_v36  ;;  %v7717_v43 = vpop.f32.mrf.mxu0  ;;  %v12415_v56 = vpack.c.bf16 %v6277_v58, %v6230_v40  ;;  %v12419_v4 = vsel %vm14554_vm3, %v6152_v34, %v6153_v50 }
 0x5b9   : > { %v5416_v11 = vadd.f32 %v7717_v43, %v12108_v48 }
 0x5ba   : > { %v5407_v33 = vpop.f32.mrf.mxu0  ;;  %8166 = vrot.lane.b32.xlu1 %v8165_v9, %s8579_s15  ;;  %v12425_v12 = vsel %vm14596_vm8, %v6151_v19, %v6152_v34  ;;  %v12429_v36 = vsel %vm14597_vm10, %v6150_v60, %v6151_v19  ;;  %vm14618_vm8 = vmmov %vm14554_vm3 }
 0x5bb   : > { %v5408_v40 = vadd.f32 %v12108_v48, %v5407_v33  ;;  %v12439_v42 = vmax.f32 %v5416_v11, 0.0  ;;  %vm14619_vm10 = vmmov %vm14554_vm3 }
 0x5bc   : > { %v7718_v43 = vpop.f32.mrf.mxu0 }
 0x5bd   : > { %v12436_v58 = vmax.f32 %v5408_v40, 0.0  ;;  %v5419_v9 = vadd.f32 %v7718_v43, %v12108_v48  ;;  %14599 = vst [vmem:[#allocation73_spill] sm:$0xff] %v12439_v42  ;;  %v6156_v11 = vrot.slane %v12439_v42, 1 }
 0x5be   : > { %v5410_v34 = vpop.f32.mrf.mxu0  ;;  %8171 = vrot.lane.b32.xlu1 %v8170_v32, %s8579_s15 }
 0x5bf   : > { %14598 = vst [vmem:[#allocation75_spill] sm:$0xff] %v12436_v58  ;;  %v6154_v60 = vrot.slane %v12436_v58, 1  ;;  %v12443_v19 = vmax.f32 %v5419_v9, 0.0  ;;  %v5411_v33 = vadd.f32 %v12108_v48, %v5410_v34 }
 0x5c0   : > { %v7721_v5 = vpop.f32.mrf.mxu0 }
 0x5c1   : > { %14600 = vst [vmem:[#allocation80_spill] sm:$0xff] %v12443_v19  ;;  %v6157_v40 = vrot.slane %v12443_v19, 1  ;;  %v12449_v21 = vmax.f32 %v5411_v33, 0.0  ;;  %v5432_v43 = vadd.f32 %v7721_v5, %v12108_v48  ;;  %v12455_v32 = vsel %vm14602_vm12, %v6153_v50, %v6154_v60  ;;  %v8300_v5 = vld [vmem:[%s13497_s7 + $0x18] sm:$0xff]   ;;  %vm14621_vm12 = vmmov %vm14554_vm3 }
 0x5c2   : > { %v5423_v8 = vpop.f32.mrf.mxu0  ;;  %6719 = vmatpush1.bf16.msra.mxu1 %v8300_v5 }
 0x5c3   : > { %14601 = vst [vmem:[#allocation35_spill] sm:$0xff] %v12449_v21  ;;  %v6155_v9 = vrot.slane %v12449_v21, 1  ;;  %v8175_v34 = vpack.i.bf16 %v12449_v21, %v12436_v58  ;;  %v5424_v33 = vadd.f32 %v12108_v48, %v5423_v8  ;;  %v6222_v50 = vsel %vm14603_vm9, %v6156_v11, %v6157_v40  ;;  %6720 = vmatprep.subr.bf16.mxu1 %v14546_v54  ;;  %vm14622_vm9 = vmmov %vm14554_vm3 }
 0x5c4   : > { %v7722_v13 = vpop.f32.mrf.mxu0  ;;  %v12482_v58 = vmax.f32 %v5432_v43, 0.0 }
 0x5c5   : > { %v12470_v22 = vmax.f32 %v5424_v33, 0.0  ;;  %v5435_v61 = vadd.f32 %v7722_v13, %v12108_v48  ;;  %8176 = vrot.lane.b32.xlu1 %v8175_v34, %s8579_s15  ;;  %v12476_v8 = vsel %vm14605_vm11, %v6155_v9, %v6156_v11  ;;  %v12480_v57 = vsel %vm14606_vm7, %v6154_v60, %v6155_v9  ;;  %vm14626_vm11 = vmmov %vm14554_vm3 }
 0x5c6   : > { %14607 = vst [vmem:[#allocation39_spill] sm:$0xff] %v12482_v58  ;;  %v5426_v49 = vpop.f32.mrf.mxu0  ;;  %v8180_v13 = vpack.i.bf16 %v12443_v19, %v12439_v42  ;;  %v6160_v33 = vrot.slane %v12482_v58, 1  ;;  %vm14628_vm7 = vmmov %vm14554_vm3 }
 0x5c7   : > { %14604 = vst [vmem:[#allocation36_spill] sm:$0xff] %v12470_v22  ;;  %v6158_v34 = vrot.slane %v12470_v22, 1  ;;  %v12489_v21 = vmax.f32 %v5435_v61, 0.0  ;;  %v5427_v11 = vadd.f32 %v12108_v48, %v5426_v49 }
 0x5c8   : > { %v7725_v60 = vpop.f32.mrf.mxu0 }
 0x5c9   : > { %14608 = vst [vmem:[#allocation42_spill] sm:$0xff] %v12489_v21  ;;  %v6161_v9 = vrot.slane %v12489_v21, 1  ;;  %v12496_v5 = vmax.f32 %v5427_v11, 0.0  ;;  %8181 = vrot.lane.b32.xlu1 %v8180_v13, %s8579_s15  ;;  %v5448_v42 = vadd.f32 %v7725_v60, %v12108_v48  ;;  %v6221_v49 = vsel %vm14610_vm6, %v6157_v40, %v6158_v34  ;;  %vm14631_vm6 = vmmov %vm14554_vm3 }
 0x5ca   : > { %v5439_v61 = vpop.f32.mrf.mxu0  ;;  %v6285_v47 = vsel %vm9512_vm14, %v6221_v49, 0.0  ;;  %vm14615_vm14 = vmmov %vm14554_vm3 }
 0x5cb   : > { %14609 = vst [vmem:[#allocation83_spill] sm:$0xff] %v12496_v5  ;;  %v6159_v19 = vrot.slane %v12496_v5, 1  ;;  %v8185_v39 = vpack.i.bf16 %v12496_v5, %v12470_v22  ;;  %v5440_v11 = vadd.f32 %v12108_v48, %v5439_v61  ;;  %v12513_v60 = vsel %vm14612_vm4, %v6160_v33, %v6161_v9  ;;  %vm14636_vm4 = vmmov %vm14554_vm3 }
 0x5cc   : > { %v7726_v29 = vpop.f32.mrf.mxu0  ;;  %v12519_v30 = vpack.c.bf16 %v6285_v47, %v6222_v50  ;;  %v8190_v61 = vpack.i.bf16 %v12489_v21, %v12482_v58  ;;  %v12527_v49 = vmax.f32 %v5448_v42, 0.0  ;;  %v8301_v42 = vld [vmem:[%s13497_s7 + $0x10] sm:$0xff]  }
 0x5cd   : > { %v12515_v17 = vmax.f32 %v5440_v11, 0.0  ;;  %v5451_v40 = vadd.f32 %v7726_v29, %v12108_v48  ;;  %8186 = vrot.lane.b32.xlu1 %v8185_v39, %s8579_s15  ;;  %v12523_v43 = vsel %vm14554_vm3, %v6159_v19, %v6160_v33  ;;  %v12531_v11 = vsel %vm14615_vm14, %v6158_v34, %v6159_v19  ;;  %6721 = vmatpush1.bf16.msra.mxu1 %v8301_v42  ;;  %vm14638_vm14 = vmmov %vm14554_vm3 }
 0x5ce   : > { %14614 = vst [vmem:[#allocation85_spill] sm:$0xff] %v12527_v49  ;;  %v5442_v13 = vpop.f32.mrf.mxu0  ;;  %6722 = vmatprep.subr.bf16.mxu1 %v14546_v54 }
 0x5cf   : > { %14613 = vst [vmem:[#allocation87_spill] sm:$0xff] %v12515_v17  ;;  %v6162_v29 = vrot.slane %v12515_v17, 1  ;;  %v12534_v22 = vmax.f32 %v5451_v40, 0.0  ;;  %v5443_v47 = vadd.f32 %v12108_v48, %v5442_v13  ;;  %v6164_v40 = vrot.slane %v12527_v49, 1 }
 0x5d0   : > { %v7729_v50 = vpop.f32.mrf.mxu0 }
 0x5d1   : > { %14616 = vst [vmem:[#allocation14_spill] sm:$0xff] %v12534_v22  ;;  %v6165_v19 = vrot.slane %v12534_v22, 1  ;;  %v12545_v34 = vmax.f32 %v5443_v47, 0.0  ;;  %8191 = vrot.lane.b32.xlu1 %v8190_v61, %s8579_s15  ;;  %v5464_v13 = vadd.f32 %v7729_v50, %v12108_v48  ;;  %v12552_v39 = vsel %vm14618_vm8, %v6161_v9, %v6162_v29  ;;  %vm14640_vm8 = vmmov %vm14554_vm3 }
 0x5d2   : > { %v5455_v58 = vpop.f32.mrf.mxu0 }
 0x5d3   : > { %14617 = vst [vmem:[#allocation20_spill] sm:$0xff] %v12545_v34  ;;  %v6163_v21 = vrot.slane %v12545_v34, 1  ;;  %v8195_v33 = vpack.i.bf16 %v12545_v34, %v12515_v17  ;;  %v5456_v61 = vadd.f32 %v12108_v48, %v5455_v58  ;;  %v6214_v9 = vsel %vm14619_vm10, %v6164_v40, %v6165_v19  ;;  %vm14645_vm10 = vmmov %vm14554_vm3 }
 0x5d4   : > { %v7730_v5 = vpop.f32.mrf.mxu0  ;;  %v12577_v17 = vmax.f32 %v5464_v13, 0.0 }
 0x5d5   : > { %v12565_v42 = vmax.f32 %v5456_v61, 0.0  ;;  %v5467_v2 = vadd.f32 %v7730_v5, %v12108_v48  ;;  %8196 = vrot.lane.b32.xlu1 %v8195_v33, %s8579_s15  ;;  %v12571_v47 = vsel %vm14621_vm12, %v6163_v21, %v6164_v40  ;;  %v12575_v58 = vsel %vm14622_vm9, %v6162_v29, %v6163_v21  ;;  %vm14648_vm12 = vmmov %vm14554_vm3 }
 0x5d6   : > { %14623 = vst [vmem:[#allocation16_spill] sm:$0xff] %v12577_v17  ;;  %v5458_v50 = vpop.f32.mrf.mxu0  ;;  %v8200_v61 = vpack.i.bf16 %v12534_v22, %v12527_v49  ;;  %v6168_v34 = vrot.slane %v12577_v17, 1  ;;  %vm14650_vm9 = vmmov %vm14554_vm3 }
 0x5d7   : > { %14620 = vst [vmem:[#allocation38_spill] sm:$0xff] %v12565_v42  ;;  %v6166_v5 = vrot.slane %v12565_v42, 1  ;;  %v12584_v33 = vmax.f32 %v5467_v2, 0.0  ;;  %v5459_v40 = vadd.f32 %v12108_v48, %v5458_v50 }
 0x5d8   : > { %v7733_v27 = vpop.f32.mrf.mxu0 }
 0x5d9   : > { %14624 = vst [vmem:[#allocation25_spill] sm:$0xff] %v12584_v33  ;;  %v6169_v29 = vrot.slane %v12584_v33, 1  ;;  %v12590_v13 = vmax.f32 %v5459_v40, 0.0  ;;  %8201 = vrot.lane.b32.xlu1 %v8200_v61, %s8579_s15  ;;  %v5480_v49 = vadd.f32 %v7733_v27, %v12108_v48  ;;  %v6213_v2 = vsel %vm14626_vm11, %v6165_v19, %v6166_v5  ;;  %vm14652_vm11 = vmmov %vm14554_vm3 }
 0x5da   : > { %v5471_v22 = vpop.f32.mrf.mxu0  ;;  %v6293_v52 = vsel %vm14192_vm13, %v6213_v2, 0.0  ;;  %vm14633_vm13 = vmmov %vm14554_vm3 }
 0x5db   : > { %14625 = vst [vmem:[#allocation95_spill] sm:$0xff] %v12590_v13  ;;  %v6167_v50 = vrot.slane %v12590_v13, 1  ;;  %v8205_v63 = vpack.i.bf16 %v12590_v13, %v12565_v42  ;;  %v5472_v40 = vadd.f32 %v12108_v48, %v5471_v22  ;;  %v12607_v27 = vsel %vm14628_vm7, %v6168_v34, %v6169_v29 }
 0x5dc   : > { %v7734_v7 = vpop.f32.mrf.mxu0  ;;  %14629 = vst [vmem:[#allocation93_spill] sm:$0xff] %v12607_v27  ;;  %v12613_v38 = vpack.c.bf16 %v6293_v52, %v6214_v9  ;;  %v8210_v22 = vpack.i.bf16 %v12584_v33, %v12577_v17  ;;  %v12621_v2 = vmax.f32 %v5480_v49, 0.0  ;;  %v8302_v49 = vld [vmem:[%s13497_s7 + $0x8] sm:$0xff]  }
 0x5dd   : > { %v12609_v23 = vmax.f32 %v5472_v40, 0.0  ;;  %v5483_v19 = vadd.f32 %v7734_v7, %v12108_v48  ;;  %8206 = vrot.lane.b32.xlu1 %v8205_v63, %s8579_s15  ;;  %v12617_v21 = vsel %vm14631_vm6, %v6167_v50, %v6168_v34  ;;  %v12625_v40 = vsel %vm14633_vm13, %v6166_v5, %v6167_v50  ;;  %6723 = vmatpush1.bf16.msra.mxu1 %v8302_v49 }
 0x5de   : > { %14632 = vst [vmem:[#allocation89_spill] sm:$0xff] %v12621_v2  ;;  %v5474_v61 = vpop.f32.mrf.mxu0  ;;  %6724 = vmatprep.subr.bf16.mxu1 %v14546_v54 }
 0x5df   : > { %14630 = vst [vmem:[#allocation91_spill] sm:$0xff] %v12609_v23  ;;  %v6170_v7 = vrot.slane %v12609_v23, 1  ;;  %v12628_v42 = vmax.f32 %v5483_v19, 0.0  ;;  %v5475_v52 = vadd.f32 %v12108_v48, %v5474_v61  ;;  %v6172_v19 = vrot.slane %v12621_v2, 1 }
 0x5e0   : > { %v7737_v34 = vpop.f32.mrf.mxu0 }
 0x5e1   : > { %14634 = vst [vmem:[#allocation27_spill] sm:$0xff] %v12628_v42  ;;  %v6173_v5 = vrot.slane %v12628_v42, 1  ;;  %v12639_v50 = vmax.f32 %v5475_v52, 0.0  ;;  %8211 = vrot.lane.b32.xlu1 %v8210_v22, %s8579_s15  ;;  %v5496_v61 = vadd.f32 %v7737_v34, %v12108_v48  ;;  %v12646_v63 = vsel %vm14636_vm4, %v6169_v29, %v6170_v7 }
 0x5e2   : > { %v5487_v17 = vpop.f32.mrf.mxu0 }
 0x5e3   : > { %14635 = vst [vmem:[#allocation17_spill] sm:$0xff] %v12639_v50  ;;  %v6171_v33 = vrot.slane %v12639_v50, 1  ;;  %v8215_v9 = vpack.i.bf16 %v12639_v50, %v12609_v23  ;;  %v5488_v22 = vadd.f32 %v12108_v48, %v5487_v17  ;;  %v6206_v29 = vsel %vm14554_vm3, %v6172_v19, %v6173_v5 }
 0x5e4   : > { %v7738_v13 = vpop.f32.mrf.mxu0  ;;  %v12671_v23 = vmax.f32 %v5496_v61, 0.0 }
 0x5e5   : > { %v12659_v49 = vmax.f32 %v5488_v22, 0.0  ;;  %v5499_v0 = vadd.f32 %v7738_v13, %v12108_v48  ;;  %8216 = vrot.lane.b32.xlu1 %v8215_v9, %s8579_s15  ;;  %v12665_v52 = vsel %vm14638_vm14, %v6171_v33, %v6172_v19  ;;  %v12669_v17 = vsel %vm14640_vm8, %v6170_v7, %v6171_v33 }
 0x5e6   : > { %14639 = vst [vmem:[#allocation29_spill] sm:$0xff] %v12665_v52  ;;  %14641 = vst [vmem:[#allocation96_spill] sm:$0xff] %v12669_v17  ;;  %v5490_v34 = vpop.f32.mrf.mxu0  ;;  %v8220_v22 = vpack.i.bf16 %v12628_v42, %v12621_v2  ;;  %v6176_v61 = vrot.slane %v12671_v23, 1 }
 0x5e7   : > { %14637 = vst [vmem:[#allocation33_spill] sm:$0xff] %v12659_v49  ;;  %14642 = vst [vmem:[#allocation44_spill] sm:$0xff] %v12671_v23  ;;  %v6174_v13 = vrot.slane %v12659_v49, 1  ;;  %v12678_v9 = vmax.f32 %v5499_v0, 0.0  ;;  %v5491_v19 = vadd.f32 %v12108_v48, %v5490_v34 }
 0x5e9   : > { %14643 = vst [vmem:[#allocation32_spill] sm:$0xff] %v12678_v9  ;;  %v6177_v33 = vrot.slane %v12678_v9, 1  ;;  %v12684_v7 = vmax.f32 %v5491_v19, 0.0  ;;  %8221 = vrot.lane.b32.xlu1 %v8220_v22, %s8579_s15  ;;  %v6205_v50 = vsel %vm14645_vm10, %v6173_v5, %v6174_v13  ;;  %v8303_v5 = vld [vmem:[%s13497_s7] sm:$0xff]  }
 0x5ea   : > { %v6301_v42 = vsel %vm9606_vm1, %v6205_v50, 0.0  ;;  %v8230_v50 = vpack.i.bf16 %v12678_v9, %v12671_v23  ;;  %6725 = vmatpush1.bf16.msra.mxu1 %v8303_v5  ;;  %vm14658_vm1 = vmmov %vm14554_vm3 }
 0x5eb   : > { %14644 = vst [vmem:[#allocation48_spill] sm:$0xff] %v12684_v7  ;;  %v6175_v2 = vrot.slane %v12684_v7, 1  ;;  %v8225_v0 = vpack.i.bf16 %v12684_v7, %v12659_v49  ;;  %v12697_v19 = vpack.c.bf16 %v6301_v42, %v6206_v29  ;;  %v12701_v22 = vsel %vm14648_vm12, %v6176_v61, %v6177_v33  ;;  %6734 = vmatprep.subr.bf16.mxu1 %v14546_v54  ;;  %v8304_v29 = vld [vmem:[%s13497_s7 + $0x58] sm:$0xff]   ;;  %vm14660_vm7 = vmmov %vm14658_vm1 }
 0x5ec   : > { %14649 = vst [vmem:[#allocation51_spill] sm:$0xff] %v12701_v22  ;;  %vm14662_vm6 = vmmov %vm14658_vm1 }
 0x5ed   : > { %14647 = vst [vmem:[#allocation46_spill] sm:$0xff] %v12697_v19  ;;  %8226 = vrot.lane.b32.xlu1 %v8225_v0, %s8579_s15  ;;  %v12709_v51 = vsel %vm14650_vm9, %v6175_v2, %v6176_v61  ;;  %v12713_v45 = vsel %vm14652_vm11, %v6174_v13, %v6175_v2  ;;  %v8305_v2 = vld [vmem:[%s13497_s7 + $0x50] sm:$0xff]   ;;  %v8306_v13 = vld [vmem:[%s13497_s7 + $0x48] sm:$0xff]   ;;  %vm14664_vm13 = vmmov %vm14658_vm1 }
 0x5ee   : > { %14651 = vst [vmem:[#allocation50_spill] sm:$0xff] %v12709_v51  ;;  %14653 = vst [vmem:[#allocation55_spill] sm:$0xff] %v12713_v45  ;;  %6735 = vmatpush2.bf16.msra.mxu1 %v8304_v29  ;;  %v14667_v51 = vld [vmem:[#allocation9_spill] sm:$0xff] }
 0x5ef   : > { %6736 = vmatprep.subr.bf16.mxu1 %v14546_v54  ;;  %vm14666_vm4 = vmmov %vm14658_vm1  ;;  %vm14668_vm3 = vnez %v14667_v51 }
 0x5f0   : > { %vm14669_vm14 = vmmov %vm14658_vm1 }
 0x5f1   : > { %8231 = vrot.lane.b32.xlu1 %v8230_v50, %s8579_s15  ;;  %vm14670_vm8 = vmmov %vm14658_vm1 }
 0x5f2   : > { %6737 = vmatpush2.bf16.msra.mxu1 %v8305_v2  ;;  %vm14671_vm10 = vmmov %vm14658_vm1 }
 0x5f3   : > { %6738 = vmatprep.subr.bf16.mxu1 %v14546_v54  ;;  %vm14672_vm12 = vmmov %vm14658_vm1 }
 0x5f4   : > { %vm14673_vm9 = vmmov %vm14658_vm1 }
 0x5f5   : > { %vm14674_vm11 = vmmov %vm14658_vm1 }
 0x5f6   : > { %6739 = vmatpush2.bf16.msra.mxu1 %v8306_v13 }
 0x5f7   : > { %6740 = vmatprep.subr.bf16.mxu1 %v14546_v54 }
 0x61e   : > { %v7741_v61 = vpop.f32.mrf.mxu0 }
 0x61f   : > { %v5512_v5 = vadd.f32 %v7741_v61, %v12108_v48 }
 0x620   : > { %v5503_v0 = vpop.f32.mrf.mxu0 }
 0x621   : > { %v5504_v50 = vadd.f32 %v12108_v48, %v5503_v0  ;;  %v12738_v23 = vmax.f32 %v5512_v5, 0.0 }
 0x622   : > { %v7742_v29 = vpop.f32.mrf.mxu0 }
 0x623   : > { %v12735_v34 = vmax.f32 %v5504_v50, 0.0  ;;  %v5515_v2 = vadd.f32 %v7742_v29, %v12108_v48  ;;  %14655 = vst [vmem:[#allocation59_spill] sm:$0xff] %v12738_v23  ;;  %v6180_v5 = vrot.slane %v12738_v23, 1 }
 0x624   : > { %v5506_v42 = vpop.f32.mrf.mxu0 }
 0x625   : > { %14654 = vst [vmem:[#allocation53_spill] sm:$0xff] %v12735_v34  ;;  %v6178_v9 = vrot.slane %v12735_v34, 1  ;;  %v12741_v49 = vmax.f32 %v5515_v2, 0.0  ;;  %v5507_v54 = vadd.f32 %v12108_v48, %v5506_v42 }
 0x627   : > { %14656 = vst [vmem:[#allocation57_spill] sm:$0xff] %v12741_v49  ;;  %v12746_v61 = vmax.f32 %v5507_v54, 0.0  ;;  %v6181_v0 = vrot.slane %v12741_v49, 1  ;;  %v12751_v50 = vsel %vm14658_vm1, %v6177_v33, %v6178_v9 }
 0x628   : > { %14659 = vst [vmem:[#allocation61_spill] sm:$0xff] %v12751_v50 }
 0x629   : > { %14657 = vst [vmem:[#allocation63_spill] sm:$0xff] %v12746_v61  ;;  %v6179_v29 = vrot.slane %v12746_v61, 1  ;;  %v8235_v2 = vpack.i.bf16 %v12746_v61, %v12735_v34  ;;  %v6198_v34 = vsel %vm14664_vm13, %v6180_v5, %v6181_v0  ;;  %vm14710_vm13 = vcmp.lt.s32.totalorder %v8643_v3, 1 }
 0x62a   : > { %v7745_v7 = vpop.f32.mrf.mxu0 }
 0x62b   : > { %8236 = vrot.lane.b32.xlu1 %v8235_v2, %s8579_s15  ;;  %v12764_v33 = vsel %vm14660_vm7, %v6179_v29, %v6180_v5  ;;  %v12768_v13 = vsel %vm14662_vm6, %v6178_v9, %v6179_v29  ;;  %v5528_v6 = vadd.f32 %v7745_v7, %v12108_v48  ;;  %v8240_v2 = vpack.i.bf16 %v12741_v49, %v12738_v23  ;;  %v8307_v9 = vld [vmem:[%s13497_s7 + $0x40] sm:$0xff]   ;;  %vm14676_vm7 = vmmov %vm14658_vm1 }
 0x62c   : > { %14661 = vst [vmem:[#allocation66_spill] sm:$0xff] %v12764_v33  ;;  %14663 = vst [vmem:[#allocation65_spill] sm:$0xff] %v12768_v13  ;;  %v5519_v45 = vpop.f32.mrf.mxu0  ;;  %6741 = vmatpush2.bf16.msra.mxu1 %v8307_v9 }
 0x62d   : > { %v5520_v54 = vadd.f32 %v12108_v48, %v5519_v45  ;;  %v12784_v7 = vmax.f32 %v5528_v6, 0.0 }
 0x62e   : > { %v7746_v61 = vpop.f32.mrf.mxu0 }
 0x62f   : > { %v12781_v29 = vmax.f32 %v5520_v54, 0.0  ;;  %8241 = vrot.lane.b32.xlu1 %v8240_v2, %s8579_s15  ;;  %v5531_v42 = vadd.f32 %v7746_v61, %v12108_v48  ;;  %v6184_v2 = vrot.slane %v12784_v7, 1 }
 0x630   : > { %v5522_v13 = vpop.f32.mrf.mxu0 }
 0x631   : > { %14665 = vst [vmem:[#allocation70_spill] sm:$0xff] %v12781_v29  ;;  %v6182_v5 = vrot.slane %v12781_v29, 1  ;;  %v5523_v23 = vadd.f32 %v12108_v48, %v5522_v13  ;;  %v12789_v45 = vmax.f32 %v5531_v42, 0.0 }
 0x632   : > { %v7749_v49 = vpop.f32.mrf.mxu0 }
 0x633   : > { %v12791_v33 = vmax.f32 %v5523_v23, 0.0  ;;  %v6197_v54 = vsel %vm14666_vm4, %v6181_v0, %v6182_v5  ;;  %v6185_v61 = vrot.slane %v12789_v45, 1  ;;  %v5544_v9 = vadd.f32 %v7749_v49, %v12108_v48  ;;  %vm14711_vm4 = vmmov %vm14710_vm13 }
 0x634   : > { %v5535_v22 = vpop.f32.mrf.mxu0  ;;  %v6309_v19 = vsel %vm14668_vm3, %v6197_v54, 0.0  ;;  %v8250_v52 = vpack.i.bf16 %v12789_v45, %v12784_v7  ;;  %vm14712_vm3 = vmmov %vm14711_vm4 }
 0x635   : > { %v6183_v13 = vrot.slane %v12791_v33, 1  ;;  %v8245_v42 = vpack.i.bf16 %v12791_v33, %v12781_v29  ;;  %v5536_v0 = vadd.f32 %v12108_v48, %v5535_v22  ;;  %v12810_v6 = vsel %vm14669_vm14, %v6184_v2, %v6185_v61  ;;  %vm14713_vm14 = vmmov %vm14712_vm3 }
 0x636   : > { %v7750_v50 = vpop.f32.mrf.mxu0  ;;  %v6345_v17 = vpack.c.bf16 %v6309_v19, %v6198_v34  ;;  %v12816_v27 = vmax.f32 %v5544_v9, 0.0  ;;  %v14677_v9 = vpack.c.bf16 %v12147_v24, %v12155_v14  ;;  %v14681_v24 = vpack.c.bf16 %v12191_v25, %v12199_v31 }
 0x637   : > { %v5547_v49 = vadd.f32 %v7750_v50, %v12108_v48  ;;  %8246 = vrot.lane.b32.xlu1 %v8245_v42, %s8579_s15  ;;  %v12818_v23 = vmax.f32 %v5536_v0, 0.0  ;;  %v6195_v54 = vsel %vm14670_vm8, %v6183_v13, %v6184_v2  ;;  %v6196_v50 = vsel %vm14671_vm10, %v6182_v5, %v6183_v13 }
 0x638   : > { %v5538_v22 = vpop.f32.mrf.mxu0  ;;  %v6346_v19 = vpack.c.bf16 %v6195_v54, %v6196_v50  ;;  %v14682_v14 = vpack.c.bf16 %v12241_v59, %v12245_v53  ;;  %v14686_v25 = vpack.c.bf16 %v12361_v44, %v12325_v18  ;;  %v14687_v31 = vpack.c.bf16 %v12379_v16, %v12383_v20  ;;  %v5713_v44 = vpop.permute.xlu1 %5712  ;;  %v14705_v20 = vld [vmem:[#allocation51_spill] sm:$0xff] }
 0x639   : > { %v12820_v29 = vmax.f32 %v5547_v49, 0.0  ;;  %v5539_v51 = vadd.f32 %v12108_v48, %v5538_v22  ;;  %v6186_v34 = vrot.slane %v12818_v23, 1  ;;  %v6188_v48 = vrot.slane %v12816_v27, 1 }
 0x63a   : > { %v14690_v59 = vpack.c.bf16 %v12476_v8, %v12480_v57  ;;  %v14691_v16 = vpack.c.bf16 %v12523_v43, %v12531_v11  ;;  %v14693_v53 = vpack.c.bf16 %v12571_v47, %v12575_v58  ;;  %v14704_v57 = vld [vmem:[#allocation61_spill] sm:$0xff]  ;;  %vm6446_vm8 = vcmask 261120  }
 0x63b   : > { %v6189_v42 = vrot.slane %v12820_v29, 1  ;;  %v8105_v0 = vpack.i.bf16 %v12820_v29, %v12121_v46  ;;  %v12833_v49 = vmax.f32 %v5539_v51, 0.0  ;;  %8251 = vrot.lane.b32.xlu1 %v8250_v52, %s8579_s15  ;;  %v6193_v22 = vsel %vm14672_vm12, %v6185_v61, %v6186_v34  ;;  %v14708_v8 = vld [vmem:[#allocation65_spill] sm:$0xff]  ;;  %vm14718_vm12 = vmmov %vm14712_vm3 }
 0x63c   : > { %v6347_v52 = vpack.c.bf16 %v6193_v22, %v12810_v6  ;;  %vm14716_vm10 = vcmask 523264  }
 0x63d   : > { %v6187_v2 = vrot.slane %v12833_v49, 1  ;;  %v8255_v5 = vpack.i.bf16 %v12833_v49, %v12818_v23  ;;  %v5644_v13 = vpack.c.bf16 %v12833_v49, %v12818_v23  ;;  %8106 = vrot.lane.b32.xlu0 %v8105_v0, %s8579_s15  ;;  %v6190_v51 = vsel %vm14673_vm9, %v6188_v48, %v6189_v42  ;;  %vm14719_vm9 = vmmov %vm14712_vm3 }
 0x63e   : > { %v14675_v0 = vrot.slane %v12121_v46, 1 }
 0x63f   : > { %8256 = vrot.lane.b32.xlu1 %v8255_v5, %s8579_s15  ;;  %v12851_v54 = vsel %vm14674_vm11, %v6187_v2, %v6188_v48  ;;  %v12855_v50 = vsel %vm14658_vm1, %v6186_v34, %v6187_v2  ;;  %v14678_v5 = vld [vmem:[#allocation10_spill] sm:$0xff]  ;;  %v14680_v34 = vpack.c.bf16 %v12171_v41, %v12138_v28  ;;  %v14684_v28 = vpack.c.bf16 %v12285_v15, %v12289_v35  ;;  %v14697_v35 = vld [vmem:[#allocation29_spill] sm:$0xff]  ;;  %vm14724_vm1 = vmmov %vm14712_vm3 }
 0x640   : > { %v6253_v61 = vsel %vm14676_vm7, %v6189_v42, %v14675_v0  ;;  %v6348_v6 = vpack.c.bf16 %v12851_v54, %v12855_v50  ;;  %vm14679_vm6 = vnez %v14678_v5  ;;  %v14685_v41 = vpack.c.bf16 %v12335_v1, %v12343_v10  ;;  %v14700_v1 = vld [vmem:[#allocation46_spill] sm:$0xff]  ;;  %vm14725_vm7 = vmmov %vm14724_vm1 }
 0x641   : > { %6382 = vrot.lane.b32.xlu0 %v14677_v9, %s8579_s15  ;;  %v6317_v48 = vsel %vm14679_vm6, %v6253_v61, 0.0  ;;  %v14683_v9 = vpack.c.bf16 %v12267_v26, %v12231_v37  ;;  %v14689_v37 = vpack.c.bf16 %v12455_v32, %v12419_v4  ;;  %v14695_v26 = vld [vmem:[#allocation93_spill] sm:$0xff]  ;;  %v8112_v4 = vpop.permute.xlu1 %8111  ;;  %v14707_v32 = vld [vmem:[#allocation66_spill] sm:$0xff]  ;;  %vm14726_vm6 = vmmov %vm14724_vm1 }
 0x642   : > { %v12869_v22 = vpack.c.bf16 %v6317_v48, %v6190_v51  ;;  %v14696_v15 = vpack.c.bf16 %v12646_v63, %v14695_v26  ;;  %v14709_v43 = vpack.c.bf16 %v14707_v32, %v14708_v8  ;;  %v8113_v11 = vunpack.i.l.bf16 %v8112_v4 }
 0x643   : > { %5834 = vrot.lane.b32.xlu1 %v12816_v27, %s8579_s15  ;;  %v5903_v63 = vrot.slane %v5713_v44, 7 }
 0x644   : > { %v5904_v58 = vrot.slane %v8113_v11, 7 }
 0x645   : > { %6384 = vrot.lane.b32.xlu0 %v14680_v34, %s8579_s15  ;;  %v8117_v42 = vpop.permute.xlu1 %8116 }
 0x646   : > { %v6027_v0 = vsel %vm14711_vm4, %v5903_v63, %v5904_v58  ;;  %v8118_v5 = vunpack.i.l.bf16 %v8117_v42  ;;  %vm14731_vm4 = vmmov %vm14724_vm1 }
 0x649   : > { %6386 = vrot.lane.b32.xlu0 %v14681_v24, %s8579_s15 }
 0x64d   : > { %6388 = vrot.lane.b32.xlu0 %v12227_v55, %s8579_s15  ;;  %v14688_v55 = vpack.c.bf16 %v12425_v12, %v12429_v36  ;;  %v14692_v36 = vpack.c.bf16 %v12552_v39, %v12513_v60  ;;  %v14706_v12 = vpack.c.bf16 %v14704_v57, %v14705_v20  ;;  %v8114_v60 = vunpack.i.h.bf16 %v8112_v4 }
 0x64f   : > { %v5905_v47 = vrot.slane %v8114_v60, 7  ;;  %v14728_v60 = vld [vmem:[#allocation43_spill] sm:$0xff] }
 0x651   : > { %6390 = vrot.lane.b32.xlu0 %v14682_v14, %s8579_s15  ;;  %v6026_v50 = vsel %vm14710_vm13, %v5904_v58, %v5905_v47 }
 0x655   : > { %6392 = vrot.lane.b32.xlu0 %v14683_v9, %s8579_s15  ;;  %v14715_v9 = vld [vmem:[#allocation21_spill] sm:$0xff] }
 0x659   : > { %6394 = vrot.lane.b32.xlu0 %v14684_v28, %s8579_s15  ;;  %v5614_v28 = vpack.c.bf16 %v14715_v9, %v12121_v46 }
 0x65d   : > { %6396 = vrot.lane.b32.xlu0 %v12331_v62, %s8579_s15  ;;  %v14698_v62 = vld [vmem:[#allocation96_spill] sm:$0xff] }
 0x65e   : > { %v14699_v18 = vpack.c.bf16 %v14697_v35, %v14698_v62 }
 0x661   : > { %6398 = vrot.lane.b32.xlu0 %v14685_v41, %s8579_s15 }
 0x665   : > { %6400 = vrot.lane.b32.xlu0 %v14686_v25, %s8579_s15  ;;  %v6095_v25 = vpack.c.bf16 %v6026_v50, %v6027_v0 }
 0x669   : > { %6402 = vrot.lane.b32.xlu0 %v14687_v31, %s8579_s15 }
 0x66d   : > { %6404 = vrot.lane.b32.xlu0 %v12415_v56, %s8579_s15  ;;  %v14702_v56 = vld [vmem:[#allocation55_spill] sm:$0xff] }
 0x671   : > { %6406 = vrot.lane.b32.xlu0 %v14688_v55, %s8579_s15  ;;  %v5906_v55 = vrot.slane %v8118_v5, 7 }
 0x673   : > { %v6025_v46 = vsel %vm14719_vm9, %v5905_v47, %v5906_v55 }
 0x675   : > { %6408 = vrot.lane.b32.xlu0 %v14689_v37, %s8579_s15  ;;  %v8122_v37 = vpop.permute.xlu1 %8121 }
 0x679   : > { %6410 = vrot.lane.b32.xlu0 %v14690_v59, %s8579_s15 }
 0x67d   : > { %6412 = vrot.lane.b32.xlu0 %v12519_v30, %s8579_s15  ;;  %v14694_v30 = vpack.c.bf16 %v12617_v21, %v12625_v40 }
 0x681   : > { %6414 = vrot.lane.b32.xlu0 %v14691_v16, %s8579_s15  ;;  %v8124_v16 = vunpack.i.h.bf16 %v8122_v37 }
 0x683   : > { %v5909_v26 = vrot.slane %v8124_v16, 7 }
 0x685   : > { %6416 = vrot.lane.b32.xlu0 %v14692_v36, %s8579_s15  ;;  %v8123_v36 = vunpack.i.l.bf16 %v8122_v37  ;;  %v14740_v37 = vld [vmem:[#allocation22_spill] sm:$0xff] }
 0x689   : > { %6418 = vrot.lane.b32.xlu0 %v14693_v53, %s8579_s15  ;;  %v8127_v53 = vpop.permute.xlu1 %8126 }
 0x68a   : > { %v8128_v35 = vunpack.i.l.bf16 %v8127_v53 }
 0x68c   : > { %v5910_v44 = vrot.slane %v8128_v35, 7 }
 0x68d   : > { %6420 = vrot.lane.b32.xlu0 %v12613_v38, %s8579_s15  ;;  %v14701_v38 = vld [vmem:[#allocation50_spill] sm:$0xff]  ;;  %v8132_v32 = vpop.permute.xlu1 %8131 }
 0x68e   : > { %v14703_v10 = vpack.c.bf16 %v14701_v38, %v14702_v56  ;;  %v6021_v4 = vsel %vm14726_vm6, %v5909_v26, %v5910_v44  ;;  %v8134_v47 = vunpack.i.h.bf16 %v8132_v32  ;;  %v8133_v58 = vunpack.i.l.bf16 %v8132_v32 }
 0x691   : > { %6422 = vrot.lane.b32.xlu0 %v14694_v30, %s8579_s15  ;;  %v8137_v50 = vpop.permute.xlu1 %8136 }
 0x695   : > { %6424 = vrot.lane.b32.xlu0 %v14696_v15, %s8579_s15  ;;  %v5908_v15 = vrot.slane %v8123_v36, 7 }
 0x697   : > { %v6022_v56 = vsel %vm14724_vm1, %v5908_v15, %v5909_v26 }
 0x699   : > { %6426 = vrot.lane.b32.xlu0 %v14699_v18, %s8579_s15  ;;  %v14720_v18 = vld [vmem:[#allocation41_spill] sm:$0xff] }
 0x69d   : > { %6428 = vrot.lane.b32.xlu0 %v14700_v1, %s8579_s15  ;;  %v14721_v1 = vld [vmem:[#allocation37_spill] sm:$0xff] }
 0x69e   : > { %v14722_v38 = vpack.c.bf16 %v14720_v18, %v14721_v1  ;;  %v14745_v18 = vld [vmem:[#allocation28_spill] sm:$0xff]  ;;  %v14746_v1 = vld [vmem:[#allocation30_spill] sm:$0xff] }
 0x6a1   : > { %6430 = vrot.lane.b32.xlu0 %v14703_v10, %s8579_s15  ;;  %v8129_v10 = vunpack.i.h.bf16 %v8127_v53 }
 0x6a5   : > { %6432 = vrot.lane.b32.xlu0 %v14706_v12, %s8579_s15  ;;  %v5911_v12 = vrot.slane %v8129_v10, 7 }
 0x6a9   : > { %6434 = vrot.lane.b32.xlu0 %v14709_v43, %s8579_s15  ;;  %v14727_v43 = vld [vmem:[#allocation15_spill] sm:$0xff] }
 0x6aa   : > { %v14729_v11 = vpack.c.bf16 %v14727_v43, %v14728_v60  ;;  %v14752_v43 = vld [vmem:[#allocation64_spill] sm:$0xff]  ;;  %v14753_v60 = vld [vmem:[#allocation47_spill] sm:$0xff] }
 0x6ad   : > { %6436 = vrot.lane.b32.xlu0 %v6345_v17, %s8579_s15 }
 0x6af   : > { %v8107_v39 = vpop.permute.xlu0 %8106 }
 0x6b0   : > { %v8109_v21 = vunpack.i.h.bf16 %v8107_v39  ;;  %v8108_v40 = vunpack.i.l.bf16 %v8107_v39  ;;  %v6020_v39 = vsel %vm14731_vm4, %v5910_v44, %v5911_v12 }
 0x6b1   : > { %6438 = vrot.lane.b32.xlu0 %v6346_v19, %s8579_s15  ;;  %v8119_v19 = vunpack.i.h.bf16 %v8117_v42 }
 0x6b2   : > { %v12967_v2 = vrot.slane %v8109_v21, 7  ;;  %v5902_v51 = vrot.slane %v8108_v40, 7  ;;  %v6038_v40 = vsel %vm14117_vm5, %v6021_v4, 0.0  ;;  %v14782_v21 = vld [vmem:[#allocation6_spill] sm:$0xff] }
 0x6b3   : > { %v6383_v54 = vpop.permute.xlu0 %6382  ;;  %v5907_v31 = vrot.slane %v8119_v19, 7  ;;  %v6098_v42 = vpack.c.bf16 %v6020_v39, %v6038_v40 }
 0x6b4   : > { %v6028_v17 = vsel %vm14712_vm3, %v5902_v51, %v5903_v63  ;;  %v6029_v61 = vsel %vm14713_vm14, %v12967_v2, %v5902_v51  ;;  %v5913_v51 = vrot.slane %v8134_v47, 7  ;;  %vm14737_vm14 = vmmov %vm14724_vm1 }
 0x6b5   : > { %v6030_v34 = vsel %vm8667_vm0, %v6029_v61, 0.0  ;;  %6440 = vrot.lane.b32.xlu0 %v6347_v52, %s8579_s15  ;;  %vm14717_vm0 = vmmov %vm14716_vm10  ;;  %v6024_v52 = vsel %vm14718_vm12, %v5906_v55, %v5907_v31  ;;  %v14734_v61 = vld [vmem:[#allocation12_spill] sm:$0xff]  ;;  %v14739_v55 = vld [vmem:[#allocation49_spill] sm:$0xff] }
 0x6b6   : > { %v6094_v24 = vpack.c.bf16 %v6028_v17, %v6030_v34  ;;  %v6096_v30 = vpack.c.bf16 %v6024_v52, %v6025_v46  ;;  %vm14723_vm11 = vmmov %vm14717_vm0  ;;  %v14733_v17 = vld [vmem:[#allocation11_spill] sm:$0xff]  ;;  %v8139_v34 = vunpack.i.h.bf16 %v8137_v50 }
 0x6b7   : > { %v6385_v14 = vpop.permute.xlu0 %6384  ;;  %vm14730_vm13 = vmmov %vm14717_vm0  ;;  %v14735_v19 = vpack.c.bf16 %v14733_v17, %v14734_v61  ;;  %v14758_v17 = vld [vmem:[#allocation54_spill] sm:$0xff]  ;;  %v14759_v61 = vld [vmem:[#allocation56_spill] sm:$0xff] }
 0x6b8   : > { %v6449_v41 = vsel %vm6446_vm8, %v6094_v24, %v6383_v54  ;;  %v6452_v59 = vsel %vm6446_vm8, %v6095_v25, %v6385_v14  ;;  %v5912_v54 = vrot.slane %v8133_v58, 7  ;;  %vm14736_vm3 = vmmov %vm14717_vm0  ;;  %v8138_v24 = vunpack.i.l.bf16 %v8137_v50  ;;  %v8142_v25 = vpop.permute.xlu1 %8141 }
 0x6b9   : > { %6442 = vrot.lane.b32.xlu0 %v6348_v6, %s8579_s15  ;;  %7597 = vmatprep.mubr.msk.bf16.mxu1 %vm14716_vm10, %v6449_v41  ;;  %vm14738_vm10 = vmmov %vm14724_vm1  ;;  %v8144_v16 = vunpack.i.h.bf16 %v8142_v25  ;;  %v8143_v36 = vunpack.i.l.bf16 %v8142_v25 }
 0x6ba   : > { %6743 = vmatmul.mubr.bf16.vlgmr.msra.gmra.mxu1 %v5614_v28  ;;  %v6018_v5 = vsel %vm14737_vm14, %v5912_v54, %v5913_v51  ;;  %v6019_v48 = vsel %vm14738_vm10, %v5911_v12, %v5912_v54  ;;  %v5915_v28 = vrot.slane %v8139_v34, 7  ;;  %v5914_v41 = vrot.slane %v8138_v24, 7  ;;  %vm14742_vm5 = vmmov %vm14717_vm0 }
 0x6bb   : > { %7598 = vmatprep.mubr.msk.bf16.mxu1 %vm14717_vm0, %v6452_v59  ;;  %v6387_v6 = vpop.permute.xlu0 %6386  ;;  %v6099_v9 = vpack.c.bf16 %v6018_v5, %v6019_v48  ;;  %v14741_v59 = vpack.c.bf16 %v14739_v55, %v14740_v37  ;;  %vm14743_vm0 = vmmov %vm14724_vm1  ;;  %v5917_v26 = vrot.slane %v8144_v16, 7  ;;  %v14764_v55 = vld [vmem:[#allocation69_spill] sm:$0xff]  ;;  %v14765_v37 = vld [vmem:[#allocation62_spill] sm:$0xff] }
 0x6bc   : > { %v6455_v62 = vsel %vm6446_vm8, %v6096_v30, %v6387_v6  ;;  %v6016_v52 = vsel %vm14743_vm0, %v5914_v41, %v5915_v28  ;;  %vm14744_vm12 = vmmov %vm14743_vm0  ;;  %v8147_v53 = vpop.permute.xlu1 %8146 }
 0x6bd   : > { %6444 = vrot.lane.b32.xlu0 %v12869_v22, %s8579_s15  ;;  %v6023_v22 = vsel %vm14725_vm7, %v5907_v31, %v5908_v15  ;;  %v6017_v46 = vsel %vm14744_vm12, %v5913_v51, %v5914_v41  ;;  %v5916_v15 = vrot.slane %v8143_v36, 7  ;;  %v8148_v35 = vunpack.i.l.bf16 %v8147_v53  ;;  %vm14748_vm9 = vmmov %vm14736_vm3 }
 0x6be   : > { %v6097_v20 = vpack.c.bf16 %v6022_v56, %v6023_v22  ;;  %v6100_v30 = vpack.c.bf16 %v6016_v52, %v6017_v46  ;;  %vm14750_vm1 = vmmov %vm14743_vm0  ;;  %v8149_v10 = vunpack.i.h.bf16 %v8147_v53 }
 0x6bf   : > { %v6389_v57 = vpop.permute.xlu0 %6388  ;;  %v6015_v22 = vsel %vm14750_vm1, %v5915_v28, %v5916_v15  ;;  %v5918_v44 = vrot.slane %v8148_v35, 7  ;;  %vm14751_vm7 = vmmov %vm14743_vm0 }
 0x6c0   : > { %v6458_v8 = vsel %vm6446_vm8, %v6097_v20, %v6389_v57  ;;  %v5919_v12 = vrot.slane %v8149_v10, 7  ;;  %v8152_v32 = vpop.permute.xlu1 %8151  ;;  %vm14755_vm6 = vmmov %vm14736_vm3 }
 0x6c1   : > { %v6013_v4 = vsel %vm14751_vm7, %v5917_v26, %v5918_v44  ;;  %v8154_v47 = vunpack.i.h.bf16 %v8152_v32  ;;  %v8153_v58 = vunpack.i.l.bf16 %v8152_v32  ;;  %vm14761_vm4 = vmmov %vm14736_vm3 }
 0x6c2   : > { %6751 = vmatmul.mubr.bf16.gmra.mxu1 %v14722_v38  ;;  %v14747_v38 = vpack.c.bf16 %v14745_v18, %v14746_v1  ;;  %v6046_v40 = vsel %vm14145_vm15, %v6013_v4, 0.0  ;;  %vm14763_vm14 = vmmov %vm14743_vm0  ;;  %v14770_v18 = vld [vmem:[#allocation71_spill] sm:$0xff]  ;;  %v14771_v1 = vld [vmem:[#allocation26_spill] sm:$0xff] }
 0x6c3   : > { %7599 = vmatprep.mubr.msk.bf16.mxu1 %vm14723_vm11, %v6455_v62  ;;  %v6391_v63 = vpop.permute.xlu0 %6390  ;;  %vm14749_vm11 = vmmov %vm14743_vm0  ;;  %v5921_v51 = vrot.slane %v8154_v47, 7  ;;  %v5920_v54 = vrot.slane %v8153_v58, 7 }
 0x6c4   : > { %v6461_v0 = vsel %vm6446_vm8, %v6098_v42, %v6391_v63  ;;  %v6014_v56 = vsel %vm14749_vm11, %v5916_v15, %v5917_v26  ;;  %v8157_v50 = vpop.permute.xlu1 %8156  ;;  %vm14767_vm15 = vmmov %vm14761_vm4 }
 0x6c5   : > { %v6101_v20 = vpack.c.bf16 %v6014_v56, %v6015_v22  ;;  %v6011_v48 = vsel %vm14763_vm14, %v5919_v12, %v5920_v54  ;;  %v8159_v34 = vunpack.i.h.bf16 %v8157_v50  ;;  %v8158_v24 = vunpack.i.l.bf16 %v8157_v50  ;;  %vm14768_vm10 = vmmov %vm14743_vm0 }
 0x6c6   : > { %vm14774_vm12 = vmmov %vm14750_vm1 }
 0x6c7   : > { %v6393_v14 = vpop.permute.xlu0 %6392  ;;  %v5923_v28 = vrot.slane %v8159_v34, 7  ;;  %v5922_v41 = vrot.slane %v8158_v24, 7  ;;  %vm14776_vm11 = vmmov %vm14750_vm1 }
 0x6c8   : > { %v6464_v31 = vsel %vm6446_vm8, %v6099_v9, %v6393_v14  ;;  %v8162_v25 = vpop.permute.xlu1 %8161 }
 0x6c9   : > { %v6008_v52 = vsel %vm14768_vm10, %v5922_v41, %v5923_v28  ;;  %v8164_v16 = vunpack.i.h.bf16 %v8162_v25  ;;  %v8163_v36 = vunpack.i.l.bf16 %v8162_v25 }
 0x6ca   : > { %6759 = vmatmul.mubr.bf16.gmra.mxu1 %v14729_v11  ;;  %v14754_v11 = vpack.c.bf16 %v14752_v43, %v14753_v60  ;;  %v14777_v43 = vld [vmem:[#allocation76_spill] sm:$0xff]  ;;  %v14778_v60 = vld [vmem:[#allocation45_spill] sm:$0xff] }
 0x6cb   : > { %7600 = vmatprep.mubr.msk.bf16.mxu1 %vm14730_vm13, %v6458_v8  ;;  %v6395_v6 = vpop.permute.xlu0 %6394  ;;  %vm14756_vm13 = vmmov %vm14743_vm0  ;;  %v5925_v26 = vrot.slane %v8164_v16, 7  ;;  %v5924_v15 = vrot.slane %v8163_v36, 7 }
 0x6cc   : > { %v6467_v62 = vsel %vm6446_vm8, %v6100_v30, %v6395_v6  ;;  %v6012_v39 = vsel %vm14756_vm13, %v5918_v44, %v5919_v12  ;;  %v8167_v53 = vpop.permute.xlu1 %8166 }
 0x6cd   : > { %v6102_v42 = vpack.c.bf16 %v6012_v39, %v6046_v40  ;;  %v8168_v35 = vunpack.i.l.bf16 %v8167_v53  ;;  %v6006_v56 = vsel %vm14774_vm12, %v5924_v15, %v5925_v26  ;;  %v8169_v10 = vunpack.i.h.bf16 %v8167_v53 }
 0x6cf   : > { %v6397_v57 = vpop.permute.xlu0 %6396  ;;  %v5926_v44 = vrot.slane %v8168_v35, 7  ;;  %v5927_v12 = vrot.slane %v8169_v10, 7 }
 0x6d0   : > { %v6470_v8 = vsel %vm6446_vm8, %v6101_v20, %v6397_v57  ;;  %v8172_v32 = vpop.permute.xlu1 %8171 }
 0x6d1   : > { %v6005_v4 = vsel %vm14776_vm11, %v5925_v26, %v5926_v44  ;;  %v8174_v47 = vunpack.i.h.bf16 %v8172_v32  ;;  %v8173_v58 = vunpack.i.l.bf16 %v8172_v32 }
 0x6d2   : > { %6767 = vmatmul.mubr.bf16.gmra.mxu1 %v14735_v19  ;;  %v14760_v19 = vpack.c.bf16 %v14758_v17, %v14759_v61  ;;  %v14784_v17 = vld [vmem:[#allocation79_spill] sm:$0xff] }
 0x6d3   : > { %7601 = vmatprep.mubr.msk.bf16.mxu1 %vm14736_vm3, %v6461_v0  ;;  %v6399_v63 = vpop.permute.xlu0 %6398  ;;  %vm14762_vm3 = vmmov %vm14743_vm0  ;;  %v14785_v61 = vld [vmem:[#allocation19_spill] sm:$0xff] }
 0x6d4   : > { %v6473_v0 = vsel %vm6446_vm8, %v6102_v42, %v6399_v63  ;;  %v6010_v5 = vsel %vm14762_vm3, %v5920_v54, %v5921_v51  ;;  %vm14781_vm7 = vmmov %vm14762_vm3  ;;  %v5928_v54 = vrot.slane %v8173_v58, 7  ;;  %v8177_v50 = vpop.permute.xlu1 %8176 }
 0x6d5   : > { %v6103_v9 = vpack.c.bf16 %v6010_v5, %v6011_v48  ;;  %v6004_v39 = vsel %vm14781_vm7, %v5926_v44, %v5927_v12  ;;  %v8179_v34 = vunpack.i.h.bf16 %v8177_v50  ;;  %v8178_v24 = vunpack.i.l.bf16 %v8177_v50  ;;  %vm14794_vm10 = vmmov %vm14762_vm3 }
 0x6d6   : > { %v6003_v48 = vsel %vm14762_vm3, %v5927_v12, %v5928_v54 }
 0x6d7   : > { %v6401_v14 = vpop.permute.xlu0 %6400 }
 0x6d8   : > { %v8182_v25 = vpop.permute.xlu1 %8181 }
 0x6d9   : > { %v8184_v16 = vunpack.i.h.bf16 %v8182_v25  ;;  %v8183_v36 = vunpack.i.l.bf16 %v8182_v25 }
 0x6da   : > { %6775 = vmatmul.mubr.bf16.gmra.mxu1 %v14741_v59  ;;  %v14766_v59 = vpack.c.bf16 %v14764_v55, %v14765_v37  ;;  %v14789_v55 = vld [vmem:[#allocation67_spill] sm:$0xff]  ;;  %v14790_v37 = vld [vmem:[#allocation52_spill] sm:$0xff] }
 0x6db   : > { %7602 = vmatprep.mubr.msk.bf16.mxu1 %vm14742_vm5, %v6464_v31  ;;  %v6476_v31 = vsel %vm6446_vm8, %v6103_v9, %v6401_v14  ;;  %vm14769_vm5 = vmmov %vm14743_vm0  ;;  %v6403_v6 = vpop.permute.xlu0 %6402  ;;  %v5933_v26 = vrot.slane %v8184_v16, 7 }
 0x6dc   : > { %v6009_v46 = vsel %vm14769_vm5, %v5921_v51, %v5922_v41  ;;  %vm14773_vm0 = vmmov %vm14761_vm4  ;;  %v5929_v51 = vrot.slane %v8174_v47, 7  ;;  %v5930_v41 = vrot.slane %v8178_v24, 7  ;;  %v8187_v53 = vpop.permute.xlu1 %8186 }
 0x6dd   : > { %v6104_v30 = vpack.c.bf16 %v6008_v52, %v6009_v46  ;;  %vm14787_vm13 = vmmov %vm14773_vm0  ;;  %v8188_v35 = vunpack.i.l.bf16 %v8187_v53  ;;  %v8189_v10 = vunpack.i.h.bf16 %v8187_v53 }
 0x6de   : > { %vm14792_vm14 = vmmov %vm14773_vm0  ;;  %v6001_v46 = vsel %vm14794_vm10, %v5929_v51, %v5930_v41 }
 0x6df   : > { %v6405_v57 = vpop.permute.xlu0 %6404  ;;  %vm14798_vm5 = vmmov %vm14773_vm0  ;;  %v5934_v44 = vrot.slane %v8188_v35, 7  ;;  %v5935_v12 = vrot.slane %v8189_v10, 7 }
 0x6e0   : > { %v8192_v32 = vpop.permute.xlu1 %8191 }
 0x6e1   : > { %v8194_v47 = vunpack.i.h.bf16 %v8192_v32  ;;  %v8193_v58 = vunpack.i.l.bf16 %v8192_v32 }
 0x6e2   : > { %6783 = vmatmul.mubr.bf16.gmra.mxu1 %v14747_v38  ;;  %v14772_v38 = vpack.c.bf16 %v14770_v18, %v14771_v1  ;;  %v14795_v18 = vld [vmem:[#allocation58_spill] sm:$0xff]  ;;  %v14796_v1 = vld [vmem:[#allocation60_spill] sm:$0xff] }
 0x6e3   : > { %7603 = vmatprep.mubr.msk.bf16.mxu1 %vm14748_vm9, %v6467_v62  ;;  %v6479_v62 = vsel %vm6446_vm8, %v6104_v30, %v6403_v6  ;;  %vm14775_vm9 = vmmov %vm14750_vm1  ;;  %v6407_v63 = vpop.permute.xlu0 %6406 }
 0x6e4   : > { %v6007_v22 = vsel %vm14775_vm9, %v5923_v28, %v5924_v15  ;;  %vm14780_vm1 = vmmov %vm14773_vm0  ;;  %v5931_v28 = vrot.slane %v8179_v34, 7  ;;  %v5932_v15 = vrot.slane %v8183_v36, 7  ;;  %v8197_v50 = vpop.permute.xlu1 %8196 }
 0x6e5   : > { %v6105_v20 = vpack.c.bf16 %v6006_v56, %v6007_v22  ;;  %vm14805_vm11 = vmmov %vm14780_vm1  ;;  %v8199_v34 = vunpack.i.h.bf16 %v8197_v50  ;;  %v8198_v24 = vunpack.i.l.bf16 %v8197_v50 }
 0x6e7   : > { %v6409_v14 = vpop.permute.xlu0 %6408 }
 0x6e8   : > { %v8202_v25 = vpop.permute.xlu1 %8201 }
 0x6e9   : > { %v8204_v16 = vunpack.i.h.bf16 %v8202_v25  ;;  %v8203_v36 = vunpack.i.l.bf16 %v8202_v25 }
 0x6ea   : > { %6791 = vmatmul.mubr.bf16.gmra.mxu1 %v14754_v11  ;;  %v14779_v11 = vpack.c.bf16 %v14777_v43, %v14778_v60  ;;  %v14802_v43 = vld [vmem:[#allocation35_spill] sm:$0xff] }
 0x6eb   : > { %7604 = vmatprep.mubr.msk.bf16.mxu1 %vm14755_vm6, %v6470_v8  ;;  %v6482_v8 = vsel %vm6446_vm8, %v6105_v20, %v6405_v57  ;;  %vm14783_vm6 = vnez %v14782_v21  ;;  %v6411_v6 = vpop.permute.xlu0 %6410  ;;  %v14803_v60 = vld [vmem:[#allocation75_spill] sm:$0xff]  ;;  %v14807_v21 = vld [vmem:[#allocation13_spill] sm:$0xff] }
 0x6ec   : > { %v6054_v40 = vsel %vm14783_vm6, %v6005_v4, 0.0  ;;  %vm14808_vm7 = vnez %v14807_v21  ;;  %vm14812_vm6 = vmmov %vm14798_vm5  ;;  %v8207_v53 = vpop.permute.xlu1 %8206  ;;  %v14832_v21 = vld [vmem:[#allocation23_spill] sm:$0xff] }
 0x6ed   : > { %v6106_v42 = vpack.c.bf16 %v6004_v39, %v6054_v40  ;;  %v8208_v35 = vunpack.i.l.bf16 %v8207_v53  ;;  %v8209_v10 = vunpack.i.h.bf16 %v8207_v53 }
 0x6ef   : > { %v6413_v57 = vpop.permute.xlu0 %6412 }
 0x6f0   : > { %v8212_v32 = vpop.permute.xlu1 %8211 }
 0x6f2   : > { %6799 = vmatmul.mubr.bf16.gmra.mxu1 %v14760_v19  ;;  %v14786_v19 = vpack.c.bf16 %v14784_v17, %v14785_v61  ;;  %v14809_v17 = vld [vmem:[#allocation80_spill] sm:$0xff]  ;;  %v14810_v61 = vld [vmem:[#allocation73_spill] sm:$0xff] }
 0x6f3   : > { %7605 = vmatprep.mubr.msk.bf16.mxu1 %vm14761_vm4, %v6473_v0  ;;  %v6485_v0 = vsel %vm6446_vm8, %v6106_v42, %v6407_v63  ;;  %vm14788_vm4 = vmmov %vm14762_vm3  ;;  %v6415_v63 = vpop.permute.xlu0 %6414 }
 0x6f4   : > { %v6002_v5 = vsel %vm14788_vm4, %v5928_v54, %v5929_v51  ;;  %v5937_v51 = vrot.slane %v8194_v47, 7  ;;  %v5936_v54 = vrot.slane %v8193_v58, 7  ;;  %v8214_v47 = vunpack.i.h.bf16 %v8212_v32  ;;  %v8217_v50 = vpop.permute.xlu1 %8216 }
 0x6f5   : > { %v6107_v9 = vpack.c.bf16 %v6002_v5, %v6003_v48  ;;  %v8213_v58 = vunpack.i.l.bf16 %v8212_v32 }
 0x6f8   : > { %v8222_v25 = vpop.permute.xlu1 %8221 }
 0x6fa   : > { %6807 = vmatmul.mubr.bf16.gmra.mxu1 %v14766_v59  ;;  %v14791_v59 = vpack.c.bf16 %v14789_v55, %v14790_v37  ;;  %v14815_v55 = vld [vmem:[#allocation83_spill] sm:$0xff]  ;;  %v14816_v37 = vld [vmem:[#allocation36_spill] sm:$0xff] }
 0x6fb   : > { %7606 = vmatprep.mubr.msk.bf16.mxu1 %vm14767_vm15, %v6476_v31  ;;  %v6488_v31 = vsel %vm6446_vm8, %v6107_v9, %v6409_v14  ;;  %vm14793_vm15 = vmmov %vm14762_vm3  ;;  %v6417_v14 = vpop.permute.xlu0 %6416 }
 0x6fc   : > { %v6000_v52 = vsel %vm14793_vm15, %v5930_v41, %v5931_v28  ;;  %v5938_v41 = vrot.slane %v8198_v24, 7  ;;  %v8218_v24 = vunpack.i.l.bf16 %v8217_v50  ;;  %v8227_v53 = vpop.permute.xlu1 %8226 }
 0x6fd   : > { %v6108_v30 = vpack.c.bf16 %v6000_v52, %v6001_v46 }
 0x700   : > { %v8232_v32 = vpop.permute.xlu1 %8231 }
 0x702   : > { %6815 = vmatmul.mubr.bf16.gmra.mxu1 %v14772_v38  ;;  %v14797_v38 = vpack.c.bf16 %v14795_v18, %v14796_v1  ;;  %v14821_v18 = vld [vmem:[#allocation42_spill] sm:$0xff]  ;;  %v14822_v1 = vld [vmem:[#allocation39_spill] sm:$0xff] }
 0x703   : > { %7607 = vmatprep.mubr.msk.bf16.mxu1 %vm14773_vm0, %v6479_v62  ;;  %v6491_v62 = vsel %vm6446_vm8, %v6108_v30, %v6411_v6  ;;  %vm14799_vm0 = vmmov %vm14762_vm3  ;;  %v6419_v6 = vpop.permute.xlu0 %6418 }
 0x704   : > { %v5998_v56 = vsel %vm14799_vm0, %v5932_v15, %v5933_v26  ;;  %vm14800_vm12 = vmmov %vm14799_vm0 }
 0x705   : > { %v5999_v22 = vsel %vm14800_vm12, %v5931_v28, %v5932_v15  ;;  %vm14801_vm9 = vmmov %vm14799_vm0  ;;  %v5939_v28 = vrot.slane %v8199_v34, 7  ;;  %v5940_v15 = vrot.slane %v8203_v36, 7  ;;  %v8219_v34 = vunpack.i.h.bf16 %v8217_v50  ;;  %v8237_v50 = vpop.permute.xlu1 %8236 }
 0x706   : > { %v6109_v20 = vpack.c.bf16 %v5998_v56, %v5999_v22  ;;  %v5997_v4 = vsel %vm14801_vm9, %v5933_v26, %v5934_v44  ;;  %vm14814_vm4 = vmmov %vm14799_vm0  ;;  %v5941_v26 = vrot.slane %v8204_v16, 7  ;;  %v8224_v16 = vunpack.i.h.bf16 %v8222_v25 }
 0x707   : > { %v6062_v40 = vsel %vm14808_vm7, %v5997_v4, 0.0  ;;  %v5995_v48 = vsel %vm14814_vm4, %v5935_v12, %v5936_v54  ;;  %vm14818_vm3 = vmmov %vm14798_vm5  ;;  %v5991_v22 = vsel %vm14799_vm0, %v5939_v28, %v5940_v15  ;;  %v8223_v36 = vunpack.i.l.bf16 %v8222_v25 }
 0x708   : > { %vm14820_vm15 = vmmov %vm14799_vm0 }
 0x709   : > { %v5993_v46 = vsel %vm14820_vm15, %v5937_v51, %v5938_v41  ;;  %vm14824_vm10 = vmmov %vm14818_vm3 }
 0x70a   : > { %6823 = vmatmul.mubr.bf16.gmra.mxu1 %v14779_v11  ;;  %v14804_v11 = vpack.c.bf16 %v14802_v43, %v14803_v60  ;;  %vm14826_vm12 = vmmov %vm14799_vm0  ;;  %v14827_v43 = vld [vmem:[#allocation20_spill] sm:$0xff]  ;;  %v14828_v60 = vld [vmem:[#allocation87_spill] sm:$0xff] }
 0x70b   : > { %7608 = vmatprep.mubr.msk.bf16.mxu1 %vm14780_vm1, %v6482_v8  ;;  %v6494_v8 = vsel %vm6446_vm8, %v6109_v20, %v6413_v57  ;;  %vm14806_vm1 = vmmov %vm14799_vm0  ;;  %v6421_v57 = vpop.permute.xlu0 %6420 }
 0x70c   : > { %v5996_v39 = vsel %vm14806_vm1, %v5934_v44, %v5935_v12  ;;  %v5942_v44 = vrot.slane %v8208_v35, 7  ;;  %v5943_v12 = vrot.slane %v8209_v10, 7  ;;  %vm14830_vm9 = vmmov %vm14818_vm3  ;;  %vm14833_vm1 = vnez %v14832_v21  ;;  %v14857_v21 = vld [vmem:[#allocation31_spill] sm:$0xff] }
 0x70d   : > { %v6110_v42 = vpack.c.bf16 %v5996_v39, %v6062_v40  ;;  %vm14837_vm7 = vmmov %vm14818_vm3  ;;  %v8228_v35 = vunpack.i.l.bf16 %v8227_v53  ;;  %v8229_v10 = vunpack.i.h.bf16 %v8227_v53 }
 0x70e   : > { %v5989_v4 = vsel %vm14826_vm12, %v5941_v26, %v5942_v44  ;;  %vm14843_vm4 = vmmov %vm14818_vm3 }
 0x70f   : > { %v6070_v40 = vsel %vm14833_vm1, %v5989_v4, 0.0  ;;  %vm14849_vm15 = vmmov %vm14843_vm4 }
 0x710   : > { %vm14855_vm12 = vmmov %vm14843_vm4 }
 0x711   : > { %vm14862_vm1 = vmmov %vm14843_vm4 }
 0x712   : > { %6831 = vmatmul.mubr.bf16.gmra.mxu1 %v14786_v19  ;;  %v14811_v19 = vpack.c.bf16 %v14809_v17, %v14810_v61  ;;  %v14834_v17 = vld [vmem:[#allocation14_spill] sm:$0xff]  ;;  %v14835_v61 = vld [vmem:[#allocation85_spill] sm:$0xff] }
 0x713   : > { %7609 = vmatprep.mubr.msk.bf16.mxu1 %vm14787_vm13, %v6485_v0  ;;  %v6497_v0 = vsel %vm6446_vm8, %v6110_v42, %v6415_v63  ;;  %vm14813_vm13 = vmmov %vm14799_vm0  ;;  %v6423_v63 = vpop.permute.xlu0 %6422 }
 0x714   : > { %v5994_v5 = vsel %vm14813_vm13, %v5936_v54, %v5937_v51  ;;  %v5945_v51 = vrot.slane %v8214_v47, 7  ;;  %v5944_v54 = vrot.slane %v8213_v58, 7  ;;  %vm14839_vm13 = vmmov %vm14799_vm0  ;;  %v8234_v47 = vunpack.i.h.bf16 %v8232_v32 }
 0x715   : > { %v6111_v9 = vpack.c.bf16 %v5994_v5, %v5995_v48  ;;  %v8233_v58 = vunpack.i.l.bf16 %v8232_v32 }
 0x716   : > { %v5987_v48 = vsel %vm14839_vm13, %v5943_v12, %v5944_v54  ;;  %vm14868_vm13 = vmmov %vm14862_vm1 }
 0x71a   : > { %6839 = vmatmul.mubr.bf16.gmra.mxu1 %v14791_v59  ;;  %v14817_v59 = vpack.c.bf16 %v14815_v55, %v14816_v37  ;;  %v14840_v55 = vld [vmem:[#allocation95_spill] sm:$0xff]  ;;  %v14841_v37 = vld [vmem:[#allocation38_spill] sm:$0xff] }
 0x71b   : > { %7610 = vmatprep.mubr.msk.bf16.mxu1 %vm14792_vm14, %v6488_v31  ;;  %v6500_v31 = vsel %vm6446_vm8, %v6111_v9, %v6417_v14  ;;  %vm14819_vm14 = vmmov %vm14799_vm0  ;;  %v6425_v14 = vpop.permute.xlu0 %6424 }
 0x71c   : > { %v5992_v52 = vsel %vm14819_vm14, %v5938_v41, %v5939_v28  ;;  %v5947_v28 = vrot.slane %v8219_v34, 7  ;;  %v5946_v41 = vrot.slane %v8218_v24, 7  ;;  %vm14845_vm14 = vmmov %vm14799_vm0  ;;  %v8239_v34 = vunpack.i.h.bf16 %v8237_v50 }
 0x71d   : > { %v6112_v30 = vpack.c.bf16 %v5992_v52, %v5993_v46  ;;  %v8238_v24 = vunpack.i.l.bf16 %v8237_v50 }
 0x71e   : > { %v5985_v46 = vsel %vm14845_vm14, %v5945_v51, %v5946_v41  ;;  %vm14874_vm14 = vmmov %vm14862_vm1 }
 0x71f   : > { %v5954_v25 = vrot.slane %v8238_v24, 7 }
 0x722   : > { %6847 = vmatmul.mubr.bf16.gmra.mxu1 %v14797_v38  ;;  %v14823_v38 = vpack.c.bf16 %v14821_v18, %v14822_v1  ;;  %v14846_v18 = vld [vmem:[#allocation25_spill] sm:$0xff]  ;;  %v14847_v1 = vld [vmem:[#allocation16_spill] sm:$0xff] }
 0x723   : > { %7611 = vmatprep.mubr.msk.bf16.mxu1 %vm14798_vm5, %v6491_v62  ;;  %v6503_v62 = vsel %vm6446_vm8, %v6112_v30, %v6419_v6  ;;  %vm14825_vm5 = vmmov %vm14799_vm0  ;;  %v6427_v6 = vpop.permute.xlu0 %6426 }
 0x724   : > { %v5990_v56 = vsel %vm14825_vm5, %v5940_v15, %v5941_v26  ;;  %v5949_v26 = vrot.slane %v8224_v16, 7  ;;  %v5948_v15 = vrot.slane %v8223_v36, 7  ;;  %vm14851_vm5 = vmmov %vm14799_vm0 }
 0x725   : > { %v6113_v20 = vpack.c.bf16 %v5990_v56, %v5991_v22 }
 0x726   : > { %v5983_v22 = vsel %vm14851_vm5, %v5947_v28, %v5948_v15  ;;  %vm14877_vm5 = vmmov %vm14799_vm0 }
 0x72a   : > { %6855 = vmatmul.mubr.bf16.gmra.mxu1 %v14804_v11  ;;  %v14829_v11 = vpack.c.bf16 %v14827_v43, %v14828_v60  ;;  %v14852_v43 = vld [vmem:[#allocation17_spill] sm:$0xff]  ;;  %v14853_v60 = vld [vmem:[#allocation91_spill] sm:$0xff] }
 0x72b   : > { %7612 = vmatprep.mubr.msk.bf16.mxu1 %vm14805_vm11, %v6494_v8  ;;  %v6506_v8 = vsel %vm6446_vm8, %v6113_v20, %v6421_v57  ;;  %vm14831_vm11 = vmmov %vm14799_vm0  ;;  %v6429_v57 = vpop.permute.xlu0 %6428 }
 0x72c   : > { %v5988_v39 = vsel %vm14831_vm11, %v5942_v44, %v5943_v12  ;;  %v5950_v44 = vrot.slane %v8228_v35, 7  ;;  %v5951_v12 = vrot.slane %v8229_v10, 7  ;;  %vm14858_vm11 = vnez %v14857_v21 }
 0x72d   : > { %v6114_v42 = vpack.c.bf16 %v5988_v39, %v6070_v40 }
 0x72e   : > { %v5981_v4 = vsel %vm14799_vm0, %v5949_v26, %v5950_v44 }
 0x72f   : > { %v6078_v40 = vsel %vm14858_vm11, %v5981_v4, 0.0 }
 0x732   : > { %6863 = vmatmul.mubr.bf16.gmra.mxu1 %v14811_v19  ;;  %v14836_v19 = vpack.c.bf16 %v14834_v17, %v14835_v61  ;;  %v14859_v17 = vld [vmem:[#allocation27_spill] sm:$0xff]  ;;  %v14860_v61 = vld [vmem:[#allocation89_spill] sm:$0xff] }
 0x733   : > { %7613 = vmatprep.mubr.msk.bf16.mxu1 %vm14812_vm6, %v6497_v0  ;;  %v6509_v0 = vsel %vm6446_vm8, %v6114_v42, %v6423_v63  ;;  %vm14838_vm6 = vmmov %vm14799_vm0  ;;  %v6431_v63 = vpop.permute.xlu0 %6430 }
 0x734   : > { %v5986_v5 = vsel %vm14838_vm6, %v5944_v54, %v5945_v51  ;;  %v5953_v51 = vrot.slane %v8234_v47, 7  ;;  %v5952_v54 = vrot.slane %v8233_v58, 7  ;;  %vm14864_vm6 = vmmov %vm14799_vm0 }
 0x735   : > { %v6115_v9 = vpack.c.bf16 %v5986_v5, %v5987_v48 }
 0x736   : > { %v5979_v48 = vsel %vm14864_vm6, %v5951_v12, %v5952_v54 }
 0x73a   : > { %6871 = vmatmul.mubr.bf16.gmra.mxu1 %v14817_v59  ;;  %v14842_v59 = vpack.c.bf16 %v14840_v55, %v14841_v37 }
 0x73b   : > { %7614 = vmatprep.mubr.msk.bf16.mxu1 %vm14818_vm3, %v6500_v31  ;;  %v6512_v31 = vsel %vm6446_vm8, %v6115_v9, %v6425_v14  ;;  %vm14844_vm3 = vmmov %vm14799_vm0  ;;  %v6433_v14 = vpop.permute.xlu0 %6432 }
 0x73c   : > { %v5984_v52 = vsel %vm14844_vm3, %v5946_v41, %v5947_v28  ;;  %v13216_v28 = vld [vmem:[%s13498_s8] ss:$0 sm:$0xff]  ;;  %v5955_v41 = vrot.slane %v8239_v34, 7  ;;  %vm14870_vm3 = vmmov %vm14799_vm0 }
 0x73d   : > { %v6116_v30 = vpack.c.bf16 %v5984_v52, %v5985_v46  ;;  %v14866_v52 = vld [vmem:[#allocation33_spill] sm:$0xff]  ;;  %vm14889_vm11 = vmmov %vm14870_vm3 }
 0x73e   : > { %vm14894_vm6 = vmmov %vm14870_vm3 }
 0x742   : > { %6879 = vmatmul.mubr.bf16.gmra.mxu1 %v14823_v38  ;;  %v14848_v38 = vpack.c.bf16 %v14846_v18, %v14847_v1  ;;  %v6435_v18 = vpop.permute.xlu0 %6434 }
 0x743   : > { %7615 = vmatprep.mubr.msk.bf16.mxu1 %vm14824_vm10, %v6503_v62  ;;  %v6515_v62 = vsel %vm6446_vm8, %v6116_v30, %v6427_v6  ;;  %vm14850_vm10 = vmmov %vm14799_vm0 }
 0x744   : > { %v5982_v56 = vsel %vm14850_vm10, %v5948_v15, %v5949_v26  ;;  %v5977_v26 = vsel %vm14870_vm3, %v5953_v51, %v5954_v25  ;;  %vm14876_vm10 = vmmov %vm14799_vm0 }
 0x745   : > { %v6117_v20 = vpack.c.bf16 %v5982_v56, %v5983_v22 }
 0x746   : > { %v6437_v50 = vpop.permute.xlu0 %6436 }
 0x74a   : > { %6887 = vmatmul.mubr.bf16.gmra.mxu1 %v14829_v11  ;;  %v14854_v11 = vpack.c.bf16 %v14852_v43, %v14853_v60  ;;  %v14872_v43 = vld [vmem:[#allocation44_spill] sm:$0xff] }
 0x74b   : > { %7616 = vmatprep.mubr.msk.bf16.mxu1 %vm14830_vm9, %v6506_v8  ;;  %v6518_v8 = vsel %vm6446_vm8, %v6117_v20, %v6429_v57  ;;  %vm14856_vm9 = vmmov %vm14799_vm0 }
 0x74c   : > { %v5980_v39 = vsel %vm14856_vm9, %v5950_v44, %v5951_v12  ;;  %vm14888_vm9 = vmmov %vm14870_vm3 }
 0x74d   : > { %v6118_v42 = vpack.c.bf16 %v5980_v39, %v6078_v40 }
 0x752   : > { %6895 = vmatmul.mubr.bf16.gmra.mxu1 %v14836_v19  ;;  %v14861_v19 = vpack.c.bf16 %v14859_v17, %v14860_v61 }
 0x753   : > { %7617 = vmatprep.mubr.msk.bf16.mxu1 %vm14837_vm7, %v6509_v0  ;;  %v6521_v0 = vsel %vm6446_vm8, %v6118_v42, %v6431_v63  ;;  %vm14863_vm7 = vmmov %vm14799_vm0 }
 0x754   : > { %v5978_v5 = vsel %vm14863_vm7, %v5952_v54, %v5953_v51  ;;  %vm14893_vm7 = vmmov %vm14870_vm3 }
 0x755   : > { %v6119_v9 = vpack.c.bf16 %v5978_v5, %v5979_v48 }
 0x757   : > { %v6524_v55 = vsel %vm6446_vm8, %v6119_v9, %v6433_v14 }
 0x75a   : > { %6903 = vmatmul.mubr.bf16.gmra.mxu1 %v14842_v59  ;;  %v14865_v59 = vld [vmem:[#allocation48_spill] sm:$0xff] }
 0x75b   : > { %7618 = vmatprep.mubr.msk.bf16.mxu1 %vm14843_vm4, %v6512_v31  ;;  %v8242_v31 = vpop.permute.xlu1 %8241  ;;  %v14867_v46 = vpack.c.bf16 %v14865_v59, %v14866_v52  ;;  %vm14869_vm4 = vmmov %vm14799_vm0 }
 0x75c   : > { %v8244_v36 = vunpack.i.h.bf16 %v8242_v31  ;;  %v8243_v53 = vunpack.i.l.bf16 %v8242_v31  ;;  %v5976_v30 = vsel %vm14869_vm4, %v5954_v25, %v5955_v41  ;;  %v14878_v25 = vld [vmem:[#allocation63_spill] sm:$0xff]  ;;  %v14879_v31 = vld [vmem:[#allocation53_spill] sm:$0xff] }
 0x75d   : > { %v6120_v10 = vpack.c.bf16 %v5976_v30, %v5977_v26 }
 0x75e   : > { %v5957_v56 = vrot.slane %v8244_v36, 7  ;;  %v5956_v22 = vrot.slane %v8243_v53, 7 }
 0x75f   : > { %v6527_v4 = vsel %vm6446_vm8, %v6120_v10, %v6435_v18 }
 0x760   : > { %v5975_v21 = vsel %vm14876_vm10, %v5955_v41, %v5956_v22 }
 0x762   : > { %6911 = vmatmul.mubr.bf16.gmra.mxu1 %v14848_v38 }
 0x763   : > { %7619 = vmatprep.mubr.msk.bf16.mxu1 %vm14849_vm15, %v6515_v62  ;;  %v8247_v62 = vpop.permute.xlu1 %8246  ;;  %vm14875_vm15 = vmmov %vm14799_vm0 }
 0x764   : > { %v8248_v12 = vunpack.i.l.bf16 %v8247_v62  ;;  %v5974_v47 = vsel %vm14875_vm15, %v5956_v22, %v5957_v56  ;;  %v8249_v40 = vunpack.i.h.bf16 %v8247_v62  ;;  %vm14881_vm0 = vmmov %vm14862_vm1 }
 0x765   : > { %v6121_v61 = vpack.c.bf16 %v5974_v47, %v5975_v21  ;;  %vm14896_vm4 = vmmov %vm14881_vm0 }
 0x766   : > { %v5958_v51 = vrot.slane %v8248_v12, 7  ;;  %v5959_v5 = vrot.slane %v8249_v40, 7  ;;  %vm14898_vm15 = vmmov %vm14881_vm0 }
 0x767   : > { %v8252_v48 = vpop.permute.xlu1 %8251  ;;  %v6530_v9 = vsel %vm6446_vm8, %v6121_v61, %v6437_v50 }
 0x768   : > { %v5973_v14 = vsel %vm14877_vm5, %v5957_v56, %v5958_v51  ;;  %v8254_v52 = vunpack.i.h.bf16 %v8252_v48 }
 0x76a   : > { %6919 = vmatmul.mubr.bf16.gmra.mxu1 %v14854_v11 }
 0x76b   : > { %7620 = vmatprep.mubr.msk.bf16.mxu1 %vm14855_vm12, %v6518_v8  ;;  %v14871_v8 = vld [vmem:[#allocation32_spill] sm:$0xff]  ;;  %vm14882_vm12 = vmmov %vm14870_vm3 }
 0x76c   : > { %v14873_v60 = vpack.c.bf16 %v14871_v8, %v14872_v43  ;;  %v5972_v36 = vsel %vm14882_vm12, %v5958_v51, %v5959_v5  ;;  %v14884_v8 = vld [vmem:[#allocation57_spill] sm:$0xff]  ;;  %v14885_v43 = vld [vmem:[#allocation59_spill] sm:$0xff] }
 0x772   : > { %6927 = vmatmul.mubr.bf16.gmra.mxu1 %v14861_v19 }
 0x773   : > { %7621 = vmatprep.mubr.msk.bf16.mxu1 %vm14862_vm1, %v6521_v0  ;;  %vm14892_vm1 = vmmov %vm14881_vm0 }
 0x77a   : > { %v6744_v37 = vpop.f32.mrf.mxu1  ;;  %6935 = vmatmul.mubr.bf16.gmra.mxu1 %v14867_v46  ;;  %v8253_v46 = vunpack.i.l.bf16 %v8252_v48 }
 0x77b   : > { %v6745_v16 = vadd.f32 %v13216_v28, %v6744_v37  ;;  %7622 = vmatprep.mubr.msk.bf16.mxu1 %vm14868_vm13, %v6524_v55  ;;  %v14880_v55 = vpack.c.bf16 %v14878_v25, %v14879_v31  ;;  %vm7383_vm13 = vcmask 130048  }
 0x77c   : > { %v6746_v6 = vpop.f32.mrf.mxu1  ;;  %v5960_v56 = vrot.slane %v8253_v46, 7 }
 0x77d   : > { %v6999_v15 = vmax.f32 %v6745_v16, -60.0  ;;  %v6086_v6 = vsel %vm14433_vm2, %v5973_v14, 0.0  ;;  %vm14887_vm2 = vmmov %vm14881_vm0 }
 0x77e   : > { %v6747_v35 = vpop.f32.mrf.mxu1  ;;  %v6122_v22 = vpack.c.bf16 %v5972_v36, %v6086_v6 }
 0x77f   : > { %v7063_v1 = vsub.f32 0.0, %v6999_v15  ;;  %v6748_v38 = vadd.f32 %v13216_v28, %v6747_v35  ;;  %v6439_v35 = vpop.permute.xlu0 %6438 }
 0x780   : > { %v6749_v44 = vpop.f32.mrf.mxu1 }
 0x781   : > { %v7127_v57 = vmul.f32 1.442695, %v7063_v1  ;;  %v7000_v20 = vmax.f32 %v6748_v38, -60.0  ;;  %v5961_v38 = vrot.slane %v8254_v52, 7  ;;  %v8257_v44 = vpop.permute.xlu1 %8256 }
 0x782   : > { %v6752_v32 = vpop.f32.mrf.mxu1  ;;  %6943 = vmatmul.mubr.bf16.gmra.mxu1 %v14873_v60  ;;  %v14886_v60 = vpack.c.bf16 %v14884_v8, %v14885_v43  ;;  %v8259_v21 = vunpack.i.h.bf16 %v8257_v44  ;;  %v8258_v40 = vunpack.i.l.bf16 %v8257_v44  ;;  %v14895_v8 = vpack.c.bf16 %v12789_v45, %v12784_v7 }
 0x783   : > { %8308 = vpow2.f32 %v7127_v57  ;;  %v7064_v11 = vsub.f32 0.0, %v7000_v20  ;;  %v6753_v39 = vadd.f32 %v13216_v28, %v6752_v32  ;;  %7623 = vmatprep.mubr.msk.bf16.mxu1 %vm14874_vm14, %v6527_v4  ;;  %v6533_v4 = vsel %vm6446_vm8, %v6122_v22, %v6439_v35  ;;  %vm14897_vm14 = vmmov %vm14870_vm3 }
 0x784   : > { %v6754_v58 = vpop.f32.mrf.mxu1 }
 0x785   : > { %v7129_v63 = vmul.f32 1.442695, %v7064_v11  ;;  %v7001_v42 = vmax.f32 %v6753_v39, -60.0  ;;  %v5970_v58 = vsel %vm14888_vm9, %v5960_v56, %v5961_v38 }
 0x786   : > { %v6755_v54 = vpop.f32.mrf.mxu1 }
 0x787   : > { %8310 = vpow2.f32 %v7129_v63  ;;  %v7065_v0 = vsub.f32 0.0, %v7001_v42  ;;  %v6756_v17 = vadd.f32 %v13216_v28, %v6755_v54  ;;  %v5971_v42 = vsel %vm14889_vm11, %v5959_v5, %v5960_v56 }
 0x788   : > { %v6757_v19 = vpop.f32.mrf.mxu1  ;;  %v6123_v14 = vpack.c.bf16 %v5970_v58, %v5971_v42 }
 0x789   : > { %v7131_v34 = vmul.f32 1.442695, %v7065_v0  ;;  %v7002_v24 = vmax.f32 %v6756_v17, -60.0  ;;  %v6441_v17 = vpop.permute.xlu0 %6440 }
 0x78a   : > { %v6760_v41 = vpop.f32.mrf.mxu1  ;;  %6951 = vmatmul.mubr.bf16.gmra.mxu1 %v14880_v55  ;;  %v6536_v5 = vsel %vm6446_vm8, %v6123_v14, %v6441_v17 }
 0x78b   : > { %8312 = vpow2.f32 %v7131_v34  ;;  %v7066_v37 = vsub.f32 0.0, %v7002_v24  ;;  %v6761_v59 = vadd.f32 %v13216_v28, %v6760_v41  ;;  %7624 = vmatprep.mubr.msk.bf16.mxu1 %vm14881_vm0, %v6530_v9  ;;  %v5963_v34 = vrot.slane %v8259_v21, 7 }
 0x78c   : > { %v6762_v16 = vpop.f32.mrf.mxu1  ;;  %v5962_v24 = vrot.slane %v8258_v40, 7 }
 0x78d   : > { %v7133_v30 = vmul.f32 1.442695, %v7066_v37  ;;  %v7003_v26 = vmax.f32 %v6761_v59, -60.0  ;;  %v14890_v37 = vld [vmem:[#allocation70_spill] sm:$0xff] }
 0x78e   : > { %v6763_v15 = vpop.f32.mrf.mxu1  ;;  %v14891_v59 = vpack.c.bf16 %v12791_v33, %v14890_v37  ;;  %v5968_v36 = vsel %vm14893_vm7, %v5962_v24, %v5963_v34  ;;  %v5969_v6 = vsel %vm14894_vm6, %v5961_v38, %v5962_v24  ;;  %v5835_v33 = vpop.permute.xlu1 %5834 }
 0x78f   : > { %8314 = vpow2.f32 %v7133_v30  ;;  %v7067_v62 = vsub.f32 0.0, %v7003_v26  ;;  %v6764_v18 = vadd.f32 %v13216_v28, %v6763_v15  ;;  %v6124_v38 = vpack.c.bf16 %v5968_v36, %v5969_v6 }
 0x790   : > { %v8309_v1 = vpop.eup %8308  ;;  %v6765_v10 = vpop.f32.mrf.mxu1  ;;  %v5964_v44 = vrot.slane %v5835_v33, 7  ;;  %v14899_v6 = vpack.c.bf16 %v12820_v29, %v12816_v27 }
 0x791   : > { %v7255_v57 = vadd.f32 1.0, %v8309_v1  ;;  %v7135_v20 = vmul.f32 1.442695, %v7067_v62  ;;  %v7004_v12 = vmax.f32 %v6764_v18, -60.0  ;;  %v6443_v62 = vpop.permute.xlu0 %6442 }
 0x792   : > { %v6768_v32 = vpop.f32.mrf.mxu1  ;;  %6959 = vmatmul.mubr.bf16.gmra.mxu1 %v14886_v60  ;;  %v5966_v58 = vsel %vm14870_vm3, %v5964_v44, %v12967_v2  ;;  %v5967_v21 = vsel %vm14897_vm14, %v5963_v34, %v5964_v44 }
 0x793   : > { %8316 = vrcp.f32 %v7255_v57  ;;  %v7068_v11 = vsub.f32 0.0, %v7004_v12  ;;  %v6769_v39 = vadd.f32 %v13216_v28, %v6768_v32  ;;  %7625 = vmatprep.mubr.msk.bf16.mxu1 %vm14887_vm2, %v6533_v4  ;;  %v6539_v12 = vsel %vm6446_vm8, %v6124_v38, %v6443_v62 }
 0x794   : > { %v8311_v47 = vpop.eup %8310  ;;  %8318 = vpow2.f32 %v7135_v20  ;;  %v6770_v63 = vpop.f32.mrf.mxu1 }
 0x795   : > { %v7256_v51 = vadd.f32 1.0, %v8311_v47  ;;  %v7137_v54 = vmul.f32 1.442695, %v7068_v11  ;;  %v7005_v50 = vmax.f32 %v6769_v39, -60.0  ;;  %v6445_v42 = vpop.permute.xlu0 %6444 }
 0x796   : > { %v6771_v0 = vpop.f32.mrf.mxu1 }
 0x797   : > { %8320 = vrcp.f32 %v7256_v51  ;;  %v7069_v61 = vsub.f32 0.0, %v7005_v50  ;;  %v6772_v19 = vadd.f32 %v13216_v28, %v6771_v0  ;;  %v6125_v0 = vpack.c.bf16 %v5966_v58, %v5967_v21 }
 0x798   : > { %v8313_v48 = vpop.eup %8312  ;;  %8322 = vpow2.f32 %v7137_v54  ;;  %v6773_v9 = vpop.f32.mrf.mxu1 }
 0x799   : > { %v7257_v41 = vadd.f32 1.0, %v8313_v48  ;;  %v7139_v25 = vmul.f32 1.442695, %v7069_v61  ;;  %v7006_v31 = vmax.f32 %v6772_v19, -60.0  ;;  %v6542_v19 = vsel %vm6446_vm8, %v6125_v0, %v6445_v42 }
 0x79a   : > { %v6776_v55 = vpop.f32.mrf.mxu1  ;;  %6967 = vmatmul.mubr.bf16.gmra.mxu1 %v14891_v59 }
 0x79b   : > { %8324 = vrcp.f32 %v7257_v41  ;;  %v7070_v52 = vsub.f32 0.0, %v7006_v31  ;;  %v6777_v46 = vadd.f32 %v13216_v28, %v6776_v55  ;;  %7626 = vmatprep.mubr.msk.bf16.mxu1 %vm14892_vm1, %v6536_v5 }
 0x79c   : > { %v8315_v16 = vpop.eup %8314  ;;  %8326 = vpow2.f32 %v7139_v25  ;;  %v6778_v53 = vpop.f32.mrf.mxu1 }
 0x79d   : > { %v7258_v30 = vadd.f32 1.0, %v8315_v16  ;;  %v7141_v26 = vmul.f32 1.442695, %v7070_v52  ;;  %v7007_v15 = vmax.f32 %v6777_v46, -60.0 }
 0x79e   : > { %v6779_v35 = vpop.f32.mrf.mxu1 }
 0x79f   : > { %8328 = vrcp.f32 %v7258_v30  ;;  %v7071_v18 = vsub.f32 0.0, %v7007_v15  ;;  %v6780_v1 = vadd.f32 %v13216_v28, %v6779_v35 }
 0x7a0   : > { %v8317_v56 = vpop.eup %8316  ;;  %8330 = vpow2.f32 %v7141_v26  ;;  %v6781_v22 = vpop.f32.mrf.mxu1 }
 0x7a1   : > { %v8319_v10 = vpop.eup %8318  ;;  %7384 = vst.msk [vmem:[%s13279_s26] sm:$0xff] %vm7383_vm13, %v8317_v56  ;;  %v7143_v57 = vmul.f32 1.442695, %v7071_v18  ;;  %v7008_v20 = vmax.f32 %v6780_v1, -60.0 }
 0x7a2   : > { %v7259_v4 = vadd.f32 1.0, %v8319_v10  ;;  %v6784_v32 = vpop.f32.mrf.mxu1  ;;  %6975 = vmatmul.mubr.bf16.gmra.mxu1 %v14895_v8 }
 0x7a3   : > { %8332 = vpow2.f32 %v7143_v57  ;;  %v7072_v43 = vsub.f32 0.0, %v7008_v20  ;;  %v6785_v60 = vadd.f32 %v13216_v28, %v6784_v32  ;;  %7627 = vmatprep.mubr.msk.bf16.mxu1 %vm14896_vm4, %v6539_v12 }
 0x7a4   : > { %v8321_v11 = vpop.eup %8320  ;;  %8334 = vrcp.f32 %v7259_v4  ;;  %v6786_v39 = vpop.f32.mrf.mxu1 }
 0x7a5   : > { %v8323_v47 = vpop.eup %8322  ;;  %7385 = vst.msk [vmem:[%s13279_s26 + $0x8] sm:$0xff] %vm7383_vm13, %v8321_v11  ;;  %v7145_v7 = vmul.f32 1.442695, %v7072_v43  ;;  %v7009_v45 = vmax.f32 %v6785_v60, -60.0 }
 0x7a6   : > { %v7260_v40 = vadd.f32 1.0, %v8323_v47  ;;  %v6787_v63 = vpop.f32.mrf.mxu1 }
 0x7a7   : > { %8336 = vpow2.f32 %v7145_v7  ;;  %v7073_v51 = vsub.f32 0.0, %v7009_v45  ;;  %v6788_v54 = vadd.f32 %v13216_v28, %v6787_v63 }
 0x7a8   : > { %v8325_v50 = vpop.eup %8324  ;;  %8338 = vrcp.f32 %v7260_v40  ;;  %v6789_v17 = vpop.f32.mrf.mxu1 }
 0x7a9   : > { %v8327_v2 = vpop.eup %8326  ;;  %7386 = vst.msk [vmem:[%s13279_s26 + $0x10] sm:$0xff] %vm7383_vm13, %v8325_v50  ;;  %v7147_v3 = vmul.f32 1.442695, %v7073_v51  ;;  %v7010_v61 = vmax.f32 %v6788_v54, -60.0 }
 0x7aa   : > { %v7261_v48 = vadd.f32 1.0, %v8327_v2  ;;  %v6792_v34 = vpop.f32.mrf.mxu1  ;;  %6983 = vmatmul.mubr.bf16.gmra.mxu1 %v5644_v13 }
 0x7ab   : > { %8340 = vpow2.f32 %v7147_v3  ;;  %v7074_v24 = vsub.f32 0.0, %v7010_v61  ;;  %v6793_v14 = vadd.f32 %v13216_v28, %v6792_v34  ;;  %7628 = vmatprep.mubr.msk.bf16.mxu1 %vm14898_vm15, %v6542_v19 }
 0x7ac   : > { %v8329_v9 = vpop.eup %8328  ;;  %8342 = vrcp.f32 %v7261_v48  ;;  %v6794_v41 = vpop.f32.mrf.mxu1 }
 0x7ad   : > { %v8331_v25 = vpop.eup %8330  ;;  %7387 = vst.msk [vmem:[%s13279_s26 + $0x18] sm:$0xff] %vm7383_vm13, %v8329_v9  ;;  %v7149_v31 = vmul.f32 1.442695, %v7074_v24  ;;  %v7011_v5 = vmax.f32 %v6793_v14, -60.0 }
 0x7ae   : > { %v7262_v55 = vadd.f32 1.0, %v8331_v25  ;;  %v6795_v37 = vpop.f32.mrf.mxu1 }
 0x7af   : > { %8344 = vpow2.f32 %v7149_v31  ;;  %v7075_v23 = vsub.f32 0.0, %v7011_v5  ;;  %v6796_v49 = vadd.f32 %v13216_v28, %v6795_v37 }
 0x7b0   : > { %v8333_v13 = vpop.eup %8332  ;;  %8346 = vrcp.f32 %v7262_v55  ;;  %v6797_v59 = vpop.f32.mrf.mxu1 }
 0x7b1   : > { %v8335_v52 = vpop.eup %8334  ;;  %v7263_v46 = vadd.f32 1.0, %v8333_v13  ;;  %v7151_v16 = vmul.f32 1.442695, %v7075_v23  ;;  %v7012_v36 = vmax.f32 %v6796_v49, -60.0 }
 0x7b2   : > { %7388 = vst.msk [vmem:[%s13279_s26 + $0x20] sm:$0xff] %vm7383_vm13, %v8335_v52  ;;  %v6800_v53 = vpop.f32.mrf.mxu1  ;;  %6991 = vmatmul.mubr.bf16.gmra.mxu1 %v14899_v6 }
 0x7b3   : > { %8348 = vrcp.f32 %v7263_v46  ;;  %v7076_v30 = vsub.f32 0.0, %v7012_v36  ;;  %v6801_v26 = vadd.f32 %v13216_v28, %v6800_v53 }
 0x7b4   : > { %v8337_v15 = vpop.eup %8336  ;;  %8350 = vpow2.f32 %v7151_v16  ;;  %v6802_v33 = vpop.f32.mrf.mxu1 }
 0x7b5   : > { %v8339_v35 = vpop.eup %8338  ;;  %v7264_v62 = vadd.f32 1.0, %v8337_v15  ;;  %v7153_v18 = vmul.f32 1.442695, %v7076_v30  ;;  %v7013_v1 = vmax.f32 %v6801_v26, -60.0 }
 0x7b6   : > { %7389 = vst.msk [vmem:[%s13279_s26 + $0x28] sm:$0xff] %vm7383_vm13, %v8339_v35  ;;  %v6803_v56 = vpop.f32.mrf.mxu1 }
 0x7b7   : > { %8352 = vrcp.f32 %v7264_v62  ;;  %v7077_v38 = vsub.f32 0.0, %v7013_v1  ;;  %v6804_v27 = vadd.f32 %v13216_v28, %v6803_v56 }
 0x7b8   : > { %v8341_v29 = vpop.eup %8340  ;;  %8354 = vpow2.f32 %v7153_v18  ;;  %v6805_v22 = vpop.f32.mrf.mxu1 }
 0x7b9   : > { %v8343_v10 = vpop.eup %8342  ;;  %v7265_v44 = vadd.f32 1.0, %v8341_v29  ;;  %v7155_v57 = vmul.f32 1.442695, %v7077_v38  ;;  %v7014_v20 = vmax.f32 %v6804_v27, -60.0 }
 0x7ba   : > { %7390 = vst.msk [vmem:[%s13279_s26 + $0x30] sm:$0xff] %vm7383_vm13, %v8343_v10  ;;  %v6808_v12 = vpop.f32.mrf.mxu1 }
 0x7bb   : > { %8356 = vrcp.f32 %v7265_v44  ;;  %v7078_v4 = vsub.f32 0.0, %v7014_v20  ;;  %v6809_v32 = vadd.f32 %v13216_v28, %v6808_v12 }
 0x7bc   : > { %v8345_v8 = vpop.eup %8344  ;;  %8358 = vpow2.f32 %v7155_v57  ;;  %v6810_v43 = vpop.f32.mrf.mxu1 }
 0x7bd   : > { %v8347_v60 = vpop.eup %8346  ;;  %v7266_v11 = vadd.f32 1.0, %v8345_v8  ;;  %v7157_v39 = vmul.f32 1.442695, %v7078_v4  ;;  %v7015_v47 = vmax.f32 %v6809_v32, -60.0 }
 0x7be   : > { %7391 = vst.msk [vmem:[%s13279_s26 + $0x38] sm:$0xff] %vm7383_vm13, %v8347_v60  ;;  %v6811_v58 = vpop.f32.mrf.mxu1 }
 0x7bf   : > { %8360 = vrcp.f32 %v7266_v11  ;;  %v7079_v21 = vsub.f32 0.0, %v7015_v47  ;;  %v6812_v7 = vadd.f32 %v13216_v28, %v6811_v58 }
 0x7c0   : > { %v8349_v45 = vpop.eup %8348  ;;  %8362 = vpow2.f32 %v7157_v39  ;;  %v6813_v40 = vpop.f32.mrf.mxu1 }
 0x7c1   : > { %v8351_v63 = vpop.eup %8350  ;;  %7392 = vst.msk [vmem:[%s13279_s26 + $0x40] sm:$0xff] %vm7383_vm13, %v8349_v45  ;;  %v7159_v42 = vmul.f32 1.442695, %v7079_v21  ;;  %v7016_v51 = vmax.f32 %v6812_v7, -60.0 }
 0x7c2   : > { %v7267_v54 = vadd.f32 1.0, %v8351_v63  ;;  %v6816_v50 = vpop.f32.mrf.mxu1 }
 0x7c3   : > { %8364 = vpow2.f32 %v7159_v42  ;;  %v7080_v0 = vsub.f32 0.0, %v7016_v51  ;;  %v6817_v17 = vadd.f32 %v13216_v28, %v6816_v50 }
 0x7c4   : > { %v8353_v2 = vpop.eup %8352  ;;  %8366 = vrcp.f32 %v7267_v54  ;;  %v6818_v3 = vpop.f32.mrf.mxu1 }
 0x7c5   : > { %v8355_v61 = vpop.eup %8354  ;;  %7393 = vst.msk [vmem:[%s13279_s26 + $0x48] sm:$0xff] %vm7383_vm13, %v8353_v2  ;;  %v7161_v19 = vmul.f32 1.442695, %v7080_v0  ;;  %v7017_v48 = vmax.f32 %v6817_v17, -60.0 }
 0x7c6   : > { %v7268_v34 = vadd.f32 1.0, %v8355_v61  ;;  %v6819_v24 = vpop.f32.mrf.mxu1 }
 0x7c7   : > { %8368 = vpow2.f32 %v7161_v19  ;;  %v7081_v14 = vsub.f32 0.0, %v7017_v48  ;;  %v6820_v9 = vadd.f32 %v13216_v28, %v6819_v24 }
 0x7c8   : > { %v8357_v41 = vpop.eup %8356  ;;  %8370 = vrcp.f32 %v7268_v34  ;;  %v6821_v25 = vpop.f32.mrf.mxu1 }
 0x7c9   : > { %v8359_v31 = vpop.eup %8358  ;;  %7394 = vst.msk [vmem:[%s13279_s26 + $0x50] sm:$0xff] %vm7383_vm13, %v8357_v41  ;;  %v7163_v5 = vmul.f32 1.442695, %v7081_v14  ;;  %v7018_v55 = vmax.f32 %v6820_v9, -60.0 }
 0x7ca   : > { %v7269_v37 = vadd.f32 1.0, %v8359_v31  ;;  %v6824_v23 = vpop.f32.mrf.mxu1 }
 0x7cb   : > { %8372 = vpow2.f32 %v7163_v5  ;;  %v7082_v49 = vsub.f32 0.0, %v7018_v55  ;;  %v6825_v13 = vadd.f32 %v13216_v28, %v6824_v23 }
 0x7cc   : > { %v8361_v59 = vpop.eup %8360  ;;  %8374 = vrcp.f32 %v7269_v37  ;;  %v6826_v52 = vpop.f32.mrf.mxu1 }
 0x7cd   : > { %v8363_v46 = vpop.eup %8362  ;;  %7395 = vst.msk [vmem:[%s13279_s26 + $0x58] sm:$0xff] %vm7383_vm13, %v8361_v59  ;;  %v7165_v16 = vmul.f32 1.442695, %v7082_v49  ;;  %v7019_v36 = vmax.f32 %v6825_v13, -60.0 }
 0x7ce   : > { %v7270_v53 = vadd.f32 1.0, %v8363_v46  ;;  %v6827_v6 = vpop.f32.mrf.mxu1 }
 0x7cf   : > { %8376 = vpow2.f32 %v7165_v16  ;;  %v7083_v30 = vsub.f32 0.0, %v7019_v36  ;;  %v6828_v26 = vadd.f32 %v13216_v28, %v6827_v6 }
 0x7d0   : > { %v8365_v15 = vpop.eup %8364  ;;  %8378 = vrcp.f32 %v7270_v53  ;;  %v6829_v33 = vpop.f32.mrf.mxu1 }
 0x7d1   : > { %v8367_v35 = vpop.eup %8366  ;;  %v7271_v62 = vadd.f32 1.0, %v8365_v15  ;;  %v7167_v18 = vmul.f32 1.442695, %v7083_v30  ;;  %v7020_v1 = vmax.f32 %v6828_v26, -60.0 }
 0x7d2   : > { %7396 = vst.msk [vmem:[%s13279_s26 + $0x60] sm:$0xff] %vm7383_vm13, %v8367_v35  ;;  %v6832_v56 = vpop.f32.mrf.mxu1 }
 0x7d3   : > { %8380 = vrcp.f32 %v7271_v62  ;;  %v7084_v38 = vsub.f32 0.0, %v7020_v1  ;;  %v6833_v27 = vadd.f32 %v13216_v28, %v6832_v56 }
 0x7d4   : > { %v8369_v29 = vpop.eup %8368  ;;  %8382 = vpow2.f32 %v7167_v18  ;;  %v6834_v22 = vpop.f32.mrf.mxu1 }
 0x7d5   : > { %v8371_v10 = vpop.eup %8370  ;;  %v7272_v44 = vadd.f32 1.0, %v8369_v29  ;;  %v7169_v57 = vmul.f32 1.442695, %v7084_v38  ;;  %v7021_v20 = vmax.f32 %v6833_v27, -60.0 }
 0x7d6   : > { %7397 = vst.msk [vmem:[%s13279_s26 + $0x68] sm:$0xff] %vm7383_vm13, %v8371_v10  ;;  %v6835_v12 = vpop.f32.mrf.mxu1 }
 0x7d7   : > { %8384 = vrcp.f32 %v7272_v44  ;;  %v7085_v4 = vsub.f32 0.0, %v7021_v20  ;;  %v6836_v32 = vadd.f32 %v13216_v28, %v6835_v12 }
 0x7d8   : > { %v8373_v8 = vpop.eup %8372  ;;  %8386 = vpow2.f32 %v7169_v57  ;;  %v6837_v43 = vpop.f32.mrf.mxu1 }
 0x7d9   : > { %v8375_v60 = vpop.eup %8374  ;;  %v7273_v11 = vadd.f32 1.0, %v8373_v8  ;;  %v7171_v39 = vmul.f32 1.442695, %v7085_v4  ;;  %v7022_v47 = vmax.f32 %v6836_v32, -60.0 }
 0x7da   : > { %7398 = vst.msk [vmem:[%s13279_s26 + $0x70] sm:$0xff] %vm7383_vm13, %v8375_v60  ;;  %v6840_v58 = vpop.f32.mrf.mxu1 }
 0x7db   : > { %8388 = vrcp.f32 %v7273_v11  ;;  %v7086_v21 = vsub.f32 0.0, %v7022_v47  ;;  %v6841_v7 = vadd.f32 %v13216_v28, %v6840_v58 }
 0x7dc   : > { %v8377_v45 = vpop.eup %8376  ;;  %8390 = vpow2.f32 %v7171_v39  ;;  %v6842_v40 = vpop.f32.mrf.mxu1 }
 0x7dd   : > { %v8379_v63 = vpop.eup %8378  ;;  %v7274_v42 = vadd.f32 1.0, %v8377_v45  ;;  %v7173_v51 = vmul.f32 1.442695, %v7086_v21  ;;  %v7023_v54 = vmax.f32 %v6841_v7, -60.0 }
 0x7de   : > { %7399 = vst.msk [vmem:[%s13279_s26 + $0x78] sm:$0xff] %vm7383_vm13, %v8379_v63  ;;  %v6843_v50 = vpop.f32.mrf.mxu1 }
 0x7df   : > { %8392 = vrcp.f32 %v7274_v42  ;;  %v7087_v0 = vsub.f32 0.0, %v7023_v54  ;;  %v6844_v17 = vadd.f32 %v13216_v28, %v6843_v50 }
 0x7e0   : > { %v8381_v2 = vpop.eup %8380  ;;  %8394 = vpow2.f32 %v7173_v51  ;;  %v6845_v3 = vpop.f32.mrf.mxu1 }
 0x7e1   : > { %v8383_v61 = vpop.eup %8382  ;;  %7400 = vst.msk [vmem:[%s13279_s26 + $0x80] sm:$0xff] %vm7383_vm13, %v8381_v2  ;;  %v7175_v19 = vmul.f32 1.442695, %v7087_v0  ;;  %v7024_v48 = vmax.f32 %v6844_v17, -60.0 }
 0x7e2   : > { %v7275_v34 = vadd.f32 1.0, %v8383_v61  ;;  %v6848_v24 = vpop.f32.mrf.mxu1 }
 0x7e3   : > { %8396 = vpow2.f32 %v7175_v19  ;;  %v7088_v14 = vsub.f32 0.0, %v7024_v48  ;;  %v6849_v9 = vadd.f32 %v13216_v28, %v6848_v24 }
 0x7e4   : > { %v8385_v41 = vpop.eup %8384  ;;  %8398 = vrcp.f32 %v7275_v34  ;;  %v6850_v25 = vpop.f32.mrf.mxu1 }
 0x7e5   : > { %v8387_v31 = vpop.eup %8386  ;;  %7401 = vst.msk [vmem:[%s13279_s26 + $0x88] sm:$0xff] %vm7383_vm13, %v8385_v41  ;;  %v7177_v5 = vmul.f32 1.442695, %v7088_v14  ;;  %v7025_v55 = vmax.f32 %v6849_v9, -60.0 }
 0x7e6   : > { %v7276_v37 = vadd.f32 1.0, %v8387_v31  ;;  %v6851_v23 = vpop.f32.mrf.mxu1 }
 0x7e7   : > { %8400 = vpow2.f32 %v7177_v5  ;;  %v7089_v49 = vsub.f32 0.0, %v7025_v55  ;;  %v6852_v13 = vadd.f32 %v13216_v28, %v6851_v23 }
 0x7e8   : > { %v8389_v59 = vpop.eup %8388  ;;  %8402 = vrcp.f32 %v7276_v37  ;;  %v6853_v52 = vpop.f32.mrf.mxu1 }
 0x7e9   : > { %v8391_v46 = vpop.eup %8390  ;;  %7402 = vst.msk [vmem:[%s13279_s26 + $0x90] sm:$0xff] %vm7383_vm13, %v8389_v59  ;;  %v7179_v16 = vmul.f32 1.442695, %v7089_v49  ;;  %v7026_v36 = vmax.f32 %v6852_v13, -60.0 }
 0x7ea   : > { %v7277_v53 = vadd.f32 1.0, %v8391_v46  ;;  %v6856_v6 = vpop.f32.mrf.mxu1 }
 0x7eb   : > { %8404 = vpow2.f32 %v7179_v16  ;;  %v7090_v30 = vsub.f32 0.0, %v7026_v36  ;;  %v6857_v26 = vadd.f32 %v13216_v28, %v6856_v6 }
 0x7ec   : > { %v8393_v15 = vpop.eup %8392  ;;  %8406 = vrcp.f32 %v7277_v53  ;;  %v6858_v33 = vpop.f32.mrf.mxu1 }
 0x7ed   : > { %v8395_v35 = vpop.eup %8394  ;;  %7403 = vst.msk [vmem:[%s13279_s26 + $0x98] sm:$0xff] %vm7383_vm13, %v8393_v15  ;;  %v7181_v62 = vmul.f32 1.442695, %v7090_v30  ;;  %v7027_v18 = vmax.f32 %v6857_v26, -60.0 }
 0x7ee   : > { %v7278_v1 = vadd.f32 1.0, %v8395_v35  ;;  %v6859_v56 = vpop.f32.mrf.mxu1 }
 0x7ef   : > { %8408 = vpow2.f32 %v7181_v62  ;;  %v7091_v38 = vsub.f32 0.0, %v7027_v18  ;;  %v6860_v27 = vadd.f32 %v13216_v28, %v6859_v56 }
 0x7f0   : > { %v8397_v29 = vpop.eup %8396  ;;  %8410 = vrcp.f32 %v7278_v1  ;;  %v6861_v22 = vpop.f32.mrf.mxu1 }
 0x7f1   : > { %v8399_v10 = vpop.eup %8398  ;;  %v7279_v44 = vadd.f32 1.0, %v8397_v29  ;;  %v7183_v57 = vmul.f32 1.442695, %v7091_v38  ;;  %v7028_v20 = vmax.f32 %v6860_v27, -60.0 }
 0x7f2   : > { %7404 = vst.msk [vmem:[%s13279_s26 + $0xa0] sm:$0xff] %vm7383_vm13, %v8399_v10  ;;  %v6864_v12 = vpop.f32.mrf.mxu1 }
 0x7f3   : > { %8412 = vrcp.f32 %v7279_v44  ;;  %v7092_v4 = vsub.f32 0.0, %v7028_v20  ;;  %v6865_v32 = vadd.f32 %v13216_v28, %v6864_v12 }
 0x7f4   : > { %v8401_v8 = vpop.eup %8400  ;;  %8414 = vpow2.f32 %v7183_v57  ;;  %v6866_v43 = vpop.f32.mrf.mxu1 }
 0x7f5   : > { %v8403_v60 = vpop.eup %8402  ;;  %v7280_v11 = vadd.f32 1.0, %v8401_v8  ;;  %v7185_v39 = vmul.f32 1.442695, %v7092_v4  ;;  %v7029_v47 = vmax.f32 %v6865_v32, -60.0 }
 0x7f6   : > { %7405 = vst.msk [vmem:[%s13279_s26 + $0xa8] sm:$0xff] %vm7383_vm13, %v8403_v60  ;;  %v6867_v58 = vpop.f32.mrf.mxu1 }
 0x7f7   : > { %8416 = vrcp.f32 %v7280_v11  ;;  %v7093_v21 = vsub.f32 0.0, %v7029_v47  ;;  %v6868_v7 = vadd.f32 %v13216_v28, %v6867_v58 }
 0x7f8   : > { %v8405_v45 = vpop.eup %8404  ;;  %8418 = vpow2.f32 %v7185_v39  ;;  %v6869_v40 = vpop.f32.mrf.mxu1 }
 0x7f9   : > { %v8407_v63 = vpop.eup %8406  ;;  %v7281_v42 = vadd.f32 1.0, %v8405_v45  ;;  %v7187_v51 = vmul.f32 1.442695, %v7093_v21  ;;  %v7030_v54 = vmax.f32 %v6868_v7, -60.0 }
 0x7fa   : > { %7406 = vst.msk [vmem:[%s13279_s26 + $0xb0] sm:$0xff] %vm7383_vm13, %v8407_v63  ;;  %v6872_v50 = vpop.f32.mrf.mxu1 }
 0x7fb   : > { %8420 = vrcp.f32 %v7281_v42  ;;  %v7094_v0 = vsub.f32 0.0, %v7030_v54  ;;  %v6873_v17 = vadd.f32 %v13216_v28, %v6872_v50 }
 0x7fc   : > { %v8409_v2 = vpop.eup %8408  ;;  %8422 = vpow2.f32 %v7187_v51  ;;  %v6874_v3 = vpop.f32.mrf.mxu1 }
 0x7fd   : > { %v8411_v61 = vpop.eup %8410  ;;  %v7282_v19 = vadd.f32 1.0, %v8409_v2  ;;  %v7189_v48 = vmul.f32 1.442695, %v7094_v0  ;;  %v7031_v34 = vmax.f32 %v6873_v17, -60.0 }
 0x7fe   : > { %7407 = vst.msk [vmem:[%s13279_s26 + $0xb8] sm:$0xff] %vm7383_vm13, %v8411_v61  ;;  %v6875_v24 = vpop.f32.mrf.mxu1 }
 0x7ff   : > { %8424 = vrcp.f32 %v7282_v19  ;;  %v7095_v14 = vsub.f32 0.0, %v7031_v34  ;;  %v6876_v9 = vadd.f32 %v13216_v28, %v6875_v24 }
 0x800   : > { %v8413_v41 = vpop.eup %8412  ;;  %8426 = vpow2.f32 %v7189_v48  ;;  %v6877_v25 = vpop.f32.mrf.mxu1 }
 0x801   : > { %v8415_v31 = vpop.eup %8414  ;;  %7408 = vst.msk [vmem:[%s13279_s26 + $0xc0] sm:$0xff] %vm7383_vm13, %v8413_v41  ;;  %v7191_v5 = vmul.f32 1.442695, %v7095_v14  ;;  %v7032_v55 = vmax.f32 %v6876_v9, -60.0  ;;  %v13395_v9 = vld [vmem:[%s13498_s8] ss:$0 sm:$0xff] }
 0x802   : > { %v7283_v37 = vadd.f32 1.0, %v8415_v31  ;;  %v6880_v23 = vpop.f32.mrf.mxu1 }
 0x803   : > { %8428 = vpow2.f32 %v7191_v5  ;;  %v7096_v49 = vsub.f32 0.0, %v7032_v55  ;;  %v6881_v13 = vadd.f32 %v13216_v28, %v6880_v23 }
 0x804   : > { %v8417_v59 = vpop.eup %8416  ;;  %8430 = vrcp.f32 %v7283_v37  ;;  %v6882_v52 = vpop.f32.mrf.mxu1 }
 0x805   : > { %v8419_v46 = vpop.eup %8418  ;;  %7409 = vst.msk [vmem:[%s13279_s26 + $0xc8] sm:$0xff] %vm7383_vm13, %v8417_v59  ;;  %v7193_v16 = vmul.f32 1.442695, %v7096_v49  ;;  %v7033_v36 = vmax.f32 %v6881_v13, -60.0 }
 0x806   : > { %v7284_v53 = vadd.f32 1.0, %v8419_v46  ;;  %v6883_v6 = vpop.f32.mrf.mxu1 }
 0x807   : > { %8432 = vpow2.f32 %v7193_v16  ;;  %v7097_v30 = vsub.f32 0.0, %v7033_v36  ;;  %v6884_v26 = vadd.f32 %v13216_v28, %v6883_v6 }
 0x808   : > { %v8421_v15 = vpop.eup %8420  ;;  %8434 = vrcp.f32 %v7284_v53  ;;  %v6885_v33 = vpop.f32.mrf.mxu1 }
 0x809   : > { %v8423_v35 = vpop.eup %8422  ;;  %7410 = vst.msk [vmem:[%s13279_s26 + $0xd0] sm:$0xff] %vm7383_vm13, %v8421_v15  ;;  %v7195_v62 = vmul.f32 1.442695, %v7097_v30  ;;  %v7034_v18 = vmax.f32 %v6884_v26, -60.0 }
 0x80a   : > { %v7285_v1 = vadd.f32 1.0, %v8423_v35  ;;  %v6888_v56 = vpop.f32.mrf.mxu1 }
 0x80b   : > { %8436 = vpow2.f32 %v7195_v62  ;;  %v7098_v38 = vsub.f32 0.0, %v7034_v18  ;;  %v6889_v27 = vadd.f32 %v13216_v28, %v6888_v56 }
 0x80c   : > { %v8425_v29 = vpop.eup %8424  ;;  %8438 = vrcp.f32 %v7285_v1  ;;  %v6890_v22 = vpop.f32.mrf.mxu1 }
 0x80d   : > { %v8427_v10 = vpop.eup %8426  ;;  %7411 = vst.msk [vmem:[%s13279_s26 + $0xd8] sm:$0xff] %vm7383_vm13, %v8425_v29  ;;  %v7197_v44 = vmul.f32 1.442695, %v7098_v38  ;;  %v7035_v57 = vmax.f32 %v6889_v27, -60.0 }
 0x80e   : > { %v7286_v20 = vadd.f32 1.0, %v8427_v10  ;;  %v6891_v12 = vpop.f32.mrf.mxu1 }
 0x80f   : > { %8440 = vpow2.f32 %v7197_v44  ;;  %v7099_v4 = vsub.f32 0.0, %v7035_v57  ;;  %v6892_v32 = vadd.f32 %v13216_v28, %v6891_v12 }
 0x810   : > { %v8429_v8 = vpop.eup %8428  ;;  %8442 = vrcp.f32 %v7286_v20  ;;  %v6893_v43 = vpop.f32.mrf.mxu1 }
 0x811   : > { %v8431_v60 = vpop.eup %8430  ;;  %v7287_v11 = vadd.f32 1.0, %v8429_v8  ;;  %v7199_v39 = vmul.f32 1.442695, %v7099_v4  ;;  %v7036_v47 = vmax.f32 %v6892_v32, -60.0 }
 0x812   : > { %7412 = vst.msk [vmem:[%s13279_s26 + $0xe0] sm:$0xff] %vm7383_vm13, %v8431_v60  ;;  %v6896_v58 = vpop.f32.mrf.mxu1 }
 0x813   : > { %8444 = vrcp.f32 %v7287_v11  ;;  %v7100_v21 = vsub.f32 0.0, %v7036_v47  ;;  %v6897_v7 = vadd.f32 %v13216_v28, %v6896_v58 }
 0x814   : > { %v8433_v45 = vpop.eup %8432  ;;  %8446 = vpow2.f32 %v7199_v39  ;;  %v6898_v40 = vpop.f32.mrf.mxu1 }
 0x815   : > { %v8435_v63 = vpop.eup %8434  ;;  %v7288_v42 = vadd.f32 1.0, %v8433_v45  ;;  %v7201_v51 = vmul.f32 1.442695, %v7100_v21  ;;  %v7037_v54 = vmax.f32 %v6897_v7, -60.0 }
 0x816   : > { %7413 = vst.msk [vmem:[%s13279_s26 + $0xe8] sm:$0xff] %vm7383_vm13, %v8435_v63  ;;  %v6899_v50 = vpop.f32.mrf.mxu1 }
 0x817   : > { %8448 = vrcp.f32 %v7288_v42  ;;  %v7101_v0 = vsub.f32 0.0, %v7037_v54  ;;  %v6900_v17 = vadd.f32 %v13216_v28, %v6899_v50 }
 0x818   : > { %v8437_v2 = vpop.eup %8436  ;;  %8450 = vpow2.f32 %v7201_v51  ;;  %v6901_v3 = vpop.f32.mrf.mxu1 }
 0x819   : > { %v8439_v61 = vpop.eup %8438  ;;  %v7289_v19 = vadd.f32 1.0, %v8437_v2  ;;  %v7203_v48 = vmul.f32 1.442695, %v7101_v0  ;;  %v7038_v34 = vmax.f32 %v6900_v17, -60.0 }
 0x81a   : > { %7414 = vst.msk [vmem:[%s13279_s26 + $0xf0] sm:$0xff] %vm7383_vm13, %v8439_v61  ;;  %v6904_v24 = vpop.f32.mrf.mxu1 }
 0x81b   : > { %8452 = vrcp.f32 %v7289_v19  ;;  %v7102_v14 = vsub.f32 0.0, %v7038_v34  ;;  %v6905_v28 = vadd.f32 %v13395_v9, %v6904_v24 }
 0x81c   : > { %v8441_v41 = vpop.eup %8440  ;;  %8454 = vpow2.f32 %v7203_v48  ;;  %v6906_v25 = vpop.f32.mrf.mxu1 }
 0x81d   : > { %v8443_v31 = vpop.eup %8442  ;;  %v7290_v5 = vadd.f32 1.0, %v8441_v41  ;;  %v7205_v55 = vmul.f32 1.442695, %v7102_v14  ;;  %v7039_v37 = vmax.f32 %v6905_v28, -60.0 }
 0x81e   : > { %7415 = vst.msk [vmem:[%s13279_s26 + $0xf8] sm:$0xff] %vm7383_vm13, %v8443_v31  ;;  %v6907_v23 = vpop.f32.mrf.mxu1 }
 0x81f   : > { %8456 = vrcp.f32 %v7290_v5  ;;  %v7103_v49 = vsub.f32 0.0, %v7039_v37  ;;  %v6908_v13 = vadd.f32 %v13395_v9, %v6907_v23 }
 0x820   : > { %v8445_v59 = vpop.eup %8444  ;;  %8458 = vpow2.f32 %v7205_v55  ;;  %v6909_v52 = vpop.f32.mrf.mxu1 }
 0x821   : > { %v8447_v46 = vpop.eup %8446  ;;  %7416 = vst.msk [vmem:[%s13279_s26 + $0x100] sm:$0xff] %vm7383_vm13, %v8445_v59  ;;  %v7207_v16 = vmul.f32 1.442695, %v7103_v49  ;;  %v7040_v36 = vmax.f32 %v6908_v13, -60.0 }
 0x822   : > { %v7291_v53 = vadd.f32 1.0, %v8447_v46  ;;  %v6912_v6 = vpop.f32.mrf.mxu1 }
 0x823   : > { %8460 = vpow2.f32 %v7207_v16  ;;  %v7104_v30 = vsub.f32 0.0, %v7040_v36  ;;  %v6913_v26 = vadd.f32 %v13395_v9, %v6912_v6 }
 0x824   : > { %v8449_v15 = vpop.eup %8448  ;;  %8462 = vrcp.f32 %v7291_v53  ;;  %v6914_v33 = vpop.f32.mrf.mxu1 }
 0x825   : > { %v8451_v35 = vpop.eup %8450  ;;  %7417 = vst.msk [vmem:[%s13279_s26 + $0x108] sm:$0xff] %vm7383_vm13, %v8449_v15  ;;  %v7209_v62 = vmul.f32 1.442695, %v7104_v30  ;;  %v7041_v18 = vmax.f32 %v6913_v26, -60.0 }
 0x826   : > { %v7292_v1 = vadd.f32 1.0, %v8451_v35  ;;  %v6915_v56 = vpop.f32.mrf.mxu1 }
 0x827   : > { %8464 = vpow2.f32 %v7209_v62  ;;  %v7105_v38 = vsub.f32 0.0, %v7041_v18  ;;  %v6916_v27 = vadd.f32 %v13395_v9, %v6915_v56 }
 0x828   : > { %v8453_v29 = vpop.eup %8452  ;;  %8466 = vrcp.f32 %v7292_v1  ;;  %v6917_v22 = vpop.f32.mrf.mxu1 }
 0x829   : > { %v8455_v10 = vpop.eup %8454  ;;  %7418 = vst.msk [vmem:[%s13279_s26 + $0x110] sm:$0xff] %vm7383_vm13, %v8453_v29  ;;  %v7211_v44 = vmul.f32 1.442695, %v7105_v38  ;;  %v7042_v57 = vmax.f32 %v6916_v27, -60.0 }
 0x82a   : > { %v7293_v20 = vadd.f32 1.0, %v8455_v10  ;;  %v6920_v12 = vpop.f32.mrf.mxu1 }
 0x82b   : > { %8468 = vpow2.f32 %v7211_v44  ;;  %v7106_v4 = vsub.f32 0.0, %v7042_v57  ;;  %v6921_v32 = vadd.f32 %v13395_v9, %v6920_v12 }
 0x82c   : > { %v8457_v8 = vpop.eup %8456  ;;  %8470 = vrcp.f32 %v7293_v20  ;;  %v6922_v43 = vpop.f32.mrf.mxu1 }
 0x82d   : > { %v8459_v60 = vpop.eup %8458  ;;  %7419 = vst.msk [vmem:[%s13279_s26 + $0x118] sm:$0xff] %vm7383_vm13, %v8457_v8  ;;  %v7213_v11 = vmul.f32 1.442695, %v7106_v4  ;;  %v7043_v39 = vmax.f32 %v6921_v32, -60.0 }
 0x82e   : > { %v7294_v47 = vadd.f32 1.0, %v8459_v60  ;;  %v6923_v58 = vpop.f32.mrf.mxu1 }
 0x82f   : > { %8472 = vpow2.f32 %v7213_v11  ;;  %v7107_v21 = vsub.f32 0.0, %v7043_v39  ;;  %v6924_v7 = vadd.f32 %v13395_v9, %v6923_v58 }
 0x830   : > { %v8461_v45 = vpop.eup %8460  ;;  %8474 = vrcp.f32 %v7294_v47  ;;  %v6925_v40 = vpop.f32.mrf.mxu1 }
 0x831   : > { %v8463_v63 = vpop.eup %8462  ;;  %v7295_v42 = vadd.f32 1.0, %v8461_v45  ;;  %v7215_v51 = vmul.f32 1.442695, %v7107_v21  ;;  %v7044_v54 = vmax.f32 %v6924_v7, -60.0 }
 0x832   : > { %7420 = vst.msk [vmem:[%s13279_s26 + $0x120] sm:$0xff] %vm7383_vm13, %v8463_v63  ;;  %v6928_v50 = vpop.f32.mrf.mxu1 }
 0x833   : > { %8476 = vrcp.f32 %v7295_v42  ;;  %v7108_v0 = vsub.f32 0.0, %v7044_v54  ;;  %v6929_v17 = vadd.f32 %v13395_v9, %v6928_v50 }
 0x834   : > { %v8465_v2 = vpop.eup %8464  ;;  %8478 = vpow2.f32 %v7215_v51  ;;  %v6930_v3 = vpop.f32.mrf.mxu1 }
 0x835   : > { %v8467_v61 = vpop.eup %8466  ;;  %v7296_v19 = vadd.f32 1.0, %v8465_v2  ;;  %v7217_v48 = vmul.f32 1.442695, %v7108_v0  ;;  %v7045_v34 = vmax.f32 %v6929_v17, -60.0 }
 0x836   : > { %7421 = vst.msk [vmem:[%s13279_s26 + $0x128] sm:$0xff] %vm7383_vm13, %v8467_v61  ;;  %v6931_v24 = vpop.f32.mrf.mxu1 }
 0x837   : > { %8480 = vrcp.f32 %v7296_v19  ;;  %v7109_v14 = vsub.f32 0.0, %v7045_v34  ;;  %v6932_v28 = vadd.f32 %v13395_v9, %v6931_v24 }
 0x838   : > { %v8469_v41 = vpop.eup %8468  ;;  %8482 = vpow2.f32 %v7217_v48  ;;  %v6933_v25 = vpop.f32.mrf.mxu1 }
 0x839   : > { %v8471_v31 = vpop.eup %8470  ;;  %v7297_v5 = vadd.f32 1.0, %v8469_v41  ;;  %v7219_v55 = vmul.f32 1.442695, %v7109_v14  ;;  %v7046_v37 = vmax.f32 %v6932_v28, -60.0 }
 0x83a   : > { %7422 = vst.msk [vmem:[%s13279_s26 + $0x130] sm:$0xff] %vm7383_vm13, %v8471_v31  ;;  %v6936_v23 = vpop.f32.mrf.mxu1 }
 0x83b   : > { %8484 = vrcp.f32 %v7297_v5  ;;  %v7110_v49 = vsub.f32 0.0, %v7046_v37  ;;  %v6937_v13 = vadd.f32 %v13395_v9, %v6936_v23 }
 0x83c   : > { %v8473_v59 = vpop.eup %8472  ;;  %8486 = vpow2.f32 %v7219_v55  ;;  %v6938_v52 = vpop.f32.mrf.mxu1 }
 0x83d   : > { %v8475_v46 = vpop.eup %8474  ;;  %v7298_v16 = vadd.f32 1.0, %v8473_v59  ;;  %v7221_v36 = vmul.f32 1.442695, %v7110_v49  ;;  %v7047_v53 = vmax.f32 %v6937_v13, -60.0 }
 0x83e   : > { %7423 = vst.msk [vmem:[%s13279_s26 + $0x138] sm:$0xff] %vm7383_vm13, %v8475_v46  ;;  %v6939_v6 = vpop.f32.mrf.mxu1 }
 0x83f   : > { %8488 = vrcp.f32 %v7298_v16  ;;  %v7111_v30 = vsub.f32 0.0, %v7047_v53  ;;  %v6940_v26 = vadd.f32 %v13395_v9, %v6939_v6 }
 0x840   : > { %v8477_v15 = vpop.eup %8476  ;;  %8490 = vpow2.f32 %v7221_v36  ;;  %v6941_v33 = vpop.f32.mrf.mxu1 }
 0x841   : > { %v8479_v35 = vpop.eup %8478  ;;  %7424 = vst.msk [vmem:[%s13279_s26 + $0x140] sm:$0xff] %vm7383_vm13, %v8477_v15  ;;  %v7223_v62 = vmul.f32 1.442695, %v7111_v30  ;;  %v7048_v18 = vmax.f32 %v6940_v26, -60.0 }
 0x842   : > { %v7299_v1 = vadd.f32 1.0, %v8479_v35  ;;  %v6944_v56 = vpop.f32.mrf.mxu1 }
 0x843   : > { %8492 = vpow2.f32 %v7223_v62  ;;  %v7112_v38 = vsub.f32 0.0, %v7048_v18  ;;  %v6945_v27 = vadd.f32 %v13395_v9, %v6944_v56 }
 0x844   : > { %v8481_v29 = vpop.eup %8480  ;;  %8494 = vrcp.f32 %v7299_v1  ;;  %v6946_v22 = vpop.f32.mrf.mxu1 }
 0x845   : > { %v8483_v10 = vpop.eup %8482  ;;  %7425 = vst.msk [vmem:[%s13279_s26 + $0x148] sm:$0xff] %vm7383_vm13, %v8481_v29  ;;  %v7225_v44 = vmul.f32 1.442695, %v7112_v38  ;;  %v7049_v57 = vmax.f32 %v6945_v27, -60.0 }
 0x846   : > { %v7300_v20 = vadd.f32 1.0, %v8483_v10  ;;  %v6947_v12 = vpop.f32.mrf.mxu1 }
 0x847   : > { %8496 = vpow2.f32 %v7225_v44  ;;  %v7113_v4 = vsub.f32 0.0, %v7049_v57  ;;  %v6948_v32 = vadd.f32 %v13395_v9, %v6947_v12 }
 0x848   : > { %v8485_v8 = vpop.eup %8484  ;;  %8498 = vrcp.f32 %v7300_v20  ;;  %v6949_v43 = vpop.f32.mrf.mxu1 }
 0x849   : > { %v8487_v60 = vpop.eup %8486  ;;  %7426 = vst.msk [vmem:[%s13279_s26 + $0x150] sm:$0xff] %vm7383_vm13, %v8485_v8  ;;  %v7227_v11 = vmul.f32 1.442695, %v7113_v4  ;;  %v7050_v39 = vmax.f32 %v6948_v32, -60.0 }
 0x84a   : > { %v7301_v47 = vadd.f32 1.0, %v8487_v60  ;;  %v6952_v58 = vpop.f32.mrf.mxu1 }
 0x84b   : > { %8500 = vpow2.f32 %v7227_v11  ;;  %v7114_v21 = vsub.f32 0.0, %v7050_v39  ;;  %v6953_v7 = vadd.f32 %v13395_v9, %v6952_v58 }
 0x84c   : > { %v8489_v45 = vpop.eup %8488  ;;  %8502 = vrcp.f32 %v7301_v47  ;;  %v6954_v40 = vpop.f32.mrf.mxu1 }
 0x84d   : > { %v8491_v63 = vpop.eup %8490  ;;  %7427 = vst.msk [vmem:[%s13279_s26 + $0x158] sm:$0xff] %vm7383_vm13, %v8489_v45  ;;  %v7229_v42 = vmul.f32 1.442695, %v7114_v21  ;;  %v7051_v51 = vmax.f32 %v6953_v7, -60.0 }
 0x84e   : > { %v7302_v54 = vadd.f32 1.0, %v8491_v63  ;;  %v6955_v50 = vpop.f32.mrf.mxu1 }
 0x84f   : > { %8504 = vpow2.f32 %v7229_v42  ;;  %v7115_v0 = vsub.f32 0.0, %v7051_v51  ;;  %v6956_v17 = vadd.f32 %v13395_v9, %v6955_v50 }
 0x850   : > { %v8493_v2 = vpop.eup %8492  ;;  %8506 = vrcp.f32 %v7302_v54  ;;  %v6957_v3 = vpop.f32.mrf.mxu1 }
 0x851   : > { %v8495_v61 = vpop.eup %8494  ;;  %v7303_v19 = vadd.f32 1.0, %v8493_v2  ;;  %v7231_v48 = vmul.f32 1.442695, %v7115_v0  ;;  %v7052_v34 = vmax.f32 %v6956_v17, -60.0 }
 0x852   : > { %7428 = vst.msk [vmem:[%s13279_s26 + $0x160] sm:$0xff] %vm7383_vm13, %v8495_v61  ;;  %v6960_v24 = vpop.f32.mrf.mxu1 }
 0x853   : > { %8508 = vrcp.f32 %v7303_v19  ;;  %v7116_v14 = vsub.f32 0.0, %v7052_v34  ;;  %v6961_v28 = vadd.f32 %v13395_v9, %v6960_v24 }
 0x854   : > { %v8497_v41 = vpop.eup %8496  ;;  %8510 = vpow2.f32 %v7231_v48  ;;  %v6962_v25 = vpop.f32.mrf.mxu1 }
 0x855   : > { %v8499_v31 = vpop.eup %8498  ;;  %v7304_v5 = vadd.f32 1.0, %v8497_v41  ;;  %v7233_v55 = vmul.f32 1.442695, %v7116_v14  ;;  %v7053_v37 = vmax.f32 %v6961_v28, -60.0 }
 0x856   : > { %7429 = vst.msk [vmem:[%s13279_s26 + $0x168] sm:$0xff] %vm7383_vm13, %v8499_v31  ;;  %v6963_v23 = vpop.f32.mrf.mxu1 }
 0x857   : > { %8512 = vrcp.f32 %v7304_v5  ;;  %v7117_v49 = vsub.f32 0.0, %v7053_v37  ;;  %v6964_v13 = vadd.f32 %v13395_v9, %v6963_v23 }
 0x858   : > { %v8501_v59 = vpop.eup %8500  ;;  %8514 = vpow2.f32 %v7233_v55  ;;  %v6965_v52 = vpop.f32.mrf.mxu1 }
 0x859   : > { %v8503_v46 = vpop.eup %8502  ;;  %v7305_v16 = vadd.f32 1.0, %v8501_v59  ;;  %v7235_v36 = vmul.f32 1.442695, %v7117_v49  ;;  %v7054_v53 = vmax.f32 %v6964_v13, -60.0 }
 0x85a   : > { %7430 = vst.msk [vmem:[%s13279_s26 + $0x170] sm:$0xff] %vm7383_vm13, %v8503_v46  ;;  %v6968_v6 = vpop.f32.mrf.mxu1 }
 0x85b   : > { %8516 = vrcp.f32 %v7305_v16  ;;  %v7118_v30 = vsub.f32 0.0, %v7054_v53  ;;  %v6969_v26 = vadd.f32 %v13395_v9, %v6968_v6 }
 0x85c   : > { %v8505_v15 = vpop.eup %8504  ;;  %8518 = vpow2.f32 %v7235_v36  ;;  %v6970_v33 = vpop.f32.mrf.mxu1 }
 0x85d   : > { %v8507_v35 = vpop.eup %8506  ;;  %v7306_v62 = vadd.f32 1.0, %v8505_v15  ;;  %v7237_v18 = vmul.f32 1.442695, %v7118_v30  ;;  %v7055_v1 = vmax.f32 %v6969_v26, -60.0 }
 0x85e   : > { %7431 = vst.msk [vmem:[%s13279_s26 + $0x178] sm:$0xff] %vm7383_vm13, %v8507_v35  ;;  %v6971_v56 = vpop.f32.mrf.mxu1 }
 0x85f   : > { %8520 = vrcp.f32 %v7306_v62  ;;  %v7119_v38 = vsub.f32 0.0, %v7055_v1  ;;  %v6972_v27 = vadd.f32 %v13395_v9, %v6971_v56 }
 0x860   : > { %v8509_v29 = vpop.eup %8508  ;;  %8522 = vpow2.f32 %v7237_v18  ;;  %v6973_v22 = vpop.f32.mrf.mxu1 }
 0x861   : > { %v8511_v10 = vpop.eup %8510  ;;  %7432 = vst.msk [vmem:[%s13279_s26 + $0x180] sm:$0xff] %vm7383_vm13, %v8509_v29  ;;  %v7239_v44 = vmul.f32 1.442695, %v7119_v38  ;;  %v7056_v57 = vmax.f32 %v6972_v27, -60.0 }
 0x862   : > { %v7307_v20 = vadd.f32 1.0, %v8511_v10  ;;  %v6976_v12 = vpop.f32.mrf.mxu1 }
 0x863   : > { %8524 = vpow2.f32 %v7239_v44  ;;  %v7120_v4 = vsub.f32 0.0, %v7056_v57  ;;  %v6977_v32 = vadd.f32 %v13395_v9, %v6976_v12 }
 0x864   : > { %v8513_v8 = vpop.eup %8512  ;;  %8526 = vrcp.f32 %v7307_v20  ;;  %v6978_v43 = vpop.f32.mrf.mxu1 }
 0x865   : > { %v8515_v60 = vpop.eup %8514  ;;  %7433 = vst.msk [vmem:[%s13279_s26 + $0x188] sm:$0xff] %vm7383_vm13, %v8513_v8  ;;  %v7241_v11 = vmul.f32 1.442695, %v7120_v4  ;;  %v7057_v39 = vmax.f32 %v6977_v32, -60.0 }
 0x866   : > { %v7308_v47 = vadd.f32 1.0, %v8515_v60  ;;  %v6979_v58 = vpop.f32.mrf.mxu1 }
 0x867   : > { %8528 = vpow2.f32 %v7241_v11  ;;  %v7121_v21 = vsub.f32 0.0, %v7057_v39  ;;  %v6980_v7 = vadd.f32 %v13395_v9, %v6979_v58 }
 0x868   : > { %v8517_v45 = vpop.eup %8516  ;;  %8530 = vrcp.f32 %v7308_v47  ;;  %v6981_v40 = vpop.f32.mrf.mxu1 }
 0x869   : > { %v8519_v63 = vpop.eup %8518  ;;  %7434 = vst.msk [vmem:[%s13279_s26 + $0x190] sm:$0xff] %vm7383_vm13, %v8517_v45  ;;  %v7243_v42 = vmul.f32 1.442695, %v7121_v21  ;;  %v7058_v51 = vmax.f32 %v6980_v7, -60.0 }
 0x86a   : > { %v7309_v54 = vadd.f32 1.0, %v8519_v63  ;;  %v6984_v50 = vpop.f32.mrf.mxu1 }
 0x86b   : > { %8532 = vpow2.f32 %v7243_v42  ;;  %v7122_v0 = vsub.f32 0.0, %v7058_v51  ;;  %v6985_v17 = vadd.f32 %v13395_v9, %v6984_v50 }
 0x86c   : > { %v8521_v2 = vpop.eup %8520  ;;  %8534 = vrcp.f32 %v7309_v54  ;;  %v6986_v3 = vpop.f32.mrf.mxu1 }
 0x86d   : > { %v8523_v61 = vpop.eup %8522  ;;  %7435 = vst.msk [vmem:[%s13279_s26 + $0x198] sm:$0xff] %vm7383_vm13, %v8521_v2  ;;  %v7245_v19 = vmul.f32 1.442695, %v7122_v0  ;;  %v7059_v48 = vmax.f32 %v6985_v17, -60.0 }
 0x86e   : > { %v7310_v34 = vadd.f32 1.0, %v8523_v61  ;;  %v6987_v24 = vpop.f32.mrf.mxu1 }
 0x86f   : > { %8536 = vpow2.f32 %v7245_v19  ;;  %v7123_v14 = vsub.f32 0.0, %v7059_v48  ;;  %v6988_v28 = vadd.f32 %v13395_v9, %v6987_v24 }
 0x870   : > { %v8525_v41 = vpop.eup %8524  ;;  %8538 = vrcp.f32 %v7310_v34  ;;  %v6989_v25 = vpop.f32.mrf.mxu1 }
 0x871   : > { %v8527_v31 = vpop.eup %8526  ;;  %v7311_v5 = vadd.f32 1.0, %v8525_v41  ;;  %v7247_v55 = vmul.f32 1.442695, %v7123_v14  ;;  %v7060_v37 = vmax.f32 %v6988_v28, -60.0 }
 0x872   : > { %7436 = vst.msk [vmem:[%s13279_s26 + $0x1a0] sm:$0xff] %vm7383_vm13, %v8527_v31  ;;  %v6992_v23 = vpop.f32.mrf.mxu1 }
 0x873   : > { %8540 = vrcp.f32 %v7311_v5  ;;  %v7124_v49 = vsub.f32 0.0, %v7060_v37  ;;  %v6993_v13 = vadd.f32 %v13395_v9, %v6992_v23 }
 0x874   : > { %v8529_v59 = vpop.eup %8528  ;;  %8542 = vpow2.f32 %v7247_v55  ;;  %v6994_v52 = vpop.f32.mrf.mxu1 }
 0x875   : > { %v8531_v46 = vpop.eup %8530  ;;  %v7312_v16 = vadd.f32 1.0, %v8529_v59  ;;  %v7249_v36 = vmul.f32 1.442695, %v7124_v49  ;;  %v7061_v53 = vmax.f32 %v6993_v13, -60.0 }
 0x876   : > { %7437 = vst.msk [vmem:[%s13279_s26 + $0x1a8] sm:$0xff] %vm7383_vm13, %v8531_v46  ;;  %v6995_v6 = vpop.f32.mrf.mxu1 }
 0x877   : > { %8544 = vrcp.f32 %v7312_v16  ;;  %v7125_v30 = vsub.f32 0.0, %v7061_v53  ;;  %v6996_v26 = vadd.f32 %v13395_v9, %v6995_v6 }
 0x878   : > { %v8533_v15 = vpop.eup %8532  ;;  %8546 = vpow2.f32 %v7249_v36  ;;  %v6997_v33 = vpop.f32.mrf.mxu1 }
 0x879   : > { %v8535_v35 = vpop.eup %8534  ;;  %v7313_v62 = vadd.f32 1.0, %v8533_v15  ;;  %v7251_v18 = vmul.f32 1.442695, %v7125_v30  ;;  %v7062_v1 = vmax.f32 %v6996_v26, -60.0 }
 0x87a   : > { %7438 = vst.msk [vmem:[%s13279_s26 + $0x1b0] sm:$0xff] %vm7383_vm13, %v8535_v35 }
 0x87b   : > { %8548 = vrcp.f32 %v7313_v62  ;;  %v7126_v56 = vsub.f32 0.0, %v7062_v1 }
 0x87c   : > { %v8537_v38 = vpop.eup %8536  ;;  %8550 = vpow2.f32 %v7251_v18 }
 0x87d   : > { %v8539_v27 = vpop.eup %8538  ;;  %v7314_v29 = vadd.f32 1.0, %v8537_v38  ;;  %v7253_v22 = vmul.f32 1.442695, %v7126_v56 }
 0x87e   : > { %7439 = vst.msk [vmem:[%s13279_s26 + $0x1b8] sm:$0xff] %vm7383_vm13, %v8539_v27 }
 0x87f   : > { %8552 = vrcp.f32 %v7314_v29 }
 0x880   : > { %v8541_v9 = vpop.eup %8540  ;;  %8554 = vpow2.f32 %v7253_v22 }
 0x881   : > { %v8543_v10 = vpop.eup %8542  ;;  %7440 = vst.msk [vmem:[%s13279_s26 + $0x1c0] sm:$0xff] %vm7383_vm13, %v8541_v9 }
 0x882   : > { %v7315_v44 = vadd.f32 1.0, %v8543_v10 }
 0x884   : > { %v8545_v57 = vpop.eup %8544  ;;  %8556 = vrcp.f32 %v7315_v44 }
 0x885   : > { %v8547_v20 = vpop.eup %8546  ;;  %7441 = vst.msk [vmem:[%s13279_s26 + $0x1c8] sm:$0xff] %vm7383_vm13, %v8545_v57 }
 0x886   : > { %v7316_v12 = vadd.f32 1.0, %v8547_v20 }
 0x888   : > { %v8549_v4 = vpop.eup %8548  ;;  %8558 = vrcp.f32 %v7316_v12 }
 0x889   : > { %v8551_v32 = vpop.eup %8550  ;;  %7442 = vst.msk [vmem:[%s13279_s26 + $0x1d0] sm:$0xff] %vm7383_vm13, %v8549_v4 }
 0x88a   : > { %v7317_v8 = vadd.f32 1.0, %v8551_v32 }
 0x88c   : > { %v8553_v43 = vpop.eup %8552  ;;  %8560 = vrcp.f32 %v7317_v8 }
 0x88d   : > { %v8555_v60 = vpop.eup %8554  ;;  %7443 = vst.msk [vmem:[%s13279_s26 + $0x1d8] sm:$0xff] %vm7383_vm13, %v8553_v43 }
 0x88e   : > { %v7318_v11 = vadd.f32 1.0, %v8555_v60 }
 0x890   : > { %8562 = vrcp.f32 %v7318_v11 }
 0x891   : > { %v8557_v39 = vpop.eup %8556 }
 0x892   : > { %7444 = vst.msk [vmem:[%s13279_s26 + $0x1e0] sm:$0xff] %vm7383_vm13, %v8557_v39 }
 0x895   : > { %v8559_v47 = vpop.eup %8558 }
 0x896   : > { %7445 = vst.msk [vmem:[%s13279_s26 + $0x1e8] sm:$0xff] %vm7383_vm13, %v8559_v47 }
 0x899   : > { %v8561_v58 = vpop.eup %8560 }
 0x89a   : > { %7446 = vst.msk [vmem:[%s13279_s26 + $0x1f0] sm:$0xff] %vm7383_vm13, %v8561_v58 }
 0x89d   : > { %v8563_v21 = vpop.eup %8562 }
 0x89e   : > { %7447 = vst.msk [vmem:[%s13279_s26 + $0x1f8] sm:$0xff] %vm7383_vm13, %v8563_v21 }
 0x89f PF: > { %s19_s30 = sadd.s32 1, %s8574_s30  }
 0x8a0   : > { %p16_p4 = scmp.ge.s32.totalorder %s19_s30, 4  }
 0x8a2   :  { %18 = sbr.rel (!%p16_p4) target bundleno = 1 (0x1), region = 86 }

</bundles_post_ra>
